<compile_context>
chip_gen: v7x
topology: tpu7x:2x2x1
jax: 0.10.0
libtpu: 0.0.40
codegen_flags: <defaults>
</compile_context>

<pallas_src>
import jax
import jax.numpy as jnp
from jax.experimental import pallas as pl
from jax.experimental.pallas import tpu as pltpu

EPS = 1e-5   # nn.BatchNorm2d default eps
PW = 8       # left pad of the W (sublane) axis -> interior stores are aligned


def _conv3x3_bn_relu(xpad, w, gamma, beta, N, H, W, C):
    """Bias-free 3x3 'same' conv + training-mode BatchNorm + ReLU.

    xpad  : (N, H+2, W+2*PW, C) zero-haloed value; data at [:, 1:H+1, PW:PW+W, :]
    w     : (3, 3, Cin, Cout) HWIO
    gamma, beta : (1, C)
    returns (N*H*W, C)
    """
    y = None
    for kh in range(3):
        for kw in range(3):
            patch = xpad[:, kh:kh + H, PW - 1 + kw:PW - 1 + kw + W, :]
            d = jnp.dot(patch.reshape(N * H * W, C), w[kh, kw],
                        preferred_element_type=jnp.float32)
            y = d if y is None else y + d
    # Training-mode BatchNorm2d: per-channel stats over all N*H*W rows, biased
    # variance.  (Conv bias omitted: a per-channel constant cancels here.)
    mean = jnp.mean(y, axis=0, keepdims=True)
    var = jnp.mean((y - mean) ** 2, axis=0, keepdims=True)
    yn = (y - mean) * jax.lax.rsqrt(var + EPS) * gamma + beta
    return jnp.maximum(yn, 0.0)


def fused_basic_block_kernel(x_ref, w1_ref, g1_ref, bt1_ref,
                             w2_ref, g2_ref, bt2_ref, o_ref, xpad_ref):
    N, H, W, C = x_ref.shape
    x = x_ref[...]

    # In-kernel halo: zero the scratch once, then write the interior with a
    # sublane-aligned plain store.  No padded copies ever hit HBM.
    xpad_ref[...] = jnp.zeros(xpad_ref.shape, jnp.float32)
    xpad_ref[:, 1:H + 1, PW:PW + W, :] = x

    # conv1 -> bn1 -> relu
    h1 = _conv3x3_bn_relu(xpad_ref[...], w1_ref[...], g1_ref[...], bt1_ref[...],
                          N, H, W, C)

    # conv2 consumes h1 straight from VMEM: overwrite the interior of the same
    # halo scratch (the zero border is untouched).
    xpad_ref[:, 1:H + 1, PW:PW + W, :] = h1.reshape(N, H, W, C)

    # conv2 -> bn2 -> relu
    h2 = _conv3x3_bn_relu(xpad_ref[...], w2_ref[...], g2_ref[...], bt2_ref[...],
                          N, H, W, C)

    # residual add + final relu
    out = jnp.maximum(x.reshape(N * H * W, C) + h2, 0.0)
    o_ref[...] = out.reshape(N, H, W, C)


def _vmem():
    return pl.BlockSpec(memory_space=pltpu.MemorySpace.VMEM)


@jax.jit
def basic_block_forward(x_nchw, params):
    x = jnp.transpose(x_nchw, (0, 2, 3, 1)).astype(jnp.float32)   # NCHW -> NHWC
    N, H, W, C = x.shape

    # PyTorch conv weight is OIHW; kernel consumes HWIO (3,3,Cin,Cout).
    w1 = jnp.transpose(params['w1'], (2, 3, 1, 0)).astype(jnp.float32)
    w2 = jnp.transpose(params['w2'], (2, 3, 1, 0)).astype(jnp.float32)
    g1 = params['gamma1'].reshape(1, C).astype(jnp.float32)
    bt1 = params['beta1'].reshape(1, C).astype(jnp.float32)
    g2 = params['gamma2'].reshape(1, C).astype(jnp.float32)
    bt2 = params['beta2'].reshape(1, C).astype(jnp.float32)
    # Conv biases b1/b2 intentionally NOT passed: training-mode BatchNorm
    # subtracts the batch mean, so a per-channel conv bias cancels exactly.

    out_nhwc = pl.pallas_call(
        fused_basic_block_kernel,
        out_shape=jax.ShapeDtypeStruct((N, H, W, C), jnp.float32),
        in_specs=[_vmem()] * 7,
        out_specs=_vmem(),
        scratch_shapes=[pltpu.VMEM((N, H + 2, W + 2 * PW, C), jnp.float32)],
        compiler_params=pltpu.CompilerParams(vmem_limit_bytes=32 * 1024 * 1024),
    )(x, w1, g1, bt1, w2, g2, bt2)

    return jnp.transpose(out_nhwc, (0, 3, 1, 2))   # NHWC -> NCHW


def reference_forward(x_nchw, params):
    # Pure-JAX reference (keeps the conv bias; the kernel's bias drop is exact).
    x = jnp.transpose(x_nchw, (0, 2, 3, 1)).astype(jnp.float32)

    def conv(z, w_oihw, b):
        w = jnp.transpose(w_oihw, (2, 3, 1, 0))
        y = jax.lax.conv_general_dilated(
            z, w, window_strides=(1, 1), padding=((1, 1), (1, 1)),
            dimension_numbers=('NHWC', 'HWIO', 'NHWC'))
        return y + b.reshape(1, 1, 1, -1)

    def bn(y, g, b):
        m = jnp.mean(y, axis=(0, 1, 2), keepdims=True)
        v = jnp.mean((y - m) ** 2, axis=(0, 1, 2), keepdims=True)
        return (y - m) / jnp.sqrt(v + EPS) * g.reshape(1, 1, 1, -1) + b.reshape(1, 1, 1, -1)

    h = jax.nn.relu(bn(conv(x, params['w1'], params['b1']),
                       params['gamma1'], params['beta1']))
    h = jax.nn.relu(bn(conv(h, params['w2'], params['b2']),
                       params['gamma2'], params['beta2']))
    out = jax.nn.relu(x + h)
    return jnp.transpose(out, (0, 3, 1, 2))


if __name__ == "__main__":
    # args.filter_num = 4, args.filter_size = 3
    N, C, H, W, K = 2, 4, 16, 16, 3
    key = jax.random.PRNGKey(0)
    keys = jax.random.split(key, 5)
    bound = (1.0 / (C * K * K)) ** 0.5  # PyTorch Conv2d default init range

    params = {
        'w1': jax.random.uniform(keys[0], (C, C, K, K), jnp.float32, -bound, bound),
        'b1': jax.random.uniform(keys[1], (C,), jnp.float32, -bound, bound),
        'w2': jax.random.uniform(keys[2], (C, C, K, K), jnp.float32, -bound, bound),
        'b2': jax.random.uniform(keys[3], (C,), jnp.float32, -bound, bound),
        'gamma1': jnp.ones((C,), jnp.float32),   # BatchNorm2d default weight
        'beta1': jnp.zeros((C,), jnp.float32),   # BatchNorm2d default bias
        'gamma2': jnp.ones((C,), jnp.float32),
        'beta2': jnp.zeros((C,), jnp.float32),
    }

    x = jax.random.normal(keys[4], (N, C, H, W), jnp.float32)

    out = jax.block_until_ready(basic_block_forward(x, params))
    ref = jax.block_until_ready(reference_forward(x, params))

    assert out.shape == (N, C, H, W)
    max_err = float(jnp.max(jnp.abs(out - ref)))
    assert jnp.allclose(out, ref, atol=1e-3, rtol=1e-3), max_err
    print("KERNEL_OK")
</pallas_src>

<mosaic_0001>
module attributes {stable_mosaic.version = 11 : i64} {
  func.func @fused_basic_block_kernel(%arg0: memref<2x16x16x4xf32, #tpu.memory_space<vmem>>, %arg1: memref<3x3x4x4xf32, #tpu.memory_space<vmem>>, %arg2: memref<1x4xf32, #tpu.memory_space<vmem>>, %arg3: memref<1x4xf32, #tpu.memory_space<vmem>>, %arg4: memref<3x3x4x4xf32, #tpu.memory_space<vmem>>, %arg5: memref<1x4xf32, #tpu.memory_space<vmem>>, %arg6: memref<1x4xf32, #tpu.memory_space<vmem>>, %arg7: memref<2x16x16x4xf32, #tpu.memory_space<vmem>>, %arg8: memref<2x18x32x4xf32, #tpu.memory_space<vmem>>) attributes {dimension_semantics = [], scalar_prefetch = 0 : i64, scratch_operands = 1 : i64, tpu.core_type = #tpu.core_type<tc>} {
    %c0 = arith.constant 0 : index
    %c0_0 = arith.constant 0 : index
    %c0_1 = arith.constant 0 : index
    %c0_2 = arith.constant 0 : index
    %0 = vector.load %arg0[%c0, %c0_0, %c0_1, %c0_2] : memref<2x16x16x4xf32, #tpu.memory_space<vmem>>, vector<2x16x16x4xf32>
    %cst = arith.constant 0.000000e+00 : f32
    %1 = vector.broadcast %cst : f32 to vector<2x18x32x4xf32>
    %c0_3 = arith.constant 0 : index
    %c0_4 = arith.constant 0 : index
    %c0_5 = arith.constant 0 : index
    %c0_6 = arith.constant 0 : index
    %2 = vector.load %arg8[%c0_3, %c0_4, %c0_5, %c0_6] : memref<2x18x32x4xf32, #tpu.memory_space<vmem>>, vector<2x18x32x4xf32>
    tpu.vector_store %arg8[%c0_3, %c0_4, %c0_5, %c0_6], %1 {strides = array<i32>} : memref<2x18x32x4xf32, #tpu.memory_space<vmem>>, vector<2x18x32x4xf32>,
    %c0_7 = arith.constant 0 : index
    %c1 = arith.constant 1 : index
    %c8 = arith.constant 8 : index
    %c0_8 = arith.constant 0 : index
    %3 = vector.load %arg8[%c0_7, %c1, %c8, %c0_8] : memref<2x18x32x4xf32, #tpu.memory_space<vmem>>, vector<2x16x16x4xf32>
    tpu.vector_store %arg8[%c0_7, %c1, %c8, %c0_8], %0 {strides = array<i32>} : memref<2x18x32x4xf32, #tpu.memory_space<vmem>>, vector<2x16x16x4xf32>,
    %c0_9 = arith.constant 0 : index
    %c0_10 = arith.constant 0 : index
    %c0_11 = arith.constant 0 : index
    %c0_12 = arith.constant 0 : index
    %4 = vector.load %arg8[%c0_9, %c0_10, %c0_11, %c0_12] : memref<2x18x32x4xf32, #tpu.memory_space<vmem>>, vector<2x18x32x4xf32>
    %c0_13 = arith.constant 0 : index
    %c0_14 = arith.constant 0 : index
    %c0_15 = arith.constant 0 : index
    %c0_16 = arith.constant 0 : index
    %5 = vector.load %arg1[%c0_13, %c0_14, %c0_15, %c0_16] : memref<3x3x4x4xf32, #tpu.memory_space<vmem>>, vector<3x3x4x4xf32>
    %c0_17 = arith.constant 0 : index
    %c0_18 = arith.constant 0 : index
    %6 = vector.load %arg2[%c0_17, %c0_18] : memref<1x4xf32, #tpu.memory_space<vmem>>, vector<1x4xf32>
    %c0_19 = arith.constant 0 : index
    %c0_20 = arith.constant 0 : index
    %7 = vector.load %arg3[%c0_19, %c0_20] : memref<1x4xf32, #tpu.memory_space<vmem>>, vector<1x4xf32>
    %8 = vector.extract_strided_slice %4 {offsets = [0, 0, 7, 0], sizes = [2, 16, 16, 4], strides = [1, 1, 1, 1]} : vector<2x18x32x4xf32> to vector<2x16x16x4xf32>
    %9 = vector.shape_cast %8 : vector<2x16x16x4xf32> to vector<512x4xf32>
    %10 = vector.extract_strided_slice %5 {offsets = [0, 0, 0, 0], sizes = [1, 1, 4, 4], strides = [1, 1, 1, 1]} : vector<3x3x4x4xf32> to vector<1x1x4x4xf32>
    %11 = vector.shape_cast %10 : vector<1x1x4x4xf32> to vector<4x4xf32>
    %cst_21 = arith.constant dense<0.000000e+00> : vector<512x4xf32>
    %12 = tpu.matmul %9, %11, %cst_21 {dimension_numbers = #tpu.dot_dimension_numbers<[1], [0], [0], [1], [0, 0, 1, 1], [], []>} : vector<512x4xf32>, vector<4x4xf32>, vector<512x4xf32> -> vector<512x4xf32>
    %13 = vector.extract_strided_slice %4 {offsets = [0, 0, 8, 0], sizes = [2, 16, 16, 4], strides = [1, 1, 1, 1]} : vector<2x18x32x4xf32> to vector<2x16x16x4xf32>
    %14 = vector.shape_cast %13 : vector<2x16x16x4xf32> to vector<512x4xf32>
    %15 = vector.extract_strided_slice %5 {offsets = [0, 1, 0, 0], sizes = [1, 1, 4, 4], strides = [1, 1, 1, 1]} : vector<3x3x4x4xf32> to vector<1x1x4x4xf32>
    %16 = vector.shape_cast %15 : vector<1x1x4x4xf32> to vector<4x4xf32>
    %cst_22 = arith.constant dense<0.000000e+00> : vector<512x4xf32>
    %17 = tpu.matmul %14, %16, %cst_22 {dimension_numbers = #tpu.dot_dimension_numbers<[1], [0], [0], [1], [0, 0, 1, 1], [], []>} : vector<512x4xf32>, vector<4x4xf32>, vector<512x4xf32> -> vector<512x4xf32>
    %18 = arith.addf %12, %17 : vector<512x4xf32>
    %19 = vector.extract_strided_slice %4 {offsets = [0, 0, 9, 0], sizes = [2, 16, 16, 4], strides = [1, 1, 1, 1]} : vector<2x18x32x4xf32> to vector<2x16x16x4xf32>
    %20 = vector.shape_cast %19 : vector<2x16x16x4xf32> to vector<512x4xf32>
    %21 = vector.extract_strided_slice %5 {offsets = [0, 2, 0, 0], sizes = [1, 1, 4, 4], strides = [1, 1, 1, 1]} : vector<3x3x4x4xf32> to vector<1x1x4x4xf32>
    %22 = vector.shape_cast %21 : vector<1x1x4x4xf32> to vector<4x4xf32>
    %cst_23 = arith.constant dense<0.000000e+00> : vector<512x4xf32>
    %23 = tpu.matmul %20, %22, %cst_23 {dimension_numbers = #tpu.dot_dimension_numbers<[1], [0], [0], [1], [0, 0, 1, 1], [], []>} : vector<512x4xf32>, vector<4x4xf32>, vector<512x4xf32> -> vector<512x4xf32>
    %24 = arith.addf %18, %23 : vector<512x4xf32>
    %25 = vector.extract_strided_slice %4 {offsets = [0, 1, 7, 0], sizes = [2, 16, 16, 4], strides = [1, 1, 1, 1]} : vector<2x18x32x4xf32> to vector<2x16x16x4xf32>
    %26 = vector.shape_cast %25 : vector<2x16x16x4xf32> to vector<512x4xf32>
    %27 = vector.extract_strided_slice %5 {offsets = [1, 0, 0, 0], sizes = [1, 1, 4, 4], strides = [1, 1, 1, 1]} : vector<3x3x4x4xf32> to vector<1x1x4x4xf32>
    %28 = vector.shape_cast %27 : vector<1x1x4x4xf32> to vector<4x4xf32>
    %cst_24 = arith.constant dense<0.000000e+00> : vector<512x4xf32>
    %29 = tpu.matmul %26, %28, %cst_24 {dimension_numbers = #tpu.dot_dimension_numbers<[1], [0], [0], [1], [0, 0, 1, 1], [], []>} : vector<512x4xf32>, vector<4x4xf32>, vector<512x4xf32> -> vector<512x4xf32>
    %30 = arith.addf %24, %29 : vector<512x4xf32>
    %31 = vector.extract_strided_slice %4 {offsets = [0, 1, 8, 0], sizes = [2, 16, 16, 4], strides = [1, 1, 1, 1]} : vector<2x18x32x4xf32> to vector<2x16x16x4xf32>
    %32 = vector.shape_cast %31 : vector<2x16x16x4xf32> to vector<512x4xf32>
    %33 = vector.extract_strided_slice %5 {offsets = [1, 1, 0, 0], sizes = [1, 1, 4, 4], strides = [1, 1, 1, 1]} : vector<3x3x4x4xf32> to vector<1x1x4x4xf32>
    %34 = vector.shape_cast %33 : vector<1x1x4x4xf32> to vector<4x4xf32>
    %cst_25 = arith.constant dense<0.000000e+00> : vector<512x4xf32>
    %35 = tpu.matmul %32, %34, %cst_25 {dimension_numbers = #tpu.dot_dimension_numbers<[1], [0], [0], [1], [0, 0, 1, 1], [], []>} : vector<512x4xf32>, vector<4x4xf32>, vector<512x4xf32> -> vector<512x4xf32>
    %36 = arith.addf %30, %35 : vector<512x4xf32>
    %37 = vector.extract_strided_slice %4 {offsets = [0, 1, 9, 0], sizes = [2, 16, 16, 4], strides = [1, 1, 1, 1]} : vector<2x18x32x4xf32> to vector<2x16x16x4xf32>
    %38 = vector.shape_cast %37 : vector<2x16x16x4xf32> to vector<512x4xf32>
    %39 = vector.extract_strided_slice %5 {offsets = [1, 2, 0, 0], sizes = [1, 1, 4, 4], strides = [1, 1, 1, 1]} : vector<3x3x4x4xf32> to vector<1x1x4x4xf32>
    %40 = vector.shape_cast %39 : vector<1x1x4x4xf32> to vector<4x4xf32>
    %cst_26 = arith.constant dense<0.000000e+00> : vector<512x4xf32>
    %41 = tpu.matmul %38, %40, %cst_26 {dimension_numbers = #tpu.dot_dimension_numbers<[1], [0], [0], [1], [0, 0, 1, 1], [], []>} : vector<512x4xf32>, vector<4x4xf32>, vector<512x4xf32> -> vector<512x4xf32>
    %42 = arith.addf %36, %41 : vector<512x4xf32>
    %43 = vector.extract_strided_slice %4 {offsets = [0, 2, 7, 0], sizes = [2, 16, 16, 4], strides = [1, 1, 1, 1]} : vector<2x18x32x4xf32> to vector<2x16x16x4xf32>
    %44 = vector.shape_cast %43 : vector<2x16x16x4xf32> to vector<512x4xf32>
    %45 = vector.extract_strided_slice %5 {offsets = [2, 0, 0, 0], sizes = [1, 1, 4, 4], strides = [1, 1, 1, 1]} : vector<3x3x4x4xf32> to vector<1x1x4x4xf32>
    %46 = vector.shape_cast %45 : vector<1x1x4x4xf32> to vector<4x4xf32>
    %cst_27 = arith.constant dense<0.000000e+00> : vector<512x4xf32>
    %47 = tpu.matmul %44, %46, %cst_27 {dimension_numbers = #tpu.dot_dimension_numbers<[1], [0], [0], [1], [0, 0, 1, 1], [], []>} : vector<512x4xf32>, vector<4x4xf32>, vector<512x4xf32> -> vector<512x4xf32>
    %48 = arith.addf %42, %47 : vector<512x4xf32>
    %49 = vector.extract_strided_slice %4 {offsets = [0, 2, 8, 0], sizes = [2, 16, 16, 4], strides = [1, 1, 1, 1]} : vector<2x18x32x4xf32> to vector<2x16x16x4xf32>
    %50 = vector.shape_cast %49 : vector<2x16x16x4xf32> to vector<512x4xf32>
    %51 = vector.extract_strided_slice %5 {offsets = [2, 1, 0, 0], sizes = [1, 1, 4, 4], strides = [1, 1, 1, 1]} : vector<3x3x4x4xf32> to vector<1x1x4x4xf32>
    %52 = vector.shape_cast %51 : vector<1x1x4x4xf32> to vector<4x4xf32>
    %cst_28 = arith.constant dense<0.000000e+00> : vector<512x4xf32>
    %53 = tpu.matmul %50, %52, %cst_28 {dimension_numbers = #tpu.dot_dimension_numbers<[1], [0], [0], [1], [0, 0, 1, 1], [], []>} : vector<512x4xf32>, vector<4x4xf32>, vector<512x4xf32> -> vector<512x4xf32>
    %54 = arith.addf %48, %53 : vector<512x4xf32>
    %55 = vector.extract_strided_slice %4 {offsets = [0, 2, 9, 0], sizes = [2, 16, 16, 4], strides = [1, 1, 1, 1]} : vector<2x18x32x4xf32> to vector<2x16x16x4xf32>
    %56 = vector.shape_cast %55 : vector<2x16x16x4xf32> to vector<512x4xf32>
    %57 = vector.extract_strided_slice %5 {offsets = [2, 2, 0, 0], sizes = [1, 1, 4, 4], strides = [1, 1, 1, 1]} : vector<3x3x4x4xf32> to vector<1x1x4x4xf32>
    %58 = vector.shape_cast %57 : vector<1x1x4x4xf32> to vector<4x4xf32>
    %cst_29 = arith.constant dense<0.000000e+00> : vector<512x4xf32>
    %59 = tpu.matmul %56, %58, %cst_29 {dimension_numbers = #tpu.dot_dimension_numbers<[1], [0], [0], [1], [0, 0, 1, 1], [], []>} : vector<512x4xf32>, vector<4x4xf32>, vector<512x4xf32> -> vector<512x4xf32>
    %60 = arith.addf %54, %59 : vector<512x4xf32>
    %cst_30 = arith.constant dense<0.000000e+00> : vector<4xf32>
    %61 = vector.multi_reduction <add>, %60, %cst_30 [0] : vector<512x4xf32> to vector<4xf32>
    %62 = vector.shape_cast %61 : vector<4xf32> to vector<1x4xf32>
    %cst_31 = arith.constant 5.120000e+02 : f32
    %63 = vector.broadcast %cst_31 : f32 to vector<1x4xf32>
    %64 = arith.divf %62, %63 : vector<1x4xf32>
    %65 = vector.broadcast %64 : vector<1x4xf32> to vector<512x4xf32>
    %66 = arith.subf %60, %65 : vector<512x4xf32>
    %67 = arith.mulf %66, %66 : vector<512x4xf32>
    %cst_32 = arith.constant dense<0.000000e+00> : vector<4xf32>
    %68 = vector.multi_reduction <add>, %67, %cst_32 [0] : vector<512x4xf32> to vector<4xf32>
    %69 = vector.shape_cast %68 : vector<4xf32> to vector<1x4xf32>
    %cst_33 = arith.constant 5.120000e+02 : f32
    %70 = vector.broadcast %cst_33 : f32 to vector<1x4xf32>
    %71 = arith.divf %69, %70 : vector<1x4xf32>
    %72 = vector.broadcast %64 : vector<1x4xf32> to vector<512x4xf32>
    %73 = arith.subf %60, %72 : vector<512x4xf32>
    %cst_34 = arith.constant 9.99999974E-6 : f32
    %74 = vector.broadcast %cst_34 : f32 to vector<1x4xf32>
    %75 = arith.addf %71, %74 : vector<1x4xf32>
    %76 = math.rsqrt %75 : vector<1x4xf32>
    %77 = vector.broadcast %76 : vector<1x4xf32> to vector<512x4xf32>
    %78 = arith.mulf %73, %77 : vector<512x4xf32>
    %79 = vector.broadcast %6 : vector<1x4xf32> to vector<512x4xf32>
    %80 = arith.mulf %78, %79 : vector<512x4xf32>
    %81 = vector.broadcast %7 : vector<1x4xf32> to vector<512x4xf32>
    %82 = arith.addf %80, %81 : vector<512x4xf32>
    %cst_35 = arith.constant 0.000000e+00 : f32
    %83 = vector.broadcast %cst_35 : f32 to vector<512x4xf32>
    %84 = arith.maximumf %82, %83 : vector<512x4xf32>
    %85 = vector.shape_cast %84 : vector<512x4xf32> to vector<2x16x16x4xf32>
    %c0_36 = arith.constant 0 : index
    %c1_37 = arith.constant 1 : index
    %c8_38 = arith.constant 8 : index
    %c0_39 = arith.constant 0 : index
    %86 = vector.load %arg8[%c0_36, %c1_37, %c8_38, %c0_39] : memref<2x18x32x4xf32, #tpu.memory_space<vmem>>, vector<2x16x16x4xf32>
    tpu.vector_store %arg8[%c0_36, %c1_37, %c8_38, %c0_39], %85 {strides = array<i32>} : memref<2x18x32x4xf32, #tpu.memory_space<vmem>>, vector<2x16x16x4xf32>,
    %c0_40 = arith.constant 0 : index
    %c0_41 = arith.constant 0 : index
    %c0_42 = arith.constant 0 : index
    %c0_43 = arith.constant 0 : index
    %87 = vector.load %arg8[%c0_40, %c0_41, %c0_42, %c0_43] : memref<2x18x32x4xf32, #tpu.memory_space<vmem>>, vector<2x18x32x4xf32>
    %c0_44 = arith.constant 0 : index
    %c0_45 = arith.constant 0 : index
    %c0_46 = arith.constant 0 : index
    %c0_47 = arith.constant 0 : index
    %88 = vector.load %arg4[%c0_44, %c0_45, %c0_46, %c0_47] : memref<3x3x4x4xf32, #tpu.memory_space<vmem>>, vector<3x3x4x4xf32>
    %c0_48 = arith.constant 0 : index
    %c0_49 = arith.constant 0 : index
    %89 = vector.load %arg5[%c0_48, %c0_49] : memref<1x4xf32, #tpu.memory_space<vmem>>, vector<1x4xf32>
    %c0_50 = arith.constant 0 : index
    %c0_51 = arith.constant 0 : index
    %90 = vector.load %arg6[%c0_50, %c0_51] : memref<1x4xf32, #tpu.memory_space<vmem>>, vector<1x4xf32>
    %91 = vector.extract_strided_slice %87 {offsets = [0, 0, 7, 0], sizes = [2, 16, 16, 4], strides = [1, 1, 1, 1]} : vector<2x18x32x4xf32> to vector<2x16x16x4xf32>
    %92 = vector.shape_cast %91 : vector<2x16x16x4xf32> to vector<512x4xf32>
    %93 = vector.extract_strided_slice %88 {offsets = [0, 0, 0, 0], sizes = [1, 1, 4, 4], strides = [1, 1, 1, 1]} : vector<3x3x4x4xf32> to vector<1x1x4x4xf32>
    %94 = vector.shape_cast %93 : vector<1x1x4x4xf32> to vector<4x4xf32>
    %cst_52 = arith.constant dense<0.000000e+00> : vector<512x4xf32>
    %95 = tpu.matmul %92, %94, %cst_52 {dimension_numbers = #tpu.dot_dimension_numbers<[1], [0], [0], [1], [0, 0, 1, 1], [], []>} : vector<512x4xf32>, vector<4x4xf32>, vector<512x4xf32> -> vector<512x4xf32>
    %96 = vector.extract_strided_slice %87 {offsets = [0, 0, 8, 0], sizes = [2, 16, 16, 4], strides = [1, 1, 1, 1]} : vector<2x18x32x4xf32> to vector<2x16x16x4xf32>
    %97 = vector.shape_cast %96 : vector<2x16x16x4xf32> to vector<512x4xf32>
    %98 = vector.extract_strided_slice %88 {offsets = [0, 1, 0, 0], sizes = [1, 1, 4, 4], strides = [1, 1, 1, 1]} : vector<3x3x4x4xf32> to vector<1x1x4x4xf32>
    %99 = vector.shape_cast %98 : vector<1x1x4x4xf32> to vector<4x4xf32>
    %cst_53 = arith.constant dense<0.000000e+00> : vector<512x4xf32>
    %100 = tpu.matmul %97, %99, %cst_53 {dimension_numbers = #tpu.dot_dimension_numbers<[1], [0], [0], [1], [0, 0, 1, 1], [], []>} : vector<512x4xf32>, vector<4x4xf32>, vector<512x4xf32> -> vector<512x4xf32>
    %101 = arith.addf %95, %100 : vector<512x4xf32>
    %102 = vector.extract_strided_slice %87 {offsets = [0, 0, 9, 0], sizes = [2, 16, 16, 4], strides = [1, 1, 1, 1]} : vector<2x18x32x4xf32> to vector<2x16x16x4xf32>
    %103 = vector.shape_cast %102 : vector<2x16x16x4xf32> to vector<512x4xf32>
    %104 = vector.extract_strided_slice %88 {offsets = [0, 2, 0, 0], sizes = [1, 1, 4, 4], strides = [1, 1, 1, 1]} : vector<3x3x4x4xf32> to vector<1x1x4x4xf32>
    %105 = vector.shape_cast %104 : vector<1x1x4x4xf32> to vector<4x4xf32>
    %cst_54 = arith.constant dense<0.000000e+00> : vector<512x4xf32>
    %106 = tpu.matmul %103, %105, %cst_54 {dimension_numbers = #tpu.dot_dimension_numbers<[1], [0], [0], [1], [0, 0, 1, 1], [], []>} : vector<512x4xf32>, vector<4x4xf32>, vector<512x4xf32> -> vector<512x4xf32>
    %107 = arith.addf %101, %106 : vector<512x4xf32>
    %108 = vector.extract_strided_slice %87 {offsets = [0, 1, 7, 0], sizes = [2, 16, 16, 4], strides = [1, 1, 1, 1]} : vector<2x18x32x4xf32> to vector<2x16x16x4xf32>
    %109 = vector.shape_cast %108 : vector<2x16x16x4xf32> to vector<512x4xf32>
    %110 = vector.extract_strided_slice %88 {offsets = [1, 0, 0, 0], sizes = [1, 1, 4, 4], strides = [1, 1, 1, 1]} : vector<3x3x4x4xf32> to vector<1x1x4x4xf32>
    %111 = vector.shape_cast %110 : vector<1x1x4x4xf32> to vector<4x4xf32>
    %cst_55 = arith.constant dense<0.000000e+00> : vector<512x4xf32>
    %112 = tpu.matmul %109, %111, %cst_55 {dimension_numbers = #tpu.dot_dimension_numbers<[1], [0], [0], [1], [0, 0, 1, 1], [], []>} : vector<512x4xf32>, vector<4x4xf32>, vector<512x4xf32> -> vector<512x4xf32>
    %113 = arith.addf %107, %112 : vector<512x4xf32>
    %114 = vector.extract_strided_slice %87 {offsets = [0, 1, 8, 0], sizes = [2, 16, 16, 4], strides = [1, 1, 1, 1]} : vector<2x18x32x4xf32> to vector<2x16x16x4xf32>
    %115 = vector.shape_cast %114 : vector<2x16x16x4xf32> to vector<512x4xf32>
    %116 = vector.extract_strided_slice %88 {offsets = [1, 1, 0, 0], sizes = [1, 1, 4, 4], strides = [1, 1, 1, 1]} : vector<3x3x4x4xf32> to vector<1x1x4x4xf32>
    %117 = vector.shape_cast %116 : vector<1x1x4x4xf32> to vector<4x4xf32>
    %cst_56 = arith.constant dense<0.000000e+00> : vector<512x4xf32>
    %118 = tpu.matmul %115, %117, %cst_56 {dimension_numbers = #tpu.dot_dimension_numbers<[1], [0], [0], [1], [0, 0, 1, 1], [], []>} : vector<512x4xf32>, vector<4x4xf32>, vector<512x4xf32> -> vector<512x4xf32>
    %119 = arith.addf %113, %118 : vector<512x4xf32>
    %120 = vector.extract_strided_slice %87 {offsets = [0, 1, 9, 0], sizes = [2, 16, 16, 4], strides = [1, 1, 1, 1]} : vector<2x18x32x4xf32> to vector<2x16x16x4xf32>
    %121 = vector.shape_cast %120 : vector<2x16x16x4xf32> to vector<512x4xf32>
    %122 = vector.extract_strided_slice %88 {offsets = [1, 2, 0, 0], sizes = [1, 1, 4, 4], strides = [1, 1, 1, 1]} : vector<3x3x4x4xf32> to vector<1x1x4x4xf32>
    %123 = vector.shape_cast %122 : vector<1x1x4x4xf32> to vector<4x4xf32>
    %cst_57 = arith.constant dense<0.000000e+00> : vector<512x4xf32>
    %124 = tpu.matmul %121, %123, %cst_57 {dimension_numbers = #tpu.dot_dimension_numbers<[1], [0], [0], [1], [0, 0, 1, 1], [], []>} : vector<512x4xf32>, vector<4x4xf32>, vector<512x4xf32> -> vector<512x4xf32>
    %125 = arith.addf %119, %124 : vector<512x4xf32>
    %126 = vector.extract_strided_slice %87 {offsets = [0, 2, 7, 0], sizes = [2, 16, 16, 4], strides = [1, 1, 1, 1]} : vector<2x18x32x4xf32> to vector<2x16x16x4xf32>
    %127 = vector.shape_cast %126 : vector<2x16x16x4xf32> to vector<512x4xf32>
    %128 = vector.extract_strided_slice %88 {offsets = [2, 0, 0, 0], sizes = [1, 1, 4, 4], strides = [1, 1, 1, 1]} : vector<3x3x4x4xf32> to vector<1x1x4x4xf32>
    %129 = vector.shape_cast %128 : vector<1x1x4x4xf32> to vector<4x4xf32>
    %cst_58 = arith.constant dense<0.000000e+00> : vector<512x4xf32>
    %130 = tpu.matmul %127, %129, %cst_58 {dimension_numbers = #tpu.dot_dimension_numbers<[1], [0], [0], [1], [0, 0, 1, 1], [], []>} : vector<512x4xf32>, vector<4x4xf32>, vector<512x4xf32> -> vector<512x4xf32>
    %131 = arith.addf %125, %130 : vector<512x4xf32>
    %132 = vector.extract_strided_slice %87 {offsets = [0, 2, 8, 0], sizes = [2, 16, 16, 4], strides = [1, 1, 1, 1]} : vector<2x18x32x4xf32> to vector<2x16x16x4xf32>
    %133 = vector.shape_cast %132 : vector<2x16x16x4xf32> to vector<512x4xf32>
    %134 = vector.extract_strided_slice %88 {offsets = [2, 1, 0, 0], sizes = [1, 1, 4, 4], strides = [1, 1, 1, 1]} : vector<3x3x4x4xf32> to vector<1x1x4x4xf32>
    %135 = vector.shape_cast %134 : vector<1x1x4x4xf32> to vector<4x4xf32>
    %cst_59 = arith.constant dense<0.000000e+00> : vector<512x4xf32>
    %136 = tpu.matmul %133, %135, %cst_59 {dimension_numbers = #tpu.dot_dimension_numbers<[1], [0], [0], [1], [0, 0, 1, 1], [], []>} : vector<512x4xf32>, vector<4x4xf32>, vector<512x4xf32> -> vector<512x4xf32>
    %137 = arith.addf %131, %136 : vector<512x4xf32>
    %138 = vector.extract_strided_slice %87 {offsets = [0, 2, 9, 0], sizes = [2, 16, 16, 4], strides = [1, 1, 1, 1]} : vector<2x18x32x4xf32> to vector<2x16x16x4xf32>
    %139 = vector.shape_cast %138 : vector<2x16x16x4xf32> to vector<512x4xf32>
    %140 = vector.extract_strided_slice %88 {offsets = [2, 2, 0, 0], sizes = [1, 1, 4, 4], strides = [1, 1, 1, 1]} : vector<3x3x4x4xf32> to vector<1x1x4x4xf32>
    %141 = vector.shape_cast %140 : vector<1x1x4x4xf32> to vector<4x4xf32>
    %cst_60 = arith.constant dense<0.000000e+00> : vector<512x4xf32>
    %142 = tpu.matmul %139, %141, %cst_60 {dimension_numbers = #tpu.dot_dimension_numbers<[1], [0], [0], [1], [0, 0, 1, 1], [], []>} : vector<512x4xf32>, vector<4x4xf32>, vector<512x4xf32> -> vector<512x4xf32>
    %143 = arith.addf %137, %142 : vector<512x4xf32>
    %cst_61 = arith.constant dense<0.000000e+00> : vector<4xf32>
    %144 = vector.multi_reduction <add>, %143, %cst_61 [0] : vector<512x4xf32> to vector<4xf32>
    %145 = vector.shape_cast %144 : vector<4xf32> to vector<1x4xf32>
    %cst_62 = arith.constant 5.120000e+02 : f32
    %146 = vector.broadcast %cst_62 : f32 to vector<1x4xf32>
    %147 = arith.divf %145, %146 : vector<1x4xf32>
    %148 = vector.broadcast %147 : vector<1x4xf32> to vector<512x4xf32>
    %149 = arith.subf %143, %148 : vector<512x4xf32>
    %150 = arith.mulf %149, %149 : vector<512x4xf32>
    %cst_63 = arith.constant dense<0.000000e+00> : vector<4xf32>
    %151 = vector.multi_reduction <add>, %150, %cst_63 [0] : vector<512x4xf32> to vector<4xf32>
    %152 = vector.shape_cast %151 : vector<4xf32> to vector<1x4xf32>
    %cst_64 = arith.constant 5.120000e+02 : f32
    %153 = vector.broadcast %cst_64 : f32 to vector<1x4xf32>
    %154 = arith.divf %152, %153 : vector<1x4xf32>
    %155 = vector.broadcast %147 : vector<1x4xf32> to vector<512x4xf32>
    %156 = arith.subf %143, %155 : vector<512x4xf32>
    %cst_65 = arith.constant 9.99999974E-6 : f32
    %157 = vector.broadcast %cst_65 : f32 to vector<1x4xf32>
    %158 = arith.addf %154, %157 : vector<1x4xf32>
    %159 = math.rsqrt %158 : vector<1x4xf32>
    %160 = vector.broadcast %159 : vector<1x4xf32> to vector<512x4xf32>
    %161 = arith.mulf %156, %160 : vector<512x4xf32>
    %162 = vector.broadcast %89 : vector<1x4xf32> to vector<512x4xf32>
    %163 = arith.mulf %161, %162 : vector<512x4xf32>
    %164 = vector.broadcast %90 : vector<1x4xf32> to vector<512x4xf32>
    %165 = arith.addf %163, %164 : vector<512x4xf32>
    %cst_66 = arith.constant 0.000000e+00 : f32
    %166 = vector.broadcast %cst_66 : f32 to vector<512x4xf32>
    %167 = arith.maximumf %165, %166 : vector<512x4xf32>
    %168 = vector.shape_cast %0 : vector<2x16x16x4xf32> to vector<512x4xf32>
    %169 = arith.addf %168, %167 : vector<512x4xf32>
    %cst_67 = arith.constant 0.000000e+00 : f32
    %170 = vector.broadcast %cst_67 : f32 to vector<512x4xf32>
    %171 = arith.maximumf %169, %170 : vector<512x4xf32>
    %172 = vector.shape_cast %171 : vector<512x4xf32> to vector<2x16x16x4xf32>
    %c0_68 = arith.constant 0 : index
    %c0_69 = arith.constant 0 : index
    %c0_70 = arith.constant 0 : index
    %c0_71 = arith.constant 0 : index
    %173 = vector.load %arg7[%c0_68, %c0_69, %c0_70, %c0_71] : memref<2x16x16x4xf32, #tpu.memory_space<vmem>>, vector<2x16x16x4xf32>
    tpu.vector_store %arg7[%c0_68, %c0_69, %c0_70, %c0_71], %172 {strides = array<i32>} : memref<2x16x16x4xf32, #tpu.memory_space<vmem>>, vector<2x16x16x4xf32>,
    return
  }
}

</mosaic_0001>

<bundles_post_ra>
// kernel: basic_block_forward.1
= control target key start
LH: loop header
LB: loop body
LE: loop exit
PB: predicated region body
PF: predicated region fallthrough
CT: control target
= control target key end

     0   :  { %vm840_vm0 = vcmask 1043456   ;;  %vm90_vm1 = vcmask 31744   ;;  %v17217_v1 = vmov 0.0   ;;  %vm551_vm2 = vcmask 1040384   ;;  %s25848_s1 = inlined_call_operand.vmem [shape: f32[3,3,4,4], index: 1, kind: input, shape index: {}]   ;;  %s25849_s0 = inlined_call_operand.vmem [shape: f32[2,16,16,4], index: 0, kind: input, shape index: {}]   ;;  %s25850_s4 = inlined_call_operand.vmem [shape: f32[3,3,4,4], index: 4, kind: input, shape index: {}]   ;;  %s25851_s2 = inlined_call_operand.vmem [shape: f32[1,4], index: 2, kind: input, shape index: {}]   ;;  %s25852_s3 = inlined_call_operand.vmem [shape: f32[1,4], index: 3, kind: input, shape index: {}]   ;;  %s25853_s5 = inlined_call_operand.vmem [shape: f32[1,4], index: 5, kind: input, shape index: {}]   ;;  %s25854_s6 = inlined_call_operand.vmem [shape: f32[1,4], index: 6, kind: input, shape index: {}]   ;;  %s25855_s7 = inlined_call_operand.vmem [shape: f32[2,16,16,4], index: 7, kind: output, shape index: {}]  }
   0x1   :  { %v17261_v0 = vld [vmem:[%s25848_s1 + $0x4] sm:$0xf]  ;;  %92 = vst.msk [vmem:[#allocation2 + $0x8] sm:$0xff] %vm90_vm1, %v17217_v1  ;;  %91 = vst.msk [vmem:[#allocation2] sm:$0xff] %vm90_vm1, %v17217_v1  ;;  %v444_v2 = vld [vmem:[%s25848_s1] sm:$0xf] }
   0x2   :  { %93 = vst.msk [vmem:[#allocation2 + $0x10] sm:$0xff] %vm90_vm1, %v17217_v1  ;;  %94 = vst.msk [vmem:[#allocation2 + $0x18] sm:$0xff] %vm90_vm1, %v17217_v1  ;;  %v17557_v3 = vld [vmem:[%s25849_s0] sm:$0xff]  ;;  %14302 = vmatprep.subr.msk.mxu0 %vm840_vm0, %v17261_v0  ;;  %v17566_v4 = vld [vmem:[%s25849_s0 + $0x8] sm:$0xff]  ;;  %vm1777_vm3 = vcmask 1046528  }
   0x3   :  { %95 = vst.msk [vmem:[#allocation2 + $0x20] sm:$0xff] %vm90_vm1, %v17217_v1  ;;  %96 = vst.msk [vmem:[#allocation2 + $0x28] sm:$0xff] %vm90_vm1, %v17217_v1  ;;  %v17571_v5 = vld [vmem:[%s25849_s0 + $0x10] sm:$0xff]  ;;  %v17576_v6 = vld [vmem:[%s25849_s0 + $0x18] sm:$0xff]  ;;  %14303 = vmatpush3.msk.msra.mxu0 %vm840_vm0, %v17261_v0 }
   0x4   :  { %97 = vst.msk [vmem:[#allocation2 + $0x30] sm:$0xff] %vm90_vm1, %v17217_v1  ;;  %98 = vst.msk [vmem:[#allocation2 + $0x38] sm:$0xff] %vm90_vm1, %v17217_v1  ;;  %v17589_v7 = vld [vmem:[%s25849_s0 + $0x20] sm:$0xff]  ;;  %v17594_v8 = vld [vmem:[%s25849_s0 + $0x28] sm:$0xff]  ;;  %14400 = vmatprep.subr.msk.mxu0 %vm840_vm0, %v444_v2 }
   0x5   :  { %99 = vst.msk [vmem:[#allocation2 + $0x40] sm:$0xff] %vm90_vm1, %v17217_v1  ;;  %100 = vst.msk [vmem:[#allocation2 + $0x48] sm:$0xff] %vm90_vm1, %v17217_v1  ;;  %v17599_v9 = vld [vmem:[%s25849_s0 + $0x30] sm:$0xff]  ;;  %v17611_v10 = vld [vmem:[%s25849_s0 + $0x38] sm:$0xff] }
   0x6   :  { %101 = vst.msk [vmem:[#allocation2 + $0x50] sm:$0xff] %vm90_vm1, %v17217_v1  ;;  %102 = vst.msk [vmem:[#allocation2 + $0x58] sm:$0xff] %vm90_vm1, %v17217_v1  ;;  %v17616_v11 = vld [vmem:[%s25849_s0 + $0x40] sm:$0xff]  ;;  %v17621_v12 = vld [vmem:[%s25849_s0 + $0x48] sm:$0xff] }
   0x7   :  { %103 = vst.msk [vmem:[#allocation2 + $0x60] sm:$0xff] %vm90_vm1, %v17217_v1  ;;  %104 = vst.msk [vmem:[#allocation2 + $0x68] sm:$0xff] %vm90_vm1, %v17217_v1  ;;  %v17632_v13 = vld [vmem:[%s25849_s0 + $0x50] sm:$0xff]  ;;  %v17637_v14 = vld [vmem:[%s25849_s0 + $0x58] sm:$0xff] }
   0x8   :  { %105 = vst.msk [vmem:[#allocation2 + $0x70] sm:$0xff] %vm90_vm1, %v17217_v1  ;;  %106 = vst.msk [vmem:[#allocation2 + $0x78] sm:$0xff] %vm90_vm1, %v17217_v1  ;;  %v17642_v15 = vld [vmem:[%s25849_s0 + $0x60] sm:$0xff]  ;;  %v17653_v16 = vld [vmem:[%s25849_s0 + $0x68] sm:$0xff] }
   0x9   :  { %107 = vst.msk [vmem:[#allocation2 + $0x80] sm:$0xff] %vm90_vm1, %v17217_v1  ;;  %108 = vst.msk [vmem:[#allocation2 + $0x88] sm:$0xff] %vm90_vm1, %v17217_v1  ;;  %v17658_v17 = vld [vmem:[%s25849_s0 + $0x70] sm:$0xff]  ;;  %v17663_v18 = vld [vmem:[%s25849_s0 + $0x78] sm:$0xff] }
   0xa   :  { %109 = vst.msk [vmem:[#allocation2 + $0x90] sm:$0xff] %vm90_vm1, %v17217_v1  ;;  %110 = vst.msk [vmem:[#allocation2 + $0x98] sm:$0xff] %vm90_vm1, %v17217_v1  ;;  %v17674_v19 = vld [vmem:[%s25849_s0 + $0x80] sm:$0xff]  ;;  %v17679_v20 = vld [vmem:[%s25849_s0 + $0x88] sm:$0xff] }
   0xb   :  { %111 = vst.msk [vmem:[#allocation2 + $0xa0] sm:$0xff] %vm90_vm1, %v17217_v1  ;;  %112 = vst.msk [vmem:[#allocation2 + $0xa8] sm:$0xff] %vm90_vm1, %v17217_v1  ;;  %v17684_v21 = vld [vmem:[%s25849_s0 + $0x90] sm:$0xff]  ;;  %v17686_v22 = vld [vmem:[#allocation2 + $0x8] sm:$0xff] }
   0xc   :  { %113 = vst.msk [vmem:[#allocation2 + $0xb0] sm:$0xff] %vm90_vm1, %v17217_v1  ;;  %114 = vst.msk [vmem:[#allocation2 + $0xb8] sm:$0xff] %vm90_vm1, %v17217_v1  ;;  %v17688_v23 = vld [vmem:[#allocation2 + $0x10] sm:$0xff]  ;;  %v17699_v24 = vld [vmem:[%s25849_s0 + $0x98] sm:$0xff]  ;;  %v25856_v25 = vrot.slane %v17686_v22, 7  ;;  %14304 = vmatprep.mubr.msk.f32.mxu0 %vm90_vm1, %v17686_v22 }
   0xd   :  { %115 = vst.msk [vmem:[#allocation2 + $0xc0] sm:$0xff] %vm90_vm1, %v17217_v1  ;;  %116 = vst.msk [vmem:[#allocation2 + $0xc8] sm:$0xff] %vm90_vm1, %v17217_v1  ;;  %v555_v26 = vrot.slane %v17688_v23, 7  ;;  %v17712_v28 = vld [vmem:[%s25849_s0 + $0xa0] sm:$0xff]  ;;  %14305 = vmatmul.mubr.msk.f32.vlgmr.msra.gmra.mrb[0].mxu0 %vm90_vm1, %v17688_v23  ;;  %v17741_v34 = vld [vmem:[%s25849_s0 + $0xa8] sm:$0xff] }
   0xe   :  { %117 = vst.msk [vmem:[#allocation2 + $0xd0] sm:$0xff] %vm90_vm1, %v17217_v1  ;;  %118 = vst.msk [vmem:[#allocation2 + $0xd8] sm:$0xff] %vm90_vm1, %v17217_v1  ;;  %14401 = vmatpush3.msk.msra.mxu0 %vm840_vm0, %v444_v2  ;;  %v17746_v35 = vld [vmem:[%s25849_s0 + $0xb0] sm:$0xff]  ;;  %v17755_v36 = vld [vmem:[%s25849_s0 + $0xb8] sm:$0xff] }
   0xf   :  { %119 = vst.msk [vmem:[#allocation2 + $0xe0] sm:$0xff] %vm90_vm1, %v17217_v1  ;;  %120 = vst.msk [vmem:[#allocation2 + $0xe8] sm:$0xff] %vm90_vm1, %v17217_v1  ;;  %v17726_v30 = vsel %vm551_vm2, %v25856_v25, %v555_v26  ;;  %v17760_v37 = vld [vmem:[%s25849_s0 + $0xc0] sm:$0xff]  ;;  %v17771_v38 = vld [vmem:[%s25849_s0 + $0xc8] sm:$0xff] }
  0x10   :  { %121 = vst.msk [vmem:[#allocation2 + $0xf0] sm:$0xff] %vm90_vm1, %v17217_v1  ;;  %122 = vst.msk [vmem:[#allocation2 + $0xf8] sm:$0xff] %vm90_vm1, %v17217_v1  ;;  %v17776_v39 = vld [vmem:[%s25849_s0 + $0xd0] sm:$0xff]  ;;  %v17781_v40 = vld [vmem:[%s25849_s0 + $0xd8] sm:$0xff] }
  0x11   :  { %123 = vst.msk [vmem:[#allocation2 + $0x100] sm:$0xff] %vm90_vm1, %v17217_v1  ;;  %124 = vst.msk [vmem:[#allocation2 + $0x108] sm:$0xff] %vm90_vm1, %v17217_v1  ;;  %v17796_v42 = vld [vmem:[%s25849_s0 + $0xe0] sm:$0xff]  ;;  %v17801_v43 = vld [vmem:[%s25849_s0 + $0xe8] sm:$0xff] }
  0x12   :  { %125 = vst.msk [vmem:[#allocation2 + $0x110] sm:$0xff] %vm90_vm1, %v17217_v1  ;;  %126 = vst.msk [vmem:[#allocation2 + $0x118] sm:$0xff] %vm90_vm1, %v17217_v1  ;;  %v17812_v45 = vld [vmem:[%s25849_s0 + $0x100] sm:$0xff]  ;;  %v17817_v46 = vld [vmem:[%s25849_s0 + $0x108] sm:$0xff] }
  0x13   :  { %127 = vst.msk [vmem:[#allocation2 + $0x120] sm:$0xff] %vm90_vm1, %v17217_v1  ;;  %128 = vst.msk [vmem:[#allocation2 + $0x128] sm:$0xff] %vm90_vm1, %v17217_v1  ;;  %v17828_v48 = vld [vmem:[%s25849_s0 + $0x110] sm:$0xff]  ;;  %v17833_v49 = vld [vmem:[%s25849_s0 + $0x118] sm:$0xff] }
  0x14   :  { %129 = vst.msk [vmem:[#allocation2 + $0x130] sm:$0xff] %vm90_vm1, %v17217_v1  ;;  %130 = vst.msk [vmem:[#allocation2 + $0x138] sm:$0xff] %vm90_vm1, %v17217_v1  ;;  %v17838_v50 = vld [vmem:[%s25849_s0 + $0x120] sm:$0xff]  ;;  %v17851_v51 = vld [vmem:[%s25849_s0 + $0x128] sm:$0xff] }
  0x15   :  { %131 = vst.msk [vmem:[#allocation2 + $0x140] sm:$0xff] %vm90_vm1, %v17217_v1  ;;  %132 = vst.msk [vmem:[#allocation2 + $0x148] sm:$0xff] %vm90_vm1, %v17217_v1  ;;  %v17856_v52 = vld [vmem:[%s25849_s0 + $0x130] sm:$0xff]  ;;  %v17861_v53 = vld [vmem:[%s25849_s0 + $0x138] sm:$0xff] }
  0x16   :  { %133 = vst.msk [vmem:[#allocation2 + $0x150] sm:$0xff] %vm90_vm1, %v17217_v1  ;;  %134 = vst.msk [vmem:[#allocation2 + $0x158] sm:$0xff] %vm90_vm1, %v17217_v1  ;;  %v17874_v54 = vld [vmem:[%s25849_s0 + $0x140] sm:$0xff]  ;;  %v17879_v55 = vld [vmem:[%s25849_s0 + $0x148] sm:$0xff] }
  0x17   :  { %135 = vst.msk [vmem:[#allocation2 + $0x160] sm:$0xff] %vm90_vm1, %v17217_v1  ;;  %136 = vst.msk [vmem:[#allocation2 + $0x168] sm:$0xff] %vm90_vm1, %v17217_v1  ;;  %v17884_v56 = vld [vmem:[%s25849_s0 + $0x150] sm:$0xff]  ;;  %v17897_v58 = vld [vmem:[%s25849_s0 + $0x158] sm:$0xff] }
  0x18   :  { %137 = vst.msk [vmem:[#allocation2 + $0x170] sm:$0xff] %vm90_vm1, %v17217_v1  ;;  %138 = vst.msk [vmem:[#allocation2 + $0x178] sm:$0xff] %vm90_vm1, %v17217_v1  ;;  %v17904_v59 = vld [vmem:[%s25849_s0 + $0x160] sm:$0xff]  ;;  %v17917_v61 = vld [vmem:[%s25849_s0 + $0x168] sm:$0xff] }
  0x19   :  { %139 = vst.msk [vmem:[#allocation2 + $0x180] sm:$0xff] %vm90_vm1, %v17217_v1  ;;  %140 = vst.msk [vmem:[#allocation2 + $0x188] sm:$0xff] %vm90_vm1, %v17217_v1  ;;  %v17926_v63 = vld [vmem:[%s25849_s0 + $0x170] sm:$0xff]  ;;  %v17941_v2 = vld [vmem:[%s25849_s0 + $0x178] sm:$0xff] }
  0x1a   :  { %141 = vst.msk [vmem:[#allocation2 + $0x190] sm:$0xff] %vm90_vm1, %v17217_v1  ;;  %142 = vst.msk [vmem:[#allocation2 + $0x198] sm:$0xff] %vm90_vm1, %v17217_v1  ;;  %v17946_v26 = vld [vmem:[%s25849_s0 + $0x180] sm:$0xff]  ;;  %v17955_v25 = vld [vmem:[%s25849_s0 + $0x188] sm:$0xff] }
  0x1b   :  { %143 = vst.msk [vmem:[#allocation2 + $0x1a0] sm:$0xff] %vm90_vm1, %v17217_v1  ;;  %144 = vst.msk [vmem:[#allocation2 + $0x1a8] sm:$0xff] %vm90_vm1, %v17217_v1 }
  0x1c   :  { %145 = vst.msk [vmem:[#allocation2 + $0x1b0] sm:$0xff] %vm90_vm1, %v17217_v1  ;;  %146 = vst.msk [vmem:[#allocation2 + $0x1b8] sm:$0xff] %vm90_vm1, %v17217_v1 }
  0x1d   :  { %147 = vst.msk [vmem:[#allocation2 + $0x1c0] sm:$0xff] %vm90_vm1, %v17217_v1  ;;  %148 = vst.msk [vmem:[#allocation2 + $0x1c8] sm:$0xff] %vm90_vm1, %v17217_v1 }
  0x1e   :  { %149 = vst.msk [vmem:[#allocation2 + $0x1d0] sm:$0xff] %vm90_vm1, %v17217_v1  ;;  %150 = vst.msk [vmem:[#allocation2 + $0x1d8] sm:$0xff] %vm90_vm1, %v17217_v1 }
  0x1f   :  { %151 = vst.msk [vmem:[#allocation2 + $0x1e0] sm:$0xff] %vm90_vm1, %v17217_v1  ;;  %152 = vst.msk [vmem:[#allocation2 + $0x1e8] sm:$0xff] %vm90_vm1, %v17217_v1 }
  0x20   :  { %153 = vst.msk [vmem:[#allocation2 + $0x1f0] sm:$0xff] %vm90_vm1, %v17217_v1  ;;  %154 = vst.msk [vmem:[#allocation2 + $0x1f8] sm:$0xff] %vm90_vm1, %v17217_v1 }
  0x21   :  { %155 = vst.msk [vmem:[#allocation2 + $0x200] sm:$0xff] %vm90_vm1, %v17217_v1  ;;  %156 = vst.msk [vmem:[#allocation2 + $0x208] sm:$0xff] %vm90_vm1, %v17217_v1 }
  0x22   :  { %157 = vst.msk [vmem:[#allocation2 + $0x210] sm:$0xff] %vm90_vm1, %v17217_v1  ;;  %158 = vst.msk [vmem:[#allocation2 + $0x218] sm:$0xff] %vm90_vm1, %v17217_v1 }
  0x23   :  { %159 = vst.msk [vmem:[#allocation2 + $0x220] sm:$0xff] %vm90_vm1, %v17217_v1  ;;  %160 = vst.msk [vmem:[#allocation2 + $0x228] sm:$0xff] %vm90_vm1, %v17217_v1 }
  0x24   :  { %161 = vst.msk [vmem:[#allocation2 + $0x230] sm:$0xff] %vm90_vm1, %v17217_v1  ;;  %162 = vst.msk [vmem:[#allocation2 + $0x238] sm:$0xff] %vm90_vm1, %v17217_v1 }
  0x25   :  { %163 = vst.msk [vmem:[#allocation2 + $0x240] sm:$0xff] %vm90_vm1, %v17217_v1  ;;  %164 = vst.msk [vmem:[#allocation2 + $0x248] sm:$0xff] %vm90_vm1, %v17217_v1 }
  0x26   :  { %165 = vst.msk [vmem:[#allocation2 + $0x250] sm:$0xff] %vm90_vm1, %v17217_v1  ;;  %166 = vst.msk [vmem:[#allocation2 + $0x258] sm:$0xff] %vm90_vm1, %v17217_v1 }
  0x27   :  { %167 = vst.msk [vmem:[#allocation2 + $0x260] sm:$0xff] %vm90_vm1, %v17217_v1  ;;  %168 = vst.msk [vmem:[#allocation2 + $0x268] sm:$0xff] %vm90_vm1, %v17217_v1 }
  0x28   :  { %169 = vst.msk [vmem:[#allocation2 + $0x270] sm:$0xff] %vm90_vm1, %v17217_v1  ;;  %170 = vst.msk [vmem:[#allocation2 + $0x278] sm:$0xff] %vm90_vm1, %v17217_v1 }
  0x29   :  { %171 = vst.msk [vmem:[#allocation2 + $0x280] sm:$0xff] %vm90_vm1, %v17217_v1  ;;  %172 = vst.msk [vmem:[#allocation2 + $0x288] sm:$0xff] %vm90_vm1, %v17217_v1 }
  0x2a   :  { %173 = vst.msk [vmem:[#allocation2 + $0x290] sm:$0xff] %vm90_vm1, %v17217_v1  ;;  %174 = vst.msk [vmem:[#allocation2 + $0x298] sm:$0xff] %vm90_vm1, %v17217_v1 }
  0x2b   :  { %175 = vst.msk [vmem:[#allocation2 + $0x2a0] sm:$0xff] %vm90_vm1, %v17217_v1  ;;  %176 = vst.msk [vmem:[#allocation2 + $0x2a8] sm:$0xff] %vm90_vm1, %v17217_v1 }
  0x2c   :  { %177 = vst.msk [vmem:[#allocation2 + $0x2b0] sm:$0xff] %vm90_vm1, %v17217_v1  ;;  %178 = vst.msk [vmem:[#allocation2 + $0x2b8] sm:$0xff] %vm90_vm1, %v17217_v1 }
  0x2d   :  { %179 = vst.msk [vmem:[#allocation2 + $0x2c0] sm:$0xff] %vm90_vm1, %v17217_v1  ;;  %180 = vst.msk [vmem:[#allocation2 + $0x2c8] sm:$0xff] %vm90_vm1, %v17217_v1 }
  0x2e   :  { %181 = vst.msk [vmem:[#allocation2 + $0x2d0] sm:$0xff] %vm90_vm1, %v17217_v1  ;;  %182 = vst.msk [vmem:[#allocation2 + $0x2d8] sm:$0xff] %vm90_vm1, %v17217_v1 }
  0x2f   :  { %183 = vst.msk [vmem:[#allocation2 + $0x2e0] sm:$0xff] %vm90_vm1, %v17217_v1  ;;  %184 = vst.msk [vmem:[#allocation2 + $0x2e8] sm:$0xff] %vm90_vm1, %v17217_v1 }
  0x30   :  { %185 = vst.msk [vmem:[#allocation2 + $0x2f0] sm:$0xff] %vm90_vm1, %v17217_v1  ;;  %186 = vst.msk [vmem:[#allocation2 + $0x2f8] sm:$0xff] %vm90_vm1, %v17217_v1 }
  0x31   :  { %187 = vst.msk [vmem:[#allocation2 + $0x300] sm:$0xff] %vm90_vm1, %v17217_v1  ;;  %188 = vst.msk [vmem:[#allocation2 + $0x308] sm:$0xff] %vm90_vm1, %v17217_v1 }
  0x32   :  { %189 = vst.msk [vmem:[#allocation2 + $0x310] sm:$0xff] %vm90_vm1, %v17217_v1  ;;  %190 = vst.msk [vmem:[#allocation2 + $0x318] sm:$0xff] %vm90_vm1, %v17217_v1 }
  0x33   :  { %191 = vst.msk [vmem:[#allocation2 + $0x320] sm:$0xff] %vm90_vm1, %v17217_v1  ;;  %192 = vst.msk [vmem:[#allocation2 + $0x328] sm:$0xff] %vm90_vm1, %v17217_v1 }
  0x34   :  { %193 = vst.msk [vmem:[#allocation2 + $0x330] sm:$0xff] %vm90_vm1, %v17217_v1  ;;  %194 = vst.msk [vmem:[#allocation2 + $0x338] sm:$0xff] %vm90_vm1, %v17217_v1 }
  0x35   :  { %195 = vst.msk [vmem:[#allocation2 + $0x340] sm:$0xff] %vm90_vm1, %v17217_v1  ;;  %196 = vst.msk [vmem:[#allocation2 + $0x348] sm:$0xff] %vm90_vm1, %v17217_v1 }
  0x36   :  { %197 = vst.msk [vmem:[#allocation2 + $0x350] sm:$0xff] %vm90_vm1, %v17217_v1  ;;  %198 = vst.msk [vmem:[#allocation2 + $0x358] sm:$0xff] %vm90_vm1, %v17217_v1 }
  0x37   :  { %199 = vst.msk [vmem:[#allocation2 + $0x360] sm:$0xff] %vm90_vm1, %v17217_v1  ;;  %200 = vst.msk [vmem:[#allocation2 + $0x368] sm:$0xff] %vm90_vm1, %v17217_v1 }
  0x38   :  { %201 = vst.msk [vmem:[#allocation2 + $0x370] sm:$0xff] %vm90_vm1, %v17217_v1  ;;  %202 = vst.msk [vmem:[#allocation2 + $0x378] sm:$0xff] %vm90_vm1, %v17217_v1 }
  0x39   :  { %203 = vst.msk [vmem:[#allocation2 + $0x380] sm:$0xff] %vm90_vm1, %v17217_v1  ;;  %204 = vst.msk [vmem:[#allocation2 + $0x388] sm:$0xff] %vm90_vm1, %v17217_v1 }
  0x3a   :  { %205 = vst.msk [vmem:[#allocation2 + $0x390] sm:$0xff] %vm90_vm1, %v17217_v1  ;;  %206 = vst.msk [vmem:[#allocation2 + $0x398] sm:$0xff] %vm90_vm1, %v17217_v1 }
  0x3b   :  { %207 = vst.msk [vmem:[#allocation2 + $0x3a0] sm:$0xff] %vm90_vm1, %v17217_v1  ;;  %208 = vst.msk [vmem:[#allocation2 + $0x3a8] sm:$0xff] %vm90_vm1, %v17217_v1 }
  0x3c   :  { %209 = vst.msk [vmem:[#allocation2 + $0x3b0] sm:$0xff] %vm90_vm1, %v17217_v1  ;;  %210 = vst.msk [vmem:[#allocation2 + $0x3b8] sm:$0xff] %vm90_vm1, %v17217_v1 }
  0x3d   :  { %211 = vst.msk [vmem:[#allocation2 + $0x3c0] sm:$0xff] %vm90_vm1, %v17217_v1  ;;  %212 = vst.msk [vmem:[#allocation2 + $0x3c8] sm:$0xff] %vm90_vm1, %v17217_v1 }
  0x3e   :  { %213 = vst.msk [vmem:[#allocation2 + $0x3d0] sm:$0xff] %vm90_vm1, %v17217_v1  ;;  %214 = vst.msk [vmem:[#allocation2 + $0x3d8] sm:$0xff] %vm90_vm1, %v17217_v1 }
  0x3f   :  { %215 = vst.msk [vmem:[#allocation2 + $0x3e0] sm:$0xff] %vm90_vm1, %v17217_v1  ;;  %216 = vst.msk [vmem:[#allocation2 + $0x3e8] sm:$0xff] %vm90_vm1, %v17217_v1 }
  0x40   :  { %217 = vst.msk [vmem:[#allocation2 + $0x3f0] sm:$0xff] %vm90_vm1, %v17217_v1  ;;  %218 = vst.msk [vmem:[#allocation2 + $0x3f8] sm:$0xff] %vm90_vm1, %v17217_v1 }
  0x41   :  { %219 = vst.msk [vmem:[#allocation2 + $0x400] sm:$0xff] %vm90_vm1, %v17217_v1  ;;  %220 = vst.msk [vmem:[#allocation2 + $0x408] sm:$0xff] %vm90_vm1, %v17217_v1 }
  0x42   :  { %221 = vst.msk [vmem:[#allocation2 + $0x410] sm:$0xff] %vm90_vm1, %v17217_v1  ;;  %222 = vst.msk [vmem:[#allocation2 + $0x418] sm:$0xff] %vm90_vm1, %v17217_v1 }
  0x43   :  { %223 = vst.msk [vmem:[#allocation2 + $0x420] sm:$0xff] %vm90_vm1, %v17217_v1  ;;  %224 = vst.msk [vmem:[#allocation2 + $0x428] sm:$0xff] %vm90_vm1, %v17217_v1 }
  0x44   :  { %225 = vst.msk [vmem:[#allocation2 + $0x430] sm:$0xff] %vm90_vm1, %v17217_v1  ;;  %226 = vst.msk [vmem:[#allocation2 + $0x438] sm:$0xff] %vm90_vm1, %v17217_v1 }
  0x45   :  { %227 = vst.msk [vmem:[#allocation2 + $0x440] sm:$0xff] %vm90_vm1, %v17217_v1  ;;  %228 = vst.msk [vmem:[#allocation2 + $0x448] sm:$0xff] %vm90_vm1, %v17217_v1 }
  0x46   :  { %229 = vst.msk [vmem:[#allocation2 + $0x450] sm:$0xff] %vm90_vm1, %v17217_v1  ;;  %230 = vst.msk [vmem:[#allocation2 + $0x458] sm:$0xff] %vm90_vm1, %v17217_v1 }
  0x47   :  { %231 = vst.msk [vmem:[#allocation2 + $0x460] sm:$0xff] %vm90_vm1, %v17217_v1  ;;  %232 = vst.msk [vmem:[#allocation2 + $0x468] sm:$0xff] %vm90_vm1, %v17217_v1 }
  0x48   :  { %233 = vst.msk [vmem:[#allocation2 + $0x470] sm:$0xff] %vm90_vm1, %v17217_v1  ;;  %234 = vst.msk [vmem:[#allocation2 + $0x478] sm:$0xff] %vm90_vm1, %v17217_v1 }
  0x49   :  { %26483 = vst [vmem:[#allocation3_spill] sm:$0xff] %v17557_v3  ;;  %236 = vst.msk [vmem:[#allocation2 + $0x28] sm:$0xff] %vm90_vm1, %v17557_v3 }
  0x4a   :  { %26484 = vst [vmem:[#allocation4_spill] sm:$0xff] %v17566_v4  ;;  %26485 = vst [vmem:[#allocation5_spill] sm:$0xff] %v17571_v5 }
  0x4b   :  { %26486 = vst [vmem:[#allocation6_spill] sm:$0xff] %v17576_v6  ;;  %237 = vst.msk [vmem:[#allocation2 + $0x30] sm:$0xff] %vm90_vm1, %v17566_v4 }
  0x4c   :  { %238 = vst.msk [vmem:[#allocation2 + $0x48] sm:$0xff] %vm90_vm1, %v17571_v5  ;;  %239 = vst.msk [vmem:[#allocation2 + $0x50] sm:$0xff] %vm90_vm1, %v17576_v6 }
  0x4d   :  { %26487 = vst [vmem:[#allocation7_spill] sm:$0xff] %v17589_v7  ;;  %26488 = vst [vmem:[#allocation8_spill] sm:$0xff] %v17594_v8 }
  0x4e   :  { %26489 = vst [vmem:[#allocation9_spill] sm:$0xff] %v17599_v9  ;;  %240 = vst.msk [vmem:[#allocation2 + $0x68] sm:$0xff] %vm90_vm1, %v17589_v7 }
  0x4f   :  { %241 = vst.msk [vmem:[#allocation2 + $0x70] sm:$0xff] %vm90_vm1, %v17594_v8  ;;  %242 = vst.msk [vmem:[#allocation2 + $0x88] sm:$0xff] %vm90_vm1, %v17599_v9 }
  0x50   :  { %26490 = vst [vmem:[#allocation10_spill] sm:$0xff] %v17611_v10  ;;  %26491 = vst [vmem:[#allocation11_spill] sm:$0xff] %v17616_v11  ;;  %v17705_v27 = vld [vmem:[#allocation2 + $0x28] sm:$0xff] }
  0x51   :  { %26492 = vst [vmem:[#allocation12_spill] sm:$0xff] %v17621_v12  ;;  %243 = vst.msk [vmem:[#allocation2 + $0x90] sm:$0xff] %vm90_vm1, %v17611_v10  ;;  %14307 = vmatprep.mubr.msk.f32.mxu0 %vm90_vm1, %v17705_v27 }
  0x52   :  { %244 = vst.msk [vmem:[#allocation2 + $0xa8] sm:$0xff] %vm90_vm1, %v17616_v11  ;;  %245 = vst.msk [vmem:[#allocation2 + $0xb0] sm:$0xff] %vm90_vm1, %v17621_v12  ;;  %v17721_v29 = vld [vmem:[#allocation2 + $0x30] sm:$0xff] }
  0x53   :  { %26493 = vst [vmem:[#allocation13_spill] sm:$0xff] %v17632_v13  ;;  %26494 = vst [vmem:[#allocation14_spill] sm:$0xff] %v17637_v14  ;;  %v17728_v31 = vld [vmem:[#allocation2 + $0x48] sm:$0xff]  ;;  %14308 = vmatmul.mubr.msk.f32.gmra.mrb[2].mxu0 %vm90_vm1, %v17721_v29  ;;  %v17734_v32 = vld [vmem:[#allocation2 + $0x50] sm:$0xff] }
  0x54   :  { %26495 = vst [vmem:[#allocation15_spill] sm:$0xff] %v17642_v15  ;;  %246 = vst.msk [vmem:[#allocation2 + $0xc8] sm:$0xff] %vm90_vm1, %v17632_v13  ;;  %14310 = vmatprep.mubr.msk.f32.mxu0 %vm90_vm1, %v17728_v31 }
  0x55   :  { %247 = vst.msk [vmem:[#allocation2 + $0xd0] sm:$0xff] %vm90_vm1, %v17637_v14  ;;  %248 = vst.msk [vmem:[#allocation2 + $0xe8] sm:$0xff] %vm90_vm1, %v17642_v15  ;;  %v17736_v33 = vld [vmem:[#allocation2 + $0x68] sm:$0xff] }
  0x56   :  { %26496 = vst [vmem:[#allocation16_spill] sm:$0xff] %v17653_v16  ;;  %26497 = vst [vmem:[#allocation17_spill] sm:$0xff] %v17658_v17  ;;  %v17785_v41 = vld [vmem:[#allocation2 + $0x70] sm:$0xff]  ;;  %v17803_v44 = vld [vmem:[#allocation2 + $0x88] sm:$0xff] }
  0x57   :  { %26498 = vst [vmem:[#allocation18_spill] sm:$0xff] %v17663_v18  ;;  %249 = vst.msk [vmem:[#allocation2 + $0xf0] sm:$0xff] %vm90_vm1, %v17653_v16  ;;  %14311 = vmatmul.mubr.msk.f32.gmra.mrb[4].mxu0 %vm90_vm1, %v17734_v32 }
  0x58   :  { %250 = vst.msk [vmem:[#allocation2 + $0x108] sm:$0xff] %vm90_vm1, %v17658_v17  ;;  %251 = vst.msk [vmem:[#allocation2 + $0x110] sm:$0xff] %vm90_vm1, %v17663_v18  ;;  %14313 = vmatprep.mubr.msk.f32.mxu0 %vm90_vm1, %v17736_v33  ;;  %v17819_v47 = vld [vmem:[#allocation2 + $0x90] sm:$0xff] }
  0x59   :  { %26499 = vst [vmem:[#allocation19_spill] sm:$0xff] %v17674_v19  ;;  %26500 = vst [vmem:[#allocation20_spill] sm:$0xff] %v17679_v20  ;;  %v17886_v57 = vld [vmem:[#allocation2 + $0xa8] sm:$0xff]  ;;  %v17912_v60 = vld [vmem:[#allocation2 + $0xb0] sm:$0xff] }
  0x5a   :  { %26501 = vst [vmem:[#allocation21_spill] sm:$0xff] %v17684_v21  ;;  %252 = vst.msk [vmem:[#allocation2 + $0x128] sm:$0xff] %vm90_vm1, %v17674_v19 }
  0x5b   :  { %253 = vst.msk [vmem:[#allocation2 + $0x130] sm:$0xff] %vm90_vm1, %v17679_v20  ;;  %254 = vst.msk [vmem:[#allocation2 + $0x148] sm:$0xff] %vm90_vm1, %v17684_v21  ;;  %14314 = vmatmul.mubr.msk.f32.gmra.mrb[6].mxu0 %vm90_vm1, %v17785_v41  ;;  %v17919_v62 = vld [vmem:[#allocation2 + $0xc8] sm:$0xff] }
  0x5c   :  { %26502 = vst [vmem:[#allocation22_spill] sm:$0xff] %v17699_v24  ;;  %26503 = vst [vmem:[#allocation23_spill] sm:$0xff] %v17705_v27  ;;  %14316 = vmatprep.mubr.msk.f32.mxu0 %vm90_vm1, %v17803_v44  ;;  %v17934_v0 = vld [vmem:[#allocation2 + $0xd0] sm:$0xff]  ;;  %v17936_v1 = vld [vmem:[#allocation2 + $0xe8] sm:$0xff] }
  0x5d   :  { %255 = vst.msk [vmem:[#allocation2 + $0x150] sm:$0xff] %vm90_vm1, %v17699_v24  ;;  %26504 = vst [vmem:[#allocation24_spill] sm:$0xff] %v17712_v28 }
  0x5e   :  { %256 = vst.msk [vmem:[#allocation2 + $0x168] sm:$0xff] %vm90_vm1, %v17712_v28  ;;  %26505 = vst [vmem:[#allocation25_spill] sm:$0xff] %v17741_v34 }
  0x5f   :  { %26506 = vst [vmem:[#allocation26_spill] sm:$0xff] %v17746_v35  ;;  %257 = vst.msk [vmem:[#allocation2 + $0x170] sm:$0xff] %vm90_vm1, %v17741_v34  ;;  %14317 = vmatmul.mubr.msk.f32.gmra.mrb[8].mxu0 %vm90_vm1, %v17819_v47 }
  0x60   :  { %258 = vst.msk [vmem:[#allocation2 + $0x188] sm:$0xff] %vm90_vm1, %v17746_v35  ;;  %26507 = vst [vmem:[#allocation27_spill] sm:$0xff] %v17755_v36  ;;  %14319 = vmatprep.mubr.msk.f32.mxu0 %vm90_vm1, %v17886_v57 }
  0x61   :  { %26508 = vst [vmem:[#allocation28_spill] sm:$0xff] %v17760_v37  ;;  %259 = vst.msk [vmem:[#allocation2 + $0x190] sm:$0xff] %vm90_vm1, %v17755_v36 }
  0x62   :  { %260 = vst.msk [vmem:[#allocation2 + $0x1a8] sm:$0xff] %vm90_vm1, %v17760_v37  ;;  %26509 = vst [vmem:[#allocation29_spill] sm:$0xff] %v17771_v38 }
  0x63   :  { %26510 = vst [vmem:[#allocation30_spill] sm:$0xff] %v17776_v39  ;;  %26511 = vst [vmem:[#allocation31_spill] sm:$0xff] %v17781_v40  ;;  %14320 = vmatmul.mubr.msk.f32.gmra.mrb[10].mxu0 %vm90_vm1, %v17912_v60 }
  0x64   :  { %261 = vst.msk [vmem:[#allocation2 + $0x1b0] sm:$0xff] %vm90_vm1, %v17771_v38  ;;  %262 = vst.msk [vmem:[#allocation2 + $0x1c8] sm:$0xff] %vm90_vm1, %v17776_v39  ;;  %14322 = vmatprep.mubr.msk.f32.mxu0 %vm90_vm1, %v17919_v62 }
  0x65   :  { %263 = vst.msk [vmem:[#allocation2 + $0x1d0] sm:$0xff] %vm90_vm1, %v17781_v40  ;;  %26512 = vst [vmem:[#allocation32_spill] sm:$0xff] %v17796_v42 }
  0x66   :  { %26513 = vst [vmem:[#allocation33_spill] sm:$0xff] %v17801_v43  ;;  %264 = vst.msk [vmem:[#allocation2 + $0x1e8] sm:$0xff] %vm90_vm1, %v17796_v42 }
  0x67   :  { %265 = vst.msk [vmem:[#allocation2 + $0x1f0] sm:$0xff] %vm90_vm1, %v17801_v43  ;;  %26514 = vst [vmem:[#allocation34_spill] sm:$0xff] %v17812_v45  ;;  %14323 = vmatmul.mubr.msk.f32.gmra.mrb[12].mxu0 %vm90_vm1, %v17934_v0  ;;  %v18118_v43 = vld [vmem:[#allocation2 + $0x250] sm:$0xff] }
  0x68   :  { %26515 = vst [vmem:[#allocation35_spill] sm:$0xff] %v17817_v46  ;;  %268 = vst.msk [vmem:[#allocation2 + $0x268] sm:$0xff] %vm90_vm1, %v17812_v45  ;;  %14325 = vmatprep.mubr.msk.f32.mxu0 %vm90_vm1, %v17936_v1  ;;  %v18116_v45 = vld [vmem:[#allocation2 + $0x248] sm:$0xff]  ;;  %v635_v39 = vrot.slane %v18118_v43, 7 }
  0x69   :  { %269 = vst.msk [vmem:[#allocation2 + $0x270] sm:$0xff] %vm90_vm1, %v17817_v46  ;;  %26516 = vst [vmem:[#allocation36_spill] sm:$0xff] %v17828_v48  ;;  %v25895_v40 = vrot.slane %v18116_v45, 7 }
  0x6a   :  { %26517 = vst [vmem:[#allocation37_spill] sm:$0xff] %v17833_v49  ;;  %26518 = vst [vmem:[#allocation38_spill] sm:$0xff] %v17838_v50 }
  0x6b   :  { %270 = vst.msk [vmem:[#allocation2 + $0x288] sm:$0xff] %vm90_vm1, %v17828_v48  ;;  %271 = vst.msk [vmem:[#allocation2 + $0x290] sm:$0xff] %vm90_vm1, %v17833_v49  ;;  %v18104_v49 = vld [vmem:[#allocation2 + $0x1c8] sm:$0xff]  ;;  %v18133_v38 = vsel %vm551_vm2, %v25895_v40, %v635_v39 }
  0x6c   :  { %272 = vst.msk [vmem:[#allocation2 + $0x2a8] sm:$0xff] %vm90_vm1, %v17838_v50  ;;  %26519 = vst [vmem:[#allocation39_spill] sm:$0xff] %v17851_v51  ;;  %v18102_v50 = vld [vmem:[#allocation2 + $0x1b0] sm:$0xff] }
  0x6d   :  { %26520 = vst [vmem:[#allocation40_spill] sm:$0xff] %v17856_v52  ;;  %26521 = vst [vmem:[#allocation41_spill] sm:$0xff] %v17861_v53  ;;  %v18110_v48 = vld [vmem:[#allocation2 + $0x1d0] sm:$0xff]  ;;  %v18112_v46 = vld [vmem:[#allocation2 + $0x1e8] sm:$0xff] }
  0x6e   :  { %273 = vst.msk [vmem:[#allocation2 + $0x2b0] sm:$0xff] %vm90_vm1, %v17851_v51  ;;  %274 = vst.msk [vmem:[#allocation2 + $0x2c8] sm:$0xff] %vm90_vm1, %v17856_v52  ;;  %v18094_v52 = vld [vmem:[#allocation2 + $0x190] sm:$0xff]  ;;  %v18096_v51 = vld [vmem:[#allocation2 + $0x1a8] sm:$0xff] }
  0x6f   :  { %275 = vst.msk [vmem:[#allocation2 + $0x2d0] sm:$0xff] %vm90_vm1, %v17861_v53  ;;  %26522 = vst [vmem:[#allocation42_spill] sm:$0xff] %v17874_v54  ;;  %v18088_v53 = vld [vmem:[#allocation2 + $0x188] sm:$0xff]  ;;  %v18122_v42 = vld [vmem:[#allocation2 + $0x1f0] sm:$0xff] }
  0x70   :  { %26523 = vst [vmem:[#allocation43_spill] sm:$0xff] %v17879_v55  ;;  %26524 = vst [vmem:[#allocation44_spill] sm:$0xff] %v17884_v56  ;;  %v18135_v37 = vld [vmem:[#allocation2 + $0x268] sm:$0xff]  ;;  %v18141_v36 = vld [vmem:[#allocation2 + $0x270] sm:$0xff] }
  0x71   :  { %276 = vst.msk [vmem:[#allocation2 + $0x2e8] sm:$0xff] %vm90_vm1, %v17874_v54  ;;  %277 = vst.msk [vmem:[#allocation2 + $0x2f0] sm:$0xff] %vm90_vm1, %v17879_v55  ;;  %v18080_v55 = vld [vmem:[#allocation2 + $0x168] sm:$0xff]  ;;  %v18086_v54 = vld [vmem:[#allocation2 + $0x170] sm:$0xff] }
  0x72   :  { %278 = vst.msk [vmem:[#allocation2 + $0x308] sm:$0xff] %vm90_vm1, %v17884_v56  ;;  %26525 = vst [vmem:[#allocation45_spill] sm:$0xff] %v17897_v58  ;;  %v18072_v56 = vld [vmem:[#allocation2 + $0x148] sm:$0xff]  ;;  %v18149_v39 = vld [vmem:[#allocation2 + $0x290] sm:$0xff] }
  0x73   :  { %279 = vst.msk [vmem:[#allocation2 + $0x310] sm:$0xff] %vm90_vm1, %v17897_v58  ;;  %26526 = vst [vmem:[#allocation46_spill] sm:$0xff] %v17904_v59  ;;  %v18003_v58 = vld [vmem:[#allocation2 + $0x108] sm:$0xff] }
  0x74   :  { %280 = vst.msk [vmem:[#allocation2 + $0x328] sm:$0xff] %vm90_vm1, %v17904_v59  ;;  %26527 = vst [vmem:[#allocation47_spill] sm:$0xff] %v17917_v61  ;;  %v18001_v59 = vld [vmem:[%s25849_s0 + $0x1b8] sm:$0xff]  ;;  %v18143_v35 = vld [vmem:[#allocation2 + $0x288] sm:$0xff] }
  0x75   :  { %281 = vst.msk [vmem:[#allocation2 + $0x330] sm:$0xff] %vm90_vm1, %v17917_v61  ;;  %26528 = vst [vmem:[#allocation48_spill] sm:$0xff] %v17926_v63  ;;  %v17981_v61 = vld [vmem:[%s25849_s0 + $0x1a8] sm:$0xff]  ;;  %v18157_v34 = vld [vmem:[#allocation2 + $0x2b0] sm:$0xff] }
  0x76   :  { %282 = vst.msk [vmem:[#allocation2 + $0x348] sm:$0xff] %vm90_vm1, %v17926_v63  ;;  %26529 = vst [vmem:[#allocation49_spill] sm:$0xff] %v17941_v2  ;;  %v17960_v63 = vld [vmem:[%s25849_s0 + $0x190] sm:$0xff]  ;;  %v18151_v40 = vld [vmem:[#allocation2 + $0x2a8] sm:$0xff] }
  0x77   :  { %26530 = vst [vmem:[#allocation50_spill] sm:$0xff] %v17946_v26  ;;  %283 = vst.msk [vmem:[#allocation2 + $0x350] sm:$0xff] %vm90_vm1, %v17941_v2  ;;  %v17976_v2 = vld [vmem:[%s25849_s0 + $0x1a0] sm:$0xff]  ;;  %v18159_v28 = vld [vmem:[#allocation2 + $0x2c8] sm:$0xff] }
  0x78   :  { %284 = vst.msk [vmem:[#allocation2 + $0x368] sm:$0xff] %vm90_vm1, %v17946_v26  ;;  %26531 = vst [vmem:[#allocation51_spill] sm:$0xff] %v17955_v25  ;;  %v17971_v26 = vld [vmem:[%s25849_s0 + $0x198] sm:$0xff]  ;;  %v18165_v24 = vld [vmem:[#allocation2 + $0x2d0] sm:$0xff] }
  0x79   :  { %26532 = vst [vmem:[#allocation52_spill] sm:$0xff] %v17960_v63  ;;  %285 = vst.msk [vmem:[#allocation2 + $0x370] sm:$0xff] %vm90_vm1, %v17955_v25  ;;  %v17985_v25 = vld [vmem:[#allocation2 + $0xf0] sm:$0xff]  ;;  %v18167_v21 = vld [vmem:[#allocation2 + $0x2e8] sm:$0xff] }
  0x7a   :  { %286 = vst.msk [vmem:[#allocation2 + $0x388] sm:$0xff] %vm90_vm1, %v17960_v63  ;;  %26533 = vst [vmem:[#allocation53_spill] sm:$0xff] %v17971_v26  ;;  %v17996_v63 = vld [vmem:[%s25849_s0 + $0x1b0] sm:$0xff]  ;;  %14326 = vmatmul.mubr.msk.f32.gmra.mrb[14].mxu0 %vm90_vm1, %v17985_v25  ;;  %v18175_v19 = vld [vmem:[#allocation2 + $0x308] sm:$0xff] }
  0x7b   :  { %26534 = vst [vmem:[#allocation54_spill] sm:$0xff] %v17976_v2  ;;  %26535 = vst [vmem:[#allocation55_spill] sm:$0xff] %v17981_v61  ;;  %14328 = vmatprep.mubr.msk.f32.mxu0 %vm90_vm1, %v18003_v58  ;;  %v18173_v20 = vld [vmem:[#allocation2 + $0x2f0] sm:$0xff]  ;;  %v18183_v17 = vld [vmem:[#allocation2 + $0x328] sm:$0xff] }
  0x7c   :  { %287 = vst.msk [vmem:[#allocation2 + $0x390] sm:$0xff] %vm90_vm1, %v17971_v26  ;;  %288 = vst.msk [vmem:[#allocation2 + $0x3a8] sm:$0xff] %vm90_vm1, %v17976_v2  ;;  %v18017_v2 = vld [vmem:[%s25849_s0 + $0x1c8] sm:$0xff]  ;;  %v18036_v26 = vld [vmem:[%s25849_s0 + $0x1e0] sm:$0xff] }
  0x7d   :  { %289 = vst.msk [vmem:[#allocation2 + $0x3b0] sm:$0xff] %vm90_vm1, %v17981_v61  ;;  %26536 = vst [vmem:[#allocation56_spill] sm:$0xff] %v17996_v63  ;;  %v18012_v61 = vld [vmem:[%s25849_s0 + $0x1c0] sm:$0xff]  ;;  %v18181_v18 = vld [vmem:[#allocation2 + $0x310] sm:$0xff] }
  0x7e   :  { %26537 = vst [vmem:[#allocation57_spill] sm:$0xff] %v18001_v59  ;;  %290 = vst.msk [vmem:[#allocation2 + $0x3c8] sm:$0xff] %vm90_vm1, %v17996_v63  ;;  %v18031_v63 = vld [vmem:[%s25849_s0 + $0x1d8] sm:$0xff]  ;;  %v18189_v16 = vld [vmem:[#allocation2 + $0x330] sm:$0xff] }
  0x7f   :  { %291 = vst.msk [vmem:[#allocation2 + $0x3d0] sm:$0xff] %vm90_vm1, %v18001_v59  ;;  %26538 = vst [vmem:[#allocation58_spill] sm:$0xff] %v18012_v61  ;;  %v18026_v59 = vld [vmem:[%s25849_s0 + $0x1d0] sm:$0xff]  ;;  %v18191_v15 = vld [vmem:[#allocation2 + $0x348] sm:$0xff] }
  0x80   :  { %26539 = vst [vmem:[#allocation59_spill] sm:$0xff] %v18017_v2  ;;  %292 = vst.msk [vmem:[#allocation2 + $0x3e8] sm:$0xff] %vm90_vm1, %v18012_v61  ;;  %v18054_v61 = vld [vmem:[%s25848_s1 + $0x8] sm:$0xf]  ;;  %v18197_v14 = vld [vmem:[#allocation2 + $0x350] sm:$0xff] }
  0x81   :  { %293 = vst.msk [vmem:[#allocation2 + $0x3f0] sm:$0xff] %vm90_vm1, %v18017_v2  ;;  %26540 = vst [vmem:[#allocation60_spill] sm:$0xff] %v18026_v59  ;;  %v18049_v2 = vld [vmem:[%s25849_s0 + $0x1e8] sm:$0xff]  ;;  %14498 = vmatprep.subr.msk.mxu0 %vm840_vm0, %v18054_v61  ;;  %v18205_v12 = vld [vmem:[#allocation2 + $0x370] sm:$0xff] }
  0x82   :  { %26541 = vst [vmem:[#allocation61_spill] sm:$0xff] %v18031_v63  ;;  %26542 = vst [vmem:[#allocation62_spill] sm:$0xff] %v18036_v26  ;;  %v18199_v13 = vld [vmem:[#allocation2 + $0x368] sm:$0xff] }
  0x83   :  { %294 = vst.msk [vmem:[#allocation2 + $0x408] sm:$0xff] %vm90_vm1, %v18026_v59  ;;  %295 = vst.msk [vmem:[#allocation2 + $0x410] sm:$0xff] %vm90_vm1, %v18031_v63  ;;  %v18058_v59 = vld [vmem:[#allocation2 + $0x110] sm:$0xff]  ;;  %v18207_v11 = vld [vmem:[#allocation2 + $0x388] sm:$0xff] }
  0x84   :  { %296 = vst.msk [vmem:[#allocation2 + $0x428] sm:$0xff] %vm90_vm1, %v18036_v26  ;;  %26543 = vst [vmem:[#allocation63_spill] sm:$0xff] %v18049_v2  ;;  %v18064_v26 = vld [vmem:[#allocation2 + $0x128] sm:$0xff]  ;;  %14329 = vmatmul.mubr.msk.f32.gmra.mrb[16].mxu0 %vm90_vm1, %v18058_v59  ;;  %v18070_v63 = vld [vmem:[#allocation2 + $0x130] sm:$0xff] }
  0x85   :  { %297 = vst.msk [vmem:[#allocation2 + $0x430] sm:$0xff] %vm90_vm1, %v18049_v2  ;;  %14331 = vmatprep.mubr.msk.f32.mxu0 %vm90_vm1, %v18064_v26  ;;  %v18078_v2 = vld [vmem:[#allocation2 + $0x150] sm:$0xff]  ;;  %26544 = vst [vmem:[#allocation64_spill] sm:$0xff] %v18112_v46  ;;  %v18215_v9 = vld [vmem:[#allocation2 + $0x3a8] sm:$0xff] }
  0x86   :  { %26545 = vst [vmem:[#allocation65_spill] sm:$0xff] %v18191_v15  ;;  %26546 = vst [vmem:[#allocation66_spill] sm:$0xff] %v18197_v14  ;;  %v18213_v10 = vld [vmem:[#allocation2 + $0x390] sm:$0xff]  ;;  %v18223_v7 = vld [vmem:[#allocation2 + $0x3c8] sm:$0xff] }
  0x87   :  { %26547 = vst [vmem:[#allocation67_spill] sm:$0xff] %v18199_v13  ;;  %26548 = vst [vmem:[#allocation68_spill] sm:$0xff] %v18205_v12  ;;  %v18221_v8 = vld [vmem:[#allocation2 + $0x3b0] sm:$0xff]  ;;  %v18231_v5 = vld [vmem:[#allocation2 + $0x3e8] sm:$0xff] }
  0x88   :  { %14332 = vmatmul.mubr.msk.f32.gmra.mrb[18].mxu0 %vm90_vm1, %v18070_v63  ;;  %26549 = vst [vmem:[#allocation69_spill] sm:$0xff] %v18207_v11  ;;  %26550 = vst [vmem:[#allocation70_spill] sm:$0xff] %v18213_v10  ;;  %v18229_v6 = vld [vmem:[#allocation2 + $0x3d0] sm:$0xff] }
  0x89   :  { %14334 = vmatprep.mubr.msk.f32.mxu0 %vm90_vm1, %v18072_v56  ;;  %26551 = vst [vmem:[#allocation71_spill] sm:$0xff] %v18215_v9  ;;  %26552 = vst [vmem:[#allocation72_spill] sm:$0xff] %v18221_v8  ;;  %v18237_v4 = vld [vmem:[#allocation2 + $0x3f0] sm:$0xff] }
  0x8a   :  { %26553 = vst [vmem:[#allocation73_spill] sm:$0xff] %v18223_v7  ;;  %26554 = vst [vmem:[#allocation74_spill] sm:$0xff] %v18229_v6  ;;  %v18239_v3 = vld [vmem:[#allocation2 + $0x408] sm:$0xff] }
  0x8b   :  { %26555 = vst [vmem:[#allocation75_spill] sm:$0xff] %v18231_v5  ;;  %26556 = vst [vmem:[#allocation76_spill] sm:$0xff] %v18237_v4 }
  0x8c   :  { %14335 = vmatmul.mubr.msk.f32.gmra.mrb[20].mxu0 %vm90_vm1, %v18078_v2  ;;  %26557 = vst [vmem:[#allocation77_spill] sm:$0xff] %v18239_v3 }
  0x8d   :  { %14337 = vmatprep.mubr.msk.f32.mxu0 %vm90_vm1, %v18080_v55 }
  0x90   :  { %14338 = vmatmul.mubr.msk.f32.gmra.mrb[22].mxu0 %vm90_vm1, %v18086_v54 }
  0x91   :  { %14340 = vmatprep.mubr.msk.f32.mxu0 %vm90_vm1, %v18088_v53 }
  0x94   :  { %14341 = vmatmul.mubr.msk.f32.gmra.mrb[24].mxu0 %vm90_vm1, %v18094_v52 }
  0x95   :  { %14343 = vmatprep.mubr.msk.f32.mxu0 %vm90_vm1, %v18096_v51 }
  0x98   :  { %14344 = vmatmul.mubr.msk.f32.gmra.mrb[26].mxu0 %vm90_vm1, %v18102_v50 }
  0x99   :  { %14346 = vmatprep.mubr.msk.f32.mxu0 %vm90_vm1, %v18104_v49 }
  0x9c   :  { %14347 = vmatmul.mubr.msk.f32.gmra.mrb[28].mxu0 %vm90_vm1, %v18110_v48 }
  0x9d   :  { %14349 = vmatprep.mubr.msk.f32.mxu0 %vm90_vm1, %v18112_v46 }
  0xa0   :  { %14350 = vmatmul.mubr.msk.f32.gmra.mrb[30].mxu0 %vm90_vm1, %v18122_v42 }
  0xa1   :  { %14352 = vmatprep.mubr.msk.f32.mxu0 %vm90_vm1, %v18116_v45 }
  0xa4   :  { %14353 = vmatmul.mubr.msk.f32.gmra.mrb[32].mxu0 %vm90_vm1, %v18118_v43 }
  0xa5   :  { %14355 = vmatprep.mubr.msk.f32.mxu0 %vm90_vm1, %v18135_v37 }
  0xa8   :  { %14356 = vmatmul.mubr.msk.f32.gmra.mrb[34].mxu0 %vm90_vm1, %v18141_v36 }
  0xa9   :  { %14358 = vmatprep.mubr.msk.f32.mxu0 %vm90_vm1, %v18143_v35 }
  0xac   :  { %14359 = vmatmul.mubr.msk.f32.gmra.mrb[36].mxu0 %vm90_vm1, %v18149_v39 }
  0xad   :  { %14361 = vmatprep.mubr.msk.f32.mxu0 %vm90_vm1, %v18151_v40 }
  0xb0   :  { %14362 = vmatmul.mubr.msk.f32.gmra.mrb[38].mxu0 %vm90_vm1, %v18157_v34 }
  0xb1   :  { %14364 = vmatprep.mubr.msk.f32.mxu0 %vm90_vm1, %v18159_v28 }
  0xb4   :  { %14365 = vmatmul.mubr.msk.f32.gmra.mrb[40].mxu0 %vm90_vm1, %v18165_v24 }
  0xb5   :  { %14367 = vmatprep.mubr.msk.f32.mxu0 %vm90_vm1, %v18167_v21 }
  0xb8   :  { %14368 = vmatmul.mubr.msk.f32.gmra.mrb[42].mxu0 %vm90_vm1, %v18173_v20 }
  0xb9   :  { %14370 = vmatprep.mubr.msk.f32.mxu0 %vm90_vm1, %v18175_v19 }
  0xbc   :  { %14371 = vmatmul.mubr.msk.f32.gmra.mrb[44].mxu0 %vm90_vm1, %v18181_v18 }
  0xbd   :  { %14373 = vmatprep.mubr.msk.f32.mxu0 %vm90_vm1, %v18183_v17 }
  0xc0   :  { %14374 = vmatmul.mubr.msk.f32.gmra.mrb[46].mxu0 %vm90_vm1, %v18189_v16 }
  0xc1   :  { %14376 = vmatprep.mubr.msk.f32.mxu0 %vm90_vm1, %v18191_v15 }
  0xc4   :  { %14377 = vmatmul.mubr.msk.f32.gmra.mrb[48].mxu0 %vm90_vm1, %v18197_v14  ;;  %v308_v14 = vld [vmem:[#allocation2 + $0x40] sm:$0xff] }
  0xc5   :  { %14379 = vmatprep.mubr.msk.f32.mxu0 %vm90_vm1, %v18199_v13 }
  0xc8   :  { %14380 = vmatmul.mubr.msk.f32.gmra.mrb[50].mxu0 %vm90_vm1, %v18205_v12 }
  0xc9   :  { %14382 = vmatprep.mubr.msk.f32.mxu0 %vm90_vm1, %v18207_v11  ;;  %v560_v11 = vrot.slane %v17721_v29, 7 }
  0xcc   :  { %14383 = vmatmul.mubr.msk.f32.gmra.mrb[52].mxu0 %vm90_vm1, %v18213_v10 }
  0xcd   :  { %14385 = vmatprep.mubr.msk.f32.mxu0 %vm90_vm1, %v18215_v9  ;;  %v300_v9 = vld [vmem:[#allocation2] sm:$0xff] }
  0xce   :  { %v552_v10 = vrot.slane %v300_v9, 7  ;;  %v558_v9 = vrot.slane %v17705_v27, 7  ;;  %v18277_v27 = vld [vmem:[%s25848_s1 + $0xc] sm:$0xf] }
  0xd0   :  { %14386 = vmatmul.mubr.msk.f32.gmra.mrb[54].mxu0 %vm90_vm1, %v18221_v8  ;;  %v18247_v8 = vld [vmem:[#allocation2 + $0x428] sm:$0xff] }
  0xd1   :  { %14388 = vmatprep.mubr.msk.f32.mxu0 %vm90_vm1, %v18223_v7  ;;  %v18245_v7 = vld [vmem:[#allocation2 + $0x410] sm:$0xff]  ;;  %26559 = vst [vmem:[#allocation79_spill] sm:$0xff] %v18247_v8 }
  0xd2   :  { %26558 = vst [vmem:[#allocation78_spill] sm:$0xff] %v18245_v7 }
  0xd4   :  { %14389 = vmatmul.mubr.msk.f32.gmra.mrb[56].mxu0 %vm90_vm1, %v18229_v6  ;;  %v304_v6 = vld [vmem:[#allocation2 + $0x20] sm:$0xff] }
  0xd5   :  { %14391 = vmatprep.mubr.msk.f32.mxu0 %vm90_vm1, %v18231_v5  ;;  %v1778_v5 = vrot.slane %v17686_v22, 1  ;;  %v557_v13 = vrot.slane %v304_v6, 7  ;;  %v563_v6 = vrot.slane %v17728_v31, 7 }
  0xd8   :  { %14392 = vmatmul.mubr.msk.f32.gmra.mrb[58].mxu0 %vm90_vm1, %v18237_v4  ;;  %v18255_v4 = vld [vmem:[#allocation2 + $0x430] sm:$0xff] }
  0xd9   :  { %14394 = vmatprep.mubr.msk.f32.mxu0 %vm90_vm1, %v18239_v3  ;;  %v26560_v3 = vrot.slane %v17686_v22, 7  ;;  %v18271_v22 = vsel %vm551_vm2, %v557_v13, %v558_v9 }
  0xda   :  { %26562 = vst [vmem:[#allocation80_spill] sm:$0xff] %v18271_v22 }
  0xdb   :  { %v554_v12 = vsel %vm551_vm2, %v552_v10, %v26560_v3  ;;  %v562_v3 = vrot.slane %v308_v14, 7  ;;  %v312_v10 = vld [vmem:[#allocation2 + $0x60] sm:$0xff]  ;;  %v568_v14 = vrot.slane %v17736_v33, 7 }
  0xdc   :  { %14395 = vmatmul.mubr.msk.f32.gmra.mrb[60].mxu0 %vm90_vm1, %v18245_v7  ;;  %v567_v13 = vrot.slane %v312_v10, 7  ;;  %v573_v10 = vrot.slane %v17803_v44, 7 }
  0xdd   :  { %14397 = vmatprep.mubr.msk.f32.mxu0 %vm90_vm1, %v18247_v8  ;;  %v26561_v8 = vrot.slane %v17688_v23, 1 }
  0xdf   :  { %v18268_v7 = vsel %vm1777_vm3, %v1778_v5, %v26561_v8  ;;  %v18286_v5 = vsel %vm551_vm2, %v558_v9, %v560_v11  ;;  %v565_v8 = vrot.slane %v17734_v32, 7  ;;  %v18304_v9 = vsel %vm551_vm2, %v567_v13, %v568_v14 }
  0xe0   :  { %14398 = vmatmul.mubr.msk.f32.gmra.mrb[62].mxu0 %vm90_vm1, %v18255_v4  ;;  %26563 = vst [vmem:[#allocation81_spill] sm:$0xff] %v18286_v5  ;;  %26566 = vst [vmem:[#allocation84_spill] sm:$0xff] %v18304_v9 }
  0xe1   :  { %14402 = vmatprep.mubr.msk.f32.mxu0 %vm90_vm1, %v554_v12  ;;  %v18290_v12 = vsel %vm551_vm2, %v562_v3, %v563_v6  ;;  %v18300_v11 = vsel %vm551_vm2, %v563_v6, %v565_v8  ;;  %v575_v6 = vrot.slane %v17819_v47, 7 }
  0xe2   :  { %26564 = vst [vmem:[#allocation82_spill] sm:$0xff] %v18290_v12  ;;  %26565 = vst [vmem:[#allocation83_spill] sm:$0xff] %v18300_v11 }
  0xe4   :  { %14403 = vmatmul.mubr.msk.f32.vlgmr.msra.gmra.mrb[0].mxu0 %vm90_vm1, %v17726_v30  ;;  %v316_v30 = vld [vmem:[#allocation2 + $0x80] sm:$0xff] }
  0xe5   :  { %14499 = vmatpush3.msk.msra.mxu0 %vm840_vm0, %v18054_v61  ;;  %14405 = vmatprep.mubr.msk.f32.mxu0 %vm90_vm1, %v18271_v22  ;;  %v570_v61 = vrot.slane %v17785_v41, 7  ;;  %v572_v3 = vrot.slane %v316_v30, 7  ;;  %v320_v22 = vld [vmem:[#allocation2 + $0xa0] sm:$0xff]  ;;  %v578_v30 = vrot.slane %v17886_v57, 7 }
  0xe6   :  { %14596 = vmatprep.subr.msk.mxu0 %vm840_vm0, %v18277_v27  ;;  %v577_v13 = vrot.slane %v320_v22, 7  ;;  %v583_v22 = vrot.slane %v17919_v62, 7 }
  0xe7   :  { %v18316_v8 = vsel %vm551_vm2, %v572_v3, %v573_v10 }
  0xe8   :  { %14406 = vmatmul.mubr.msk.f32.gmra.mrb[2].mxu0 %vm90_vm1, %v18286_v5  ;;  %26568 = vst [vmem:[#allocation86_spill] sm:$0xff] %v18316_v8  ;;  %v324_v5 = vld [vmem:[#allocation2 + $0xc0] sm:$0xff] }
  0xe9   :  { %14408 = vmatprep.mubr.msk.f32.mxu0 %vm90_vm1, %v18290_v12  ;;  %v18312_v12 = vsel %vm551_vm2, %v568_v14, %v570_v61  ;;  %v580_v14 = vrot.slane %v17912_v60, 7  ;;  %v18328_v61 = vsel %vm551_vm2, %v577_v13, %v578_v30  ;;  %v582_v3 = vrot.slane %v324_v5, 7 }
  0xea   :  { %26567 = vst [vmem:[#allocation85_spill] sm:$0xff] %v18312_v12  ;;  %26570 = vst [vmem:[#allocation88_spill] sm:$0xff] %v18328_v61  ;;  %v588_v5 = vrot.slane %v17936_v1, 7 }
  0xec   :  { %14409 = vmatmul.mubr.msk.f32.gmra.mrb[4].mxu0 %vm90_vm1, %v18300_v11  ;;  %v328_v11 = vld [vmem:[#allocation2 + $0xe0] sm:$0xff] }
  0xed   :  { %14411 = vmatprep.mubr.msk.f32.mxu0 %vm90_vm1, %v18304_v9  ;;  %v18324_v9 = vsel %vm551_vm2, %v573_v10, %v575_v6  ;;  %v585_v10 = vrot.slane %v17934_v0, 7  ;;  %v18340_v6 = vsel %vm551_vm2, %v582_v3, %v583_v22  ;;  %v587_v13 = vrot.slane %v328_v11, 7 }
  0xee   :  { %26569 = vst [vmem:[#allocation87_spill] sm:$0xff] %v18324_v9  ;;  %26572 = vst [vmem:[#allocation90_spill] sm:$0xff] %v18340_v6  ;;  %v593_v11 = vrot.slane %v18003_v58, 7 }
  0xf0   :  { %14412 = vmatmul.mubr.msk.f32.gmra.mrb[6].mxu0 %vm90_vm1, %v18312_v12  ;;  %v332_v12 = vld [vmem:[#allocation2 + $0x100] sm:$0xff] }
  0xf1   :  { %14414 = vmatprep.mubr.msk.f32.mxu0 %vm90_vm1, %v18316_v8  ;;  %v18336_v8 = vsel %vm551_vm2, %v578_v30, %v580_v14  ;;  %v590_v30 = vrot.slane %v17985_v25, 7  ;;  %v18352_v14 = vsel %vm551_vm2, %v587_v13, %v588_v5  ;;  %v592_v3 = vrot.slane %v332_v12, 7 }
  0xf2   :  { %26571 = vst [vmem:[#allocation89_spill] sm:$0xff] %v18336_v8  ;;  %26574 = vst [vmem:[#allocation92_spill] sm:$0xff] %v18352_v14  ;;  %v598_v12 = vrot.slane %v18064_v26, 7 }
  0xf4   :  { %14415 = vmatmul.mubr.msk.f32.gmra.mrb[8].mxu0 %vm90_vm1, %v18324_v9  ;;  %v336_v9 = vld [vmem:[#allocation2 + $0x120] sm:$0xff] }
  0xf5   :  { %14417 = vmatprep.mubr.msk.f32.mxu0 %vm90_vm1, %v18328_v61  ;;  %v18348_v61 = vsel %vm551_vm2, %v583_v22, %v585_v10  ;;  %v595_v22 = vrot.slane %v18058_v59, 7  ;;  %v18364_v10 = vsel %vm551_vm2, %v592_v3, %v593_v11  ;;  %v597_v13 = vrot.slane %v336_v9, 7 }
  0xf6   :  { %26573 = vst [vmem:[#allocation91_spill] sm:$0xff] %v18348_v61  ;;  %26576 = vst [vmem:[#allocation94_spill] sm:$0xff] %v18364_v10  ;;  %v603_v9 = vrot.slane %v18072_v56, 7 }
  0xf8   :  { %14418 = vmatmul.mubr.msk.f32.gmra.mrb[10].mxu0 %vm90_vm1, %v18336_v8  ;;  %v340_v8 = vld [vmem:[#allocation2 + $0x140] sm:$0xff] }
  0xf9   :  { %14420 = vmatprep.mubr.msk.f32.mxu0 %vm90_vm1, %v18340_v6  ;;  %v18360_v6 = vsel %vm551_vm2, %v588_v5, %v590_v30  ;;  %v600_v5 = vrot.slane %v18070_v63, 7  ;;  %v18376_v30 = vsel %vm551_vm2, %v597_v13, %v598_v12  ;;  %v602_v3 = vrot.slane %v340_v8, 7 }
  0xfa   :  { %26575 = vst [vmem:[#allocation93_spill] sm:$0xff] %v18360_v6  ;;  %26578 = vst [vmem:[#allocation96_spill] sm:$0xff] %v18376_v30  ;;  %v608_v8 = vrot.slane %v18080_v55, 7 }
  0xfc   :  { %14421 = vmatmul.mubr.msk.f32.gmra.mrb[12].mxu0 %vm90_vm1, %v18348_v61  ;;  %v344_v61 = vld [vmem:[#allocation2 + $0x160] sm:$0xff] }
  0xfd   :  { %14423 = vmatprep.mubr.msk.f32.mxu0 %vm90_vm1, %v18352_v14  ;;  %v18372_v14 = vsel %vm551_vm2, %v593_v11, %v595_v22  ;;  %v605_v11 = vrot.slane %v18078_v2, 7  ;;  %v18388_v22 = vsel %vm551_vm2, %v602_v3, %v603_v9  ;;  %v607_v13 = vrot.slane %v344_v61, 7 }
  0xfe   :  { %26577 = vst [vmem:[#allocation95_spill] sm:$0xff] %v18372_v14  ;;  %26580 = vst [vmem:[#allocation98_spill] sm:$0xff] %v18388_v22  ;;  %v613_v61 = vrot.slane %v18088_v53, 7 }
 0x100   :  { %14424 = vmatmul.mubr.msk.f32.gmra.mrb[14].mxu0 %vm90_vm1, %v18360_v6  ;;  %v348_v6 = vld [vmem:[#allocation2 + $0x180] sm:$0xff] }
 0x101   :  { %14426 = vmatprep.mubr.msk.f32.mxu0 %vm90_vm1, %v18364_v10  ;;  %v18384_v10 = vsel %vm551_vm2, %v598_v12, %v600_v5  ;;  %v610_v12 = vrot.slane %v18086_v54, 7  ;;  %v18400_v5 = vsel %vm551_vm2, %v607_v13, %v608_v8  ;;  %v612_v3 = vrot.slane %v348_v6, 7 }
 0x102   :  { %26579 = vst [vmem:[#allocation97_spill] sm:$0xff] %v18384_v10  ;;  %26582 = vst [vmem:[#allocation100_spill] sm:$0xff] %v18400_v5  ;;  %v618_v6 = vrot.slane %v18096_v51, 7 }
 0x104   :  { %14427 = vmatmul.mubr.msk.f32.gmra.mrb[16].mxu0 %vm90_vm1, %v18372_v14  ;;  %v352_v14 = vld [vmem:[#allocation2 + $0x1a0] sm:$0xff] }
 0x105   :  { %14429 = vmatprep.mubr.msk.f32.mxu0 %vm90_vm1, %v18376_v30  ;;  %v18396_v30 = vsel %vm551_vm2, %v603_v9, %v605_v11  ;;  %v615_v9 = vrot.slane %v18094_v52, 7  ;;  %v18412_v11 = vsel %vm551_vm2, %v612_v3, %v613_v61  ;;  %v617_v13 = vrot.slane %v352_v14, 7 }
 0x106   :  { %26581 = vst [vmem:[#allocation99_spill] sm:$0xff] %v18396_v30  ;;  %26584 = vst [vmem:[#allocation102_spill] sm:$0xff] %v18412_v11  ;;  %v623_v14 = vrot.slane %v18104_v49, 7 }
 0x108   :  { %14430 = vmatmul.mubr.msk.f32.gmra.mrb[18].mxu0 %vm90_vm1, %v18384_v10  ;;  %v356_v10 = vld [vmem:[#allocation2 + $0x1c0] sm:$0xff] }
 0x109   :  { %14432 = vmatprep.mubr.msk.f32.mxu0 %vm90_vm1, %v18388_v22  ;;  %v18408_v22 = vsel %vm551_vm2, %v608_v8, %v610_v12  ;;  %v620_v8 = vrot.slane %v18102_v50, 7  ;;  %v18424_v12 = vsel %vm551_vm2, %v617_v13, %v618_v6  ;;  %v622_v3 = vrot.slane %v356_v10, 7 }
 0x10a   :  { %26583 = vst [vmem:[#allocation101_spill] sm:$0xff] %v18408_v22  ;;  %26586 = vst [vmem:[#allocation104_spill] sm:$0xff] %v18424_v12  ;;  %v628_v10 = vrot.slane %v18112_v46, 7  ;;  %v26001_v46 = vrot.slane %v18118_v43, 1 }
 0x10c   :  { %14433 = vmatmul.mubr.msk.f32.gmra.mrb[20].mxu0 %vm90_vm1, %v18396_v30  ;;  %v360_v30 = vld [vmem:[#allocation2 + $0x1e0] sm:$0xff] }
 0x10d   :  { %14435 = vmatprep.mubr.msk.f32.mxu0 %vm90_vm1, %v18400_v5  ;;  %v18420_v5 = vsel %vm551_vm2, %v613_v61, %v615_v9  ;;  %v625_v61 = vrot.slane %v18110_v48, 7  ;;  %v18436_v9 = vsel %vm551_vm2, %v622_v3, %v623_v14  ;;  %v627_v13 = vrot.slane %v360_v30, 7 }
 0x10e   :  { %26585 = vst [vmem:[#allocation103_spill] sm:$0xff] %v18420_v5  ;;  %26588 = vst [vmem:[#allocation106_spill] sm:$0xff] %v18436_v9  ;;  %v1858_v30 = vrot.slane %v18116_v45, 1 }
 0x110   :  { %14436 = vmatmul.mubr.msk.f32.gmra.mrb[22].mxu0 %vm90_vm1, %v18408_v22  ;;  %v372_v22 = vld [vmem:[#allocation2 + $0x240] sm:$0xff] }
 0x111   :  { %14438 = vmatprep.mubr.msk.f32.mxu0 %vm90_vm1, %v18412_v11  ;;  %v18432_v11 = vsel %vm551_vm2, %v618_v6, %v620_v8  ;;  %v630_v6 = vrot.slane %v18122_v42, 7  ;;  %v18448_v8 = vsel %vm551_vm2, %v627_v13, %v628_v10  ;;  %v632_v3 = vrot.slane %v372_v22, 7 }
 0x112   :  { %26587 = vst [vmem:[#allocation105_spill] sm:$0xff] %v18432_v11  ;;  %26590 = vst [vmem:[#allocation108_spill] sm:$0xff] %v18448_v8  ;;  %v638_v22 = vrot.slane %v18135_v37, 7 }
 0x114   :  { %14439 = vmatmul.mubr.msk.f32.gmra.mrb[24].mxu0 %vm90_vm1, %v18420_v5  ;;  %v376_v5 = vld [vmem:[#allocation2 + $0x260] sm:$0xff] }
 0x115   :  { %14441 = vmatprep.mubr.msk.f32.mxu0 %vm90_vm1, %v18424_v12  ;;  %v18444_v12 = vsel %vm551_vm2, %v623_v14, %v625_v61  ;;  %v18457_v14 = vsel %vm551_vm2, %v628_v10, %v630_v6  ;;  %v26592_v61 = vrot.slane %v18116_v45, 7  ;;  %v640_v10 = vrot.slane %v18141_v36, 7 }
 0x116   :  { %26589 = vst [vmem:[#allocation107_spill] sm:$0xff] %v18444_v12  ;;  %26591 = vst [vmem:[#allocation109_spill] sm:$0xff] %v18457_v14 }
 0x117   :  { %v634_v13 = vsel %vm551_vm2, %v632_v3, %v26592_v61  ;;  %v384_v3 = vld [vmem:[#allocation2 + $0x2a0] sm:$0xff]  ;;  %v645_v61 = vrot.slane %v18149_v39, 7 }
 0x118   :  { %14442 = vmatmul.mubr.msk.f32.gmra.mrb[26].mxu0 %vm90_vm1, %v18432_v11  ;;  %v380_v11 = vld [vmem:[#allocation2 + $0x280] sm:$0xff] }
 0x119   :  { %14444 = vmatprep.mubr.msk.f32.mxu0 %vm90_vm1, %v18436_v9  ;;  %v637_v9 = vrot.slane %v376_v5, 7  ;;  %v642_v6 = vrot.slane %v380_v11, 7  ;;  %v643_v5 = vrot.slane %v18143_v35, 7  ;;  %v648_v11 = vrot.slane %v18151_v40, 7 }
 0x11b   :  { %v18473_v45 = vsel %vm551_vm2, %v637_v9, %v638_v22  ;;  %v647_v9 = vrot.slane %v384_v3, 7  ;;  %v653_v3 = vrot.slane %v18159_v28, 7 }
 0x11c   :  { %14445 = vmatmul.mubr.msk.f32.gmra.mrb[28].mxu0 %vm90_vm1, %v18444_v12  ;;  %v18468_v12 = vsel %vm1777_vm3, %v1858_v30, %v26001_v46  ;;  %26593 = vst [vmem:[#allocation110_spill] sm:$0xff] %v18473_v45  ;;  %v18481_v30 = vsel %vm551_vm2, %v638_v22, %v640_v10  ;;  %v388_v46 = vld [vmem:[#allocation2 + $0x2c0] sm:$0xff]  ;;  %v650_v22 = vrot.slane %v18157_v34, 7 }
 0x11d   :  { %14447 = vmatprep.mubr.msk.f32.mxu0 %vm90_vm1, %v18448_v8  ;;  %26594 = vst [vmem:[#allocation111_spill] sm:$0xff] %v18481_v30  ;;  %v18497_v10 = vsel %vm551_vm2, %v647_v9, %v648_v11  ;;  %v412_v8 = vld [vmem:[#allocation2 + $0x380] sm:$0xff] }
 0x11e   :  { %26597 = vst [vmem:[#allocation114_spill] sm:$0xff] %v18497_v10 }
 0x120   :  { %14448 = vmatmul.mubr.msk.f32.gmra.mrb[30].mxu0 %vm90_vm1, %v18457_v14  ;;  %v26609_v14 = vld [vmem:[#allocation67_spill] sm:$0xff] }
 0x121   :  { %14450 = vmatprep.mubr.msk.f32.mxu0 %vm90_vm1, %v634_v13  ;;  %v18485_v13 = vsel %vm551_vm2, %v642_v6, %v643_v5  ;;  %v652_v6 = vrot.slane %v388_v46, 7  ;;  %v658_v46 = vrot.slane %v18167_v21, 7 }
 0x122   :  { %26595 = vst [vmem:[#allocation112_spill] sm:$0xff] %v18485_v13 }
 0x124   :  { %14451 = vmatmul.mubr.msk.f32.gmra.mrb[32].mxu0 %vm90_vm1, %v18133_v38  ;;  %v18493_v38 = vsel %vm551_vm2, %v643_v5, %v645_v61  ;;  %v655_v5 = vrot.slane %v18165_v24, 7  ;;  %v18509_v61 = vsel %vm551_vm2, %v652_v6, %v653_v3 }
 0x125   :  { %14453 = vmatprep.mubr.msk.f32.mxu0 %vm90_vm1, %v18473_v45  ;;  %26596 = vst [vmem:[#allocation113_spill] sm:$0xff] %v18493_v38  ;;  %v392_v45 = vld [vmem:[#allocation2 + $0x2e0] sm:$0xff]  ;;  %26599 = vst [vmem:[#allocation116_spill] sm:$0xff] %v18509_v61 }
 0x126   :  { %v657_v9 = vrot.slane %v392_v45, 7  ;;  %v663_v45 = vrot.slane %v18175_v19, 7 }
 0x128   :  { %14454 = vmatmul.mubr.msk.f32.gmra.mrb[34].mxu0 %vm90_vm1, %v18481_v30  ;;  %v396_v30 = vld [vmem:[#allocation2 + $0x300] sm:$0xff] }
 0x129   :  { %14456 = vmatprep.mubr.msk.f32.mxu0 %vm90_vm1, %v18485_v13  ;;  %v18505_v13 = vsel %vm551_vm2, %v648_v11, %v650_v22  ;;  %v660_v11 = vrot.slane %v18173_v20, 7  ;;  %v18521_v22 = vsel %vm551_vm2, %v657_v9, %v658_v46  ;;  %v662_v6 = vrot.slane %v396_v30, 7 }
 0x12a   :  { %26598 = vst [vmem:[#allocation115_spill] sm:$0xff] %v18505_v13  ;;  %26601 = vst [vmem:[#allocation118_spill] sm:$0xff] %v18521_v22  ;;  %v668_v30 = vrot.slane %v18183_v17, 7 }
 0x12c   :  { %14457 = vmatmul.mubr.msk.f32.gmra.mrb[36].mxu0 %vm90_vm1, %v18493_v38  ;;  %v400_v38 = vld [vmem:[#allocation2 + $0x320] sm:$0xff] }
 0x12d   :  { %14459 = vmatprep.mubr.msk.f32.mxu0 %vm90_vm1, %v18497_v10  ;;  %v18517_v10 = vsel %vm551_vm2, %v653_v3, %v655_v5  ;;  %v665_v3 = vrot.slane %v18181_v18, 7  ;;  %v18533_v5 = vsel %vm551_vm2, %v662_v6, %v663_v45  ;;  %v667_v9 = vrot.slane %v400_v38, 7 }
 0x12e   :  { %26600 = vst [vmem:[#allocation117_spill] sm:$0xff] %v18517_v10  ;;  %26603 = vst [vmem:[#allocation120_spill] sm:$0xff] %v18533_v5  ;;  %v673_v38 = vrot.slane %v18191_v15, 7  ;;  %v416_v15 = vld [vmem:[#allocation2 + $0x3a0] sm:$0xff] }
 0x130   :  { %14460 = vmatmul.mubr.msk.f32.gmra.mrb[38].mxu0 %vm90_vm1, %v18505_v13  ;;  %v404_v13 = vld [vmem:[#allocation2 + $0x340] sm:$0xff] }
 0x131   :  { %14462 = vmatprep.mubr.msk.f32.mxu0 %vm90_vm1, %v18509_v61  ;;  %v18529_v61 = vsel %vm551_vm2, %v658_v46, %v660_v11  ;;  %v670_v46 = vrot.slane %v18189_v16, 7  ;;  %v18545_v11 = vsel %vm551_vm2, %v667_v9, %v668_v30  ;;  %v672_v6 = vrot.slane %v404_v13, 7 }
 0x132   :  { %26602 = vst [vmem:[#allocation119_spill] sm:$0xff] %v18529_v61  ;;  %26605 = vst [vmem:[#allocation122_spill] sm:$0xff] %v18545_v11  ;;  %v678_v13 = vrot.slane %v26609_v14, 7  ;;  %v420_v14 = vld [vmem:[#allocation2 + $0x3c0] sm:$0xff] }
 0x134   :  { %14463 = vmatmul.mubr.msk.f32.gmra.mrb[40].mxu0 %vm90_vm1, %v18517_v10  ;;  %v408_v10 = vld [vmem:[#allocation2 + $0x360] sm:$0xff] }
 0x135   :  { %14465 = vmatprep.mubr.msk.f32.mxu0 %vm90_vm1, %v18521_v22  ;;  %v18541_v22 = vsel %vm551_vm2, %v663_v45, %v665_v3  ;;  %v26607_v45 = vld [vmem:[#allocation66_spill] sm:$0xff]  ;;  %v677_v9 = vrot.slane %v408_v10, 7 }
 0x136   :  { %26604 = vst [vmem:[#allocation121_spill] sm:$0xff] %v18541_v22  ;;  %v675_v3 = vrot.slane %v26607_v45, 7  ;;  %v26613_v45 = vld [vmem:[#allocation69_spill] sm:$0xff] }
 0x137   :  { %v683_v10 = vrot.slane %v26613_v45, 7  ;;  %v424_v45 = vld [vmem:[#allocation2 + $0x3e0] sm:$0xff] }
 0x138   :  { %14466 = vmatmul.mubr.msk.f32.gmra.mrb[42].mxu0 %vm90_vm1, %v18529_v61  ;;  %v18557_v61 = vsel %vm551_vm2, %v672_v6, %v673_v38  ;;  %v682_v6 = vrot.slane %v412_v8, 7 }
 0x139   :  { %14468 = vmatprep.mubr.msk.f32.mxu0 %vm90_vm1, %v18533_v5  ;;  %v18553_v5 = vsel %vm551_vm2, %v668_v30, %v670_v46  ;;  %26608 = vst [vmem:[#allocation124_spill] sm:$0xff] %v18557_v61  ;;  %v26611_v30 = vld [vmem:[#allocation68_spill] sm:$0xff] }
 0x13a   :  { %26606 = vst [vmem:[#allocation123_spill] sm:$0xff] %v18553_v5  ;;  %v680_v46 = vrot.slane %v26611_v30, 7  ;;  %v26617_v30 = vld [vmem:[#allocation71_spill] sm:$0xff] }
 0x13b   :  { %v688_v8 = vrot.slane %v26617_v30, 7  ;;  %v428_v30 = vld [vmem:[#allocation2 + $0x400] sm:$0xff] }
 0x13c   :  { %14469 = vmatmul.mubr.msk.f32.gmra.mrb[44].mxu0 %vm90_vm1, %v18541_v22  ;;  %v18569_v22 = vsel %vm551_vm2, %v677_v9, %v678_v13  ;;  %v687_v9 = vrot.slane %v416_v15, 7 }
 0x13d   :  { %14471 = vmatprep.mubr.msk.f32.mxu0 %vm90_vm1, %v18545_v11  ;;  %v18565_v11 = vsel %vm551_vm2, %v673_v38, %v675_v3  ;;  %26612 = vst [vmem:[#allocation126_spill] sm:$0xff] %v18569_v22  ;;  %v26615_v38 = vld [vmem:[#allocation70_spill] sm:$0xff] }
 0x13e   :  { %26610 = vst [vmem:[#allocation125_spill] sm:$0xff] %v18565_v11  ;;  %v685_v3 = vrot.slane %v26615_v38, 7  ;;  %v26621_v38 = vld [vmem:[#allocation73_spill] sm:$0xff] }
 0x13f   :  { %v693_v15 = vrot.slane %v26621_v38, 7  ;;  %v432_v38 = vld [vmem:[#allocation2 + $0x420] sm:$0xff] }
 0x140   :  { %14472 = vmatmul.mubr.msk.f32.gmra.mrb[46].mxu0 %vm90_vm1, %v18553_v5  ;;  %v18581_v5 = vsel %vm551_vm2, %v682_v6, %v683_v10  ;;  %v692_v6 = vrot.slane %v420_v14, 7 }
 0x141   :  { %14474 = vmatprep.mubr.msk.f32.mxu0 %vm90_vm1, %v18557_v61  ;;  %v18577_v61 = vsel %vm551_vm2, %v678_v13, %v680_v46  ;;  %26616 = vst [vmem:[#allocation128_spill] sm:$0xff] %v18581_v5  ;;  %v26619_v13 = vld [vmem:[#allocation72_spill] sm:$0xff] }
 0x142   :  { %26614 = vst [vmem:[#allocation127_spill] sm:$0xff] %v18577_v61  ;;  %v690_v46 = vrot.slane %v26619_v13, 7  ;;  %v26625_v13 = vld [vmem:[#allocation75_spill] sm:$0xff] }
 0x143   :  { %v698_v14 = vrot.slane %v26625_v13, 7 }
 0x144   :  { %14475 = vmatmul.mubr.msk.f32.gmra.mrb[48].mxu0 %vm90_vm1, %v18565_v11  ;;  %v18593_v11 = vsel %vm551_vm2, %v687_v9, %v688_v8  ;;  %v697_v9 = vrot.slane %v424_v45, 7 }
 0x145   :  { %14477 = vmatprep.mubr.msk.f32.mxu0 %vm90_vm1, %v18569_v22  ;;  %v18589_v22 = vsel %vm551_vm2, %v683_v10, %v685_v3  ;;  %26620 = vst [vmem:[#allocation130_spill] sm:$0xff] %v18593_v11  ;;  %v26623_v10 = vld [vmem:[#allocation74_spill] sm:$0xff] }
 0x146   :  { %26618 = vst [vmem:[#allocation129_spill] sm:$0xff] %v18589_v22  ;;  %v695_v3 = vrot.slane %v26623_v10, 7  ;;  %v26629_v10 = vld [vmem:[#allocation77_spill] sm:$0xff] }
 0x147   :  { %v703_v45 = vrot.slane %v26629_v10, 7 }
 0x148   :  { %14478 = vmatmul.mubr.msk.f32.gmra.mrb[50].mxu0 %vm90_vm1, %v18577_v61  ;;  %v18605_v61 = vsel %vm551_vm2, %v692_v6, %v693_v15  ;;  %v702_v6 = vrot.slane %v428_v30, 7 }
 0x149   :  { %14480 = vmatprep.mubr.msk.f32.mxu0 %vm90_vm1, %v18581_v5  ;;  %v18601_v5 = vsel %vm551_vm2, %v688_v8, %v690_v46  ;;  %26624 = vst [vmem:[#allocation132_spill] sm:$0xff] %v18605_v61  ;;  %v26627_v8 = vld [vmem:[#allocation76_spill] sm:$0xff] }
 0x14a   :  { %26622 = vst [vmem:[#allocation131_spill] sm:$0xff] %v18601_v5  ;;  %v700_v46 = vrot.slane %v26627_v8, 7  ;;  %v26632_v8 = vld [vmem:[#allocation79_spill] sm:$0xff] }
 0x14b   :  { %v708_v30 = vrot.slane %v26632_v8, 7 }
 0x14c   :  { %14481 = vmatmul.mubr.msk.f32.gmra.mrb[52].mxu0 %vm90_vm1, %v18589_v22  ;;  %v18617_v22 = vsel %vm551_vm2, %v697_v9, %v698_v14  ;;  %v707_v9 = vrot.slane %v432_v38, 7 }
 0x14d   :  { %14483 = vmatprep.mubr.msk.f32.mxu0 %vm90_vm1, %v18593_v11  ;;  %v18613_v11 = vsel %vm551_vm2, %v693_v15, %v695_v3  ;;  %26628 = vst [vmem:[#allocation133_spill] sm:$0xff] %v18617_v22  ;;  %v26630_v15 = vld [vmem:[#allocation78_spill] sm:$0xff] }
 0x14e   :  { %26626 = vst [vmem:[#allocation75_spill] sm:$0xff] %v18613_v11  ;;  %v705_v3 = vrot.slane %v26630_v15, 7 }
 0x150   :  { %14484 = vmatmul.mubr.msk.f32.gmra.mrb[54].mxu0 %vm90_vm1, %v18601_v5  ;;  %v18629_v5 = vsel %vm551_vm2, %v702_v6, %v703_v45  ;;  %v26635_v6 = vld [vmem:[#allocation23_spill] sm:$0xff] }
 0x151   :  { %14486 = vmatprep.mubr.msk.f32.mxu0 %vm90_vm1, %v18605_v61  ;;  %v18625_v61 = vsel %vm551_vm2, %v698_v14, %v700_v46  ;;  %26631 = vst [vmem:[#allocation77_spill] sm:$0xff] %v18629_v5  ;;  %v710_v14 = vrot.slane %v18255_v4, 7  ;;  %v18641_v46 = vsel %vm551_vm2, %v707_v9, %v708_v30  ;;  %v26636_v9 = vrot.slane %v17688_v23, 1 }
 0x152   :  { %26634 = vst [vmem:[#allocation79_spill] sm:$0xff] %v18641_v46 }
 0x153   :  { %v18648_v38 = vsel %vm551_vm2, %v708_v30, %v710_v14  ;;  %v1789_v14 = vrot.slane %v17734_v32, 1  ;;  %v1793_v32 = vrot.slane %v17736_v33, 1  ;;  %v1798_v33 = vrot.slane %v17803_v44, 1 }
 0x154   :  { %14487 = vmatmul.mubr.msk.f32.gmra.mrb[56].mxu0 %vm90_vm1, %v18613_v11  ;;  %v18637_v11 = vsel %vm551_vm2, %v703_v45, %v705_v3  ;;  %v1784_v45 = vrot.slane %v17721_v29, 1  ;;  %v307_v3 = vld [vmem:[#allocation2 + $0x38] sm:$0xff]  ;;  %v1804_v44 = vrot.slane %v17912_v60, 1 }
 0x155   :  { %14489 = vmatprep.mubr.msk.f32.mxu0 %vm90_vm1, %v18617_v22  ;;  %26633 = vst [vmem:[#allocation78_spill] sm:$0xff] %v18637_v11  ;;  %v303_v22 = vld [vmem:[#allocation2 + $0x18] sm:$0xff] }
 0x156   :  { %v1781_v8 = vrot.slane %v303_v22, 1  ;;  %v1788_v22 = vrot.slane %v17728_v31, 1  ;;  %v311_v29 = vld [vmem:[#allocation2 + $0x58] sm:$0xff] }
 0x157   :  { %v1791_v23 = vrot.slane %v311_v29, 1  ;;  %v323_v29 = vld [vmem:[#allocation2 + $0xb8] sm:$0xff] }
 0x158   :  { %14490 = vmatmul.mubr.msk.f32.gmra.mrb[58].mxu0 %vm90_vm1, %v18625_v61  ;;  %v18678_v31 = vsel %vm1777_vm3, %v1788_v22, %v1789_v14 }
 0x159   :  { %14492 = vmatprep.mubr.msk.f32.mxu0 %vm90_vm1, %v18629_v5  ;;  %v1783_v5 = vrot.slane %v26635_v6, 1  ;;  %v18667_v6 = vld [vmem:[%s25848_s1 + $0x10] sm:$0xf] }
 0x15b   :  { %v18660_v30 = vsel %vm1777_vm3, %v1783_v5, %v1784_v45  ;;  %v1794_v5 = vrot.slane %v17785_v41, 1  ;;  %v1799_v41 = vrot.slane %v17819_v47, 1 }
 0x15c   :  { %14493 = vmatmul.mubr.msk.f32.gmra.mrb[60].mxu0 %vm90_vm1, %v18637_v11  ;;  %v1782_v11 = vsel %vm1777_vm3, %v26636_v9, %v1781_v8  ;;  %v315_v8 = vld [vmem:[#allocation2 + $0x78] sm:$0xff] }
 0x15d   :  { %14495 = vmatprep.mubr.msk.f32.mxu0 %vm90_vm1, %v18641_v46  ;;  %v1786_v46 = vrot.slane %v307_v3, 1  ;;  %v18704_v22 = vsel %vm1777_vm3, %v1798_v33, %v1799_v41 }
 0x160   :  { %14496 = vmatmul.mubr.msk.f32.gmra.mrb[62].mxu0 %vm90_vm1, %v18648_v38 }
 0x161   :  { %14500 = vmatprep.mubr.msk.f32.mxu0 %vm90_vm1, %v18268_v7  ;;  %v18675_v7 = vsel %vm1777_vm3, %v1784_v45, %v1786_v46  ;;  %v18692_v46 = vsel %vm1777_vm3, %v1793_v32, %v1794_v5  ;;  %v319_v45 = vld [vmem:[#allocation2 + $0x98] sm:$0xff] }
 0x162   :  { %v1801_v9 = vrot.slane %v319_v45, 1  ;;  %v331_v45 = vld [vmem:[#allocation2 + $0xf8] sm:$0xff] }
 0x164   :  { %14501 = vmatmul.mubr.msk.f32.vlgmr.msra.gmra.mrb[0].mxu0 %vm90_vm1, %v1782_v11  ;;  %v1796_v11 = vrot.slane %v315_v8, 1  ;;  %v18713_v47 = vsel %vm1777_vm3, %v1799_v41, %v1801_v9  ;;  %v327_v8 = vld [vmem:[#allocation2 + $0xd8] sm:$0xff]  ;;  %v1813_v41 = vrot.slane %v17936_v1, 1  ;;  %v1816_v9 = vrot.slane %v331_v45, 1 }
 0x165   :  { %14597 = vmatpush3.msk.msra.mxu0 %vm840_vm0, %v18277_v27  ;;  %14503 = vmatprep.mubr.msk.f32.mxu0 %vm90_vm1, %v18660_v30  ;;  %v18689_v27 = vsel %vm1777_vm3, %v1789_v14, %v1791_v23  ;;  %v1803_v14 = vrot.slane %v17886_v57, 1  ;;  %v1806_v23 = vrot.slane %v323_v29, 1  ;;  %v1809_v57 = vrot.slane %v17934_v0, 1  ;;  %v335_v29 = vld [vmem:[#allocation2 + $0x118] sm:$0xff] }
 0x166   :  { %14694 = vmatprep.subr.msk.mxu0 %vm840_vm0, %v18667_v6  ;;  %v18701_v3 = vsel %vm1777_vm3, %v1794_v5, %v1796_v11  ;;  %v1808_v5 = vrot.slane %v17919_v62, 1  ;;  %v1811_v11 = vrot.slane %v327_v8, 1  ;;  %v1814_v62 = vrot.slane %v17985_v25, 1  ;;  %v339_v8 = vld [vmem:[#allocation2 + $0x138] sm:$0xff] }
 0x167   :  { %v18716_v32 = vsel %vm1777_vm3, %v1803_v14, %v1804_v44  ;;  %v18725_v60 = vsel %vm1777_vm3, %v1804_v44, %v1806_v23  ;;  %v1818_v44 = vrot.slane %v18003_v58, 1  ;;  %v1819_v1 = vrot.slane %v18058_v59, 1  ;;  %v343_v45 = vld [vmem:[#allocation2 + $0x158] sm:$0xff] }
 0x168   :  { %14504 = vmatmul.mubr.msk.f32.gmra.mrb[2].mxu0 %vm90_vm1, %v18675_v7  ;;  %v18728_v33 = vsel %vm1777_vm3, %v1808_v5, %v1809_v57  ;;  %v18737_v0 = vsel %vm1777_vm3, %v1809_v57, %v1811_v11  ;;  %v18740_v14 = vsel %vm1777_vm3, %v1813_v41, %v1814_v62  ;;  %v18749_v25 = vsel %vm1777_vm3, %v1814_v62, %v1816_v9 }
 0x169   :  { %14506 = vmatprep.mubr.msk.f32.mxu0 %vm90_vm1, %v18678_v31  ;;  %v1821_v23 = vrot.slane %v335_v29, 1  ;;  %v18752_v5 = vsel %vm1777_vm3, %v1818_v44, %v1819_v1  ;;  %v1823_v57 = vrot.slane %v18064_v26, 1  ;;  %v1824_v58 = vrot.slane %v18070_v63, 1  ;;  %v347_v29 = vld [vmem:[#allocation2 + $0x178] sm:$0xff] }
 0x16a   :  { %v1826_v11 = vrot.slane %v339_v8, 1  ;;  %v1828_v62 = vrot.slane %v18072_v56, 1  ;;  %v1829_v26 = vrot.slane %v18078_v2, 1  ;;  %v1831_v9 = vrot.slane %v343_v45, 1  ;;  %v351_v8 = vld [vmem:[#allocation2 + $0x198] sm:$0xff] }
 0x16b   :  { %v18761_v59 = vsel %vm1777_vm3, %v1819_v1, %v1821_v23  ;;  %v18764_v41 = vsel %vm1777_vm3, %v1823_v57, %v1824_v58  ;;  %v1833_v1 = vrot.slane %v18080_v55, 1  ;;  %v1834_v56 = vrot.slane %v18086_v54, 1  ;;  %v355_v45 = vld [vmem:[#allocation2 + $0x1b8] sm:$0xff] }
 0x16c   :  { %14507 = vmatmul.mubr.msk.f32.gmra.mrb[4].mxu0 %vm90_vm1, %v18689_v27  ;;  %v18773_v63 = vsel %vm1777_vm3, %v1824_v58, %v1826_v11  ;;  %v18776_v44 = vsel %vm1777_vm3, %v1828_v62, %v1829_v26  ;;  %v18785_v2 = vsel %vm1777_vm3, %v1829_v26, %v1831_v9  ;;  %v1836_v23 = vrot.slane %v347_v29, 1  ;;  %v359_v29 = vld [vmem:[#allocation2 + $0x1d8] sm:$0xff] }
 0x16d   :  { %14509 = vmatprep.mubr.msk.f32.mxu0 %vm90_vm1, %v18692_v46  ;;  %v18788_v57 = vsel %vm1777_vm3, %v1833_v1, %v1834_v56  ;;  %v1838_v58 = vrot.slane %v18088_v53, 1  ;;  %v1839_v55 = vrot.slane %v18094_v52, 1  ;;  %v1841_v11 = vrot.slane %v351_v8, 1 }
 0x16e   :  { %v18797_v54 = vsel %vm1777_vm3, %v1834_v56, %v1836_v23  ;;  %v1843_v26 = vrot.slane %v18096_v51, 1  ;;  %v1844_v53 = vrot.slane %v18102_v50, 1  ;;  %v1846_v9 = vrot.slane %v355_v45, 1  ;;  %v18819_v50 = vld [vmem:[%s25849_s0 + $0xf0] sm:$0xff]  ;;  %v18828_v23 = vld [vmem:[%s25849_s0 + $0xf8] sm:$0xff] }
 0x16f   :  { %v18800_v62 = vsel %vm1777_vm3, %v1838_v58, %v1839_v55  ;;  %v18809_v52 = vsel %vm1777_vm3, %v1839_v55, %v1841_v11  ;;  %v1848_v56 = vrot.slane %v18104_v49, 1  ;;  %v1849_v51 = vrot.slane %v18110_v48, 1  ;;  %26639 = vst [vmem:[#allocation135_spill] sm:$0xff] %v18819_v50  ;;  %266 = vst.msk [vmem:[#allocation2 + $0x208] sm:$0xff] %vm90_vm1, %v18819_v50  ;;  %v26642_v55 = vld [vmem:[#allocation64_spill] sm:$0xff]  ;;  %v411_v50 = vld [vmem:[#allocation2 + $0x378] sm:$0xff] }
 0x170   :  { %14510 = vmatmul.mubr.msk.f32.gmra.mrb[6].mxu0 %vm90_vm1, %v18701_v3  ;;  %26637 = vst [vmem:[#allocation23_spill] sm:$0xff] %v18809_v52  ;;  %v18812_v1 = vsel %vm1777_vm3, %v1843_v26, %v1844_v53  ;;  %26640 = vst [vmem:[#allocation136_spill] sm:$0xff] %v18828_v23  ;;  %v18833_v48 = vsel %vm1777_vm3, %v1844_v53, %v1846_v9  ;;  %v1851_v49 = vrot.slane %v359_v29, 1  ;;  %v1853_v8 = vrot.slane %v26642_v55, 1  ;;  %v363_v26 = vld [vmem:[#allocation2 + $0x1f8] sm:$0xff] }
 0x171   :  { %14512 = vmatprep.mubr.msk.f32.mxu0 %vm90_vm1, %v18704_v22  ;;  %26638 = vst [vmem:[#allocation134_spill] sm:$0xff] %v18812_v1  ;;  %267 = vst.msk [vmem:[#allocation2 + $0x210] sm:$0xff] %vm90_vm1, %v18828_v23  ;;  %v18838_v58 = vsel %vm1777_vm3, %v1848_v56, %v1849_v51  ;;  %v1854_v11 = vrot.slane %v18122_v42, 1  ;;  %v1856_v45 = vrot.slane %v363_v26, 1  ;;  %v375_v56 = vld [vmem:[#allocation2 + $0x258] sm:$0xff]  ;;  %v1863_v55 = vrot.slane %v18135_v37, 1 }
 0x172   :  { %26641 = vst [vmem:[#allocation137_spill] sm:$0xff] %v18838_v58  ;;  %v18847_v53 = vsel %vm1777_vm3, %v1849_v51, %v1851_v49  ;;  %v1861_v29 = vrot.slane %v375_v56, 1  ;;  %v1864_v51 = vrot.slane %v18141_v36, 1  ;;  %v379_v49 = vld [vmem:[#allocation2 + $0x278] sm:$0xff]  ;;  %v1869_v37 = vrot.slane %v18149_v39, 1 }
 0x173   :  { %v18850_v9 = vsel %vm1777_vm3, %v1853_v8, %v1854_v11  ;;  %v18857_v42 = vsel %vm1777_vm3, %v1854_v11, %v1856_v45  ;;  %v26643_v8 = vrot.slane %v18118_v43, 1  ;;  %v1866_v23 = vrot.slane %v379_v49, 1  ;;  %v383_v36 = vld [vmem:[#allocation2 + $0x298] sm:$0xff] }
 0x174   :  { %14513 = vmatmul.mubr.msk.f32.gmra.mrb[8].mxu0 %vm90_vm1, %v18713_v47  ;;  %v18869_v11 = vsel %vm1777_vm3, %v1863_v55, %v1864_v51  ;;  %v1868_v45 = vrot.slane %v18143_v35, 1  ;;  %v1871_v43 = vrot.slane %v383_v36, 1  ;;  %v1874_v55 = vrot.slane %v18157_v34, 1  ;;  %v387_v35 = vld [vmem:[#allocation2 + $0x2b8] sm:$0xff] }
 0x175   :  { %14515 = vmatprep.mubr.msk.f32.mxu0 %vm90_vm1, %v18716_v32  ;;  %v1862_v26 = vsel %vm1777_vm3, %v26643_v8, %v1861_v29  ;;  %v1873_v29 = vrot.slane %v18151_v40, 1  ;;  %v1878_v49 = vrot.slane %v18159_v28, 1  ;;  %v1879_v40 = vrot.slane %v18165_v24, 1  ;;  %v391_v8 = vld [vmem:[#allocation2 + $0x2d8] sm:$0xff] }
 0x176   :  { %v18880_v56 = vsel %vm1777_vm3, %v1868_v45, %v1869_v37  ;;  %v18889_v39 = vsel %vm1777_vm3, %v1869_v37, %v1871_v43  ;;  %v1883_v37 = vrot.slane %v18167_v21, 1  ;;  %v1884_v28 = vrot.slane %v18173_v20, 1  ;;  %v395_v36 = vld [vmem:[#allocation2 + $0x2f8] sm:$0xff] }
 0x177   :  { %v18904_v45 = vsel %vm1777_vm3, %v1878_v49, %v1879_v40  ;;  %v1886_v43 = vrot.slane %v395_v36, 1  ;;  %v1889_v21 = vrot.slane %v18181_v18, 1 }
 0x178   :  { %14516 = vmatmul.mubr.msk.f32.gmra.mrb[10].mxu0 %vm90_vm1, %v18725_v60 }
 0x179   :  { %14518 = vmatprep.mubr.msk.f32.mxu0 %vm90_vm1, %v18728_v33  ;;  %v18925_v20 = vsel %vm1777_vm3, %v1884_v28, %v1886_v43  ;;  %v26648_v43 = vld [vmem:[#allocation66_spill] sm:$0xff] }
 0x17c   :  { %14519 = vmatmul.mubr.msk.f32.gmra.mrb[12].mxu0 %vm90_vm1, %v18737_v0 }
 0x17d   :  { %14521 = vmatprep.mubr.msk.f32.mxu0 %vm90_vm1, %v18740_v14 }
 0x180   :  { %14522 = vmatmul.mubr.msk.f32.gmra.mrb[14].mxu0 %vm90_vm1, %v18749_v25 }
 0x181   :  { %14524 = vmatprep.mubr.msk.f32.mxu0 %vm90_vm1, %v18752_v5 }
 0x184   :  { %14525 = vmatmul.mubr.msk.f32.gmra.mrb[16].mxu0 %vm90_vm1, %v18761_v59 }
 0x185   :  { %14527 = vmatprep.mubr.msk.f32.mxu0 %vm90_vm1, %v18764_v41 }
 0x188   :  { %14528 = vmatmul.mubr.msk.f32.gmra.mrb[18].mxu0 %vm90_vm1, %v18773_v63 }
 0x189   :  { %14530 = vmatprep.mubr.msk.f32.mxu0 %vm90_vm1, %v18776_v44 }
 0x18c   :  { %14531 = vmatmul.mubr.msk.f32.gmra.mrb[20].mxu0 %vm90_vm1, %v18785_v2 }
 0x18d   :  { %14533 = vmatprep.mubr.msk.f32.mxu0 %vm90_vm1, %v18788_v57 }
 0x190   :  { %14534 = vmatmul.mubr.msk.f32.gmra.mrb[22].mxu0 %vm90_vm1, %v18797_v54 }
 0x191   :  { %14536 = vmatprep.mubr.msk.f32.mxu0 %vm90_vm1, %v18800_v62 }
 0x194   :  { %14537 = vmatmul.mubr.msk.f32.gmra.mrb[24].mxu0 %vm90_vm1, %v18809_v52 }
 0x195   :  { %14539 = vmatprep.mubr.msk.f32.mxu0 %vm90_vm1, %v18812_v1 }
 0x198   :  { %14540 = vmatmul.mubr.msk.f32.gmra.mrb[26].mxu0 %vm90_vm1, %v18833_v48 }
 0x199   :  { %14542 = vmatprep.mubr.msk.f32.mxu0 %vm90_vm1, %v18838_v58 }
 0x19c   :  { %14543 = vmatmul.mubr.msk.f32.gmra.mrb[28].mxu0 %vm90_vm1, %v18847_v53 }
 0x19d   :  { %14545 = vmatprep.mubr.msk.f32.mxu0 %vm90_vm1, %v18850_v9 }
 0x1a0   :  { %14546 = vmatmul.mubr.msk.f32.gmra.mrb[30].mxu0 %vm90_vm1, %v18857_v42 }
 0x1a1   :  { %14548 = vmatprep.mubr.msk.f32.mxu0 %vm90_vm1, %v18468_v12  ;;  %v18877_v12 = vsel %vm1777_vm3, %v1864_v51, %v1866_v23  ;;  %v1876_v23 = vrot.slane %v387_v35, 1  ;;  %v18892_v51 = vsel %vm1777_vm3, %v1873_v29, %v1874_v55  ;;  %v18916_v29 = vsel %vm1777_vm3, %v1883_v37, %v1884_v28  ;;  %v399_v35 = vld [vmem:[#allocation2 + $0x318] sm:$0xff]  ;;  %v26647_v28 = vld [vmem:[#allocation65_spill] sm:$0xff] }
 0x1a2   :  { %v1898_v36 = vrot.slane %v26647_v28, 1 }
 0x1a3   :  { %v18901_v34 = vsel %vm1777_vm3, %v1874_v55, %v1876_v23  ;;  %v1888_v55 = vrot.slane %v18175_v19, 1  ;;  %v1891_v23 = vrot.slane %v399_v35, 1  ;;  %v1894_v19 = vrot.slane %v18189_v16, 1 }
 0x1a4   :  { %14549 = vmatmul.mubr.msk.f32.gmra.mrb[32].mxu0 %vm90_vm1, %v1862_v26  ;;  %v1881_v26 = vrot.slane %v391_v8, 1  ;;  %v403_v8 = vld [vmem:[#allocation2 + $0x338] sm:$0xff] }
 0x1a5   :  { %14551 = vmatprep.mubr.msk.f32.mxu0 %vm90_vm1, %v18869_v11  ;;  %v18928_v49 = vsel %vm1777_vm3, %v1888_v55, %v1889_v21  ;;  %v18937_v18 = vsel %vm1777_vm3, %v1889_v21, %v1891_v23  ;;  %v407_v55 = vld [vmem:[#allocation2 + $0x358] sm:$0xff]  ;;  %v26651_v23 = vld [vmem:[#allocation67_spill] sm:$0xff] }
 0x1a6   :  { %v18913_v24 = vsel %vm1777_vm3, %v1879_v40, %v1881_v26  ;;  %26644 = vst [vmem:[#allocation64_spill] sm:$0xff] %v18928_v49  ;;  %v1893_v40 = vrot.slane %v18183_v17, 1  ;;  %26645 = vst [vmem:[#allocation138_spill] sm:$0xff] %v18937_v18  ;;  %v1896_v26 = vrot.slane %v403_v8, 1  ;;  %v1899_v17 = vrot.slane %v26648_v43, 1  ;;  %v26652_v8 = vld [vmem:[#allocation68_spill] sm:$0xff] }
 0x1a7   :  { %v1901_v21 = vrot.slane %v407_v55, 1  ;;  %v1904_v28 = vrot.slane %v26652_v8, 1 }
 0x1a8   :  { %14552 = vmatmul.mubr.msk.f32.gmra.mrb[34].mxu0 %vm90_vm1, %v18877_v12  ;;  %v18940_v37 = vsel %vm1777_vm3, %v1893_v40, %v1894_v19  ;;  %v18949_v16 = vsel %vm1777_vm3, %v1894_v19, %v1896_v26  ;;  %v18952_v35 = vsel %vm1777_vm3, %v1898_v36, %v1899_v17  ;;  %v1903_v40 = vrot.slane %v26651_v23, 1  ;;  %v26655_v36 = vld [vmem:[#allocation69_spill] sm:$0xff] }
 0x1a9   :  { %14554 = vmatprep.mubr.msk.f32.mxu0 %vm90_vm1, %v18880_v56  ;;  %26646 = vst [vmem:[#allocation139_spill] sm:$0xff] %v18940_v37  ;;  %26649 = vst [vmem:[#allocation65_spill] sm:$0xff] %v18949_v16  ;;  %v18961_v43 = vsel %vm1777_vm3, %v1899_v17, %v1901_v21  ;;  %v1906_v19 = vrot.slane %v411_v50, 1  ;;  %v1908_v55 = vrot.slane %v26655_v36, 1  ;;  %v26659_v21 = vld [vmem:[#allocation71_spill] sm:$0xff] }
 0x1aa   :  { %26650 = vst [vmem:[#allocation66_spill] sm:$0xff] %v18952_v35  ;;  %26653 = vst [vmem:[#allocation67_spill] sm:$0xff] %v18961_v43  ;;  %v18964_v26 = vsel %vm1777_vm3, %v1903_v40, %v1904_v28  ;;  %v1913_v40 = vrot.slane %v26659_v21, 1 }
 0x1ab   :  { %26654 = vst [vmem:[#allocation68_spill] sm:$0xff] %v18964_v26  ;;  %v18973_v8 = vsel %vm1777_vm3, %v1904_v28, %v1906_v19  ;;  %v26663_v19 = vld [vmem:[#allocation73_spill] sm:$0xff] }
 0x1ac   :  { %14555 = vmatmul.mubr.msk.f32.gmra.mrb[36].mxu0 %vm90_vm1, %v18889_v39  ;;  %26657 = vst [vmem:[#allocation69_spill] sm:$0xff] %v18973_v8 }
 0x1ad   :  { %14557 = vmatprep.mubr.msk.f32.mxu0 %vm90_vm1, %v18892_v51 }
 0x1b0   :  { %14558 = vmatmul.mubr.msk.f32.gmra.mrb[38].mxu0 %vm90_vm1, %v18901_v34 }
 0x1b1   :  { %14560 = vmatprep.mubr.msk.f32.mxu0 %vm90_vm1, %v18904_v45 }
 0x1b4   :  { %14561 = vmatmul.mubr.msk.f32.gmra.mrb[40].mxu0 %vm90_vm1, %v18913_v24 }
 0x1b5   :  { %14563 = vmatprep.mubr.msk.f32.mxu0 %vm90_vm1, %v18916_v29 }
 0x1b8   :  { %14564 = vmatmul.mubr.msk.f32.gmra.mrb[42].mxu0 %vm90_vm1, %v18925_v20 }
 0x1b9   :  { %14566 = vmatprep.mubr.msk.f32.mxu0 %vm90_vm1, %v18928_v49 }
 0x1bc   :  { %14567 = vmatmul.mubr.msk.f32.gmra.mrb[44].mxu0 %vm90_vm1, %v18937_v18  ;;  %v415_v18 = vld [vmem:[#allocation2 + $0x398] sm:$0xff] }
 0x1bd   :  { %14569 = vmatprep.mubr.msk.f32.mxu0 %vm90_vm1, %v18940_v37  ;;  %v26656_v37 = vld [vmem:[#allocation70_spill] sm:$0xff]  ;;  %v1911_v17 = vrot.slane %v415_v18, 1 }
 0x1be   :  { %v1909_v23 = vrot.slane %v26656_v37, 1 }
 0x1c0   :  { %14570 = vmatmul.mubr.msk.f32.gmra.mrb[46].mxu0 %vm90_vm1, %v18949_v16  ;;  %v18976_v50 = vsel %vm1777_vm3, %v1908_v55, %v1909_v23  ;;  %v419_v16 = vld [vmem:[#allocation2 + $0x3b8] sm:$0xff]  ;;  %v18985_v37 = vsel %vm1777_vm3, %v1909_v23, %v1911_v17  ;;  %v1918_v55 = vrot.slane %v26663_v19, 1  ;;  %v1923_v17 = vrot.slane %v26625_v13, 1 }
 0x1c1   :  { %14572 = vmatprep.mubr.msk.f32.mxu0 %vm90_vm1, %v18952_v35  ;;  %26658 = vst [vmem:[#allocation70_spill] sm:$0xff] %v18976_v50  ;;  %v26660_v35 = vld [vmem:[#allocation72_spill] sm:$0xff]  ;;  %26661 = vst [vmem:[#allocation71_spill] sm:$0xff] %v18985_v37  ;;  %v1916_v28 = vrot.slane %v419_v16, 1  ;;  %v1929_v13 = vrot.slane %v26630_v15, 1 }
 0x1c2   :  { %v1914_v36 = vrot.slane %v26660_v35, 1 }
 0x1c4   :  { %14573 = vmatmul.mubr.msk.f32.gmra.mrb[48].mxu0 %vm90_vm1, %v18961_v43  ;;  %v18988_v18 = vsel %vm1777_vm3, %v1913_v40, %v1914_v36  ;;  %v423_v43 = vld [vmem:[#allocation2 + $0x3d8] sm:$0xff]  ;;  %v18997_v35 = vsel %vm1777_vm3, %v1914_v36, %v1916_v28  ;;  %v26667_v40 = vld [vmem:[#allocation76_spill] sm:$0xff]  ;;  %v1928_v28 = vrot.slane %v26629_v10, 1 }
 0x1c5   :  { %14575 = vmatprep.mubr.msk.f32.mxu0 %vm90_vm1, %v18964_v26  ;;  %26662 = vst [vmem:[#allocation72_spill] sm:$0xff] %v18988_v18  ;;  %v26664_v26 = vld [vmem:[#allocation74_spill] sm:$0xff]  ;;  %26665 = vst [vmem:[#allocation73_spill] sm:$0xff] %v18997_v35  ;;  %v1921_v23 = vrot.slane %v423_v43, 1  ;;  %v1924_v19 = vrot.slane %v26667_v40, 1  ;;  %v19019_v40 = vld [vmem:[%s25849_s0 + $0x1f0] sm:$0xff] }
 0x1c6   :  { %v1919_v21 = vrot.slane %v26664_v26, 1  ;;  %26670 = vst [vmem:[#allocation141_spill] sm:$0xff] %v19019_v40  ;;  %298 = vst.msk [vmem:[#allocation2 + $0x448] sm:$0xff] %vm90_vm1, %v19019_v40  ;;  %v1934_v40 = vrot.slane %v18255_v4, 1 }
 0x1c7   :  { %v19012_v43 = vsel %vm1777_vm3, %v1923_v17, %v1924_v19 }
 0x1c8   :  { %14576 = vmatmul.mubr.msk.f32.gmra.mrb[50].mxu0 %vm90_vm1, %v18973_v8  ;;  %v19000_v16 = vsel %vm1777_vm3, %v1918_v55, %v1919_v21  ;;  %v19009_v26 = vsel %vm1777_vm3, %v1919_v21, %v1921_v23  ;;  %26669 = vst [vmem:[#allocation140_spill] sm:$0xff] %v19012_v43  ;;  %v431_v55 = vld [vmem:[#allocation2 + $0x418] sm:$0xff]  ;;  %v19038_v21 = vsel %vm1777_vm3, %v1928_v28, %v1929_v13  ;;  %v19040_v23 = vld [vmem:[#allocation2 + $0x428] sm:$0xff] }
 0x1c9   :  { %14578 = vmatprep.mubr.msk.f32.mxu0 %vm90_vm1, %v18976_v50  ;;  %26666 = vst [vmem:[#allocation74_spill] sm:$0xff] %v19000_v16  ;;  %v427_v50 = vld [vmem:[#allocation2 + $0x3f8] sm:$0xff]  ;;  %26668 = vst [vmem:[#allocation76_spill] sm:$0xff] %v19009_v26  ;;  %v1931_v15 = vrot.slane %v431_v55, 1  ;;  %v1933_v17 = vrot.slane %v19040_v23, 1  ;;  %v26677_v55 = vld [vmem:[#allocation80_spill] sm:$0xff] }
 0x1ca   :  { %v1926_v36 = vrot.slane %v427_v50, 1  ;;  %v19028_v50 = vld [vmem:[%s25849_s0 + $0x1f8] sm:$0xff]  ;;  %26673 = vst [vmem:[#allocation144_spill] sm:$0xff] %v19038_v21 }
 0x1cb   :  { %26671 = vst [vmem:[#allocation142_spill] sm:$0xff] %v19028_v50  ;;  %299 = vst.msk [vmem:[#allocation2 + $0x450] sm:$0xff] %vm90_vm1, %v19028_v50  ;;  %v19052_v28 = vsel %vm1777_vm3, %v1933_v17, %v1934_v40  ;;  %v26681_v17 = vld [vmem:[#allocation84_spill] sm:$0xff]  ;;  %v26686_v50 = vld [vmem:[#allocation89_spill] sm:$0xff] }
 0x1cc   :  { %14579 = vmatmul.mubr.msk.f32.gmra.mrb[52].mxu0 %vm90_vm1, %v18985_v37  ;;  %v19033_v10 = vsel %vm1777_vm3, %v1924_v19, %v1926_v36  ;;  %v19049_v19 = vsel %vm1777_vm3, %v1929_v13, %v1931_v15  ;;  %26675 = vst [vmem:[#allocation146_spill] sm:$0xff] %v19052_v28  ;;  %v26678_v13 = vld [vmem:[#allocation81_spill] sm:$0xff]  ;;  %v26679_v15 = vld [vmem:[#allocation82_spill] sm:$0xff] }
 0x1cd   :  { %14581 = vmatprep.mubr.msk.f32.mxu0 %vm90_vm1, %v18988_v18  ;;  %26672 = vst [vmem:[#allocation143_spill] sm:$0xff] %v19033_v10  ;;  %26674 = vst [vmem:[#allocation145_spill] sm:$0xff] %v19049_v19 }
 0x1d0   :  { %14582 = vmatmul.mubr.msk.f32.gmra.mrb[54].mxu0 %vm90_vm1, %v18997_v35 }
 0x1d1   :  { %14584 = vmatprep.mubr.msk.f32.mxu0 %vm90_vm1, %v19000_v16 }
 0x1d4   :  { %14585 = vmatmul.mubr.msk.f32.gmra.mrb[56].mxu0 %vm90_vm1, %v19009_v26  ;;  %v435_v26 = vld [vmem:[#allocation2 + $0x438] sm:$0xff] }
 0x1d5   :  { %14587 = vmatprep.mubr.msk.f32.mxu0 %vm90_vm1, %v19012_v43  ;;  %v1936_v36 = vrot.slane %v435_v26, 1  ;;  %v19068_v26 = vld [vmem:[%s25848_s1 + $0x14] sm:$0xf] }
 0x1d7   :  { %v19059_v4 = vsel %vm1777_vm3, %v1934_v40, %v1936_v36  ;;  %v26680_v40 = vld [vmem:[#allocation83_spill] sm:$0xff]  ;;  %v26682_v36 = vld [vmem:[#allocation85_spill] sm:$0xff] }
 0x1d8   :  { %14588 = vmatmul.mubr.msk.f32.gmra.mrb[58].mxu0 %vm90_vm1, %v19033_v10  ;;  %26676 = vst [vmem:[#allocation147_spill] sm:$0xff] %v19059_v4 }
 0x1d9   :  { %14590 = vmatprep.mubr.msk.f32.mxu0 %vm90_vm1, %v19038_v21 }
 0x1dc   :  { %14591 = vmatmul.mubr.msk.f32.gmra.mrb[60].mxu0 %vm90_vm1, %v19049_v19 }
 0x1dd   :  { %14593 = vmatprep.mubr.msk.f32.mxu0 %vm90_vm1, %v19052_v28  ;;  %v19129_v28 = vld [vmem:[#allocation2 + $0x210] sm:$0xff] }
 0x1e0   :  { %14594 = vmatmul.mubr.msk.f32.gmra.mrb[62].mxu0 %vm90_vm1, %v19059_v4  ;;  %v26702_v4 = vld [vmem:[#allocation105_spill] sm:$0xff] }
 0x1e1   :  { %14598 = vmatprep.mubr.msk.f32.mxu0 %vm90_vm1, %v26677_v55  ;;  %v26683_v55 = vld [vmem:[#allocation86_spill] sm:$0xff] }
 0x1e4   :  { %14599 = vmatmul.mubr.msk.f32.vlgmr.msra.gmra.mrb[0].mxu0 %vm90_vm1, %v26678_v13  ;;  %v26684_v13 = vld [vmem:[#allocation87_spill] sm:$0xff] }
 0x1e5   :  { %14695 = vmatpush3.msk.msra.mxu0 %vm840_vm0, %v18667_v6  ;;  %14601 = vmatprep.mubr.msk.f32.mxu0 %vm90_vm1, %v26679_v15  ;;  %v26685_v6 = vld [vmem:[#allocation88_spill] sm:$0xff]  ;;  %v26687_v15 = vld [vmem:[#allocation90_spill] sm:$0xff] }
 0x1e6   :  { %14792 = vmatprep.subr.msk.mxu0 %vm840_vm0, %v19068_v26 }
 0x1e8   :  { %14602 = vmatmul.mubr.msk.f32.gmra.mrb[2].mxu0 %vm90_vm1, %v26680_v40  ;;  %v26688_v40 = vld [vmem:[#allocation91_spill] sm:$0xff] }
 0x1e9   :  { %14604 = vmatprep.mubr.msk.f32.mxu0 %vm90_vm1, %v26681_v17  ;;  %v26689_v17 = vld [vmem:[#allocation92_spill] sm:$0xff] }
 0x1ec   :  { %14605 = vmatmul.mubr.msk.f32.gmra.mrb[4].mxu0 %vm90_vm1, %v26682_v36  ;;  %v26690_v36 = vld [vmem:[#allocation93_spill] sm:$0xff] }
 0x1ed   :  { %14607 = vmatprep.mubr.msk.f32.mxu0 %vm90_vm1, %v26683_v55  ;;  %v26691_v55 = vld [vmem:[#allocation94_spill] sm:$0xff] }
 0x1f0   :  { %14608 = vmatmul.mubr.msk.f32.gmra.mrb[6].mxu0 %vm90_vm1, %v26684_v13  ;;  %v26692_v13 = vld [vmem:[#allocation95_spill] sm:$0xff] }
 0x1f1   :  { %14610 = vmatprep.mubr.msk.f32.mxu0 %vm90_vm1, %v26685_v6  ;;  %v26693_v6 = vld [vmem:[#allocation96_spill] sm:$0xff] }
 0x1f4   :  { %14611 = vmatmul.mubr.msk.f32.gmra.mrb[8].mxu0 %vm90_vm1, %v26686_v50  ;;  %v26694_v50 = vld [vmem:[#allocation97_spill] sm:$0xff] }
 0x1f5   :  { %14613 = vmatprep.mubr.msk.f32.mxu0 %vm90_vm1, %v26687_v15  ;;  %v26695_v15 = vld [vmem:[#allocation98_spill] sm:$0xff] }
 0x1f8   :  { %14614 = vmatmul.mubr.msk.f32.gmra.mrb[10].mxu0 %vm90_vm1, %v26688_v40  ;;  %v26696_v40 = vld [vmem:[#allocation99_spill] sm:$0xff] }
 0x1f9   :  { %14616 = vmatprep.mubr.msk.f32.mxu0 %vm90_vm1, %v26689_v17  ;;  %v26697_v17 = vld [vmem:[#allocation100_spill] sm:$0xff] }
 0x1fc   :  { %14617 = vmatmul.mubr.msk.f32.gmra.mrb[12].mxu0 %vm90_vm1, %v26690_v36  ;;  %v26698_v36 = vld [vmem:[#allocation101_spill] sm:$0xff] }
 0x1fd   :  { %14619 = vmatprep.mubr.msk.f32.mxu0 %vm90_vm1, %v26691_v55  ;;  %v26699_v55 = vld [vmem:[#allocation102_spill] sm:$0xff] }
 0x200   :  { %14620 = vmatmul.mubr.msk.f32.gmra.mrb[14].mxu0 %vm90_vm1, %v26692_v13  ;;  %v26700_v13 = vld [vmem:[#allocation103_spill] sm:$0xff] }
 0x201   :  { %14622 = vmatprep.mubr.msk.f32.mxu0 %vm90_vm1, %v26693_v6  ;;  %v26701_v6 = vld [vmem:[#allocation104_spill] sm:$0xff] }
 0x204   :  { %14623 = vmatmul.mubr.msk.f32.gmra.mrb[16].mxu0 %vm90_vm1, %v26694_v50  ;;  %v364_v50 = vld [vmem:[#allocation2 + $0x200] sm:$0xff] }
 0x205   :  { %14625 = vmatprep.mubr.msk.f32.mxu0 %vm90_vm1, %v26695_v15  ;;  %v19122_v15 = vld [vmem:[#allocation2 + $0x208] sm:$0xff] }
 0x208   :  { %14626 = vmatmul.mubr.msk.f32.gmra.mrb[18].mxu0 %vm90_vm1, %v26696_v40  ;;  %v26703_v40 = vld [vmem:[#allocation106_spill] sm:$0xff] }
 0x209   :  { %14628 = vmatprep.mubr.msk.f32.mxu0 %vm90_vm1, %v26697_v17  ;;  %v2524_v17 = vrot.slane %v364_v50, 7 }
 0x20c   :  { %14629 = vmatmul.mubr.msk.f32.gmra.mrb[20].mxu0 %vm90_vm1, %v26698_v36  ;;  %v2525_v36 = vrot.slane %v19122_v15, 7 }
 0x20d   :  { %14631 = vmatprep.mubr.msk.f32.mxu0 %vm90_vm1, %v26699_v55  ;;  %v26704_v55 = vld [vmem:[#allocation107_spill] sm:$0xff] }
 0x20e   :  { %v19137_v19 = vsel %vm551_vm2, %v2524_v17, %v2525_v36  ;;  %v26711_v17 = vld [vmem:[#allocation112_spill] sm:$0xff] }
 0x20f   :  { %26706 = vst [vmem:[#allocation80_spill] sm:$0xff] %v19137_v19 }
 0x210   :  { %14632 = vmatmul.mubr.msk.f32.gmra.mrb[22].mxu0 %vm90_vm1, %v26700_v13  ;;  %v26705_v13 = vld [vmem:[#allocation108_spill] sm:$0xff] }
 0x211   :  { %14634 = vmatprep.mubr.msk.f32.mxu0 %vm90_vm1, %v26701_v6  ;;  %v2527_v6 = vrot.slane %v19129_v28, 7 }
 0x213   :  { %v19144_v50 = vsel %vm551_vm2, %v2525_v36, %v2527_v6  ;;  %v26714_v36 = vld [vmem:[#allocation115_spill] sm:$0xff]  ;;  %v26715_v6 = vld [vmem:[#allocation116_spill] sm:$0xff] }
 0x214   :  { %14635 = vmatmul.mubr.msk.f32.gmra.mrb[24].mxu0 %vm90_vm1, %v26702_v4  ;;  %v26707_v4 = vld [vmem:[#allocation109_spill] sm:$0xff]  ;;  %26708 = vst [vmem:[#allocation81_spill] sm:$0xff] %v19144_v50 }
 0x215   :  { %14637 = vmatprep.mubr.msk.f32.mxu0 %vm90_vm1, %v26703_v40  ;;  %v26712_v40 = vld [vmem:[#allocation113_spill] sm:$0xff] }
 0x218   :  { %14638 = vmatmul.mubr.msk.f32.gmra.mrb[26].mxu0 %vm90_vm1, %v26704_v55  ;;  %v26709_v55 = vld [vmem:[#allocation110_spill] sm:$0xff] }
 0x219   :  { %14640 = vmatprep.mubr.msk.f32.mxu0 %vm90_vm1, %v26705_v13  ;;  %v26710_v13 = vld [vmem:[#allocation111_spill] sm:$0xff] }
 0x21c   :  { %14641 = vmatmul.mubr.msk.f32.gmra.mrb[28].mxu0 %vm90_vm1, %v26707_v4  ;;  %v26713_v4 = vld [vmem:[#allocation114_spill] sm:$0xff] }
 0x21d   :  { %14643 = vmatprep.mubr.msk.f32.mxu0 %vm90_vm1, %v19137_v19  ;;  %v19205_v19 = vld [vmem:[#allocation2 + $0x450] sm:$0xff] }
 0x220   :  { %14644 = vmatmul.mubr.msk.f32.gmra.mrb[30].mxu0 %vm90_vm1, %v19144_v50  ;;  %v26716_v50 = vld [vmem:[#allocation117_spill] sm:$0xff] }
 0x221   :  { %14646 = vmatprep.mubr.msk.f32.mxu0 %vm90_vm1, %v26709_v55  ;;  %v26717_v55 = vld [vmem:[#allocation118_spill] sm:$0xff] }
 0x224   :  { %14647 = vmatmul.mubr.msk.f32.gmra.mrb[32].mxu0 %vm90_vm1, %v26710_v13  ;;  %v26718_v13 = vld [vmem:[#allocation119_spill] sm:$0xff] }
 0x225   :  { %14649 = vmatprep.mubr.msk.f32.mxu0 %vm90_vm1, %v26711_v17  ;;  %v26719_v17 = vld [vmem:[#allocation120_spill] sm:$0xff] }
 0x228   :  { %14650 = vmatmul.mubr.msk.f32.gmra.mrb[34].mxu0 %vm90_vm1, %v26712_v40  ;;  %v26720_v40 = vld [vmem:[#allocation121_spill] sm:$0xff] }
 0x229   :  { %14652 = vmatprep.mubr.msk.f32.mxu0 %vm90_vm1, %v26713_v4  ;;  %v26721_v4 = vld [vmem:[#allocation122_spill] sm:$0xff] }
 0x22c   :  { %14653 = vmatmul.mubr.msk.f32.gmra.mrb[36].mxu0 %vm90_vm1, %v26714_v36  ;;  %v26722_v36 = vld [vmem:[#allocation123_spill] sm:$0xff] }
 0x22d   :  { %14655 = vmatprep.mubr.msk.f32.mxu0 %vm90_vm1, %v26715_v6  ;;  %v26723_v6 = vld [vmem:[#allocation124_spill] sm:$0xff] }
 0x230   :  { %14656 = vmatmul.mubr.msk.f32.gmra.mrb[38].mxu0 %vm90_vm1, %v26716_v50  ;;  %v26724_v50 = vld [vmem:[#allocation125_spill] sm:$0xff] }
 0x231   :  { %14658 = vmatprep.mubr.msk.f32.mxu0 %vm90_vm1, %v26717_v55  ;;  %v26725_v55 = vld [vmem:[#allocation126_spill] sm:$0xff] }
 0x234   :  { %14659 = vmatmul.mubr.msk.f32.gmra.mrb[40].mxu0 %vm90_vm1, %v26718_v13  ;;  %v26726_v13 = vld [vmem:[#allocation127_spill] sm:$0xff] }
 0x235   :  { %14661 = vmatprep.mubr.msk.f32.mxu0 %vm90_vm1, %v26719_v17  ;;  %v26727_v17 = vld [vmem:[#allocation128_spill] sm:$0xff] }
 0x238   :  { %14662 = vmatmul.mubr.msk.f32.gmra.mrb[42].mxu0 %vm90_vm1, %v26720_v40  ;;  %v26728_v40 = vld [vmem:[#allocation129_spill] sm:$0xff] }
 0x239   :  { %14664 = vmatprep.mubr.msk.f32.mxu0 %vm90_vm1, %v26721_v4  ;;  %v26729_v4 = vld [vmem:[#allocation130_spill] sm:$0xff] }
 0x23c   :  { %14665 = vmatmul.mubr.msk.f32.gmra.mrb[44].mxu0 %vm90_vm1, %v26722_v36  ;;  %v26730_v36 = vld [vmem:[#allocation131_spill] sm:$0xff] }
 0x23d   :  { %14667 = vmatprep.mubr.msk.f32.mxu0 %vm90_vm1, %v26723_v6  ;;  %v26731_v6 = vld [vmem:[#allocation132_spill] sm:$0xff] }
 0x240   :  { %14668 = vmatmul.mubr.msk.f32.gmra.mrb[46].mxu0 %vm90_vm1, %v26724_v50  ;;  %v26732_v50 = vld [vmem:[#allocation75_spill] sm:$0xff] }
 0x241   :  { %14670 = vmatprep.mubr.msk.f32.mxu0 %vm90_vm1, %v26725_v55  ;;  %v26733_v55 = vld [vmem:[#allocation133_spill] sm:$0xff] }
 0x244   :  { %14671 = vmatmul.mubr.msk.f32.gmra.mrb[48].mxu0 %vm90_vm1, %v26726_v13  ;;  %v436_v13 = vld [vmem:[#allocation2 + $0x440] sm:$0xff] }
 0x245   :  { %14673 = vmatprep.mubr.msk.f32.mxu0 %vm90_vm1, %v26727_v17  ;;  %v19198_v17 = vld [vmem:[#allocation2 + $0x448] sm:$0xff] }
 0x248   :  { %14674 = vmatmul.mubr.msk.f32.gmra.mrb[50].mxu0 %vm90_vm1, %v26728_v40  ;;  %v26734_v40 = vld [vmem:[#allocation77_spill] sm:$0xff] }
 0x249   :  { %14676 = vmatprep.mubr.msk.f32.mxu0 %vm90_vm1, %v26729_v4  ;;  %v2529_v4 = vrot.slane %v436_v13, 7 }
 0x24c   :  { %14677 = vmatmul.mubr.msk.f32.gmra.mrb[52].mxu0 %vm90_vm1, %v26730_v36  ;;  %v2530_v36 = vrot.slane %v19198_v17, 7 }
 0x24d   :  { %14679 = vmatprep.mubr.msk.f32.mxu0 %vm90_vm1, %v26731_v6  ;;  %v26735_v6 = vld [vmem:[#allocation78_spill] sm:$0xff] }
 0x24e   :  { %v19213_v21 = vsel %vm551_vm2, %v2529_v4, %v2530_v36  ;;  %v19228_v4 = vld [vmem:[%s25848_s1 + $0x18] sm:$0xf] }
 0x24f   :  { %26737 = vst [vmem:[#allocation110_spill] sm:$0xff] %v19213_v21 }
 0x250   :  { %14680 = vmatmul.mubr.msk.f32.gmra.mrb[54].mxu0 %vm90_vm1, %v26732_v50  ;;  %v26736_v50 = vld [vmem:[#allocation79_spill] sm:$0xff] }
 0x251   :  { %14682 = vmatprep.mubr.msk.f32.mxu0 %vm90_vm1, %v26733_v55  ;;  %v2532_v55 = vrot.slane %v19205_v19, 7 }
 0x253   :  { %v19220_v13 = vsel %vm551_vm2, %v2530_v36, %v2532_v55  ;;  %v19239_v36 = vld [vmem:[#allocation2 + $0x50] sm:$0xff] }
 0x254   :  { %14683 = vmatmul.mubr.msk.f32.gmra.mrb[56].mxu0 %vm90_vm1, %v18625_v61  ;;  %26739 = vst [vmem:[#allocation77_spill] sm:$0xff] %v19239_v36  ;;  %v19255_v55 = vld [vmem:[#allocation2 + $0x90] sm:$0xff] }
 0x255   :  { %14685 = vmatprep.mubr.msk.f32.mxu0 %vm90_vm1, %v26734_v40  ;;  %26743 = vst [vmem:[#allocation151_spill] sm:$0xff] %v19255_v55 }
 0x258   :  { %14686 = vmatmul.mubr.msk.f32.gmra.mrb[58].mxu0 %vm90_vm1, %v26735_v6  ;;  %v17096_v6 = vld [vmem:[#allocation2 + $0x28] sm:$0xff] }
 0x259   :  { %14688 = vmatprep.mubr.msk.f32.mxu0 %vm90_vm1, %v26736_v50  ;;  %v17097_v50 = vld [vmem:[#allocation2 + $0x30] sm:$0xff] }
 0x25c   :  { %14689 = vmatmul.mubr.msk.f32.gmra.mrb[60].mxu0 %vm90_vm1, %v18648_v38 }
 0x25d   :  { %14691 = vmatprep.mubr.msk.f32.mxu0 %vm90_vm1, %v19213_v21  ;;  %v19233_v21 = vld [vmem:[#allocation2 + $0x48] sm:$0xff] }
 0x25e   :  { %26738 = vst [vmem:[#allocation111_spill] sm:$0xff] %v19233_v21 }
 0x260   :  { %14692 = vmatmul.mubr.msk.f32.gmra.mrb[62].mxu0 %vm90_vm1, %v19220_v13 }
 0x261   :  { %14696 = vmatprep.mubr.msk.f32.mxu0 %vm90_vm1, %v17096_v6  ;;  %v19243_v6 = vld [vmem:[#allocation2 + $0x68] sm:$0xff] }
 0x262   :  { %26740 = vst [vmem:[#allocation148_spill] sm:$0xff] %v19243_v6 }
 0x264   :  { %14697 = vmatmul.mubr.msk.f32.vlgmr.msra.gmra.mrb[0].mxu0 %vm90_vm1, %v17097_v50  ;;  %v19247_v50 = vld [vmem:[#allocation2 + $0x70] sm:$0xff] }
 0x265   :  { %14793 = vmatpush3.msk.msra.mxu0 %vm840_vm0, %v19068_v26  ;;  %14699 = vmatprep.mubr.msk.f32.mxu0 %vm90_vm1, %v19233_v21  ;;  %26741 = vst [vmem:[#allocation149_spill] sm:$0xff] %v19247_v50  ;;  %v19251_v26 = vld [vmem:[#allocation2 + $0x88] sm:$0xff]  ;;  %v19365_v21 = vld [vmem:[#allocation2 + $0x2b0] sm:$0xff] }
 0x266   :  { %14890 = vmatprep.subr.msk.mxu0 %vm840_vm0, %v19228_v4  ;;  %26742 = vst [vmem:[#allocation150_spill] sm:$0xff] %v19251_v26  ;;  %26768 = vst [vmem:[#allocation176_spill] sm:$0xff] %v19365_v21 }
 0x268   :  { %14700 = vmatmul.mubr.msk.f32.gmra.mrb[2].mxu0 %vm90_vm1, %v19239_v36  ;;  %v19259_v36 = vld [vmem:[#allocation2 + $0xa8] sm:$0xff] }
 0x269   :  { %14702 = vmatprep.mubr.msk.f32.mxu0 %vm90_vm1, %v19243_v6  ;;  %26744 = vst [vmem:[#allocation152_spill] sm:$0xff] %v19259_v36  ;;  %v19263_v6 = vld [vmem:[#allocation2 + $0xb0] sm:$0xff] }
 0x26a   :  { %26745 = vst [vmem:[#allocation153_spill] sm:$0xff] %v19263_v6 }
 0x26c   :  { %14703 = vmatmul.mubr.msk.f32.gmra.mrb[4].mxu0 %vm90_vm1, %v19247_v50  ;;  %v19267_v50 = vld [vmem:[#allocation2 + $0xc8] sm:$0xff] }
 0x26d   :  { %14705 = vmatprep.mubr.msk.f32.mxu0 %vm90_vm1, %v19251_v26  ;;  %26746 = vst [vmem:[#allocation154_spill] sm:$0xff] %v19267_v50  ;;  %v19271_v26 = vld [vmem:[#allocation2 + $0xd0] sm:$0xff] }
 0x26e   :  { %26747 = vst [vmem:[#allocation155_spill] sm:$0xff] %v19271_v26 }
 0x270   :  { %14706 = vmatmul.mubr.msk.f32.gmra.mrb[6].mxu0 %vm90_vm1, %v19255_v55  ;;  %v19275_v55 = vld [vmem:[#allocation2 + $0xe8] sm:$0xff] }
 0x271   :  { %14708 = vmatprep.mubr.msk.f32.mxu0 %vm90_vm1, %v19259_v36  ;;  %26748 = vst [vmem:[#allocation156_spill] sm:$0xff] %v19275_v55  ;;  %v19279_v36 = vld [vmem:[#allocation2 + $0xf0] sm:$0xff] }
 0x272   :  { %26749 = vst [vmem:[#allocation157_spill] sm:$0xff] %v19279_v36 }
 0x274   :  { %14709 = vmatmul.mubr.msk.f32.gmra.mrb[8].mxu0 %vm90_vm1, %v19263_v6  ;;  %v19283_v6 = vld [vmem:[#allocation2 + $0x108] sm:$0xff] }
 0x275   :  { %14711 = vmatprep.mubr.msk.f32.mxu0 %vm90_vm1, %v19267_v50  ;;  %26750 = vst [vmem:[#allocation158_spill] sm:$0xff] %v19283_v6  ;;  %v19287_v50 = vld [vmem:[#allocation2 + $0x110] sm:$0xff] }
 0x276   :  { %26751 = vst [vmem:[#allocation159_spill] sm:$0xff] %v19287_v50 }
 0x278   :  { %14712 = vmatmul.mubr.msk.f32.gmra.mrb[10].mxu0 %vm90_vm1, %v19271_v26  ;;  %v19291_v26 = vld [vmem:[#allocation2 + $0x128] sm:$0xff] }
 0x279   :  { %14714 = vmatprep.mubr.msk.f32.mxu0 %vm90_vm1, %v19275_v55  ;;  %26752 = vst [vmem:[#allocation160_spill] sm:$0xff] %v19291_v26  ;;  %v19295_v55 = vld [vmem:[#allocation2 + $0x130] sm:$0xff] }
 0x27a   :  { %26753 = vst [vmem:[#allocation161_spill] sm:$0xff] %v19295_v55 }
 0x27c   :  { %14715 = vmatmul.mubr.msk.f32.gmra.mrb[12].mxu0 %vm90_vm1, %v19279_v36  ;;  %v19299_v36 = vld [vmem:[#allocation2 + $0x148] sm:$0xff] }
 0x27d   :  { %14717 = vmatprep.mubr.msk.f32.mxu0 %vm90_vm1, %v19283_v6  ;;  %26754 = vst [vmem:[#allocation162_spill] sm:$0xff] %v19299_v36  ;;  %v19303_v6 = vld [vmem:[#allocation2 + $0x150] sm:$0xff] }
 0x27e   :  { %26755 = vst [vmem:[#allocation163_spill] sm:$0xff] %v19303_v6 }
 0x280   :  { %14718 = vmatmul.mubr.msk.f32.gmra.mrb[14].mxu0 %vm90_vm1, %v19287_v50  ;;  %v19307_v50 = vld [vmem:[#allocation2 + $0x168] sm:$0xff] }
 0x281   :  { %14720 = vmatprep.mubr.msk.f32.mxu0 %vm90_vm1, %v19291_v26  ;;  %26756 = vst [vmem:[#allocation164_spill] sm:$0xff] %v19307_v50  ;;  %v19311_v26 = vld [vmem:[#allocation2 + $0x170] sm:$0xff] }
 0x282   :  { %26757 = vst [vmem:[#allocation165_spill] sm:$0xff] %v19311_v26 }
 0x284   :  { %14721 = vmatmul.mubr.msk.f32.gmra.mrb[16].mxu0 %vm90_vm1, %v19295_v55  ;;  %v19315_v55 = vld [vmem:[#allocation2 + $0x188] sm:$0xff] }
 0x285   :  { %14723 = vmatprep.mubr.msk.f32.mxu0 %vm90_vm1, %v19299_v36  ;;  %26758 = vst [vmem:[#allocation166_spill] sm:$0xff] %v19315_v55  ;;  %v19319_v36 = vld [vmem:[#allocation2 + $0x190] sm:$0xff] }
 0x286   :  { %26759 = vst [vmem:[#allocation167_spill] sm:$0xff] %v19319_v36 }
 0x288   :  { %14724 = vmatmul.mubr.msk.f32.gmra.mrb[18].mxu0 %vm90_vm1, %v19303_v6  ;;  %v19323_v6 = vld [vmem:[#allocation2 + $0x1a8] sm:$0xff] }
 0x289   :  { %14726 = vmatprep.mubr.msk.f32.mxu0 %vm90_vm1, %v19307_v50  ;;  %26760 = vst [vmem:[#allocation168_spill] sm:$0xff] %v19323_v6  ;;  %v19327_v50 = vld [vmem:[#allocation2 + $0x1b0] sm:$0xff] }
 0x28a   :  { %26761 = vst [vmem:[#allocation169_spill] sm:$0xff] %v19327_v50 }
 0x28c   :  { %14727 = vmatmul.mubr.msk.f32.gmra.mrb[20].mxu0 %vm90_vm1, %v19311_v26  ;;  %v19331_v26 = vld [vmem:[#allocation2 + $0x1c8] sm:$0xff] }
 0x28d   :  { %14729 = vmatprep.mubr.msk.f32.mxu0 %vm90_vm1, %v19315_v55  ;;  %26762 = vst [vmem:[#allocation170_spill] sm:$0xff] %v19331_v26  ;;  %v19335_v55 = vld [vmem:[#allocation2 + $0x1d0] sm:$0xff] }
 0x28e   :  { %26763 = vst [vmem:[#allocation171_spill] sm:$0xff] %v19335_v55 }
 0x290   :  { %14730 = vmatmul.mubr.msk.f32.gmra.mrb[22].mxu0 %vm90_vm1, %v19319_v36  ;;  %v19339_v36 = vld [vmem:[#allocation2 + $0x1e8] sm:$0xff] }
 0x291   :  { %14732 = vmatprep.mubr.msk.f32.mxu0 %vm90_vm1, %v19323_v6  ;;  %26764 = vst [vmem:[#allocation172_spill] sm:$0xff] %v19339_v36  ;;  %v19343_v6 = vld [vmem:[#allocation2 + $0x1f0] sm:$0xff] }
 0x292   :  { %26765 = vst [vmem:[#allocation173_spill] sm:$0xff] %v19343_v6 }
 0x294   :  { %14733 = vmatmul.mubr.msk.f32.gmra.mrb[24].mxu0 %vm90_vm1, %v19327_v50  ;;  %v19353_v50 = vld [vmem:[#allocation2 + $0x288] sm:$0xff] }
 0x295   :  { %14735 = vmatprep.mubr.msk.f32.mxu0 %vm90_vm1, %v19331_v26  ;;  %v17126_v26 = vld [vmem:[#allocation2 + $0x268] sm:$0xff] }
 0x298   :  { %14736 = vmatmul.mubr.msk.f32.gmra.mrb[26].mxu0 %vm90_vm1, %v19335_v55  ;;  %v17127_v55 = vld [vmem:[#allocation2 + $0x270] sm:$0xff] }
 0x299   :  { %14738 = vmatprep.mubr.msk.f32.mxu0 %vm90_vm1, %v19339_v36  ;;  %v19357_v36 = vld [vmem:[#allocation2 + $0x290] sm:$0xff] }
 0x29a   :  { %26766 = vst [vmem:[#allocation174_spill] sm:$0xff] %v19357_v36 }
 0x29c   :  { %14739 = vmatmul.mubr.msk.f32.gmra.mrb[28].mxu0 %vm90_vm1, %v19343_v6  ;;  %v19361_v6 = vld [vmem:[#allocation2 + $0x2a8] sm:$0xff] }
 0x29d   :  { %14741 = vmatprep.mubr.msk.f32.mxu0 %vm90_vm1, %v19122_v15  ;;  %26767 = vst [vmem:[#allocation175_spill] sm:$0xff] %v19361_v6 }
 0x2a0   :  { %14742 = vmatmul.mubr.msk.f32.gmra.mrb[30].mxu0 %vm90_vm1, %v19129_v28 }
 0x2a1   :  { %14744 = vmatprep.mubr.msk.f32.mxu0 %vm90_vm1, %v17126_v26  ;;  %v19369_v26 = vld [vmem:[#allocation2 + $0x2c8] sm:$0xff] }
 0x2a2   :  { %26769 = vst [vmem:[#allocation177_spill] sm:$0xff] %v19369_v26 }
 0x2a4   :  { %14745 = vmatmul.mubr.msk.f32.gmra.mrb[32].mxu0 %vm90_vm1, %v17127_v55  ;;  %v19373_v55 = vld [vmem:[#allocation2 + $0x2d0] sm:$0xff] }
 0x2a5   :  { %14747 = vmatprep.mubr.msk.f32.mxu0 %vm90_vm1, %v19353_v50  ;;  %26770 = vst [vmem:[#allocation178_spill] sm:$0xff] %v19373_v55 }
 0x2a8   :  { %14748 = vmatmul.mubr.msk.f32.gmra.mrb[34].mxu0 %vm90_vm1, %v19357_v36  ;;  %v19377_v36 = vld [vmem:[#allocation2 + $0x2e8] sm:$0xff] }
 0x2a9   :  { %14750 = vmatprep.mubr.msk.f32.mxu0 %vm90_vm1, %v19361_v6  ;;  %26771 = vst [vmem:[#allocation179_spill] sm:$0xff] %v19377_v36  ;;  %v19381_v6 = vld [vmem:[#allocation2 + $0x2f0] sm:$0xff] }
 0x2aa   :  { %26772 = vst [vmem:[#allocation180_spill] sm:$0xff] %v19381_v6 }
 0x2ac   :  { %14751 = vmatmul.mubr.msk.f32.gmra.mrb[36].mxu0 %vm90_vm1, %v19365_v21  ;;  %v19385_v21 = vld [vmem:[#allocation2 + $0x308] sm:$0xff] }
 0x2ad   :  { %14753 = vmatprep.mubr.msk.f32.mxu0 %vm90_vm1, %v19369_v26  ;;  %26773 = vst [vmem:[#allocation181_spill] sm:$0xff] %v19385_v21  ;;  %v19389_v26 = vld [vmem:[#allocation2 + $0x310] sm:$0xff] }
 0x2ae   :  { %26774 = vst [vmem:[#allocation182_spill] sm:$0xff] %v19389_v26 }
 0x2b0   :  { %14754 = vmatmul.mubr.msk.f32.gmra.mrb[38].mxu0 %vm90_vm1, %v19373_v55  ;;  %v19393_v55 = vld [vmem:[#allocation2 + $0x328] sm:$0xff] }
 0x2b1   :  { %14756 = vmatprep.mubr.msk.f32.mxu0 %vm90_vm1, %v19377_v36  ;;  %26775 = vst [vmem:[#allocation183_spill] sm:$0xff] %v19393_v55  ;;  %v19397_v36 = vld [vmem:[#allocation2 + $0x330] sm:$0xff] }
 0x2b2   :  { %26776 = vst [vmem:[#allocation184_spill] sm:$0xff] %v19397_v36 }
 0x2b4   :  { %14757 = vmatmul.mubr.msk.f32.gmra.mrb[40].mxu0 %vm90_vm1, %v19381_v6  ;;  %v19401_v6 = vld [vmem:[#allocation2 + $0x348] sm:$0xff] }
 0x2b5   :  { %14759 = vmatprep.mubr.msk.f32.mxu0 %vm90_vm1, %v19385_v21  ;;  %26777 = vst [vmem:[#allocation185_spill] sm:$0xff] %v19401_v6  ;;  %v19405_v21 = vld [vmem:[#allocation2 + $0x350] sm:$0xff] }
 0x2b6   :  { %26778 = vst [vmem:[#allocation186_spill] sm:$0xff] %v19405_v21 }
 0x2b8   :  { %14760 = vmatmul.mubr.msk.f32.gmra.mrb[42].mxu0 %vm90_vm1, %v19389_v26  ;;  %v19409_v26 = vld [vmem:[#allocation2 + $0x368] sm:$0xff] }
 0x2b9   :  { %14762 = vmatprep.mubr.msk.f32.mxu0 %vm90_vm1, %v19393_v55  ;;  %26779 = vst [vmem:[#allocation187_spill] sm:$0xff] %v19409_v26  ;;  %v19413_v55 = vld [vmem:[#allocation2 + $0x370] sm:$0xff] }
 0x2ba   :  { %26780 = vst [vmem:[#allocation188_spill] sm:$0xff] %v19413_v55 }
 0x2bc   :  { %14763 = vmatmul.mubr.msk.f32.gmra.mrb[44].mxu0 %vm90_vm1, %v19397_v36  ;;  %v19417_v36 = vld [vmem:[#allocation2 + $0x388] sm:$0xff] }
 0x2bd   :  { %14765 = vmatprep.mubr.msk.f32.mxu0 %vm90_vm1, %v19401_v6  ;;  %26781 = vst [vmem:[#allocation189_spill] sm:$0xff] %v19417_v36  ;;  %v19421_v6 = vld [vmem:[#allocation2 + $0x390] sm:$0xff] }
 0x2be   :  { %26782 = vst [vmem:[#allocation190_spill] sm:$0xff] %v19421_v6 }
 0x2c0   :  { %14766 = vmatmul.mubr.msk.f32.gmra.mrb[46].mxu0 %vm90_vm1, %v19405_v21  ;;  %v19425_v21 = vld [vmem:[#allocation2 + $0x3a8] sm:$0xff] }
 0x2c1   :  { %14768 = vmatprep.mubr.msk.f32.mxu0 %vm90_vm1, %v19409_v26  ;;  %26783 = vst [vmem:[#allocation191_spill] sm:$0xff] %v19425_v21  ;;  %v19429_v26 = vld [vmem:[#allocation2 + $0x3b0] sm:$0xff] }
 0x2c2   :  { %26784 = vst [vmem:[#allocation192_spill] sm:$0xff] %v19429_v26 }
 0x2c4   :  { %14769 = vmatmul.mubr.msk.f32.gmra.mrb[48].mxu0 %vm90_vm1, %v19413_v55  ;;  %v19433_v55 = vld [vmem:[#allocation2 + $0x3c8] sm:$0xff] }
 0x2c5   :  { %14771 = vmatprep.mubr.msk.f32.mxu0 %vm90_vm1, %v19417_v36  ;;  %26785 = vst [vmem:[#allocation193_spill] sm:$0xff] %v19433_v55  ;;  %v19437_v36 = vld [vmem:[#allocation2 + $0x3d0] sm:$0xff] }
 0x2c6   :  { %26786 = vst [vmem:[#allocation194_spill] sm:$0xff] %v19437_v36 }
 0x2c8   :  { %14772 = vmatmul.mubr.msk.f32.gmra.mrb[50].mxu0 %vm90_vm1, %v19421_v6  ;;  %v19441_v6 = vld [vmem:[#allocation2 + $0x3e8] sm:$0xff] }
 0x2c9   :  { %14774 = vmatprep.mubr.msk.f32.mxu0 %vm90_vm1, %v19425_v21  ;;  %v19445_v21 = vld [vmem:[#allocation2 + $0x3f0] sm:$0xff] }
 0x2cc   :  { %14775 = vmatmul.mubr.msk.f32.gmra.mrb[52].mxu0 %vm90_vm1, %v19429_v26  ;;  %v19449_v26 = vld [vmem:[#allocation2 + $0x408] sm:$0xff] }
 0x2cd   :  { %14777 = vmatprep.mubr.msk.f32.mxu0 %vm90_vm1, %v19433_v55  ;;  %v19453_v55 = vld [vmem:[#allocation2 + $0x410] sm:$0xff] }
 0x2ce   :  { %26787 = vst [vmem:[#allocation195_spill] sm:$0xff] %v19453_v55 }
 0x2d0   :  { %14778 = vmatmul.mubr.msk.f32.gmra.mrb[54].mxu0 %vm90_vm1, %v19437_v36  ;;  %v19459_v36 = vld [vmem:[#allocation2 + $0x430] sm:$0xff] }
 0x2d1   :  { %14780 = vmatprep.mubr.msk.f32.mxu0 %vm90_vm1, %v19441_v6 }
 0x2d4   :  { %14781 = vmatmul.mubr.msk.f32.gmra.mrb[56].mxu0 %vm90_vm1, %v19445_v21 }
 0x2d5   :  { %14783 = vmatprep.mubr.msk.f32.mxu0 %vm90_vm1, %v19449_v26 }
 0x2d8   :  { %14784 = vmatmul.mubr.msk.f32.gmra.mrb[58].mxu0 %vm90_vm1, %v19453_v55  ;;  %v19472_v55 = vld [vmem:[%s25848_s1 + $0x1c] sm:$0xf] }
 0x2d9   :  { %14786 = vmatprep.mubr.msk.f32.mxu0 %vm90_vm1, %v19040_v23 }
 0x2dc   :  { %14787 = vmatmul.mubr.msk.f32.gmra.mrb[60].mxu0 %vm90_vm1, %v19459_v36 }
 0x2dd   :  { %14789 = vmatprep.mubr.msk.f32.mxu0 %vm90_vm1, %v19198_v17 }
 0x2e0   :  { %14790 = vmatmul.mubr.msk.f32.gmra.mrb[62].mxu0 %vm90_vm1, %v19205_v19 }
 0x2e1   :  { %14794 = vmatprep.mubr.msk.f32.mxu0 %vm90_vm1, %v18660_v30  ;;  %v3456_v30 = vrot.slane %v19122_v15, 1 }
 0x2e4   :  { %14795 = vmatmul.mubr.msk.f32.vlgmr.msra.gmra.mrb[0].mxu0 %vm90_vm1, %v18675_v7  ;;  %v3457_v7 = vrot.slane %v19129_v28, 1 }
 0x2e5   :  { %14891 = vmatpush3.msk.msra.mxu0 %vm840_vm0, %v19228_v4  ;;  %14797 = vmatprep.mubr.msk.f32.mxu0 %vm90_vm1, %v18678_v31  ;;  %v367_v4 = vld [vmem:[#allocation2 + $0x218] sm:$0xff] }
 0x2e6   :  { %14988 = vmatprep.subr.msk.mxu0 %vm840_vm0, %v19472_v55 }
 0x2e8   :  { %14798 = vmatmul.mubr.msk.f32.gmra.mrb[2].mxu0 %vm90_vm1, %v18689_v27 }
 0x2e9   :  { %14800 = vmatprep.mubr.msk.f32.mxu0 %vm90_vm1, %v18692_v46 }
 0x2ec   :  { %14801 = vmatmul.mubr.msk.f32.gmra.mrb[4].mxu0 %vm90_vm1, %v18701_v3 }
 0x2ed   :  { %14803 = vmatprep.mubr.msk.f32.mxu0 %vm90_vm1, %v18704_v22 }
 0x2f0   :  { %14804 = vmatmul.mubr.msk.f32.gmra.mrb[6].mxu0 %vm90_vm1, %v18713_v47 }
 0x2f1   :  { %14806 = vmatprep.mubr.msk.f32.mxu0 %vm90_vm1, %v18716_v32 }
 0x2f4   :  { %14807 = vmatmul.mubr.msk.f32.gmra.mrb[8].mxu0 %vm90_vm1, %v18725_v60 }
 0x2f5   :  { %14809 = vmatprep.mubr.msk.f32.mxu0 %vm90_vm1, %v18728_v33 }
 0x2f8   :  { %14810 = vmatmul.mubr.msk.f32.gmra.mrb[10].mxu0 %vm90_vm1, %v18737_v0 }
 0x2f9   :  { %14812 = vmatprep.mubr.msk.f32.mxu0 %vm90_vm1, %v18740_v14 }
 0x2fc   :  { %14813 = vmatmul.mubr.msk.f32.gmra.mrb[12].mxu0 %vm90_vm1, %v18749_v25 }
 0x2fd   :  { %14815 = vmatprep.mubr.msk.f32.mxu0 %vm90_vm1, %v18752_v5 }
 0x300   :  { %14816 = vmatmul.mubr.msk.f32.gmra.mrb[14].mxu0 %vm90_vm1, %v18761_v59 }
 0x301   :  { %14818 = vmatprep.mubr.msk.f32.mxu0 %vm90_vm1, %v18764_v41 }
 0x304   :  { %14819 = vmatmul.mubr.msk.f32.gmra.mrb[16].mxu0 %vm90_vm1, %v18773_v63 }
 0x305   :  { %14821 = vmatprep.mubr.msk.f32.mxu0 %vm90_vm1, %v18776_v44 }
 0x308   :  { %14822 = vmatmul.mubr.msk.f32.gmra.mrb[18].mxu0 %vm90_vm1, %v18785_v2 }
 0x309   :  { %14824 = vmatprep.mubr.msk.f32.mxu0 %vm90_vm1, %v18788_v57 }
 0x30c   :  { %14825 = vmatmul.mubr.msk.f32.gmra.mrb[20].mxu0 %vm90_vm1, %v18797_v54 }
 0x30d   :  { %14827 = vmatprep.mubr.msk.f32.mxu0 %vm90_vm1, %v18800_v62 }
 0x310   :  { %14828 = vmatmul.mubr.msk.f32.gmra.mrb[22].mxu0 %vm90_vm1, %v18809_v52  ;;  %v3459_v52 = vrot.slane %v367_v4, 1  ;;  %v26793_v4 = vld [vmem:[#allocation68_spill] sm:$0xff] }
 0x311   :  { %14830 = vmatprep.mubr.msk.f32.mxu0 %vm90_vm1, %v18812_v1  ;;  %v19537_v1 = vsel %vm1777_vm3, %v3456_v30, %v3457_v7  ;;  %v26791_v30 = vld [vmem:[#allocation66_spill] sm:$0xff] }
 0x314   :  { %14831 = vmatmul.mubr.msk.f32.gmra.mrb[24].mxu0 %vm90_vm1, %v18833_v48 }
 0x315   :  { %14833 = vmatprep.mubr.msk.f32.mxu0 %vm90_vm1, %v18838_v58  ;;  %v19544_v58 = vsel %vm1777_vm3, %v3457_v7, %v3459_v52  ;;  %v26788_v52 = vld [vmem:[#allocation138_spill] sm:$0xff]  ;;  %v26792_v7 = vld [vmem:[#allocation67_spill] sm:$0xff] }
 0x318   :  { %14834 = vmatmul.mubr.msk.f32.gmra.mrb[26].mxu0 %vm90_vm1, %v18847_v53 }
 0x319   :  { %14836 = vmatprep.mubr.msk.f32.mxu0 %vm90_vm1, %v18850_v9 }
 0x31c   :  { %14837 = vmatmul.mubr.msk.f32.gmra.mrb[28].mxu0 %vm90_vm1, %v18857_v42 }
 0x31d   :  { %14839 = vmatprep.mubr.msk.f32.mxu0 %vm90_vm1, %v19537_v1 }
 0x320   :  { %14840 = vmatmul.mubr.msk.f32.gmra.mrb[30].mxu0 %vm90_vm1, %v19544_v58 }
 0x321   :  { %14842 = vmatprep.mubr.msk.f32.mxu0 %vm90_vm1, %v18869_v11  ;;  %v26789_v11 = vld [vmem:[#allocation139_spill] sm:$0xff] }
 0x324   :  { %14843 = vmatmul.mubr.msk.f32.gmra.mrb[32].mxu0 %vm90_vm1, %v18877_v12  ;;  %v26790_v12 = vld [vmem:[#allocation65_spill] sm:$0xff] }
 0x325   :  { %14845 = vmatprep.mubr.msk.f32.mxu0 %vm90_vm1, %v18880_v56 }
 0x328   :  { %14846 = vmatmul.mubr.msk.f32.gmra.mrb[34].mxu0 %vm90_vm1, %v18889_v39 }
 0x329   :  { %14848 = vmatprep.mubr.msk.f32.mxu0 %vm90_vm1, %v18892_v51 }
 0x32c   :  { %14849 = vmatmul.mubr.msk.f32.gmra.mrb[36].mxu0 %vm90_vm1, %v18901_v34 }
 0x32d   :  { %14851 = vmatprep.mubr.msk.f32.mxu0 %vm90_vm1, %v18904_v45 }
 0x330   :  { %14852 = vmatmul.mubr.msk.f32.gmra.mrb[38].mxu0 %vm90_vm1, %v18913_v24 }
 0x331   :  { %14854 = vmatprep.mubr.msk.f32.mxu0 %vm90_vm1, %v18916_v29 }
 0x334   :  { %14855 = vmatmul.mubr.msk.f32.gmra.mrb[40].mxu0 %vm90_vm1, %v18925_v20 }
 0x335   :  { %14857 = vmatprep.mubr.msk.f32.mxu0 %vm90_vm1, %v18928_v49  ;;  %v26794_v49 = vld [vmem:[#allocation70_spill] sm:$0xff] }
 0x338   :  { %14858 = vmatmul.mubr.msk.f32.gmra.mrb[42].mxu0 %vm90_vm1, %v26788_v52 }
 0x339   :  { %14860 = vmatprep.mubr.msk.f32.mxu0 %vm90_vm1, %v26789_v11 }
 0x33c   :  { %14861 = vmatmul.mubr.msk.f32.gmra.mrb[44].mxu0 %vm90_vm1, %v26790_v12  ;;  %v26831_v12 = vld [vmem:[#allocation81_spill] sm:$0xff] }
 0x33d   :  { %14863 = vmatprep.mubr.msk.f32.mxu0 %vm90_vm1, %v26791_v30 }
 0x340   :  { %14864 = vmatmul.mubr.msk.f32.gmra.mrb[46].mxu0 %vm90_vm1, %v26792_v7  ;;  %v26795_v7 = vld [vmem:[#allocation76_spill] sm:$0xff] }
 0x341   :  { %14866 = vmatprep.mubr.msk.f32.mxu0 %vm90_vm1, %v26793_v4  ;;  %v26800_v4 = vld [vmem:[#allocation147_spill] sm:$0xff] }
 0x344   :  { %14867 = vmatmul.mubr.msk.f32.gmra.mrb[48].mxu0 %vm90_vm1, %v18973_v8  ;;  %v26797_v8 = vld [vmem:[#allocation145_spill] sm:$0xff] }
 0x345   :  { %14869 = vmatprep.mubr.msk.f32.mxu0 %vm90_vm1, %v26794_v49  ;;  %v26796_v49 = vld [vmem:[#allocation144_spill] sm:$0xff] }
 0x348   :  { %14870 = vmatmul.mubr.msk.f32.gmra.mrb[50].mxu0 %vm90_vm1, %v18985_v37  ;;  %v3462_v37 = vrot.slane %v19205_v19, 1 }
 0x349   :  { %14872 = vmatprep.mubr.msk.f32.mxu0 %vm90_vm1, %v18988_v18  ;;  %v3461_v18 = vrot.slane %v19198_v17, 1 }
 0x34c   :  { %14873 = vmatmul.mubr.msk.f32.gmra.mrb[52].mxu0 %vm90_vm1, %v18997_v35  ;;  %v439_v35 = vld [vmem:[#allocation2 + $0x458] sm:$0xff] }
 0x34d   :  { %14875 = vmatprep.mubr.msk.f32.mxu0 %vm90_vm1, %v19000_v16  ;;  %v26798_v16 = vld [vmem:[#allocation146_spill] sm:$0xff] }
 0x350   :  { %14876 = vmatmul.mubr.msk.f32.gmra.mrb[54].mxu0 %vm90_vm1, %v26795_v7  ;;  %v3464_v7 = vrot.slane %v439_v35, 1  ;;  %v26803_v35 = vld [vmem:[#allocation83_spill] sm:$0xff] }
 0x351   :  { %14878 = vmatprep.mubr.msk.f32.mxu0 %vm90_vm1, %v19012_v43  ;;  %v19609_v43 = vsel %vm1777_vm3, %v3461_v18, %v3462_v37  ;;  %v19625_v18 = vld [vmem:[%s25848_s1 + $0x20] sm:$0xf] }
 0x352   :  { %26799 = vst [vmem:[#allocation138_spill] sm:$0xff] %v19609_v43 }
 0x354   :  { %14879 = vmatmul.mubr.msk.f32.gmra.mrb[56].mxu0 %vm90_vm1, %v19033_v10  ;;  %v19686_v10 = vld [vmem:[#allocation2 + $0x230] sm:$0xff] }
 0x355   :  { %14881 = vmatprep.mubr.msk.f32.mxu0 %vm90_vm1, %v26796_v49  ;;  %v19616_v49 = vsel %vm1777_vm3, %v3462_v37, %v3464_v7  ;;  %v26805_v37 = vld [vmem:[#allocation85_spill] sm:$0xff]  ;;  %v26807_v7 = vld [vmem:[#allocation87_spill] sm:$0xff] }
 0x356   :  { %26801 = vst [vmem:[#allocation139_spill] sm:$0xff] %v19616_v49 }
 0x358   :  { %14882 = vmatmul.mubr.msk.f32.gmra.mrb[58].mxu0 %vm90_vm1, %v26797_v8  ;;  %v26802_v8 = vld [vmem:[#allocation82_spill] sm:$0xff] }
 0x359   :  { %14884 = vmatprep.mubr.msk.f32.mxu0 %vm90_vm1, %v26798_v16  ;;  %v26827_v16 = vld [vmem:[#allocation107_spill] sm:$0xff] }
 0x35c   :  { %14885 = vmatmul.mubr.msk.f32.gmra.mrb[60].mxu0 %vm90_vm1, %v26800_v4  ;;  %v26812_v4 = vld [vmem:[#allocation92_spill] sm:$0xff] }
 0x35d   :  { %14887 = vmatprep.mubr.msk.f32.mxu0 %vm90_vm1, %v19609_v43  ;;  %v26804_v43 = vld [vmem:[#allocation84_spill] sm:$0xff] }
 0x360   :  { %14888 = vmatmul.mubr.msk.f32.gmra.mrb[62].mxu0 %vm90_vm1, %v19616_v49  ;;  %v26808_v49 = vld [vmem:[#allocation88_spill] sm:$0xff] }
 0x361   :  { %14892 = vmatprep.mubr.msk.f32.mxu0 %vm90_vm1, %v26802_v8  ;;  %v26806_v8 = vld [vmem:[#allocation86_spill] sm:$0xff] }
 0x364   :  { %14893 = vmatmul.mubr.msk.f32.vlgmr.msra.gmra.mrb[0].mxu0 %vm90_vm1, %v26803_v35  ;;  %v26809_v35 = vld [vmem:[#allocation89_spill] sm:$0xff] }
 0x365   :  { %14989 = vmatpush3.msk.msra.mxu0 %vm840_vm0, %v19472_v55  ;;  %14895 = vmatprep.mubr.msk.f32.mxu0 %vm90_vm1, %v26804_v43  ;;  %v26810_v55 = vld [vmem:[#allocation90_spill] sm:$0xff]  ;;  %v26811_v43 = vld [vmem:[#allocation91_spill] sm:$0xff] }
 0x366   :  { %15086 = vmatprep.subr.msk.mxu0 %vm840_vm0, %v19625_v18 }
 0x368   :  { %14896 = vmatmul.mubr.msk.f32.gmra.mrb[2].mxu0 %vm90_vm1, %v26805_v37  ;;  %v26813_v37 = vld [vmem:[#allocation93_spill] sm:$0xff] }
 0x369   :  { %14898 = vmatprep.mubr.msk.f32.mxu0 %vm90_vm1, %v26806_v8  ;;  %v26814_v8 = vld [vmem:[#allocation94_spill] sm:$0xff] }
 0x36c   :  { %14899 = vmatmul.mubr.msk.f32.gmra.mrb[4].mxu0 %vm90_vm1, %v26807_v7  ;;  %v26815_v7 = vld [vmem:[#allocation95_spill] sm:$0xff] }
 0x36d   :  { %14901 = vmatprep.mubr.msk.f32.mxu0 %vm90_vm1, %v26808_v49  ;;  %v26816_v49 = vld [vmem:[#allocation96_spill] sm:$0xff] }
 0x370   :  { %14902 = vmatmul.mubr.msk.f32.gmra.mrb[6].mxu0 %vm90_vm1, %v26809_v35  ;;  %v26817_v35 = vld [vmem:[#allocation97_spill] sm:$0xff] }
 0x371   :  { %14904 = vmatprep.mubr.msk.f32.mxu0 %vm90_vm1, %v26810_v55  ;;  %v26818_v55 = vld [vmem:[#allocation98_spill] sm:$0xff] }
 0x374   :  { %14905 = vmatmul.mubr.msk.f32.gmra.mrb[8].mxu0 %vm90_vm1, %v26811_v43  ;;  %v26819_v43 = vld [vmem:[#allocation99_spill] sm:$0xff] }
 0x375   :  { %14907 = vmatprep.mubr.msk.f32.mxu0 %vm90_vm1, %v26812_v4  ;;  %v26820_v4 = vld [vmem:[#allocation100_spill] sm:$0xff] }
 0x378   :  { %14908 = vmatmul.mubr.msk.f32.gmra.mrb[10].mxu0 %vm90_vm1, %v26813_v37  ;;  %v26821_v37 = vld [vmem:[#allocation101_spill] sm:$0xff] }
 0x379   :  { %14910 = vmatprep.mubr.msk.f32.mxu0 %vm90_vm1, %v26814_v8  ;;  %v26822_v8 = vld [vmem:[#allocation102_spill] sm:$0xff] }
 0x37c   :  { %14911 = vmatmul.mubr.msk.f32.gmra.mrb[12].mxu0 %vm90_vm1, %v26815_v7  ;;  %v26823_v7 = vld [vmem:[#allocation103_spill] sm:$0xff] }
 0x37d   :  { %14913 = vmatprep.mubr.msk.f32.mxu0 %vm90_vm1, %v26816_v49  ;;  %v26824_v49 = vld [vmem:[#allocation104_spill] sm:$0xff] }
 0x380   :  { %14914 = vmatmul.mubr.msk.f32.gmra.mrb[14].mxu0 %vm90_vm1, %v26817_v35  ;;  %v26825_v35 = vld [vmem:[#allocation105_spill] sm:$0xff] }
 0x381   :  { %14916 = vmatprep.mubr.msk.f32.mxu0 %vm90_vm1, %v26818_v55  ;;  %v26826_v55 = vld [vmem:[#allocation106_spill] sm:$0xff] }
 0x384   :  { %14917 = vmatmul.mubr.msk.f32.gmra.mrb[16].mxu0 %vm90_vm1, %v26819_v43  ;;  %v368_v43 = vld [vmem:[#allocation2 + $0x220] sm:$0xff] }
 0x385   :  { %14919 = vmatprep.mubr.msk.f32.mxu0 %vm90_vm1, %v26820_v4  ;;  %v19679_v4 = vld [vmem:[#allocation2 + $0x228] sm:$0xff] }
 0x388   :  { %14920 = vmatmul.mubr.msk.f32.gmra.mrb[18].mxu0 %vm90_vm1, %v26821_v37  ;;  %v26828_v37 = vld [vmem:[#allocation108_spill] sm:$0xff] }
 0x389   :  { %14922 = vmatprep.mubr.msk.f32.mxu0 %vm90_vm1, %v26822_v8  ;;  %v3932_v8 = vrot.slane %v368_v43, 7  ;;  %v26832_v43 = vld [vmem:[#allocation112_spill] sm:$0xff] }
 0x38c   :  { %14923 = vmatmul.mubr.msk.f32.gmra.mrb[20].mxu0 %vm90_vm1, %v26823_v7  ;;  %v3933_v7 = vrot.slane %v19679_v4, 7 }
 0x38d   :  { %14925 = vmatprep.mubr.msk.f32.mxu0 %vm90_vm1, %v26824_v49  ;;  %v26829_v49 = vld [vmem:[#allocation109_spill] sm:$0xff] }
 0x38e   :  { %v3934_v30 = vsel %vm551_vm2, %v3932_v8, %v3933_v7  ;;  %v26836_v8 = vld [vmem:[#allocation116_spill] sm:$0xff] }
 0x390   :  { %14926 = vmatmul.mubr.msk.f32.gmra.mrb[22].mxu0 %vm90_vm1, %v26825_v35  ;;  %v26830_v35 = vld [vmem:[#allocation80_spill] sm:$0xff] }
 0x391   :  { %14928 = vmatprep.mubr.msk.f32.mxu0 %vm90_vm1, %v26826_v55  ;;  %v3935_v55 = vrot.slane %v19686_v10, 7 }
 0x394   :  { %14929 = vmatmul.mubr.msk.f32.gmra.mrb[24].mxu0 %vm90_vm1, %v26827_v16  ;;  %v3936_v16 = vsel %vm551_vm2, %v3933_v7, %v3935_v55  ;;  %v26839_v7 = vld [vmem:[#allocation119_spill] sm:$0xff]  ;;  %v26840_v55 = vld [vmem:[#allocation120_spill] sm:$0xff] }
 0x395   :  { %14931 = vmatprep.mubr.msk.f32.mxu0 %vm90_vm1, %v26828_v37  ;;  %v26833_v37 = vld [vmem:[#allocation113_spill] sm:$0xff] }
 0x398   :  { %14932 = vmatmul.mubr.msk.f32.gmra.mrb[26].mxu0 %vm90_vm1, %v26829_v49  ;;  %v26834_v49 = vld [vmem:[#allocation114_spill] sm:$0xff] }
 0x399   :  { %14934 = vmatprep.mubr.msk.f32.mxu0 %vm90_vm1, %v26830_v35  ;;  %v26835_v35 = vld [vmem:[#allocation115_spill] sm:$0xff] }
 0x39c   :  { %14935 = vmatmul.mubr.msk.f32.gmra.mrb[28].mxu0 %vm90_vm1, %v26831_v12  ;;  %v26837_v12 = vld [vmem:[#allocation117_spill] sm:$0xff] }
 0x39d   :  { %14937 = vmatprep.mubr.msk.f32.mxu0 %vm90_vm1, %v3934_v30  ;;  %v26838_v30 = vld [vmem:[#allocation118_spill] sm:$0xff] }
 0x3a0   :  { %14938 = vmatmul.mubr.msk.f32.gmra.mrb[30].mxu0 %vm90_vm1, %v3936_v16  ;;  %v26841_v16 = vld [vmem:[#allocation121_spill] sm:$0xff] }
 0x3a1   :  { %14940 = vmatprep.mubr.msk.f32.mxu0 %vm90_vm1, %v26832_v43  ;;  %v26842_v43 = vld [vmem:[#allocation122_spill] sm:$0xff] }
 0x3a4   :  { %14941 = vmatmul.mubr.msk.f32.gmra.mrb[32].mxu0 %vm90_vm1, %v26833_v37  ;;  %v26843_v37 = vld [vmem:[#allocation123_spill] sm:$0xff] }
 0x3a5   :  { %14943 = vmatprep.mubr.msk.f32.mxu0 %vm90_vm1, %v26834_v49  ;;  %v26844_v49 = vld [vmem:[#allocation124_spill] sm:$0xff] }
 0x3a8   :  { %14944 = vmatmul.mubr.msk.f32.gmra.mrb[34].mxu0 %vm90_vm1, %v26835_v35  ;;  %v26845_v35 = vld [vmem:[#allocation125_spill] sm:$0xff] }
 0x3a9   :  { %14946 = vmatprep.mubr.msk.f32.mxu0 %vm90_vm1, %v26836_v8  ;;  %v26846_v8 = vld [vmem:[#allocation126_spill] sm:$0xff] }
 0x3ac   :  { %14947 = vmatmul.mubr.msk.f32.gmra.mrb[36].mxu0 %vm90_vm1, %v26837_v12  ;;  %v26847_v12 = vld [vmem:[#allocation127_spill] sm:$0xff] }
 0x3ad   :  { %14949 = vmatprep.mubr.msk.f32.mxu0 %vm90_vm1, %v26838_v30  ;;  %v26848_v30 = vld [vmem:[#allocation128_spill] sm:$0xff] }
 0x3b0   :  { %14950 = vmatmul.mubr.msk.f32.gmra.mrb[38].mxu0 %vm90_vm1, %v26839_v7  ;;  %v26849_v7 = vld [vmem:[#allocation129_spill] sm:$0xff] }
 0x3b1   :  { %14952 = vmatprep.mubr.msk.f32.mxu0 %vm90_vm1, %v26840_v55  ;;  %v26850_v55 = vld [vmem:[#allocation130_spill] sm:$0xff] }
 0x3b4   :  { %14953 = vmatmul.mubr.msk.f32.gmra.mrb[40].mxu0 %vm90_vm1, %v26841_v16  ;;  %v26851_v16 = vld [vmem:[#allocation131_spill] sm:$0xff] }
 0x3b5   :  { %14955 = vmatprep.mubr.msk.f32.mxu0 %vm90_vm1, %v26842_v43  ;;  %v26852_v43 = vld [vmem:[#allocation132_spill] sm:$0xff] }
 0x3b8   :  { %14956 = vmatmul.mubr.msk.f32.gmra.mrb[42].mxu0 %vm90_vm1, %v26843_v37  ;;  %v26853_v37 = vld [vmem:[#allocation75_spill] sm:$0xff] }
 0x3b9   :  { %14958 = vmatprep.mubr.msk.f32.mxu0 %vm90_vm1, %v26844_v49  ;;  %v26854_v49 = vld [vmem:[#allocation133_spill] sm:$0xff] }
 0x3bc   :  { %14959 = vmatmul.mubr.msk.f32.gmra.mrb[44].mxu0 %vm90_vm1, %v26845_v35  ;;  %v440_v35 = vld [vmem:[#allocation2 + $0x460] sm:$0xff] }
 0x3bd   :  { %14961 = vmatprep.mubr.msk.f32.mxu0 %vm90_vm1, %v26846_v8  ;;  %v19749_v8 = vld [vmem:[#allocation2 + $0x468] sm:$0xff] }
 0x3c0   :  { %14962 = vmatmul.mubr.msk.f32.gmra.mrb[46].mxu0 %vm90_vm1, %v26847_v12  ;;  %v26855_v12 = vld [vmem:[#allocation78_spill] sm:$0xff] }
 0x3c1   :  { %14964 = vmatprep.mubr.msk.f32.mxu0 %vm90_vm1, %v26848_v30  ;;  %v26856_v30 = vld [vmem:[#allocation79_spill] sm:$0xff] }
 0x3c4   :  { %14965 = vmatmul.mubr.msk.f32.gmra.mrb[48].mxu0 %vm90_vm1, %v26849_v7  ;;  %v3937_v7 = vrot.slane %v440_v35, 7  ;;  %v26860_v35 = vld [vmem:[#allocation148_spill] sm:$0xff] }
 0x3c5   :  { %14967 = vmatprep.mubr.msk.f32.mxu0 %vm90_vm1, %v26850_v55  ;;  %v3938_v55 = vrot.slane %v19749_v8, 7 }
 0x3c8   :  { %14968 = vmatmul.mubr.msk.f32.gmra.mrb[50].mxu0 %vm90_vm1, %v26851_v16  ;;  %v19756_v16 = vld [vmem:[#allocation2 + $0x470] sm:$0xff] }
 0x3c9   :  { %14970 = vmatprep.mubr.msk.f32.mxu0 %vm90_vm1, %v26852_v43  ;;  %v3939_v43 = vsel %vm551_vm2, %v3937_v7, %v3938_v55  ;;  %v26864_v7 = vld [vmem:[#allocation152_spill] sm:$0xff] }
 0x3cc   :  { %14971 = vmatmul.mubr.msk.f32.gmra.mrb[52].mxu0 %vm90_vm1, %v26853_v37 }
 0x3cd   :  { %14973 = vmatprep.mubr.msk.f32.mxu0 %vm90_vm1, %v26854_v49  ;;  %v26858_v49 = vld [vmem:[#allocation111_spill] sm:$0xff] }
 0x3d0   :  { %14974 = vmatmul.mubr.msk.f32.gmra.mrb[54].mxu0 %vm90_vm1, %v18625_v61  ;;  %v26857_v61 = vld [vmem:[#allocation110_spill] sm:$0xff] }
 0x3d1   :  { %14976 = vmatprep.mubr.msk.f32.mxu0 %vm90_vm1, %v26734_v40  ;;  %v3940_v40 = vrot.slane %v19756_v16, 7 }
 0x3d3   :  { %v3941_v37 = vsel %vm551_vm2, %v3938_v55, %v3940_v40  ;;  %v26865_v55 = vld [vmem:[#allocation153_spill] sm:$0xff]  ;;  %v26868_v40 = vld [vmem:[#allocation156_spill] sm:$0xff] }
 0x3d4   :  { %14977 = vmatmul.mubr.msk.f32.gmra.mrb[56].mxu0 %vm90_vm1, %v26855_v12  ;;  %v26861_v12 = vld [vmem:[#allocation149_spill] sm:$0xff] }
 0x3d5   :  { %14979 = vmatprep.mubr.msk.f32.mxu0 %vm90_vm1, %v26856_v30  ;;  %v26863_v30 = vld [vmem:[#allocation151_spill] sm:$0xff] }
 0x3d8   :  { %14980 = vmatmul.mubr.msk.f32.gmra.mrb[58].mxu0 %vm90_vm1, %v18648_v38  ;;  %v26859_v38 = vld [vmem:[#allocation77_spill] sm:$0xff] }
 0x3d9   :  { %14982 = vmatprep.mubr.msk.f32.mxu0 %vm90_vm1, %v26857_v61  ;;  %v26866_v61 = vld [vmem:[#allocation154_spill] sm:$0xff] }
 0x3dc   :  { %14983 = vmatmul.mubr.msk.f32.gmra.mrb[60].mxu0 %vm90_vm1, %v19220_v13  ;;  %v26862_v13 = vld [vmem:[#allocation150_spill] sm:$0xff] }
 0x3dd   :  { %14985 = vmatprep.mubr.msk.f32.mxu0 %vm90_vm1, %v3939_v43  ;;  %v26869_v43 = vld [vmem:[#allocation157_spill] sm:$0xff] }
 0x3e0   :  { %14986 = vmatmul.mubr.msk.f32.gmra.mrb[62].mxu0 %vm90_vm1, %v3941_v37  ;;  %v26870_v37 = vld [vmem:[#allocation158_spill] sm:$0xff] }
 0x3e1   :  { %14990 = vmatprep.mubr.msk.f32.mxu0 %vm90_vm1, %v26858_v49  ;;  %v26871_v49 = vld [vmem:[#allocation159_spill] sm:$0xff] }
 0x3e4   :  { %14991 = vmatmul.mubr.msk.f32.vlgmr.msra.gmra.mrb[0].mxu0 %vm90_vm1, %v26859_v38  ;;  %v26872_v38 = vld [vmem:[#allocation160_spill] sm:$0xff] }
 0x3e5   :  { %15087 = vmatpush3.msk.msra.mxu0 %vm840_vm0, %v19625_v18  ;;  %14993 = vmatprep.mubr.msk.f32.mxu0 %vm90_vm1, %v26860_v35  ;;  %v26867_v18 = vld [vmem:[#allocation155_spill] sm:$0xff]  ;;  %v26873_v35 = vld [vmem:[#allocation161_spill] sm:$0xff] }
 0x3e8   :  { %14994 = vmatmul.mubr.msk.f32.gmra.mrb[2].mxu0 %vm90_vm1, %v26861_v12  ;;  %v26874_v12 = vld [vmem:[#allocation162_spill] sm:$0xff] }
 0x3e9   :  { %14996 = vmatprep.mubr.msk.f32.mxu0 %vm90_vm1, %v26862_v13  ;;  %v26875_v13 = vld [vmem:[#allocation163_spill] sm:$0xff] }
 0x3ec   :  { %14997 = vmatmul.mubr.msk.f32.gmra.mrb[4].mxu0 %vm90_vm1, %v26863_v30  ;;  %v26876_v30 = vld [vmem:[#allocation164_spill] sm:$0xff] }
 0x3ed   :  { %14999 = vmatprep.mubr.msk.f32.mxu0 %vm90_vm1, %v26864_v7  ;;  %v26877_v7 = vld [vmem:[#allocation165_spill] sm:$0xff] }
 0x3f0   :  { %15000 = vmatmul.mubr.msk.f32.gmra.mrb[6].mxu0 %vm90_vm1, %v26865_v55  ;;  %v26878_v55 = vld [vmem:[#allocation166_spill] sm:$0xff] }
 0x3f1   :  { %15002 = vmatprep.mubr.msk.f32.mxu0 %vm90_vm1, %v26866_v61  ;;  %v26879_v61 = vld [vmem:[#allocation167_spill] sm:$0xff] }
 0x3f4   :  { %15003 = vmatmul.mubr.msk.f32.gmra.mrb[8].mxu0 %vm90_vm1, %v26867_v18  ;;  %v26880_v18 = vld [vmem:[#allocation168_spill] sm:$0xff] }
 0x3f5   :  { %15005 = vmatprep.mubr.msk.f32.mxu0 %vm90_vm1, %v26868_v40  ;;  %v26881_v40 = vld [vmem:[#allocation169_spill] sm:$0xff] }
 0x3f8   :  { %15006 = vmatmul.mubr.msk.f32.gmra.mrb[10].mxu0 %vm90_vm1, %v26869_v43  ;;  %v26882_v43 = vld [vmem:[#allocation170_spill] sm:$0xff] }
 0x3f9   :  { %15008 = vmatprep.mubr.msk.f32.mxu0 %vm90_vm1, %v26870_v37  ;;  %v26883_v37 = vld [vmem:[#allocation171_spill] sm:$0xff] }
 0x3fc   :  { %15009 = vmatmul.mubr.msk.f32.gmra.mrb[12].mxu0 %vm90_vm1, %v26871_v49  ;;  %v26884_v49 = vld [vmem:[#allocation172_spill] sm:$0xff] }
 0x3fd   :  { %15011 = vmatprep.mubr.msk.f32.mxu0 %vm90_vm1, %v26872_v38  ;;  %v26885_v38 = vld [vmem:[#allocation173_spill] sm:$0xff] }
 0x400   :  { %15012 = vmatmul.mubr.msk.f32.gmra.mrb[14].mxu0 %vm90_vm1, %v26873_v35  ;;  %v26886_v35 = vld [vmem:[#allocation174_spill] sm:$0xff] }
 0x401   :  { %15014 = vmatprep.mubr.msk.f32.mxu0 %vm90_vm1, %v26874_v12  ;;  %v26887_v12 = vld [vmem:[#allocation175_spill] sm:$0xff] }
 0x404   :  { %15015 = vmatmul.mubr.msk.f32.gmra.mrb[16].mxu0 %vm90_vm1, %v26875_v13  ;;  %v26888_v13 = vld [vmem:[#allocation176_spill] sm:$0xff] }
 0x405   :  { %15017 = vmatprep.mubr.msk.f32.mxu0 %vm90_vm1, %v26876_v30  ;;  %v26891_v30 = vld [vmem:[#allocation179_spill] sm:$0xff] }
 0x408   :  { %15018 = vmatmul.mubr.msk.f32.gmra.mrb[18].mxu0 %vm90_vm1, %v26877_v7  ;;  %v26892_v7 = vld [vmem:[#allocation180_spill] sm:$0xff] }
 0x409   :  { %15020 = vmatprep.mubr.msk.f32.mxu0 %vm90_vm1, %v26878_v55  ;;  %v26894_v55 = vld [vmem:[#allocation182_spill] sm:$0xff] }
 0x40c   :  { %15021 = vmatmul.mubr.msk.f32.gmra.mrb[20].mxu0 %vm90_vm1, %v26879_v61  ;;  %v26895_v61 = vld [vmem:[#allocation183_spill] sm:$0xff] }
 0x40d   :  { %15023 = vmatprep.mubr.msk.f32.mxu0 %vm90_vm1, %v26880_v18  ;;  %v26896_v18 = vld [vmem:[#allocation184_spill] sm:$0xff] }
 0x410   :  { %15024 = vmatmul.mubr.msk.f32.gmra.mrb[22].mxu0 %vm90_vm1, %v26881_v40  ;;  %v26897_v40 = vld [vmem:[#allocation185_spill] sm:$0xff] }
 0x411   :  { %15026 = vmatprep.mubr.msk.f32.mxu0 %vm90_vm1, %v26882_v43  ;;  %v26898_v43 = vld [vmem:[#allocation186_spill] sm:$0xff] }
 0x414   :  { %15027 = vmatmul.mubr.msk.f32.gmra.mrb[24].mxu0 %vm90_vm1, %v26883_v37  ;;  %v26899_v37 = vld [vmem:[#allocation187_spill] sm:$0xff] }
 0x415   :  { %15029 = vmatprep.mubr.msk.f32.mxu0 %vm90_vm1, %v26884_v49  ;;  %v26900_v49 = vld [vmem:[#allocation188_spill] sm:$0xff] }
 0x418   :  { %15030 = vmatmul.mubr.msk.f32.gmra.mrb[26].mxu0 %vm90_vm1, %v26885_v38  ;;  %v26901_v38 = vld [vmem:[#allocation189_spill] sm:$0xff] }
 0x419   :  { %15032 = vmatprep.mubr.msk.f32.mxu0 %vm90_vm1, %v19122_v15  ;;  %v26889_v15 = vld [vmem:[#allocation177_spill] sm:$0xff] }
 0x41c   :  { %15033 = vmatmul.mubr.msk.f32.gmra.mrb[28].mxu0 %vm90_vm1, %v19129_v28  ;;  %v26890_v28 = vld [vmem:[#allocation178_spill] sm:$0xff] }
 0x41d   :  { %15035 = vmatprep.mubr.msk.f32.mxu0 %vm90_vm1, %v19679_v4 }
 0x420   :  { %15036 = vmatmul.mubr.msk.f32.gmra.mrb[30].mxu0 %vm90_vm1, %v19686_v10 }
 0x421   :  { %15038 = vmatprep.mubr.msk.f32.mxu0 %vm90_vm1, %v19353_v50  ;;  %v26893_v50 = vld [vmem:[#allocation181_spill] sm:$0xff] }
 0x424   :  { %15039 = vmatmul.mubr.msk.f32.gmra.mrb[32].mxu0 %vm90_vm1, %v26886_v35  ;;  %v26902_v35 = vld [vmem:[#allocation190_spill] sm:$0xff] }
 0x425   :  { %15041 = vmatprep.mubr.msk.f32.mxu0 %vm90_vm1, %v26887_v12  ;;  %v26903_v12 = vld [vmem:[#allocation191_spill] sm:$0xff] }
 0x428   :  { %15042 = vmatmul.mubr.msk.f32.gmra.mrb[34].mxu0 %vm90_vm1, %v26888_v13  ;;  %v26904_v13 = vld [vmem:[#allocation192_spill] sm:$0xff] }
 0x429   :  { %15044 = vmatprep.mubr.msk.f32.mxu0 %vm90_vm1, %v26889_v15  ;;  %v26905_v15 = vld [vmem:[#allocation193_spill] sm:$0xff] }
 0x42c   :  { %15045 = vmatmul.mubr.msk.f32.gmra.mrb[36].mxu0 %vm90_vm1, %v26890_v28  ;;  %v26906_v28 = vld [vmem:[#allocation194_spill] sm:$0xff] }
 0x42d   :  { %15047 = vmatprep.mubr.msk.f32.mxu0 %vm90_vm1, %v26891_v30  ;;  %v26907_v30 = vld [vmem:[#allocation195_spill] sm:$0xff] }
 0x430   :  { %15048 = vmatmul.mubr.msk.f32.gmra.mrb[38].mxu0 %vm90_vm1, %v26892_v7 }
 0x431   :  { %15050 = vmatprep.mubr.msk.f32.mxu0 %vm90_vm1, %v26893_v50 }
 0x434   :  { %15051 = vmatmul.mubr.msk.f32.gmra.mrb[40].mxu0 %vm90_vm1, %v26894_v55 }
 0x435   :  { %15053 = vmatprep.mubr.msk.f32.mxu0 %vm90_vm1, %v26895_v61 }
 0x438   :  { %15054 = vmatmul.mubr.msk.f32.gmra.mrb[42].mxu0 %vm90_vm1, %v26896_v18 }
 0x439   :  { %15056 = vmatprep.mubr.msk.f32.mxu0 %vm90_vm1, %v26897_v40 }
 0x43c   :  { %15057 = vmatmul.mubr.msk.f32.gmra.mrb[44].mxu0 %vm90_vm1, %v26898_v43 }
 0x43d   :  { %15059 = vmatprep.mubr.msk.f32.mxu0 %vm90_vm1, %v26899_v37 }
 0x440   :  { %15060 = vmatmul.mubr.msk.f32.gmra.mrb[46].mxu0 %vm90_vm1, %v26900_v49 }
 0x441   :  { %15062 = vmatprep.mubr.msk.f32.mxu0 %vm90_vm1, %v26901_v38 }
 0x444   :  { %15063 = vmatmul.mubr.msk.f32.gmra.mrb[48].mxu0 %vm90_vm1, %v26902_v35 }
 0x445   :  { %15065 = vmatprep.mubr.msk.f32.mxu0 %vm90_vm1, %v26903_v12 }
 0x448   :  { %15066 = vmatmul.mubr.msk.f32.gmra.mrb[50].mxu0 %vm90_vm1, %v26904_v13 }
 0x449   :  { %15068 = vmatprep.mubr.msk.f32.mxu0 %vm90_vm1, %v26905_v15 }
 0x44c   :  { %15069 = vmatmul.mubr.msk.f32.gmra.mrb[52].mxu0 %vm90_vm1, %v26906_v28 }
 0x44d   :  { %15071 = vmatprep.mubr.msk.f32.mxu0 %vm90_vm1, %v19441_v6 }
 0x450   :  { %15072 = vmatmul.mubr.msk.f32.gmra.mrb[54].mxu0 %vm90_vm1, %v19445_v21 }
 0x451   :  { %15074 = vmatprep.mubr.msk.f32.mxu0 %vm90_vm1, %v19449_v26 }
 0x454   :  { %15075 = vmatmul.mubr.msk.f32.gmra.mrb[56].mxu0 %vm90_vm1, %v26907_v30 }
 0x455   :  { %15077 = vmatprep.mubr.msk.f32.mxu0 %vm90_vm1, %v19040_v23 }
 0x458   :  { %15078 = vmatmul.mubr.msk.f32.gmra.mrb[58].mxu0 %vm90_vm1, %v19459_v36 }
 0x459   :  { %15080 = vmatprep.mubr.msk.f32.mxu0 %vm90_vm1, %v19198_v17 }
 0x45c   :  { %15081 = vmatmul.mubr.msk.f32.gmra.mrb[60].mxu0 %vm90_vm1, %v19205_v19 }
 0x45d   :  { %15083 = vmatprep.mubr.msk.f32.mxu0 %vm90_vm1, %v19749_v8 }
 0x460   :  { %15084 = vmatmul.mubr.msk.f32.gmra.mrb[62].mxu0 %vm90_vm1, %v19756_v16 }
 0x461   :  { %15088 = vmatprep.mubr.msk.f32.mxu0 %vm90_vm1, %v18678_v31  ;;  %v26908_v31 = vld [vmem:[#allocation23_spill] sm:$0xff] }
 0x464   :  { %15089 = vmatmul.mubr.msk.f32.vlgmr.msra.gmra.mrb[0].mxu0 %vm90_vm1, %v18689_v27  ;;  %v26909_v27 = vld [vmem:[#allocation134_spill] sm:$0xff] }
 0x465   :  { %15091 = vmatprep.mubr.msk.f32.mxu0 %vm90_vm1, %v18692_v46  ;;  %v26910_v46 = vld [vmem:[#allocation137_spill] sm:$0xff] }
 0x468   :  { %15092 = vmatmul.mubr.msk.f32.gmra.mrb[2].mxu0 %vm90_vm1, %v18701_v3  ;;  %v4864_v3 = vrot.slane %v19679_v4, 1 }
 0x469   :  { %15094 = vmatprep.mubr.msk.f32.mxu0 %vm90_vm1, %v18704_v22  ;;  %v4865_v22 = vrot.slane %v19686_v10, 1 }
 0x46c   :  { %15095 = vmatmul.mubr.msk.f32.gmra.mrb[4].mxu0 %vm90_vm1, %v18713_v47  ;;  %v371_v47 = vld [vmem:[#allocation2 + $0x238] sm:$0xff] }
 0x46d   :  { %15097 = vmatprep.mubr.msk.f32.mxu0 %vm90_vm1, %v18716_v32  ;;  %v4867_v32 = vrot.slane %v371_v47, 1 }
 0x470   :  { %15098 = vmatmul.mubr.msk.f32.gmra.mrb[6].mxu0 %vm90_vm1, %v18725_v60  ;;  %v4866_v60 = vsel %vm1777_vm3, %v4864_v3, %v4865_v22 }
 0x471   :  { %15100 = vmatprep.mubr.msk.f32.mxu0 %vm90_vm1, %v18728_v33  ;;  %v4868_v33 = vsel %vm1777_vm3, %v4865_v22, %v4867_v32 }
 0x474   :  { %15101 = vmatmul.mubr.msk.f32.gmra.mrb[8].mxu0 %vm90_vm1, %v18737_v0  ;;  %v26911_v0 = vld [vmem:[#allocation64_spill] sm:$0xff] }
 0x475   :  { %15103 = vmatprep.mubr.msk.f32.mxu0 %vm90_vm1, %v18740_v14  ;;  %v26912_v14 = vld [vmem:[#allocation65_spill] sm:$0xff] }
 0x478   :  { %15104 = vmatmul.mubr.msk.f32.gmra.mrb[10].mxu0 %vm90_vm1, %v18749_v25  ;;  %v26913_v25 = vld [vmem:[#allocation66_spill] sm:$0xff] }
 0x479   :  { %15106 = vmatprep.mubr.msk.f32.mxu0 %vm90_vm1, %v18752_v5  ;;  %v26914_v5 = vld [vmem:[#allocation67_spill] sm:$0xff] }
 0x47c   :  { %15107 = vmatmul.mubr.msk.f32.gmra.mrb[12].mxu0 %vm90_vm1, %v18761_v59  ;;  %v26915_v59 = vld [vmem:[#allocation68_spill] sm:$0xff] }
 0x47d   :  { %15109 = vmatprep.mubr.msk.f32.mxu0 %vm90_vm1, %v18764_v41  ;;  %v26916_v41 = vld [vmem:[#allocation69_spill] sm:$0xff] }
 0x480   :  { %15110 = vmatmul.mubr.msk.f32.gmra.mrb[14].mxu0 %vm90_vm1, %v18773_v63  ;;  %v26917_v63 = vld [vmem:[#allocation70_spill] sm:$0xff] }
 0x481   :  { %15112 = vmatprep.mubr.msk.f32.mxu0 %vm90_vm1, %v18776_v44  ;;  %v26918_v44 = vld [vmem:[#allocation71_spill] sm:$0xff] }
 0x484   :  { %15113 = vmatmul.mubr.msk.f32.gmra.mrb[16].mxu0 %vm90_vm1, %v18785_v2  ;;  %v26919_v2 = vld [vmem:[#allocation72_spill] sm:$0xff] }
 0x485   :  { %15115 = vmatprep.mubr.msk.f32.mxu0 %vm90_vm1, %v18788_v57  ;;  %v26920_v57 = vld [vmem:[#allocation73_spill] sm:$0xff] }
 0x488   :  { %15116 = vmatmul.mubr.msk.f32.gmra.mrb[18].mxu0 %vm90_vm1, %v18797_v54  ;;  %v26921_v54 = vld [vmem:[#allocation74_spill] sm:$0xff] }
 0x489   :  { %15118 = vmatprep.mubr.msk.f32.mxu0 %vm90_vm1, %v18800_v62  ;;  %v26922_v62 = vld [vmem:[#allocation76_spill] sm:$0xff] }
 0x48c   :  { %15119 = vmatmul.mubr.msk.f32.gmra.mrb[20].mxu0 %vm90_vm1, %v26908_v31 }
 0x48d   :  { %15121 = vmatprep.mubr.msk.f32.mxu0 %vm90_vm1, %v26909_v27 }
 0x490   :  { %15122 = vmatmul.mubr.msk.f32.gmra.mrb[22].mxu0 %vm90_vm1, %v18833_v48  ;;  %v26924_v48 = vld [vmem:[#allocation143_spill] sm:$0xff] }
 0x491   :  { %15124 = vmatprep.mubr.msk.f32.mxu0 %vm90_vm1, %v26910_v46 }
 0x494   :  { %15125 = vmatmul.mubr.msk.f32.gmra.mrb[24].mxu0 %vm90_vm1, %v18847_v53  ;;  %v26926_v53 = vld [vmem:[#allocation145_spill] sm:$0xff] }
 0x495   :  { %15127 = vmatprep.mubr.msk.f32.mxu0 %vm90_vm1, %v18850_v9  ;;  %v26927_v9 = vld [vmem:[#allocation146_spill] sm:$0xff] }
 0x498   :  { %15128 = vmatmul.mubr.msk.f32.gmra.mrb[26].mxu0 %vm90_vm1, %v18857_v42  ;;  %v4869_v42 = vrot.slane %v19749_v8, 1 }
 0x499   :  { %15130 = vmatprep.mubr.msk.f32.mxu0 %vm90_vm1, %v19537_v1  ;;  %v26923_v1 = vld [vmem:[#allocation140_spill] sm:$0xff] }
 0x49c   :  { %15131 = vmatmul.mubr.msk.f32.gmra.mrb[28].mxu0 %vm90_vm1, %v19544_v58  ;;  %v26925_v58 = vld [vmem:[#allocation144_spill] sm:$0xff] }
 0x49d   :  { %15133 = vmatprep.mubr.msk.f32.mxu0 %vm90_vm1, %v4866_v60 }
 0x4a0   :  { %15134 = vmatmul.mubr.msk.f32.gmra.mrb[30].mxu0 %vm90_vm1, %v4868_v33 }
 0x4a1   :  { %15136 = vmatprep.mubr.msk.f32.mxu0 %vm90_vm1, %v18880_v56  ;;  %v4870_v56 = vrot.slane %v19756_v16, 1 }
 0x4a4   :  { %15137 = vmatmul.mubr.msk.f32.gmra.mrb[32].mxu0 %vm90_vm1, %v18889_v39  ;;  %v443_v39 = vld [vmem:[#allocation2 + $0x478] sm:$0xff] }
 0x4a5   :  { %15139 = vmatprep.mubr.msk.f32.mxu0 %vm90_vm1, %v18892_v51  ;;  %v26928_v51 = vld [vmem:[#allocation147_spill] sm:$0xff] }
 0x4a8   :  { %15140 = vmatmul.mubr.msk.f32.gmra.mrb[34].mxu0 %vm90_vm1, %v18901_v34  ;;  %v26929_v34 = vld [vmem:[#allocation138_spill] sm:$0xff] }
 0x4a9   :  { %15142 = vmatprep.mubr.msk.f32.mxu0 %vm90_vm1, %v18904_v45  ;;  %v4872_v45 = vrot.slane %v443_v39, 1 }
 0x4ac   :  { %15143 = vmatmul.mubr.msk.f32.gmra.mrb[36].mxu0 %vm90_vm1, %v18913_v24  ;;  %v4871_v24 = vsel %vm1777_vm3, %v4869_v42, %v4870_v56 }
 0x4ad   :  { %15145 = vmatprep.mubr.msk.f32.mxu0 %vm90_vm1, %v18916_v29  ;;  %v26930_v29 = vld [vmem:[#allocation139_spill] sm:$0xff] }
 0x4b0   :  { %15146 = vmatmul.mubr.msk.f32.gmra.mrb[38].mxu0 %vm90_vm1, %v18925_v20  ;;  %v4873_v20 = vsel %vm1777_vm3, %v4870_v56, %v4872_v45 }
 0x4b1   :  { %15148 = vmatprep.mubr.msk.f32.mxu0 %vm90_vm1, %v26911_v0 }
 0x4b4   :  { %15149 = vmatmul.mubr.msk.f32.gmra.mrb[40].mxu0 %vm90_vm1, %v26788_v52 }
 0x4b5   :  { %15151 = vmatprep.mubr.msk.f32.mxu0 %vm90_vm1, %v26789_v11 }
 0x4b8   :  { %15152 = vmatmul.mubr.msk.f32.gmra.mrb[42].mxu0 %vm90_vm1, %v26912_v14 }
 0x4b9   :  { %15154 = vmatprep.mubr.msk.f32.mxu0 %vm90_vm1, %v26913_v25 }
 0x4bc   :  { %15155 = vmatmul.mubr.msk.f32.gmra.mrb[44].mxu0 %vm90_vm1, %v26914_v5 }
 0x4bd   :  { %15157 = vmatprep.mubr.msk.f32.mxu0 %vm90_vm1, %v26915_v59 }
 0x4c0   :  { %15158 = vmatmul.mubr.msk.f32.gmra.mrb[46].mxu0 %vm90_vm1, %v26916_v41 }
 0x4c1   :  { %15160 = vmatprep.mubr.msk.f32.mxu0 %vm90_vm1, %v26917_v63 }
 0x4c4   :  { %15161 = vmatmul.mubr.msk.f32.gmra.mrb[48].mxu0 %vm90_vm1, %v26918_v44 }
 0x4c5   :  { %15163 = vmatprep.mubr.msk.f32.mxu0 %vm90_vm1, %v26919_v2 }
 0x4c8   :  { %15164 = vmatmul.mubr.msk.f32.gmra.mrb[50].mxu0 %vm90_vm1, %v26920_v57 }
 0x4c9   :  { %15166 = vmatprep.mubr.msk.f32.mxu0 %vm90_vm1, %v26921_v54 }
 0x4cc   :  { %15167 = vmatmul.mubr.msk.f32.gmra.mrb[52].mxu0 %vm90_vm1, %v26922_v62 }
 0x4cd   :  { %15169 = vmatprep.mubr.msk.f32.mxu0 %vm90_vm1, %v26923_v1 }
 0x4d0   :  { %15170 = vmatmul.mubr.msk.f32.gmra.mrb[54].mxu0 %vm90_vm1, %v26924_v48 }
 0x4d1   :  { %15172 = vmatprep.mubr.msk.f32.mxu0 %vm90_vm1, %v26925_v58 }
 0x4d4   :  { %15173 = vmatmul.mubr.msk.f32.gmra.mrb[56].mxu0 %vm90_vm1, %v26926_v53 }
 0x4d5   :  { %15175 = vmatprep.mubr.msk.f32.mxu0 %vm90_vm1, %v26927_v9 }
 0x4d8   :  { %15176 = vmatmul.mubr.msk.f32.gmra.mrb[58].mxu0 %vm90_vm1, %v26928_v51 }
 0x4d9   :  { %15178 = vmatprep.mubr.msk.f32.mxu0 %vm90_vm1, %v26929_v34 }
 0x4dc   :  { %15179 = vmatmul.mubr.msk.f32.gmra.mrb[60].mxu0 %vm90_vm1, %v26930_v29 }
 0x4dd   :  { %15181 = vmatprep.mubr.msk.f32.mxu0 %vm90_vm1, %v4871_v24 }
 0x4e0   :  { %15182 = vmatmul.mubr.msk.f32.gmra.mrb[62].mxu0 %vm90_vm1, %v4873_v20 }
 0x537   :  { %v20031_v10 = vpop.f32.mrb[0].mxu0 }
 0x538   :  { %v5335_v21 = vsel %vm90_vm1, %v20031_v10, 0.0  ;;  %v20035_v23 = vpop.f32.mrb[1].mxu0 }
 0x539   :  { %v5334_v19 = vsel %vm90_vm1, %v20035_v23, 0.0 }
 0x53a   :  { %v5336_v17 = vadd.f32 %v5335_v21, %v5334_v19 }
 0x53b   :  { %v20039_v36 = vpop.f32.mrb[2].mxu0 }
 0x53c   :  { %v20041_v6 = vpop.f32.mrb[3].mxu0  ;;  %v5339_v11 = vsel %vm90_vm1, %v20039_v36, 0.0 }
 0x53d   :  { %v5337_v26 = vsel %vm90_vm1, %v20041_v6, 0.0 }
 0x53e   :  { %v5338_v52 = vadd.f32 %v5337_v26, %v5336_v17 }
 0x53f   :  { %v20047_v4 = vpop.f32.mrb[4].mxu0 }
 0x540   :  { %v5340_v8 = vadd.f32 %v5339_v11, %v5338_v52  ;;  %v20049_v16 = vpop.f32.mrb[5].mxu0  ;;  %v5343_v55 = vsel %vm90_vm1, %v20047_v4, 0.0 }
 0x541   :  { %v5341_v7 = vsel %vm90_vm1, %v20049_v16, 0.0 }
 0x542   :  { %v5342_v50 = vadd.f32 %v5341_v7, %v5340_v8 }
 0x543   :  { %v20055_v61 = vpop.f32.mrb[6].mxu0 }
 0x544   :  { %v20057_v18 = vpop.f32.mrb[7].mxu0  ;;  %v5344_v40 = vadd.f32 %v5343_v55, %v5342_v50  ;;  %v5347_v49 = vsel %vm90_vm1, %v20055_v61, 0.0 }
 0x545   :  { %v5345_v43 = vsel %vm90_vm1, %v20057_v18, 0.0 }
 0x546   :  { %v5346_v37 = vadd.f32 %v5345_v43, %v5344_v40 }
 0x547   :  { %v20063_v38 = vpop.f32.mrb[8].mxu0 }
 0x548   :  { %v20065_v35 = vpop.f32.mrb[9].mxu0  ;;  %v5348_v12 = vadd.f32 %v5347_v49, %v5346_v37  ;;  %v5351_v28 = vsel %vm90_vm1, %v20063_v38, 0.0 }
 0x549   :  { %v5349_v13 = vsel %vm90_vm1, %v20065_v35, 0.0 }
 0x54a   :  { %v5350_v15 = vadd.f32 %v5349_v13, %v5348_v12 }
 0x54b   :  { %v20071_v30 = vpop.f32.mrb[10].mxu0 }
 0x54c   :  { %v20073_v31 = vpop.f32.mrb[11].mxu0  ;;  %v5352_v27 = vadd.f32 %v5351_v28, %v5350_v15  ;;  %v5355_v22 = vsel %vm90_vm1, %v20071_v30, 0.0 }
 0x54d   :  { %v5353_v46 = vsel %vm90_vm1, %v20073_v31, 0.0 }
 0x54e   :  { %v5354_v3 = vadd.f32 %v5353_v46, %v5352_v27 }
 0x54f   :  { %v20079_v47 = vpop.f32.mrb[12].mxu0 }
 0x550   :  { %v20081_v32 = vpop.f32.mrb[13].mxu0  ;;  %v5356_v60 = vadd.f32 %v5355_v22, %v5354_v3  ;;  %v5359_v14 = vsel %vm90_vm1, %v20079_v47, 0.0 }
 0x551   :  { %v5357_v33 = vsel %vm90_vm1, %v20081_v32, 0.0 }
 0x552   :  { %v5358_v0 = vadd.f32 %v5357_v33, %v5356_v60 }
 0x553   :  { %v20087_v25 = vpop.f32.mrb[14].mxu0 }
 0x554   :  { %v20089_v5 = vpop.f32.mrb[15].mxu0  ;;  %v5360_v59 = vadd.f32 %v5359_v14, %v5358_v0  ;;  %v5363_v44 = vsel %vm90_vm1, %v20087_v25, 0.0 }
 0x555   :  { %v5361_v41 = vsel %vm90_vm1, %v20089_v5, 0.0 }
 0x556   :  { %v5362_v63 = vadd.f32 %v5361_v41, %v5360_v59 }
 0x557   :  { %v20095_v2 = vpop.f32.mrb[16].mxu0 }
 0x558   :  { %v20097_v57 = vpop.f32.mrb[17].mxu0  ;;  %v5364_v54 = vadd.f32 %v5363_v44, %v5362_v63  ;;  %v5367_v48 = vsel %vm90_vm1, %v20095_v2, 0.0 }
 0x559   :  { %v5365_v62 = vsel %vm90_vm1, %v20097_v57, 0.0 }
 0x55a   :  { %v5366_v1 = vadd.f32 %v5365_v62, %v5364_v54 }
 0x55b   :  { %v20103_v58 = vpop.f32.mrb[18].mxu0 }
 0x55c   :  { %v20105_v53 = vpop.f32.mrb[19].mxu0  ;;  %v5368_v9 = vadd.f32 %v5367_v48, %v5366_v1  ;;  %v5371_v39 = vsel %vm90_vm1, %v20103_v58, 0.0 }
 0x55d   :  { %v5369_v42 = vsel %vm90_vm1, %v20105_v53, 0.0 }
 0x55e   :  { %v5370_v56 = vadd.f32 %v5369_v42, %v5368_v9 }
 0x55f   :  { %v20111_v51 = vpop.f32.mrb[20].mxu0 }
 0x560   :  { %v20113_v34 = vpop.f32.mrb[21].mxu0  ;;  %v5372_v45 = vadd.f32 %v5371_v39, %v5370_v56  ;;  %v5375_v20 = vsel %vm90_vm1, %v20111_v51, 0.0 }
 0x561   :  { %v5373_v24 = vsel %vm90_vm1, %v20113_v34, 0.0 }
 0x562   :  { %v5374_v29 = vadd.f32 %v5373_v24, %v5372_v45 }
 0x563   :  { %v20119_v21 = vpop.f32.mrb[22].mxu0 }
 0x564   :  { %v20121_v19 = vpop.f32.mrb[23].mxu0  ;;  %v5376_v17 = vadd.f32 %v5375_v20, %v5374_v29  ;;  %v5379_v11 = vsel %vm90_vm1, %v20119_v21, 0.0 }
 0x565   :  { %v5377_v26 = vsel %vm90_vm1, %v20121_v19, 0.0 }
 0x566   :  { %v5378_v52 = vadd.f32 %v5377_v26, %v5376_v17 }
 0x567   :  { %v20127_v8 = vpop.f32.mrb[24].mxu0 }
 0x568   :  { %v20129_v7 = vpop.f32.mrb[25].mxu0  ;;  %v5380_v50 = vadd.f32 %v5379_v11, %v5378_v52  ;;  %v5383_v43 = vsel %vm90_vm1, %v20127_v8, 0.0 }
 0x569   :  { %v5381_v55 = vsel %vm90_vm1, %v20129_v7, 0.0 }
 0x56a   :  { %v5382_v40 = vadd.f32 %v5381_v55, %v5380_v50 }
 0x56b   :  { %v20135_v37 = vpop.f32.mrb[26].mxu0 }
 0x56c   :  { %v20137_v49 = vpop.f32.mrb[27].mxu0  ;;  %v5384_v12 = vadd.f32 %v5383_v43, %v5382_v40  ;;  %v5387_v28 = vsel %vm90_vm1, %v20135_v37, 0.0 }
 0x56d   :  { %v5385_v13 = vsel %vm90_vm1, %v20137_v49, 0.0 }
 0x56e   :  { %v5386_v15 = vadd.f32 %v5385_v13, %v5384_v12 }
 0x56f   :  { %v20143_v27 = vpop.f32.mrb[28].mxu0 }
 0x570   :  { %v20145_v46 = vpop.f32.mrb[29].mxu0  ;;  %v5388_v3 = vadd.f32 %v5387_v28, %v5386_v15  ;;  %v5391_v33 = vsel %vm90_vm1, %v20143_v27, 0.0 }
 0x571   :  { %v5389_v22 = vsel %vm90_vm1, %v20145_v46, 0.0 }
 0x572   :  { %v5390_v60 = vadd.f32 %v5389_v22, %v5388_v3 }
 0x573   :  { %v20151_v0 = vpop.f32.mrb[30].mxu0 }
 0x574   :  { %v20153_v14 = vpop.f32.mrb[31].mxu0  ;;  %v5392_v59 = vadd.f32 %v5391_v33, %v5390_v60  ;;  %v5395_v44 = vsel %vm90_vm1, %v20151_v0, 0.0 }
 0x575   :  { %v5393_v41 = vsel %vm90_vm1, %v20153_v14, 0.0 }
 0x576   :  { %v5394_v63 = vadd.f32 %v5393_v41, %v5392_v59 }
 0x577   :  { %v20159_v54 = vpop.f32.mrb[32].mxu0 }
 0x578   :  { %v20161_v62 = vpop.f32.mrb[33].mxu0  ;;  %v5396_v1 = vadd.f32 %v5395_v44, %v5394_v63  ;;  %v5399_v42 = vsel %vm90_vm1, %v20159_v54, 0.0 }
 0x579   :  { %v5397_v48 = vsel %vm90_vm1, %v20161_v62, 0.0 }
 0x57a   :  { %v5398_v9 = vadd.f32 %v5397_v48, %v5396_v1 }
 0x57b   :  { %v20167_v56 = vpop.f32.mrb[34].mxu0 }
 0x57c   :  { %v20169_v39 = vpop.f32.mrb[35].mxu0  ;;  %v5400_v45 = vadd.f32 %v5399_v42, %v5398_v9  ;;  %v5403_v20 = vsel %vm90_vm1, %v20167_v56, 0.0 }
 0x57d   :  { %v5401_v24 = vsel %vm90_vm1, %v20169_v39, 0.0 }
 0x57e   :  { %v5402_v29 = vadd.f32 %v5401_v24, %v5400_v45 }
 0x57f   :  { %v20175_v17 = vpop.f32.mrb[36].mxu0 }
 0x580   :  { %v20177_v26 = vpop.f32.mrb[37].mxu0  ;;  %v5404_v52 = vadd.f32 %v5403_v20, %v5402_v29  ;;  %v5407_v55 = vsel %vm90_vm1, %v20175_v17, 0.0 }
 0x581   :  { %v5405_v11 = vsel %vm90_vm1, %v20177_v26, 0.0 }
 0x582   :  { %v5406_v50 = vadd.f32 %v5405_v11, %v5404_v52 }
 0x583   :  { %v20183_v40 = vpop.f32.mrb[38].mxu0 }
 0x584   :  { %v20185_v43 = vpop.f32.mrb[39].mxu0  ;;  %v5408_v12 = vadd.f32 %v5407_v55, %v5406_v50  ;;  %v5411_v28 = vsel %vm90_vm1, %v20183_v40, 0.0 }
 0x585   :  { %v5409_v13 = vsel %vm90_vm1, %v20185_v43, 0.0 }
 0x586   :  { %v5410_v15 = vadd.f32 %v5409_v13, %v5408_v12 }
 0x587   :  { %v20191_v3 = vpop.f32.mrb[40].mxu0 }
 0x588   :  { %v20193_v22 = vpop.f32.mrb[41].mxu0  ;;  %v5412_v60 = vadd.f32 %v5411_v28, %v5410_v15  ;;  %v5415_v41 = vsel %vm90_vm1, %v20191_v3, 0.0 }
 0x589   :  { %v5413_v33 = vsel %vm90_vm1, %v20193_v22, 0.0 }
 0x58a   :  { %v5414_v59 = vadd.f32 %v5413_v33, %v5412_v60 }
 0x58b   :  { %v20199_v63 = vpop.f32.mrb[42].mxu0 }
 0x58c   :  { %v20201_v44 = vpop.f32.mrb[43].mxu0  ;;  %v5416_v1 = vadd.f32 %v5415_v41, %v5414_v59  ;;  %v5419_v42 = vsel %vm90_vm1, %v20199_v63, 0.0 }
 0x58d   :  { %v5417_v48 = vsel %vm90_vm1, %v20201_v44, 0.0 }
 0x58e   :  { %v5418_v9 = vadd.f32 %v5417_v48, %v5416_v1 }
 0x58f   :  { %v20207_v45 = vpop.f32.mrb[44].mxu0 }
 0x590   :  { %v20209_v24 = vpop.f32.mrb[45].mxu0  ;;  %v5420_v29 = vadd.f32 %v5419_v42, %v5418_v9  ;;  %v5423_v11 = vsel %vm90_vm1, %v20207_v45, 0.0 }
 0x591   :  { %v5421_v20 = vsel %vm90_vm1, %v20209_v24, 0.0 }
 0x592   :  { %v5422_v52 = vadd.f32 %v5421_v20, %v5420_v29 }
 0x593   :  { %v20215_v50 = vpop.f32.mrb[46].mxu0 }
 0x594   :  { %26931 = vst [vmem:[#allocation82_spill] sm:$0xff] %v20215_v50  ;;  %v20217_v55 = vpop.f32.mrb[47].mxu0  ;;  %v5424_v12 = vadd.f32 %v5423_v11, %v5422_v52  ;;  %v5427_v28 = vsel %vm90_vm1, %v20215_v50, 0.0 }
 0x595   :  { %v5425_v13 = vsel %vm90_vm1, %v20217_v55, 0.0 }
 0x596   :  { %v5426_v15 = vadd.f32 %v5425_v13, %v5424_v12 }
 0x597   :  { %v20223_v60 = vpop.f32.mrb[48].mxu0 }
 0x598   :  { %26932 = vst [vmem:[#allocation83_spill] sm:$0xff] %v20223_v60  ;;  %v20225_v33 = vpop.f32.mrb[49].mxu0  ;;  %v5428_v59 = vadd.f32 %v5427_v28, %v5426_v15  ;;  %v5431_v48 = vsel %vm90_vm1, %v20223_v60, 0.0 }
 0x599   :  { %26933 = vst [vmem:[#allocation84_spill] sm:$0xff] %v20225_v33  ;;  %v5429_v41 = vsel %vm90_vm1, %v20225_v33, 0.0 }
 0x59a   :  { %v5430_v1 = vadd.f32 %v5429_v41, %v5428_v59 }
 0x59b   :  { %v20231_v9 = vpop.f32.mrb[50].mxu0 }
 0x59c   :  { %26934 = vst [vmem:[#allocation85_spill] sm:$0xff] %v20231_v9  ;;  %v20233_v42 = vpop.f32.mrb[51].mxu0  ;;  %v5432_v29 = vadd.f32 %v5431_v48, %v5430_v1  ;;  %v5435_v11 = vsel %vm90_vm1, %v20231_v9, 0.0 }
 0x59d   :  { %26935 = vst [vmem:[#allocation86_spill] sm:$0xff] %v20233_v42  ;;  %v5433_v20 = vsel %vm90_vm1, %v20233_v42, 0.0 }
 0x59e   :  { %v5434_v52 = vadd.f32 %v5433_v20, %v5432_v29 }
 0x59f   :  { %v20239_v12 = vpop.f32.mrb[52].mxu0 }
 0x5a0   :  { %26936 = vst [vmem:[#allocation87_spill] sm:$0xff] %v20239_v12  ;;  %v20241_v13 = vpop.f32.mrb[53].mxu0  ;;  %v5436_v15 = vadd.f32 %v5435_v11, %v5434_v52  ;;  %v5439_v41 = vsel %vm90_vm1, %v20239_v12, 0.0 }
 0x5a1   :  { %26937 = vst [vmem:[#allocation88_spill] sm:$0xff] %v20241_v13  ;;  %v5437_v28 = vsel %vm90_vm1, %v20241_v13, 0.0 }
 0x5a2   :  { %v5438_v59 = vadd.f32 %v5437_v28, %v5436_v15 }
 0x5a3   :  { %v20247_v1 = vpop.f32.mrb[54].mxu0 }
 0x5a4   :  { %26938 = vst [vmem:[#allocation89_spill] sm:$0xff] %v20247_v1  ;;  %v20249_v48 = vpop.f32.mrb[55].mxu0  ;;  %v5440_v29 = vadd.f32 %v5439_v41, %v5438_v59  ;;  %v5443_v42 = vsel %vm90_vm1, %v20247_v1, 0.0 }
 0x5a5   :  { %26939 = vst [vmem:[#allocation90_spill] sm:$0xff] %v20249_v48  ;;  %v5441_v20 = vsel %vm90_vm1, %v20249_v48, 0.0 }
 0x5a6   :  { %v5442_v9 = vadd.f32 %v5441_v20, %v5440_v29 }
 0x5a7   :  { %v20255_v52 = vpop.f32.mrb[56].mxu0 }
 0x5a8   :  { %26940 = vst [vmem:[#allocation91_spill] sm:$0xff] %v20255_v52  ;;  %v20257_v11 = vpop.f32.mrb[57].mxu0  ;;  %v5444_v15 = vadd.f32 %v5443_v42, %v5442_v9  ;;  %v5447_v13 = vsel %vm90_vm1, %v20255_v52, 0.0 }
 0x5a9   :  { %26941 = vst [vmem:[#allocation92_spill] sm:$0xff] %v20257_v11  ;;  %v5445_v28 = vsel %vm90_vm1, %v20257_v11, 0.0 }
 0x5aa   :  { %v5446_v12 = vadd.f32 %v5445_v28, %v5444_v15 }
 0x5ab   :  { %v20263_v59 = vpop.f32.mrb[58].mxu0 }
 0x5ac   :  { %26942 = vst [vmem:[#allocation93_spill] sm:$0xff] %v20263_v59  ;;  %v20265_v41 = vpop.f32.mrb[59].mxu0  ;;  %v5448_v29 = vadd.f32 %v5447_v13, %v5446_v12  ;;  %v5451_v48 = vsel %vm90_vm1, %v20263_v59, 0.0 }
 0x5ad   :  { %26943 = vst [vmem:[#allocation94_spill] sm:$0xff] %v20265_v41  ;;  %v5449_v20 = vsel %vm90_vm1, %v20265_v41, 0.0 }
 0x5ae   :  { %v5450_v1 = vadd.f32 %v5449_v20, %v5448_v29 }
 0x5af   :  { %v20271_v9 = vpop.f32.mrb[60].mxu0 }
 0x5b0   :  { %26944 = vst [vmem:[#allocation95_spill] sm:$0xff] %v20271_v9  ;;  %v20273_v42 = vpop.f32.mrb[61].mxu0  ;;  %v5452_v15 = vadd.f32 %v5451_v48, %v5450_v1  ;;  %v5455_v11 = vsel %vm90_vm1, %v20271_v9, 0.0 }
 0x5b1   :  { %26945 = vst [vmem:[#allocation96_spill] sm:$0xff] %v20273_v42  ;;  %v5453_v28 = vsel %vm90_vm1, %v20273_v42, 0.0 }
 0x5b2   :  { %v5454_v52 = vadd.f32 %v5453_v28, %v5452_v15 }
 0x5b3   :  { %v20279_v12 = vpop.f32.mrb[62].mxu0 }
 0x5b4   :  { %v20281_v13 = vpop.f32.mrb[63].mxu0  ;;  %v5456_v29 = vadd.f32 %v5455_v11, %v5454_v52  ;;  %v5459_v41 = vsel %vm90_vm1, %v20279_v12, 0.0 }
 0x5b5   :  { %v5457_v20 = vsel %vm90_vm1, %v20281_v13, 0.0 }
 0x5b6   :  { %v5458_v59 = vadd.f32 %v5457_v20, %v5456_v29  ;;  %v26958_v29 = vld [vmem:[#allocation86_spill] sm:$0xff]  ;;  %v26960_v20 = vld [vmem:[#allocation85_spill] sm:$0xff] }
 0x5b8   :  { %v5460_v1 = vadd.f32 %v5459_v41, %v5458_v59  ;;  %v26954_v41 = vld [vmem:[#allocation84_spill] sm:$0xff] }
 0x5ba   :  { %v5461_v48 = vrot.slane %v5460_v1, 4 }
 0x5bc   :  { %v5462_v60 = vadd.f32 %v5461_v48, %v5460_v1  ;;  %v26962_v1 = vld [vmem:[#allocation88_spill] sm:$0xff] }
 0x5be   :  { %v5463_v42 = vrot.slane %v5462_v60, 2 }
 0x5c0   :  { %v5464_v15 = vadd.f32 %v5463_v42, %v5462_v60  ;;  %v26956_v42 = vld [vmem:[#allocation83_spill] sm:$0xff] }
 0x5c2   :  { %v5465_v28 = vrot.slane %v5464_v15, 1 }
 0x5c4   :  { %v5466_v33 = vadd.f32 %v5465_v28, %v5464_v15  ;;  %v26964_v15 = vld [vmem:[#allocation87_spill] sm:$0xff] }
 0x5c6   :  { %v20287_v9 = vmul.f32 0.001953125, %v5466_v33  ;;  %v26952_v33 = vld [vmem:[#allocation82_spill] sm:$0xff] }
 0x5c8   :  { %v20291_v50 = vsub.f32 %v20035_v23, %v20287_v9  ;;  %v20295_v52 = vsub.f32 %v20031_v10, %v20287_v9  ;;  %v20299_v11 = vsub.f32 %v20041_v6, %v20287_v9  ;;  %v20303_v59 = vsub.f32 %v20039_v36, %v20287_v9 }
 0x5c9   :  { %v20307_v60 = vsub.f32 %v20049_v16, %v20287_v9  ;;  %v20311_v23 = vsub.f32 %v20047_v4, %v20287_v9  ;;  %v20315_v10 = vsub.f32 %v20057_v18, %v20287_v9  ;;  %v20319_v6 = vsub.f32 %v20055_v61, %v20287_v9 }
 0x5ca   :  { %26946 = vst [vmem:[#allocation97_spill] sm:$0xff] %v20291_v50  ;;  %26947 = vst [vmem:[#allocation98_spill] sm:$0xff] %v20295_v52  ;;  %v20323_v36 = vsub.f32 %v20065_v35, %v20287_v9  ;;  %v20327_v16 = vsub.f32 %v20063_v38, %v20287_v9  ;;  %v20331_v4 = vsub.f32 %v20073_v31, %v20287_v9 }
 0x5cb   :  { %26948 = vst [vmem:[#allocation99_spill] sm:$0xff] %v20299_v11  ;;  %26949 = vst [vmem:[#allocation100_spill] sm:$0xff] %v20303_v59  ;;  %v20335_v18 = vsub.f32 %v20071_v30, %v20287_v9  ;;  %v20339_v61 = vsub.f32 %v20081_v32, %v20287_v9  ;;  %v20343_v35 = vsub.f32 %v20079_v47, %v20287_v9 }
 0x5cc   :  { %v20347_v38 = vsub.f32 %v20089_v5, %v20287_v9  ;;  %v20351_v31 = vsub.f32 %v20087_v25, %v20287_v9  ;;  %v20355_v30 = vsub.f32 %v20097_v57, %v20287_v9  ;;  %v20359_v32 = vsub.f32 %v20095_v2, %v20287_v9 }
 0x5cd   :  { %v20363_v47 = vsub.f32 %v20105_v53, %v20287_v9  ;;  %v20367_v5 = vsub.f32 %v20103_v58, %v20287_v9  ;;  %v20371_v25 = vsub.f32 %v20113_v34, %v20287_v9  ;;  %v20375_v57 = vsub.f32 %v20111_v51, %v20287_v9 }
 0x5ce   :  { %v20379_v2 = vsub.f32 %v20121_v19, %v20287_v9  ;;  %v20383_v53 = vsub.f32 %v20119_v21, %v20287_v9  ;;  %v20387_v58 = vsub.f32 %v20129_v7, %v20287_v9  ;;  %v20391_v34 = vsub.f32 %v20127_v8, %v20287_v9 }
 0x5cf   :  { %v20395_v51 = vsub.f32 %v20137_v49, %v20287_v9  ;;  %v20399_v19 = vsub.f32 %v20135_v37, %v20287_v9  ;;  %v20403_v21 = vsub.f32 %v20145_v46, %v20287_v9  ;;  %v20407_v7 = vsub.f32 %v20143_v27, %v20287_v9 }
 0x5d0   :  { %v20411_v8 = vsub.f32 %v20153_v14, %v20287_v9  ;;  %v20415_v49 = vsub.f32 %v20151_v0, %v20287_v9  ;;  %v20419_v37 = vsub.f32 %v20161_v62, %v20287_v9  ;;  %v20423_v46 = vsub.f32 %v20159_v54, %v20287_v9 }
 0x5d1   :  { %v20427_v27 = vsub.f32 %v20169_v39, %v20287_v9  ;;  %v20431_v14 = vsub.f32 %v20167_v56, %v20287_v9  ;;  %v20435_v0 = vsub.f32 %v20177_v26, %v20287_v9  ;;  %v20439_v62 = vsub.f32 %v20175_v17, %v20287_v9 }
 0x5d2   :  { %v20443_v54 = vsub.f32 %v20185_v43, %v20287_v9  ;;  %v20447_v39 = vsub.f32 %v20183_v40, %v20287_v9  ;;  %v20451_v56 = vsub.f32 %v20193_v22, %v20287_v9  ;;  %v20455_v26 = vsub.f32 %v20191_v3, %v20287_v9 }
 0x5d3   :  { %v20459_v17 = vsub.f32 %v20201_v44, %v20287_v9  ;;  %v20463_v43 = vsub.f32 %v20199_v63, %v20287_v9  ;;  %v20467_v40 = vsub.f32 %v20209_v24, %v20287_v9  ;;  %v20471_v22 = vsub.f32 %v20207_v45, %v20287_v9 }
 0x5d4   :  { %v20475_v3 = vsub.f32 %v20217_v55, %v20287_v9  ;;  %v20479_v44 = vsub.f32 %v26952_v33, %v20287_v9  ;;  %v20483_v63 = vsub.f32 %v26954_v41, %v20287_v9  ;;  %v20487_v24 = vsub.f32 %v26956_v42, %v20287_v9  ;;  %v26966_v33 = vld [vmem:[#allocation90_spill] sm:$0xff]  ;;  %v26968_v42 = vld [vmem:[#allocation89_spill] sm:$0xff] }
 0x5d5   :  { %26950 = vst [vmem:[#allocation101_spill] sm:$0xff] %v20471_v22  ;;  %v20491_v45 = vsub.f32 %v26958_v29, %v20287_v9  ;;  %v20495_v55 = vsub.f32 %v26960_v20, %v20287_v9  ;;  %v20499_v48 = vsub.f32 %v26962_v1, %v20287_v9  ;;  %v20503_v28 = vsub.f32 %v26964_v15, %v20287_v9 }
 0x5d6   :  { %26951 = vst [vmem:[#allocation102_spill] sm:$0xff] %v20475_v3  ;;  %26953 = vst [vmem:[#allocation103_spill] sm:$0xff] %v20479_v44  ;;  %v20507_v41 = vsub.f32 %v26966_v33, %v20287_v9  ;;  %v20511_v29 = vsub.f32 %v26968_v42, %v20287_v9 }
 0x5d7   :  { %26955 = vst [vmem:[#allocation104_spill] sm:$0xff] %v20483_v63  ;;  %26957 = vst [vmem:[#allocation105_spill] sm:$0xff] %v20487_v24 }
 0x5d8   :  { %26959 = vst [vmem:[#allocation106_spill] sm:$0xff] %v20491_v45  ;;  %26961 = vst [vmem:[#allocation107_spill] sm:$0xff] %v20495_v55  ;;  %v26970_v45 = vld [vmem:[#allocation92_spill] sm:$0xff]  ;;  %v26972_v55 = vld [vmem:[#allocation91_spill] sm:$0xff] }
 0x5d9   :  { %26963 = vst [vmem:[#allocation108_spill] sm:$0xff] %v20499_v48  ;;  %26965 = vst [vmem:[#allocation109_spill] sm:$0xff] %v20503_v28  ;;  %v20515_v20 = vsub.f32 %v26970_v45, %v20287_v9  ;;  %v20519_v1 = vsub.f32 %v26972_v55, %v20287_v9  ;;  %v26974_v48 = vld [vmem:[#allocation94_spill] sm:$0xff]  ;;  %v26976_v28 = vld [vmem:[#allocation93_spill] sm:$0xff]  ;;  %v20539_v55 = vsub.f32 %v20281_v13, %v20287_v9 }
 0x5da   :  { %26967 = vst [vmem:[#allocation80_spill] sm:$0xff] %v20507_v41  ;;  %26969 = vst [vmem:[#allocation81_spill] sm:$0xff] %v20511_v29  ;;  %v20523_v15 = vsub.f32 %v26974_v48, %v20287_v9  ;;  %v20527_v33 = vsub.f32 %v26976_v28, %v20287_v9  ;;  %v26978_v41 = vld [vmem:[#allocation96_spill] sm:$0xff]  ;;  %v26980_v29 = vld [vmem:[#allocation95_spill] sm:$0xff]  ;;  %v20543_v48 = vsub.f32 %v20279_v12, %v20287_v9 }
 0x5db   :  { %26971 = vst [vmem:[#allocation112_spill] sm:$0xff] %v20515_v20  ;;  %26973 = vst [vmem:[#allocation113_spill] sm:$0xff] %v20519_v1  ;;  %v20531_v42 = vsub.f32 %v26978_v41, %v20287_v9  ;;  %v20535_v45 = vsub.f32 %v26980_v29, %v20287_v9  ;;  %v5533_v28 = vmul.f32 %v20291_v50, %v20291_v50 }
 0x5dc   :  { %26975 = vst [vmem:[#allocation114_spill] sm:$0xff] %v20523_v15  ;;  %26977 = vst [vmem:[#allocation115_spill] sm:$0xff] %v20527_v33  ;;  %v5534_v33 = vmul.f32 %v20295_v52, %v20295_v52  ;;  %v5535_v41 = vmul.f32 %v20299_v11, %v20299_v11  ;;  %v5536_v29 = vmul.f32 %v20303_v59, %v20303_v59 }
 0x5dd   :  { %26979 = vst [vmem:[#allocation116_spill] sm:$0xff] %v20531_v42  ;;  %26981 = vst [vmem:[#allocation117_spill] sm:$0xff] %v20535_v45  ;;  %v5597_v45 = vsel %vm90_vm1, %v5533_v28, 0.0  ;;  %v5537_v9 = vmul.f32 %v20307_v60, %v20307_v60  ;;  %v5538_v52 = vmul.f32 %v20311_v23, %v20311_v23  ;;  %v5539_v59 = vmul.f32 %v20315_v10, %v20315_v10 }
 0x5de   :  { %26982 = vst [vmem:[#allocation118_spill] sm:$0xff] %v20539_v55  ;;  %26983 = vst [vmem:[#allocation119_spill] sm:$0xff] %v20543_v48  ;;  %v5598_v13 = vsel %vm90_vm1, %v5534_v33, 0.0  ;;  %v5600_v12 = vsel %vm90_vm1, %v5535_v41, 0.0  ;;  %v5602_v48 = vsel %vm90_vm1, %v5536_v29, 0.0  ;;  %v5540_v33 = vmul.f32 %v20319_v6, %v20319_v6 }
 0x5df   :  { %v5599_v55 = vadd.f32 %v5598_v13, %v5597_v45  ;;  %v5604_v28 = vsel %vm90_vm1, %v5537_v9, 0.0  ;;  %v5606_v45 = vsel %vm90_vm1, %v5538_v52, 0.0  ;;  %v5608_v41 = vsel %vm90_vm1, %v5539_v59, 0.0 }
 0x5e0   :  { %v5544_v52 = vmul.f32 %v20335_v18, %v20335_v18  ;;  %v5545_v59 = vmul.f32 %v20339_v61, %v20339_v61 }
 0x5e1   :  { %v5601_v50 = vadd.f32 %v5600_v12, %v5599_v55  ;;  %v5541_v55 = vmul.f32 %v20323_v36, %v20323_v36 }
 0x5e3   :  { %v5603_v11 = vadd.f32 %v5602_v48, %v5601_v50  ;;  %v5542_v50 = vmul.f32 %v20327_v16, %v20327_v16  ;;  %v5610_v48 = vsel %vm90_vm1, %v5540_v33, 0.0  ;;  %v5612_v9 = vsel %vm90_vm1, %v5541_v55, 0.0 }
 0x5e4   :  { %v5546_v33 = vmul.f32 %v20343_v35, %v20343_v35  ;;  %v5547_v55 = vmul.f32 %v20347_v38, %v20347_v38 }
 0x5e5   :  { %v5605_v42 = vadd.f32 %v5604_v28, %v5603_v11  ;;  %v5543_v11 = vmul.f32 %v20331_v4, %v20331_v4 }
 0x5e7   :  { %v5607_v13 = vadd.f32 %v5606_v45, %v5605_v42  ;;  %v5614_v42 = vsel %vm90_vm1, %v5542_v50, 0.0  ;;  %v5548_v50 = vmul.f32 %v20351_v31, %v20351_v31 }
 0x5e9   :  { %v5609_v12 = vadd.f32 %v5608_v41, %v5607_v13  ;;  %v5616_v13 = vsel %vm90_vm1, %v5543_v11, 0.0  ;;  %v5549_v11 = vmul.f32 %v20355_v30, %v20355_v30 }
 0x5eb   :  { %v5611_v29 = vadd.f32 %v5610_v48, %v5609_v12  ;;  %v5618_v12 = vsel %vm90_vm1, %v5544_v52, 0.0  ;;  %v5550_v52 = vmul.f32 %v20359_v32, %v20359_v32 }
 0x5ed   :  { %v5613_v28 = vadd.f32 %v5612_v9, %v5611_v29  ;;  %v5620_v29 = vsel %vm90_vm1, %v5545_v59, 0.0  ;;  %v5551_v59 = vmul.f32 %v20363_v47, %v20363_v47 }
 0x5ef   :  { %v5615_v45 = vadd.f32 %v5614_v42, %v5613_v28  ;;  %v5622_v28 = vsel %vm90_vm1, %v5546_v33, 0.0  ;;  %v5552_v33 = vmul.f32 %v20367_v5, %v20367_v5 }
 0x5f1   :  { %v5617_v41 = vadd.f32 %v5616_v13, %v5615_v45  ;;  %v5624_v45 = vsel %vm90_vm1, %v5547_v55, 0.0  ;;  %v5553_v55 = vmul.f32 %v20371_v25, %v20371_v25 }
 0x5f3   :  { %v5619_v48 = vadd.f32 %v5618_v12, %v5617_v41  ;;  %v5626_v41 = vsel %vm90_vm1, %v5548_v50, 0.0  ;;  %v5554_v50 = vmul.f32 %v20375_v57, %v20375_v57 }
 0x5f5   :  { %v5621_v9 = vadd.f32 %v5620_v29, %v5619_v48  ;;  %v5628_v48 = vsel %vm90_vm1, %v5549_v11, 0.0  ;;  %v5555_v11 = vmul.f32 %v20379_v2, %v20379_v2 }
 0x5f7   :  { %v5623_v42 = vadd.f32 %v5622_v28, %v5621_v9  ;;  %v5630_v9 = vsel %vm90_vm1, %v5550_v52, 0.0  ;;  %v5556_v52 = vmul.f32 %v20383_v53, %v20383_v53 }
 0x5f9   :  { %v5625_v13 = vadd.f32 %v5624_v45, %v5623_v42  ;;  %v5632_v42 = vsel %vm90_vm1, %v5551_v59, 0.0  ;;  %v5557_v59 = vmul.f32 %v20387_v58, %v20387_v58 }
 0x5fb   :  { %v5627_v12 = vadd.f32 %v5626_v41, %v5625_v13  ;;  %v5634_v13 = vsel %vm90_vm1, %v5552_v33, 0.0  ;;  %v5558_v33 = vmul.f32 %v20391_v34, %v20391_v34 }
 0x5fd   :  { %v5629_v29 = vadd.f32 %v5628_v48, %v5627_v12  ;;  %v5636_v12 = vsel %vm90_vm1, %v5553_v55, 0.0  ;;  %v5559_v55 = vmul.f32 %v20395_v51, %v20395_v51 }
 0x5ff   :  { %v5631_v28 = vadd.f32 %v5630_v9, %v5629_v29  ;;  %v5638_v29 = vsel %vm90_vm1, %v5554_v50, 0.0  ;;  %v5560_v50 = vmul.f32 %v20399_v19, %v20399_v19 }
 0x601   :  { %v5633_v45 = vadd.f32 %v5632_v42, %v5631_v28  ;;  %v5640_v28 = vsel %vm90_vm1, %v5555_v11, 0.0  ;;  %v5561_v11 = vmul.f32 %v20403_v21, %v20403_v21 }
 0x603   :  { %v5635_v41 = vadd.f32 %v5634_v13, %v5633_v45  ;;  %v5642_v45 = vsel %vm90_vm1, %v5556_v52, 0.0  ;;  %v5562_v52 = vmul.f32 %v20407_v7, %v20407_v7 }
 0x605   :  { %v5637_v48 = vadd.f32 %v5636_v12, %v5635_v41  ;;  %v5644_v41 = vsel %vm90_vm1, %v5557_v59, 0.0  ;;  %v5563_v59 = vmul.f32 %v20411_v8, %v20411_v8 }
 0x607   :  { %v5639_v9 = vadd.f32 %v5638_v29, %v5637_v48  ;;  %v5646_v48 = vsel %vm90_vm1, %v5558_v33, 0.0  ;;  %v5564_v33 = vmul.f32 %v20415_v49, %v20415_v49 }
 0x609   :  { %v5641_v42 = vadd.f32 %v5640_v28, %v5639_v9  ;;  %v5648_v9 = vsel %vm90_vm1, %v5559_v55, 0.0  ;;  %v5565_v55 = vmul.f32 %v20419_v37, %v20419_v37 }
 0x60b   :  { %v5643_v13 = vadd.f32 %v5642_v45, %v5641_v42  ;;  %v5650_v42 = vsel %vm90_vm1, %v5560_v50, 0.0  ;;  %v5566_v50 = vmul.f32 %v20423_v46, %v20423_v46 }
 0x60d   :  { %v5645_v12 = vadd.f32 %v5644_v41, %v5643_v13  ;;  %v5652_v13 = vsel %vm90_vm1, %v5561_v11, 0.0  ;;  %v5567_v11 = vmul.f32 %v20427_v27, %v20427_v27 }
 0x60f   :  { %v5647_v29 = vadd.f32 %v5646_v48, %v5645_v12  ;;  %v5654_v12 = vsel %vm90_vm1, %v5562_v52, 0.0  ;;  %v5568_v52 = vmul.f32 %v20431_v14, %v20431_v14 }
 0x611   :  { %v5649_v28 = vadd.f32 %v5648_v9, %v5647_v29  ;;  %v5656_v29 = vsel %vm90_vm1, %v5563_v59, 0.0  ;;  %v5569_v59 = vmul.f32 %v20435_v0, %v20435_v0 }
 0x613   :  { %v5651_v45 = vadd.f32 %v5650_v42, %v5649_v28  ;;  %v5658_v28 = vsel %vm90_vm1, %v5564_v33, 0.0  ;;  %v5570_v33 = vmul.f32 %v20439_v62, %v20439_v62 }
 0x615   :  { %v5653_v41 = vadd.f32 %v5652_v13, %v5651_v45  ;;  %v5660_v45 = vsel %vm90_vm1, %v5565_v55, 0.0  ;;  %v5571_v55 = vmul.f32 %v20443_v54, %v20443_v54 }
 0x617   :  { %v5655_v48 = vadd.f32 %v5654_v12, %v5653_v41  ;;  %v5662_v41 = vsel %vm90_vm1, %v5566_v50, 0.0  ;;  %v5572_v50 = vmul.f32 %v20447_v39, %v20447_v39 }
 0x619   :  { %v5657_v9 = vadd.f32 %v5656_v29, %v5655_v48  ;;  %v5664_v48 = vsel %vm90_vm1, %v5567_v11, 0.0  ;;  %v5573_v11 = vmul.f32 %v20451_v56, %v20451_v56 }
 0x61b   :  { %v5659_v42 = vadd.f32 %v5658_v28, %v5657_v9  ;;  %v5666_v9 = vsel %vm90_vm1, %v5568_v52, 0.0  ;;  %v5574_v52 = vmul.f32 %v20455_v26, %v20455_v26 }
 0x61d   :  { %v5661_v13 = vadd.f32 %v5660_v45, %v5659_v42  ;;  %v5668_v42 = vsel %vm90_vm1, %v5569_v59, 0.0  ;;  %v5575_v59 = vmul.f32 %v20459_v17, %v20459_v17 }
 0x61f   :  { %v5663_v12 = vadd.f32 %v5662_v41, %v5661_v13  ;;  %v5670_v13 = vsel %vm90_vm1, %v5570_v33, 0.0  ;;  %v5576_v33 = vmul.f32 %v20463_v43, %v20463_v43 }
 0x621   :  { %v5665_v29 = vadd.f32 %v5664_v48, %v5663_v12  ;;  %v5672_v12 = vsel %vm90_vm1, %v5571_v55, 0.0  ;;  %v5577_v55 = vmul.f32 %v20467_v40, %v20467_v40 }
 0x623   :  { %v5667_v28 = vadd.f32 %v5666_v9, %v5665_v29  ;;  %v5674_v29 = vsel %vm90_vm1, %v5572_v50, 0.0  ;;  %v5578_v50 = vmul.f32 %v20471_v22, %v20471_v22 }
 0x625   :  { %v5669_v45 = vadd.f32 %v5668_v42, %v5667_v28  ;;  %v5676_v28 = vsel %vm90_vm1, %v5573_v11, 0.0  ;;  %v5579_v11 = vmul.f32 %v20475_v3, %v20475_v3 }
 0x627   :  { %v5671_v41 = vadd.f32 %v5670_v13, %v5669_v45  ;;  %v5678_v45 = vsel %vm90_vm1, %v5574_v52, 0.0  ;;  %v5580_v52 = vmul.f32 %v20479_v44, %v20479_v44 }
 0x629   :  { %v5673_v48 = vadd.f32 %v5672_v12, %v5671_v41  ;;  %v5680_v41 = vsel %vm90_vm1, %v5575_v59, 0.0  ;;  %v5581_v59 = vmul.f32 %v20483_v63, %v20483_v63  ;;  %v26989_v63 = vld [vmem:[#allocation109_spill] sm:$0xff] }
 0x62a   :  { %v5586_v44 = vmul.f32 %v26989_v63, %v26989_v63 }
 0x62b   :  { %v5675_v9 = vadd.f32 %v5674_v29, %v5673_v48  ;;  %v5682_v48 = vsel %vm90_vm1, %v5576_v33, 0.0  ;;  %v6210_v33 = vld [vmem:[%s25850_s4 + $0x4] sm:$0xf] }
 0x62c   :  { %15184 = vmatprep.subr.msk.mxu1 %vm840_vm0, %v6210_v33 }
 0x62d   :  { %v5677_v42 = vadd.f32 %v5676_v28, %v5675_v9  ;;  %v5684_v9 = vsel %vm90_vm1, %v5577_v55, 0.0  ;;  %v6209_v55 = vld [vmem:[%s25850_s4] sm:$0xf]  ;;  %15185 = vmatpush3.msk.msra.mxu1 %vm840_vm0, %v6210_v33  ;;  %v26988_v33 = vld [vmem:[#allocation108_spill] sm:$0xff] }
 0x62e   :  { %15282 = vmatprep.subr.msk.mxu1 %vm840_vm0, %v6209_v55 }
 0x62f   :  { %v5679_v13 = vadd.f32 %v5678_v45, %v5677_v42  ;;  %v5686_v42 = vsel %vm90_vm1, %v5578_v50, 0.0  ;;  %v5582_v50 = vmul.f32 %v20487_v24, %v20487_v24  ;;  %v5585_v24 = vmul.f32 %v26988_v33, %v26988_v33 }
 0x631   :  { %v5681_v12 = vadd.f32 %v5680_v41, %v5679_v13  ;;  %v5688_v13 = vsel %vm90_vm1, %v5579_v11, 0.0 }
 0x633   :  { %v5683_v29 = vadd.f32 %v5682_v48, %v5681_v12  ;;  %v20693_v12 = vld [vmem:[#allocation2 + $0x8] sm:$0xff]  ;;  %v5690_v48 = vsel %vm90_vm1, %v5580_v52, 0.0 }
 0x634   :  { %26984 = vst [vmem:[#allocation120_spill] sm:$0xff] %v20693_v12  ;;  %15186 = vmatprep.mubr.msk.f32.mxu1 %vm90_vm1, %v20693_v12  ;;  %v27013_v12 = vld [vmem:[#allocation109_spill] sm:$0xff] }
 0x635   :  { %v5685_v28 = vadd.f32 %v5684_v9, %v5683_v29  ;;  %v20704_v29 = vld [vmem:[#allocation2 + $0x10] sm:$0xff]  ;;  %v26986_v9 = vld [vmem:[#allocation106_spill] sm:$0xff] }
 0x636   :  { %26985 = vst [vmem:[#allocation121_spill] sm:$0xff] %v20704_v29  ;;  %15187 = vmatmul.mubr.msk.f32.vlgmr.msra.gmra.mrb[0].mxu1 %vm90_vm1, %v20704_v29  ;;  %v27015_v29 = vld [vmem:[#allocation80_spill] sm:$0xff] }
 0x637   :  { %v5687_v45 = vadd.f32 %v5686_v42, %v5685_v28  ;;  %v5583_v28 = vmul.f32 %v26986_v9, %v26986_v9  ;;  %v5692_v42 = vsel %vm90_vm1, %v5581_v59, 0.0  ;;  %15283 = vmatpush3.msk.msra.mxu1 %vm840_vm0, %v6209_v55 }
 0x639   :  { %v5689_v41 = vadd.f32 %v5688_v13, %v5687_v45  ;;  %v26987_v45 = vld [vmem:[#allocation107_spill] sm:$0xff]  ;;  %v5696_v9 = vsel %vm90_vm1, %v5583_v28, 0.0 }
 0x63a   :  { %v5584_v13 = vmul.f32 %v26987_v45, %v26987_v45  ;;  %v5700_v45 = vsel %vm90_vm1, %v5585_v24, 0.0  ;;  %v5591_v24 = vmul.f32 %v20523_v15, %v20523_v15 }
 0x63b   :  { %v5691_v11 = vadd.f32 %v5690_v48, %v5689_v41  ;;  %v5694_v41 = vsel %vm90_vm1, %v5582_v50, 0.0  ;;  %v26991_v50 = vld [vmem:[#allocation81_spill] sm:$0xff] }
 0x63c   :  { %v5698_v3 = vsel %vm90_vm1, %v5584_v13, 0.0 }
 0x63d   :  { %v5693_v52 = vadd.f32 %v5692_v42, %v5691_v11  ;;  %v26990_v42 = vld [vmem:[#allocation80_spill] sm:$0xff] }
 0x63e   :  { %v5587_v55 = vmul.f32 %v26990_v42, %v26990_v42 }
 0x63f   :  { %v5695_v48 = vadd.f32 %v5694_v41, %v5693_v52  ;;  %v5588_v52 = vmul.f32 %v26991_v50, %v26991_v50  ;;  %v5702_v41 = vsel %vm90_vm1, %v5586_v44, 0.0  ;;  %v26992_v44 = vld [vmem:[#allocation115_spill] sm:$0xff] }
 0x640   :  { %v5704_v28 = vsel %vm90_vm1, %v5587_v55, 0.0  ;;  %v26993_v55 = vld [vmem:[#allocation116_spill] sm:$0xff] }
 0x641   :  { %v5697_v59 = vadd.f32 %v5696_v9, %v5695_v48  ;;  %v5589_v9 = vmul.f32 %v20515_v20, %v20515_v20  ;;  %v5706_v13 = vsel %vm90_vm1, %v5588_v52, 0.0  ;;  %v26994_v52 = vld [vmem:[#allocation117_spill] sm:$0xff] }
 0x643   :  { %v5699_v11 = vadd.f32 %v5698_v3, %v5697_v59  ;;  %v5590_v3 = vmul.f32 %v20519_v1, %v20519_v1 }
 0x645   :  { %v5701_v22 = vadd.f32 %v5700_v45, %v5699_v11  ;;  %v5708_v45 = vsel %vm90_vm1, %v5589_v9, 0.0  ;;  %v26995_v9 = vld [vmem:[#allocation118_spill] sm:$0xff] }
 0x647   :  { %v5703_v33 = vadd.f32 %v5702_v41, %v5701_v22  ;;  %v5592_v22 = vmul.f32 %v26992_v44, %v26992_v44  ;;  %v5710_v41 = vsel %vm90_vm1, %v5590_v3, 0.0  ;;  %v26996_v3 = vld [vmem:[#allocation119_spill] sm:$0xff] }
 0x649   :  { %v5705_v48 = vadd.f32 %v5704_v28, %v5703_v33  ;;  %v5593_v33 = vmul.f32 %v26993_v55, %v26993_v55  ;;  %v5712_v28 = vsel %vm90_vm1, %v5591_v24, 0.0 }
 0x64b   :  { %v5707_v59 = vadd.f32 %v5706_v13, %v5705_v48  ;;  %v5594_v48 = vmul.f32 %v26994_v52, %v26994_v52  ;;  %v5714_v13 = vsel %vm90_vm1, %v5592_v22, 0.0 }
 0x64d   :  { %v5709_v11 = vadd.f32 %v5708_v45, %v5707_v59  ;;  %v5595_v59 = vmul.f32 %v26995_v9, %v26995_v9  ;;  %v5716_v45 = vsel %vm90_vm1, %v5593_v33, 0.0 }
 0x64f   :  { %v5711_v20 = vadd.f32 %v5710_v41, %v5709_v11  ;;  %v5596_v11 = vmul.f32 %v26996_v3, %v26996_v3  ;;  %v5718_v41 = vsel %vm90_vm1, %v5594_v48, 0.0  ;;  %v27011_v48 = vld [vmem:[#allocation108_spill] sm:$0xff] }
 0x651   :  { %v5713_v1 = vadd.f32 %v5712_v28, %v5711_v20  ;;  %v5720_v20 = vsel %vm90_vm1, %v5595_v59, 0.0  ;;  %v5722_v28 = vsel %vm90_vm1, %v5596_v11, 0.0  ;;  %v26997_v59 = vld [vmem:[#allocation97_spill] sm:$0xff]  ;;  %v26999_v11 = vld [vmem:[#allocation99_spill] sm:$0xff] }
 0x653   :  { %v5715_v15 = vadd.f32 %v5714_v13, %v5713_v1 }
 0x655   :  { %v5717_v44 = vadd.f32 %v5716_v45, %v5715_v15 }
 0x657   :  { %v5719_v55 = vadd.f32 %v5718_v41, %v5717_v44  ;;  %v20760_v44 = vld [vmem:[%s25851_s2] ss:$0 sm:$0xff] }
 0x659   :  { %v5721_v24 = vadd.f32 %v5720_v20, %v5719_v55  ;;  %v20781_v20 = vld [vmem:[%s25852_s3] ss:$0 sm:$0xff] }
 0x65a   :  { %27000 = vst [vmem:[#allocation122_spill] sm:$0xff] %v20781_v20  ;;  %v27009_v55 = vld [vmem:[#allocation107_spill] sm:$0xff] }
 0x65b   :  { %v5723_v52 = vadd.f32 %v5722_v28, %v5721_v24  ;;  %v27001_v24 = vld [vmem:[#allocation100_spill] sm:$0xff] }
 0x65d   :  { %v5724_v22 = vrot.slane %v5723_v52, 4 }
 0x65f   :  { %v5725_v1 = vadd.f32 %v5724_v22, %v5723_v52 }
 0x661   :  { %v5726_v13 = vrot.slane %v5725_v1, 2 }
 0x663   :  { %v5727_v50 = vadd.f32 %v5726_v13, %v5725_v1 }
 0x665   :  { %v5728_v42 = vrot.slane %v5727_v50, 1 }
 0x667   :  { %v5729_v63 = vadd.f32 %v5728_v42, %v5727_v50 }
 0x669   :  { %v5730_v33 = vmul.f32 0.001953125, %v5729_v63  ;;  %v26998_v63 = vld [vmem:[#allocation98_spill] sm:$0xff] }
 0x66b   :  { %v5731_v15 = vadd.f32 1e-05, %v5730_v33 }
 0x66d   :  { %17091 = vrsqrt.f32 %v5731_v15 }
 0x677   :  { %v20755_v45 = vpop.eup %17091 }
 0x678   :  { %v5795_v52 = vmul.f32 %v20755_v45, %v26995_v9  ;;  %v20768_v42 = vmul.f32 %v20755_v45, %v26997_v59  ;;  %v20772_v50 = vmul.f32 %v20755_v45, %v26998_v63  ;;  %v20776_v41 = vmul.f32 %v20755_v45, %v26999_v11  ;;  %v27002_v63 = vld [vmem:[#allocation101_spill] sm:$0xff]  ;;  %v27003_v11 = vld [vmem:[#allocation102_spill] sm:$0xff] }
 0x679   :  { %v20785_v9 = vmul.f32 %v20755_v45, %v27001_v24  ;;  %v20789_v28 = vmul.f32 %v20755_v45, %v20307_v60  ;;  %v20793_v22 = vmul.f32 %v20755_v45, %v20311_v23  ;;  %v20797_v1 = vmul.f32 %v20755_v45, %v20315_v10  ;;  %v27004_v24 = vld [vmem:[#allocation103_spill] sm:$0xff] }
 0x67a   :  { %v5865_v13 = vmul.f32 %v20760_v44, %v5795_v52  ;;  %v20802_v33 = vmul.f32 %v20755_v45, %v20319_v6  ;;  %v20806_v15 = vmul.f32 %v20755_v45, %v20323_v36  ;;  %v20810_v60 = vmul.f32 %v20755_v45, %v20327_v16 }
 0x67b   :  { %v20814_v23 = vmul.f32 %v20755_v45, %v20331_v4  ;;  %v20818_v10 = vmul.f32 %v20755_v45, %v20335_v18  ;;  %v20822_v6 = vmul.f32 %v20755_v45, %v20339_v61  ;;  %v20826_v36 = vmul.f32 %v20755_v45, %v20343_v35 }
 0x67c   :  { %v5935_v52 = vadd.f32 %v20781_v20, %v5865_v13  ;;  %v20831_v16 = vmul.f32 %v20755_v45, %v20347_v38  ;;  %v20835_v4 = vmul.f32 %v20755_v45, %v20351_v31  ;;  %v20839_v18 = vmul.f32 %v20755_v45, %v20355_v30  ;;  %v27005_v13 = vld [vmem:[#allocation104_spill] sm:$0xff]  ;;  %v27017_v20 = vld [vmem:[#allocation81_spill] sm:$0xff] }
 0x67d   :  { %v20843_v61 = vmul.f32 %v20755_v45, %v20359_v32  ;;  %v20847_v35 = vmul.f32 %v20755_v45, %v20363_v47  ;;  %v20851_v38 = vmul.f32 %v20755_v45, %v20367_v5  ;;  %v20855_v31 = vmul.f32 %v20755_v45, %v20371_v25 }
 0x67e   :  { %v5999_v59 = vmax.f32 %v5935_v52, 0.0  ;;  %v20859_v30 = vmul.f32 %v20755_v45, %v20375_v57  ;;  %v20863_v32 = vmul.f32 %v20755_v45, %v20379_v2  ;;  %v20867_v47 = vmul.f32 %v20755_v45, %v20383_v53  ;;  %v27006_v52 = vld [vmem:[#allocation105_spill] sm:$0xff] }
 0x67f   :  { %v20871_v5 = vmul.f32 %v20755_v45, %v20387_v58  ;;  %v20875_v25 = vmul.f32 %v20755_v45, %v20391_v34  ;;  %v20879_v57 = vmul.f32 %v20755_v45, %v20395_v51  ;;  %v20883_v2 = vmul.f32 %v20755_v45, %v20399_v19 }
 0x680   :  { %6063 = vst.msk [vmem:[#allocation2 + $0x448] sm:$0xff] %vm90_vm1, %v5999_v59  ;;  %v20888_v53 = vmul.f32 %v20755_v45, %v20403_v21  ;;  %v20892_v58 = vmul.f32 %v20755_v45, %v20407_v7  ;;  %v20896_v34 = vmul.f32 %v20755_v45, %v20411_v8  ;;  %v20900_v51 = vmul.f32 %v20755_v45, %v20415_v49  ;;  %v27007_v59 = vld [vmem:[#allocation106_spill] sm:$0xff] }
 0x681   :  { %v20904_v19 = vmul.f32 %v20755_v45, %v20419_v37  ;;  %v20908_v21 = vmul.f32 %v20755_v45, %v20423_v46  ;;  %v20912_v7 = vmul.f32 %v20755_v45, %v20427_v27  ;;  %v20916_v8 = vmul.f32 %v20755_v45, %v20431_v14 }
 0x682   :  { %v20920_v49 = vmul.f32 %v20755_v45, %v20435_v0  ;;  %v20924_v37 = vmul.f32 %v20755_v45, %v20439_v62  ;;  %v20928_v46 = vmul.f32 %v20755_v45, %v20443_v54  ;;  %v20932_v27 = vmul.f32 %v20755_v45, %v20447_v39 }
 0x683   :  { %v20936_v14 = vmul.f32 %v20755_v45, %v20451_v56  ;;  %v20940_v0 = vmul.f32 %v20755_v45, %v20455_v26  ;;  %v20944_v62 = vmul.f32 %v20755_v45, %v20459_v17  ;;  %v20948_v54 = vmul.f32 %v20755_v45, %v20463_v43 }
 0x684   :  { %v20952_v39 = vmul.f32 %v20755_v45, %v20467_v40  ;;  %v20956_v56 = vmul.f32 %v20755_v45, %v27002_v63  ;;  %v20960_v26 = vmul.f32 %v20755_v45, %v27003_v11  ;;  %v20964_v17 = vmul.f32 %v20755_v45, %v27004_v24 }
 0x685   :  { %v20968_v43 = vmul.f32 %v20755_v45, %v27005_v13  ;;  %v20972_v40 = vmul.f32 %v20755_v45, %v27006_v52  ;;  %v20976_v63 = vmul.f32 %v20755_v45, %v27007_v59  ;;  %v20980_v11 = vmul.f32 %v20755_v45, %v27009_v55 }
 0x686   :  { %v20984_v24 = vmul.f32 %v20755_v45, %v27011_v48  ;;  %v20988_v13 = vmul.f32 %v20755_v45, %v27013_v12  ;;  %v20992_v52 = vmul.f32 %v20755_v45, %v27015_v29  ;;  %v20996_v59 = vmul.f32 %v20755_v45, %v27017_v20 }
 0x687   :  { %27008 = vst [vmem:[#allocation123_spill] sm:$0xff] %v20976_v63  ;;  %27010 = vst [vmem:[#allocation124_spill] sm:$0xff] %v20980_v11  ;;  %v27019_v63 = vld [vmem:[#allocation112_spill] sm:$0xff]  ;;  %v27020_v11 = vld [vmem:[#allocation113_spill] sm:$0xff] }
 0x688   :  { %27012 = vst [vmem:[#allocation125_spill] sm:$0xff] %v20984_v24  ;;  %27014 = vst [vmem:[#allocation126_spill] sm:$0xff] %v20988_v13  ;;  %v21000_v55 = vmul.f32 %v20755_v45, %v27019_v63  ;;  %v21004_v48 = vmul.f32 %v20755_v45, %v27020_v11  ;;  %v27021_v24 = vld [vmem:[#allocation114_spill] sm:$0xff]  ;;  %v27022_v13 = vld [vmem:[#allocation115_spill] sm:$0xff]  ;;  %v21024_v11 = vmul.f32 %v20755_v45, %v26996_v3 }
 0x689   :  { %27016 = vst [vmem:[#allocation127_spill] sm:$0xff] %v20992_v52  ;;  %27018 = vst [vmem:[#allocation128_spill] sm:$0xff] %v20996_v59  ;;  %v21008_v12 = vmul.f32 %v20755_v45, %v27021_v24  ;;  %v21012_v29 = vmul.f32 %v20755_v45, %v27022_v13  ;;  %v27023_v52 = vld [vmem:[#allocation116_spill] sm:$0xff]  ;;  %v27024_v59 = vld [vmem:[#allocation117_spill] sm:$0xff]  ;;  %v21028_v24 = vmul.f32 %v20760_v44, %v20768_v42 }
 0x68a   :  { %v21016_v20 = vmul.f32 %v20755_v45, %v27023_v52  ;;  %v21020_v63 = vmul.f32 %v20755_v45, %v27024_v59  ;;  %v21032_v13 = vmul.f32 %v20760_v44, %v20772_v50  ;;  %v21036_v52 = vmul.f32 %v20760_v44, %v20776_v41 }
 0x68b   :  { %v21040_v59 = vmul.f32 %v20760_v44, %v20785_v9  ;;  %v21044_v3 = vmul.f32 %v20760_v44, %v20789_v28  ;;  %v21048_v45 = vmul.f32 %v20760_v44, %v20793_v22  ;;  %v21052_v42 = vmul.f32 %v20760_v44, %v20797_v1 }
 0x68c   :  { %v21056_v50 = vmul.f32 %v20760_v44, %v20802_v33  ;;  %v21060_v41 = vmul.f32 %v20760_v44, %v20806_v15  ;;  %v21064_v9 = vmul.f32 %v20760_v44, %v20810_v60  ;;  %v21068_v28 = vmul.f32 %v20760_v44, %v20814_v23 }
 0x68d   :  { %v21072_v22 = vmul.f32 %v20760_v44, %v20818_v10  ;;  %v21076_v1 = vmul.f32 %v20760_v44, %v20822_v6  ;;  %v21080_v33 = vmul.f32 %v20760_v44, %v20826_v36  ;;  %v21084_v15 = vmul.f32 %v20760_v44, %v20831_v16 }
 0x68e   :  { %v21088_v60 = vmul.f32 %v20760_v44, %v20835_v4  ;;  %v21092_v23 = vmul.f32 %v20760_v44, %v20839_v18  ;;  %v21096_v10 = vmul.f32 %v20760_v44, %v20843_v61  ;;  %v21100_v6 = vmul.f32 %v20760_v44, %v20847_v35 }
 0x68f   :  { %v21104_v36 = vmul.f32 %v20760_v44, %v20851_v38  ;;  %v21108_v16 = vmul.f32 %v20760_v44, %v20855_v31  ;;  %v21112_v4 = vmul.f32 %v20760_v44, %v20859_v30  ;;  %v21116_v18 = vmul.f32 %v20760_v44, %v20863_v32 }
 0x690   :  { %v21120_v61 = vmul.f32 %v20760_v44, %v20867_v47  ;;  %v21124_v35 = vmul.f32 %v20760_v44, %v20871_v5  ;;  %v21128_v38 = vmul.f32 %v20760_v44, %v20875_v25  ;;  %v21132_v31 = vmul.f32 %v20760_v44, %v20879_v57 }
 0x691   :  { %v21136_v30 = vmul.f32 %v20760_v44, %v20883_v2  ;;  %v21140_v32 = vmul.f32 %v20760_v44, %v20888_v53  ;;  %v21144_v47 = vmul.f32 %v20760_v44, %v20892_v58  ;;  %v21148_v5 = vmul.f32 %v20760_v44, %v20896_v34 }
 0x692   :  { %v21152_v25 = vmul.f32 %v20760_v44, %v20900_v51  ;;  %v21156_v57 = vmul.f32 %v20760_v44, %v20904_v19  ;;  %v21160_v2 = vmul.f32 %v20760_v44, %v20908_v21  ;;  %v21164_v53 = vmul.f32 %v20760_v44, %v20912_v7 }
 0x693   :  { %v21168_v58 = vmul.f32 %v20760_v44, %v20916_v8  ;;  %v21172_v34 = vmul.f32 %v20760_v44, %v20920_v49  ;;  %v21176_v51 = vmul.f32 %v20760_v44, %v20924_v37  ;;  %v21180_v19 = vmul.f32 %v20760_v44, %v20928_v46 }
 0x694   :  { %v21184_v21 = vmul.f32 %v20760_v44, %v20932_v27  ;;  %v21188_v7 = vmul.f32 %v20760_v44, %v20936_v14  ;;  %v21192_v8 = vmul.f32 %v20760_v44, %v20940_v0  ;;  %v21196_v49 = vmul.f32 %v20760_v44, %v20944_v62 }
 0x695   :  { %v21200_v37 = vmul.f32 %v20760_v44, %v20948_v54  ;;  %v21204_v46 = vmul.f32 %v20760_v44, %v20952_v39  ;;  %v21208_v27 = vmul.f32 %v20760_v44, %v20956_v56  ;;  %v21212_v14 = vmul.f32 %v20760_v44, %v20960_v26  ;;  %v27030_v39 = vld [vmem:[#allocation123_spill] sm:$0xff] }
 0x696   :  { %v21216_v0 = vmul.f32 %v20760_v44, %v20964_v17  ;;  %v21220_v62 = vmul.f32 %v20760_v44, %v20968_v43  ;;  %v21224_v54 = vmul.f32 %v20760_v44, %v20972_v40  ;;  %v21228_v56 = vmul.f32 %v20760_v44, %v27030_v39 }
 0x697   :  { %27025 = vst [vmem:[#allocation129_spill] sm:$0xff] %v21208_v27  ;;  %27026 = vst [vmem:[#allocation130_spill] sm:$0xff] %v21212_v14  ;;  %v27031_v27 = vld [vmem:[#allocation124_spill] sm:$0xff]  ;;  %v27032_v14 = vld [vmem:[#allocation125_spill] sm:$0xff] }
 0x698   :  { %27027 = vst [vmem:[#allocation131_spill] sm:$0xff] %v21216_v0  ;;  %27028 = vst [vmem:[#allocation132_spill] sm:$0xff] %v21220_v62  ;;  %v21232_v26 = vmul.f32 %v20760_v44, %v27031_v27  ;;  %v21236_v17 = vmul.f32 %v20760_v44, %v27032_v14  ;;  %v27033_v0 = vld [vmem:[#allocation126_spill] sm:$0xff]  ;;  %v27034_v62 = vld [vmem:[#allocation127_spill] sm:$0xff]  ;;  %v21252_v27 = vmul.f32 %v20760_v44, %v21000_v55 }
 0x699   :  { %27029 = vst [vmem:[#allocation75_spill] sm:$0xff] %v21224_v54  ;;  %v21240_v43 = vmul.f32 %v20760_v44, %v27033_v0  ;;  %v21244_v40 = vmul.f32 %v20760_v44, %v27034_v62  ;;  %v27035_v54 = vld [vmem:[#allocation128_spill] sm:$0xff]  ;;  %v21256_v14 = vmul.f32 %v20760_v44, %v21004_v48  ;;  %v21260_v0 = vmul.f32 %v20760_v44, %v21008_v12 }
 0x69a   :  { %v21248_v39 = vmul.f32 %v20760_v44, %v27035_v54  ;;  %v21264_v62 = vmul.f32 %v20760_v44, %v21012_v29  ;;  %v21268_v54 = vmul.f32 %v20760_v44, %v21016_v20  ;;  %v21272_v55 = vmul.f32 %v20760_v44, %v21020_v63 }
 0x69b   :  { %27036 = vst [vmem:[#allocation133_spill] sm:$0xff] %v21256_v14  ;;  %v21276_v48 = vmul.f32 %v20760_v44, %v21024_v11  ;;  %v27037_v14 = vld [vmem:[#allocation122_spill] sm:$0xff] }
 0x69c   :  { %v21280_v12 = vadd.f32 %v27037_v14, %v21028_v24  ;;  %v21284_v29 = vadd.f32 %v27037_v14, %v21032_v13  ;;  %v21288_v20 = vadd.f32 %v27037_v14, %v21036_v52  ;;  %v21292_v63 = vadd.f32 %v27037_v14, %v21040_v59 }
 0x69d   :  { %v21296_v44 = vadd.f32 %v27037_v14, %v21044_v3  ;;  %v21300_v11 = vadd.f32 %v27037_v14, %v21048_v45  ;;  %v21304_v24 = vadd.f32 %v27037_v14, %v21052_v42  ;;  %v21308_v13 = vadd.f32 %v27037_v14, %v21056_v50 }
 0x69e   :  { %v21312_v52 = vadd.f32 %v27037_v14, %v21060_v41  ;;  %v21316_v59 = vadd.f32 %v27037_v14, %v21064_v9  ;;  %v21320_v3 = vadd.f32 %v27037_v14, %v21068_v28  ;;  %v21324_v45 = vadd.f32 %v27037_v14, %v21072_v22 }
 0x69f   :  { %v21328_v42 = vadd.f32 %v27037_v14, %v21076_v1  ;;  %v21332_v50 = vadd.f32 %v27037_v14, %v21080_v33  ;;  %v21336_v41 = vadd.f32 %v27037_v14, %v21084_v15  ;;  %v21340_v9 = vadd.f32 %v27037_v14, %v21088_v60 }
 0x6a0   :  { %v21344_v28 = vadd.f32 %v27037_v14, %v21092_v23  ;;  %v21348_v22 = vadd.f32 %v27037_v14, %v21096_v10  ;;  %v21352_v1 = vadd.f32 %v27037_v14, %v21100_v6  ;;  %v21356_v33 = vadd.f32 %v27037_v14, %v21104_v36 }
 0x6a1   :  { %v21360_v15 = vadd.f32 %v27037_v14, %v21108_v16  ;;  %v21364_v60 = vadd.f32 %v27037_v14, %v21112_v4  ;;  %v21368_v23 = vadd.f32 %v27037_v14, %v21116_v18  ;;  %v21372_v10 = vadd.f32 %v27037_v14, %v21120_v61 }
 0x6a2   :  { %v21376_v6 = vadd.f32 %v27037_v14, %v21124_v35  ;;  %v21380_v36 = vadd.f32 %v27037_v14, %v21128_v38  ;;  %v21384_v16 = vadd.f32 %v27037_v14, %v21132_v31  ;;  %v21388_v4 = vadd.f32 %v27037_v14, %v21136_v30 }
 0x6a3   :  { %v21392_v18 = vadd.f32 %v27037_v14, %v21140_v32  ;;  %v21396_v61 = vadd.f32 %v27037_v14, %v21144_v47  ;;  %v21400_v35 = vadd.f32 %v27037_v14, %v21148_v5  ;;  %v21404_v38 = vadd.f32 %v27037_v14, %v21152_v25 }
 0x6a4   :  { %v21408_v31 = vadd.f32 %v27037_v14, %v21156_v57  ;;  %v21412_v30 = vadd.f32 %v27037_v14, %v21160_v2  ;;  %v21416_v32 = vadd.f32 %v27037_v14, %v21164_v53  ;;  %v21420_v47 = vadd.f32 %v27037_v14, %v21168_v58 }
 0x6a5   :  { %v21424_v5 = vadd.f32 %v27037_v14, %v21172_v34  ;;  %v21428_v25 = vadd.f32 %v27037_v14, %v21176_v51  ;;  %v21432_v57 = vadd.f32 %v27037_v14, %v21180_v19  ;;  %v21436_v2 = vadd.f32 %v27037_v14, %v21184_v21  ;;  %v27042_v21 = vld [vmem:[#allocation129_spill] sm:$0xff] }
 0x6a6   :  { %v21440_v53 = vadd.f32 %v27037_v14, %v21188_v7  ;;  %v21444_v58 = vadd.f32 %v27037_v14, %v21192_v8  ;;  %v21448_v34 = vadd.f32 %v27037_v14, %v21196_v49  ;;  %v21452_v51 = vadd.f32 %v27037_v14, %v21200_v37 }
 0x6a7   :  { %v21456_v19 = vadd.f32 %v27037_v14, %v21204_v46  ;;  %v21460_v7 = vadd.f32 %v27037_v14, %v27042_v21  ;;  %v21480_v21 = vadd.f32 %v27037_v14, %v21228_v56  ;;  %v21500_v56 = vadd.f32 %v27037_v14, %v21248_v39 }
 0x6a8   :  { %27038 = vst [vmem:[#allocation78_spill] sm:$0xff] %v21440_v53  ;;  %27039 = vst [vmem:[#allocation79_spill] sm:$0xff] %v21444_v58  ;;  %v27043_v53 = vld [vmem:[#allocation130_spill] sm:$0xff]  ;;  %v27044_v58 = vld [vmem:[#allocation131_spill] sm:$0xff]  ;;  %v21520_v39 = vadd.f32 %v27037_v14, %v21268_v54  ;;  %v5942_v54 = vmax.f32 %v21300_v11, 0.0  ;;  %v5953_v11 = vmax.f32 %v21344_v28, 0.0 }
 0x6a9   :  { %27040 = vst [vmem:[#allocation110_spill] sm:$0xff] %v21448_v34  ;;  %27041 = vst [vmem:[#allocation111_spill] sm:$0xff] %v21452_v51  ;;  %v21464_v8 = vadd.f32 %v27037_v14, %v27043_v53  ;;  %v21468_v49 = vadd.f32 %v27037_v14, %v27044_v58  ;;  %v27045_v34 = vld [vmem:[#allocation132_spill] sm:$0xff]  ;;  %v27046_v51 = vld [vmem:[#allocation75_spill] sm:$0xff]  ;;  %v21484_v53 = vadd.f32 %v27037_v14, %v21232_v26  ;;  %v5963_v28 = vmax.f32 %v21384_v16, 0.0 }
 0x6aa   :  { %v21472_v37 = vadd.f32 %v27037_v14, %v27045_v34  ;;  %v21476_v46 = vadd.f32 %v27037_v14, %v27046_v51  ;;  %v21488_v58 = vadd.f32 %v27037_v14, %v21236_v17  ;;  %v21492_v34 = vadd.f32 %v27037_v14, %v21240_v43  ;;  %27052 = vst [vmem:[#allocation151_spill] sm:$0xff] %v21520_v39 }
 0x6ab   :  { %27047 = vst [vmem:[#allocation77_spill] sm:$0xff] %v21484_v53  ;;  %v21496_v51 = vadd.f32 %v27037_v14, %v21244_v40  ;;  %v21504_v26 = vadd.f32 %v27037_v14, %v21252_v27  ;;  %v27048_v53 = vld [vmem:[#allocation133_spill] sm:$0xff]  ;;  %v21512_v43 = vadd.f32 %v27037_v14, %v21260_v0  ;;  %v21516_v40 = vadd.f32 %v27037_v14, %v21264_v62 }
 0x6ac   :  { %v21508_v17 = vadd.f32 %v27037_v14, %v27048_v53  ;;  %v21524_v27 = vadd.f32 %v27037_v14, %v21272_v55  ;;  %v21528_v53 = vadd.f32 %v27037_v14, %v21276_v48  ;;  %v5938_v0 = vmax.f32 %v21284_v29, 0.0  ;;  %6006 = vst.msk [vmem:[#allocation2 + $0x70] sm:$0xff] %vm90_vm1, %v5942_v54  ;;  %6017 = vst.msk [vmem:[#allocation2 + $0x128] sm:$0xff] %vm90_vm1, %v5953_v11 }
 0x6ad   :  { %27050 = vst [vmem:[#allocation149_spill] sm:$0xff] %v21512_v43  ;;  %27051 = vst [vmem:[#allocation150_spill] sm:$0xff] %v21516_v40  ;;  %v5939_v43 = vmax.f32 %v21288_v20, 0.0  ;;  %v5940_v62 = vmax.f32 %v21292_v63, 0.0  ;;  %v5941_v40 = vmax.f32 %v21296_v44, 0.0  ;;  %v5943_v39 = vmax.f32 %v21304_v24, 0.0 }
 0x6ae   :  { %27049 = vst [vmem:[#allocation148_spill] sm:$0xff] %v21508_v17  ;;  %27053 = vst [vmem:[#allocation152_spill] sm:$0xff] %v21524_v27  ;;  %v5937_v17 = vmax.f32 %v21280_v12, 0.0  ;;  %v5944_v55 = vmax.f32 %v21308_v13, 0.0  ;;  %v5945_v27 = vmax.f32 %v21312_v52, 0.0  ;;  %v5946_v14 = vmax.f32 %v21316_v59, 0.0 }
 0x6af   :  { %v5947_v48 = vmax.f32 %v21320_v3, 0.0  ;;  %6002 = vst.msk [vmem:[#allocation2 + $0x30] sm:$0xff] %vm90_vm1, %v5938_v0  ;;  %6003 = vst.msk [vmem:[#allocation2 + $0x48] sm:$0xff] %vm90_vm1, %v5939_v43  ;;  %v5948_v12 = vmax.f32 %v21324_v45, 0.0  ;;  %v5949_v29 = vmax.f32 %v21328_v42, 0.0  ;;  %v5950_v20 = vmax.f32 %v21332_v50, 0.0 }
 0x6b0   :  { %6001 = vst.msk [vmem:[#allocation2 + $0x28] sm:$0xff] %vm90_vm1, %v5937_v17  ;;  %v5951_v63 = vmax.f32 %v21336_v41, 0.0  ;;  %6004 = vst.msk [vmem:[#allocation2 + $0x50] sm:$0xff] %vm90_vm1, %v5940_v62  ;;  %v5952_v44 = vmax.f32 %v21340_v9, 0.0  ;;  %v5954_v24 = vmax.f32 %v21348_v22, 0.0  ;;  %v5955_v13 = vmax.f32 %v21352_v1, 0.0 }
 0x6b1   :  { %6005 = vst.msk [vmem:[#allocation2 + $0x68] sm:$0xff] %vm90_vm1, %v5941_v40  ;;  %6007 = vst.msk [vmem:[#allocation2 + $0x88] sm:$0xff] %vm90_vm1, %v5943_v39  ;;  %v21563_v52 = vld [vmem:[%s25850_s4 + $0x8] sm:$0xf]  ;;  %v5956_v59 = vmax.f32 %v21356_v33, 0.0  ;;  %v5957_v3 = vmax.f32 %v21360_v15, 0.0 }
 0x6b2   :  { %6008 = vst.msk [vmem:[#allocation2 + $0x90] sm:$0xff] %vm90_vm1, %v5944_v55  ;;  %6009 = vst.msk [vmem:[#allocation2 + $0xa8] sm:$0xff] %vm90_vm1, %v5945_v27  ;;  %v5958_v45 = vmax.f32 %v21364_v60, 0.0  ;;  %v5959_v42 = vmax.f32 %v21368_v23, 0.0  ;;  %15380 = vmatprep.subr.msk.mxu1 %vm840_vm0, %v21563_v52  ;;  %v5960_v50 = vmax.f32 %v21372_v10, 0.0  ;;  %v5961_v41 = vmax.f32 %v21376_v6, 0.0 }
 0x6b3   :  { %6010 = vst.msk [vmem:[#allocation2 + $0xb0] sm:$0xff] %vm90_vm1, %v5946_v14  ;;  %6011 = vst.msk [vmem:[#allocation2 + $0xc8] sm:$0xff] %vm90_vm1, %v5947_v48  ;;  %v5962_v9 = vmax.f32 %v21380_v36, 0.0  ;;  %v5964_v22 = vmax.f32 %v21388_v4, 0.0  ;;  %v5965_v1 = vmax.f32 %v21392_v18, 0.0  ;;  %v5966_v33 = vmax.f32 %v21396_v61, 0.0 }
 0x6b4   :  { %6012 = vst.msk [vmem:[#allocation2 + $0xd0] sm:$0xff] %vm90_vm1, %v5948_v12  ;;  %6013 = vst.msk [vmem:[#allocation2 + $0xe8] sm:$0xff] %vm90_vm1, %v5949_v29  ;;  %v5967_v15 = vmax.f32 %v21400_v35, 0.0  ;;  %v5968_v60 = vmax.f32 %v21404_v38, 0.0  ;;  %v5969_v23 = vmax.f32 %v21408_v31, 0.0  ;;  %v5970_v10 = vmax.f32 %v21412_v30, 0.0 }
 0x6b5   :  { %6014 = vst.msk [vmem:[#allocation2 + $0xf0] sm:$0xff] %vm90_vm1, %v5950_v20  ;;  %6015 = vst.msk [vmem:[#allocation2 + $0x108] sm:$0xff] %vm90_vm1, %v5951_v63  ;;  %v5971_v6 = vmax.f32 %v21416_v32, 0.0  ;;  %v5972_v36 = vmax.f32 %v21420_v47, 0.0  ;;  %v5973_v16 = vmax.f32 %v21424_v5, 0.0  ;;  %v5974_v4 = vmax.f32 %v21428_v25, 0.0 }
 0x6b6   :  { %6016 = vst.msk [vmem:[#allocation2 + $0x110] sm:$0xff] %vm90_vm1, %v5952_v44  ;;  %6018 = vst.msk [vmem:[#allocation2 + $0x130] sm:$0xff] %vm90_vm1, %v5954_v24  ;;  %v5975_v18 = vmax.f32 %v21432_v57, 0.0  ;;  %v21609_v35 = vld [vmem:[#allocation2 + $0x30] sm:$0xff]  ;;  %v5976_v38 = vmax.f32 %v21436_v2, 0.0  ;;  %v27054_v31 = vld [vmem:[#allocation78_spill] sm:$0xff] }
 0x6b7   :  { %6019 = vst.msk [vmem:[#allocation2 + $0x148] sm:$0xff] %vm90_vm1, %v5955_v13  ;;  %6020 = vst.msk [vmem:[#allocation2 + $0x150] sm:$0xff] %vm90_vm1, %v5956_v59  ;;  %v21607_v61 = vld [vmem:[#allocation2 + $0x28] sm:$0xff]  ;;  %v5977_v30 = vmax.f32 %v27054_v31, 0.0  ;;  %v27055_v32 = vld [vmem:[#allocation79_spill] sm:$0xff]  ;;  %v5981_v2 = vmax.f32 %v21456_v19, 0.0 }
 0x6b8   :  { %6021 = vst.msk [vmem:[#allocation2 + $0x168] sm:$0xff] %vm90_vm1, %v5957_v3  ;;  %6022 = vst.msk [vmem:[#allocation2 + $0x170] sm:$0xff] %vm90_vm1, %v5958_v45  ;;  %v5978_v47 = vmax.f32 %v27055_v32, 0.0  ;;  %v27056_v5 = vld [vmem:[#allocation110_spill] sm:$0xff]  ;;  %15189 = vmatprep.mubr.msk.f32.mxu1 %vm90_vm1, %v21607_v61  ;;  %v27057_v57 = vld [vmem:[#allocation111_spill] sm:$0xff]  ;;  %v5982_v43 = vmax.f32 %v21460_v7, 0.0 }
 0x6b9   :  { %6023 = vst.msk [vmem:[#allocation2 + $0x188] sm:$0xff] %vm90_vm1, %v5959_v42  ;;  %6024 = vst.msk [vmem:[#allocation2 + $0x190] sm:$0xff] %vm90_vm1, %v5960_v50  ;;  %v5979_v25 = vmax.f32 %v27056_v5, 0.0  ;;  %v5980_v17 = vmax.f32 %v27057_v57, 0.0  ;;  %v5983_v40 = vmax.f32 %v21464_v8, 0.0  ;;  %15190 = vmatmul.mubr.msk.f32.gmra.mrb[2].mxu1 %vm90_vm1, %v21609_v35  ;;  %v21631_v39 = vld [vmem:[#allocation2 + $0x48] sm:$0xff] }
 0x6ba   :  { %6025 = vst.msk [vmem:[#allocation2 + $0x1a8] sm:$0xff] %vm90_vm1, %v5961_v41  ;;  %6026 = vst.msk [vmem:[#allocation2 + $0x1b0] sm:$0xff] %vm90_vm1, %v5962_v9  ;;  %v5984_v27 = vmax.f32 %v21468_v49, 0.0  ;;  %v5985_v19 = vmax.f32 %v21472_v37, 0.0  ;;  %v5986_v7 = vmax.f32 %v21476_v46, 0.0  ;;  %v5987_v8 = vmax.f32 %v21480_v21, 0.0  ;;  %15192 = vmatprep.mubr.msk.f32.mxu1 %vm90_vm1, %v21631_v39 }
 0x6bb   :  { %6027 = vst.msk [vmem:[#allocation2 + $0x1c8] sm:$0xff] %vm90_vm1, %v5963_v28  ;;  %6028 = vst.msk [vmem:[#allocation2 + $0x1d0] sm:$0xff] %vm90_vm1, %v5964_v22  ;;  %v27058_v0 = vld [vmem:[#allocation77_spill] sm:$0xff]  ;;  %v5989_v49 = vmax.f32 %v21488_v58, 0.0  ;;  %v5990_v37 = vmax.f32 %v21492_v34, 0.0  ;;  %v5991_v46 = vmax.f32 %v21496_v51, 0.0 }
 0x6bc   :  { %6029 = vst.msk [vmem:[#allocation2 + $0x1e8] sm:$0xff] %vm90_vm1, %v5965_v1  ;;  %6030 = vst.msk [vmem:[#allocation2 + $0x1f0] sm:$0xff] %vm90_vm1, %v5966_v33  ;;  %v5988_v62 = vmax.f32 %v27058_v0, 0.0  ;;  %v5992_v21 = vmax.f32 %v21500_v56, 0.0  ;;  %v5993_v54 = vmax.f32 %v21504_v26, 0.0  ;;  %v27059_v55 = vld [vmem:[#allocation148_spill] sm:$0xff] }
 0x6bd   :  { %6031 = vst.msk [vmem:[#allocation2 + $0x208] sm:$0xff] %vm90_vm1, %v5967_v15  ;;  %6032 = vst.msk [vmem:[#allocation2 + $0x210] sm:$0xff] %vm90_vm1, %v5968_v60  ;;  %v5994_v14 = vmax.f32 %v27059_v55, 0.0  ;;  %v27060_v48 = vld [vmem:[#allocation149_spill] sm:$0xff]  ;;  %v27061_v51 = vld [vmem:[#allocation150_spill] sm:$0xff]  ;;  %v6000_v63 = vmax.f32 %v21528_v53, 0.0 }
 0x6be   :  { %6033 = vst.msk [vmem:[#allocation2 + $0x268] sm:$0xff] %vm90_vm1, %v5969_v23  ;;  %6034 = vst.msk [vmem:[#allocation2 + $0x270] sm:$0xff] %vm90_vm1, %v5970_v10  ;;  %v5995_v58 = vmax.f32 %v27060_v48, 0.0  ;;  %v21659_v34 = vld [vmem:[#allocation2 + $0x50] sm:$0xff]  ;;  %v5996_v12 = vmax.f32 %v27061_v51, 0.0  ;;  %v27062_v29 = vld [vmem:[#allocation151_spill] sm:$0xff] }
 0x6bf   :  { %6035 = vst.msk [vmem:[#allocation2 + $0x288] sm:$0xff] %vm90_vm1, %v5971_v6  ;;  %6036 = vst.msk [vmem:[#allocation2 + $0x290] sm:$0xff] %vm90_vm1, %v5972_v36  ;;  %v5997_v56 = vmax.f32 %v27062_v29, 0.0  ;;  %v27063_v20 = vld [vmem:[#allocation152_spill] sm:$0xff]  ;;  %15193 = vmatmul.mubr.msk.f32.gmra.mrb[4].mxu1 %vm90_vm1, %v21659_v34  ;;  %v27064_v53 = vld [vmem:[#allocation121_spill] sm:$0xff] }
 0x6c0   :  { %6037 = vst.msk [vmem:[#allocation2 + $0x2a8] sm:$0xff] %vm90_vm1, %v5973_v16  ;;  %6038 = vst.msk [vmem:[#allocation2 + $0x2b0] sm:$0xff] %vm90_vm1, %v5974_v4  ;;  %v5998_v26 = vmax.f32 %v27063_v20, 0.0  ;;  %v21671_v44 = vld [vmem:[#allocation2 + $0x68] sm:$0xff]  ;;  %v27065_v11 = vrot.slane %v27064_v53, 7  ;;  %v21690_v3 = vld [vmem:[#allocation2 + $0x70] sm:$0xff] }
 0x6c1   :  { %6039 = vst.msk [vmem:[#allocation2 + $0x2c8] sm:$0xff] %vm90_vm1, %v5975_v18  ;;  %6040 = vst.msk [vmem:[#allocation2 + $0x2d0] sm:$0xff] %vm90_vm1, %v5976_v38  ;;  %15195 = vmatprep.mubr.msk.f32.mxu1 %vm90_vm1, %v21671_v44  ;;  %v27066_v24 = vld [vmem:[#allocation120_spill] sm:$0xff]  ;;  %v21698_v42 = vld [vmem:[#allocation2 + $0x90] sm:$0xff] }
 0x6c2   :  { %6041 = vst.msk [vmem:[#allocation2 + $0x2e8] sm:$0xff] %vm90_vm1, %v5977_v30  ;;  %6042 = vst.msk [vmem:[#allocation2 + $0x2f0] sm:$0xff] %vm90_vm1, %v5978_v47  ;;  %v27067_v13 = vrot.slane %v27066_v24, 7  ;;  %v21694_v45 = vld [vmem:[#allocation2 + $0x88] sm:$0xff]  ;;  %v21706_v41 = vld [vmem:[#allocation2 + $0xb0] sm:$0xff] }
 0x6c3   :  { %6043 = vst.msk [vmem:[#allocation2 + $0x308] sm:$0xff] %vm90_vm1, %v5979_v25  ;;  %6044 = vst.msk [vmem:[#allocation2 + $0x310] sm:$0xff] %vm90_vm1, %v5980_v17  ;;  %15196 = vmatmul.mubr.msk.f32.gmra.mrb[6].mxu1 %vm90_vm1, %v21690_v3  ;;  %v21702_v50 = vld [vmem:[#allocation2 + $0xa8] sm:$0xff]  ;;  %v21714_v28 = vld [vmem:[#allocation2 + $0xd0] sm:$0xff] }
 0x6c4   :  { %6045 = vst.msk [vmem:[#allocation2 + $0x328] sm:$0xff] %vm90_vm1, %v5981_v2  ;;  %6046 = vst.msk [vmem:[#allocation2 + $0x330] sm:$0xff] %vm90_vm1, %v5982_v43  ;;  %v21688_v59 = vsel %vm551_vm2, %v27067_v13, %v27065_v11  ;;  %15198 = vmatprep.mubr.msk.f32.mxu1 %vm90_vm1, %v21694_v45  ;;  %v21710_v9 = vld [vmem:[#allocation2 + $0xc8] sm:$0xff]  ;;  %v21722_v1 = vld [vmem:[#allocation2 + $0xf0] sm:$0xff] }
 0x6c5   :  { %6047 = vst.msk [vmem:[#allocation2 + $0x348] sm:$0xff] %vm90_vm1, %v5983_v40  ;;  %6048 = vst.msk [vmem:[#allocation2 + $0x350] sm:$0xff] %vm90_vm1, %v5984_v27  ;;  %v21718_v22 = vld [vmem:[#allocation2 + $0xe8] sm:$0xff]  ;;  %v21730_v15 = vld [vmem:[#allocation2 + $0x110] sm:$0xff] }
 0x6c6   :  { %6049 = vst.msk [vmem:[#allocation2 + $0x368] sm:$0xff] %vm90_vm1, %v5985_v19  ;;  %6050 = vst.msk [vmem:[#allocation2 + $0x370] sm:$0xff] %vm90_vm1, %v5986_v7  ;;  %v21726_v33 = vld [vmem:[#allocation2 + $0x108] sm:$0xff]  ;;  %v21738_v23 = vld [vmem:[#allocation2 + $0x130] sm:$0xff] }
 0x6c7   :  { %6051 = vst.msk [vmem:[#allocation2 + $0x388] sm:$0xff] %vm90_vm1, %v5987_v8  ;;  %6052 = vst.msk [vmem:[#allocation2 + $0x390] sm:$0xff] %vm90_vm1, %v5988_v62  ;;  %15199 = vmatmul.mubr.msk.f32.gmra.mrb[8].mxu1 %vm90_vm1, %v21698_v42  ;;  %v21734_v60 = vld [vmem:[#allocation2 + $0x128] sm:$0xff]  ;;  %v21746_v6 = vld [vmem:[#allocation2 + $0x150] sm:$0xff] }
 0x6c8   :  { %6053 = vst.msk [vmem:[#allocation2 + $0x3a8] sm:$0xff] %vm90_vm1, %v5989_v49  ;;  %6054 = vst.msk [vmem:[#allocation2 + $0x3b0] sm:$0xff] %vm90_vm1, %v5990_v37  ;;  %15201 = vmatprep.mubr.msk.f32.mxu1 %vm90_vm1, %v21702_v50  ;;  %v21742_v10 = vld [vmem:[#allocation2 + $0x148] sm:$0xff]  ;;  %v21754_v16 = vld [vmem:[#allocation2 + $0x170] sm:$0xff] }
 0x6c9   :  { %6055 = vst.msk [vmem:[#allocation2 + $0x3c8] sm:$0xff] %vm90_vm1, %v5991_v46  ;;  %6056 = vst.msk [vmem:[#allocation2 + $0x3d0] sm:$0xff] %vm90_vm1, %v5992_v21  ;;  %v21750_v36 = vld [vmem:[#allocation2 + $0x168] sm:$0xff]  ;;  %v21762_v18 = vld [vmem:[#allocation2 + $0x190] sm:$0xff] }
 0x6ca   :  { %6057 = vst.msk [vmem:[#allocation2 + $0x3e8] sm:$0xff] %vm90_vm1, %v5993_v54  ;;  %6058 = vst.msk [vmem:[#allocation2 + $0x3f0] sm:$0xff] %vm90_vm1, %v5994_v14  ;;  %v21758_v4 = vld [vmem:[#allocation2 + $0x188] sm:$0xff]  ;;  %v21770_v31 = vld [vmem:[#allocation2 + $0x1b0] sm:$0xff] }
 0x6cb   :  { %6059 = vst.msk [vmem:[#allocation2 + $0x408] sm:$0xff] %vm90_vm1, %v5995_v58  ;;  %6060 = vst.msk [vmem:[#allocation2 + $0x410] sm:$0xff] %vm90_vm1, %v5996_v12  ;;  %15202 = vmatmul.mubr.msk.f32.gmra.mrb[10].mxu1 %vm90_vm1, %v21706_v41  ;;  %v21766_v38 = vld [vmem:[#allocation2 + $0x1a8] sm:$0xff]  ;;  %v21778_v32 = vld [vmem:[#allocation2 + $0x1d0] sm:$0xff] }
 0x6cc   :  { %6061 = vst.msk [vmem:[#allocation2 + $0x428] sm:$0xff] %vm90_vm1, %v5997_v56  ;;  %6062 = vst.msk [vmem:[#allocation2 + $0x430] sm:$0xff] %vm90_vm1, %v5998_v26  ;;  %15204 = vmatprep.mubr.msk.f32.mxu1 %vm90_vm1, %v21710_v9  ;;  %v21774_v30 = vld [vmem:[#allocation2 + $0x1c8] sm:$0xff]  ;;  %v21788_v25 = vld [vmem:[#allocation2 + $0x1f0] sm:$0xff] }
 0x6cd   :  { %6064 = vst.msk [vmem:[#allocation2 + $0x450] sm:$0xff] %vm90_vm1, %v6000_v63  ;;  %27068 = vst [vmem:[#allocation153_spill] sm:$0xff] %v21774_v30  ;;  %v21782_v47 = vld [vmem:[#allocation2 + $0x1e8] sm:$0xff]  ;;  %v21794_v57 = vld [vmem:[#allocation2 + $0x250] sm:$0xff] }
 0x6ce   :  { %v21786_v5 = vld [vmem:[#allocation2 + $0x248] sm:$0xff]  ;;  %27069 = vst [vmem:[#allocation154_spill] sm:$0xff] %v21794_v57  ;;  %v21802_v2 = vld [vmem:[#allocation2 + $0x270] sm:$0xff]  ;;  %v6065_v53 = vld [vmem:[#allocation2] sm:$0xff] }
 0x6cf   :  { %15205 = vmatmul.mubr.msk.f32.gmra.mrb[12].mxu1 %vm90_vm1, %v21714_v28  ;;  %v21798_v17 = vld [vmem:[#allocation2 + $0x268] sm:$0xff]  ;;  %v21810_v40 = vld [vmem:[#allocation2 + $0x290] sm:$0xff]  ;;  %v6316_v13 = vrot.slane %v6065_v53, 7 }
 0x6d0   :  { %15207 = vmatprep.mubr.msk.f32.mxu1 %vm90_vm1, %v21718_v22  ;;  %v21806_v43 = vld [vmem:[#allocation2 + $0x288] sm:$0xff]  ;;  %v21818_v19 = vld [vmem:[#allocation2 + $0x2b0] sm:$0xff] }
 0x6d1   :  { %v21814_v27 = vld [vmem:[#allocation2 + $0x2a8] sm:$0xff]  ;;  %v21826_v8 = vld [vmem:[#allocation2 + $0x2d0] sm:$0xff] }
 0x6d2   :  { %v21822_v7 = vld [vmem:[#allocation2 + $0x2c8] sm:$0xff]  ;;  %v21834_v62 = vld [vmem:[#allocation2 + $0x2f0] sm:$0xff] }
 0x6d3   :  { %15208 = vmatmul.mubr.msk.f32.gmra.mrb[14].mxu1 %vm90_vm1, %v21722_v1  ;;  %v21830_v0 = vld [vmem:[#allocation2 + $0x2e8] sm:$0xff]  ;;  %v21842_v37 = vld [vmem:[#allocation2 + $0x310] sm:$0xff] }
 0x6d4   :  { %15210 = vmatprep.mubr.msk.f32.mxu1 %vm90_vm1, %v21726_v33  ;;  %v21838_v49 = vld [vmem:[#allocation2 + $0x308] sm:$0xff]  ;;  %v21850_v21 = vld [vmem:[#allocation2 + $0x330] sm:$0xff] }
 0x6d5   :  { %v21846_v46 = vld [vmem:[#allocation2 + $0x328] sm:$0xff]  ;;  %v21858_v55 = vld [vmem:[#allocation2 + $0x350] sm:$0xff] }
 0x6d6   :  { %v21854_v54 = vld [vmem:[#allocation2 + $0x348] sm:$0xff]  ;;  %v21866_v48 = vld [vmem:[#allocation2 + $0x370] sm:$0xff] }
 0x6d7   :  { %15211 = vmatmul.mubr.msk.f32.gmra.mrb[16].mxu1 %vm90_vm1, %v21730_v15  ;;  %v21862_v14 = vld [vmem:[#allocation2 + $0x368] sm:$0xff]  ;;  %27070 = vst [vmem:[#allocation155_spill] sm:$0xff] %v21866_v48  ;;  %v21874_v51 = vld [vmem:[#allocation2 + $0x390] sm:$0xff] }
 0x6d8   :  { %15213 = vmatprep.mubr.msk.f32.mxu1 %vm90_vm1, %v21734_v60  ;;  %v21870_v58 = vld [vmem:[#allocation2 + $0x388] sm:$0xff]  ;;  %27072 = vst [vmem:[#allocation157_spill] sm:$0xff] %v21874_v51  ;;  %v21882_v29 = vld [vmem:[#allocation2 + $0x3b0] sm:$0xff] }
 0x6d9   :  { %27071 = vst [vmem:[#allocation156_spill] sm:$0xff] %v21870_v58  ;;  %v21878_v12 = vld [vmem:[#allocation2 + $0x3a8] sm:$0xff]  ;;  %27074 = vst [vmem:[#allocation159_spill] sm:$0xff] %v21882_v29  ;;  %v21890_v20 = vld [vmem:[#allocation2 + $0x3d0] sm:$0xff] }
 0x6da   :  { %27073 = vst [vmem:[#allocation158_spill] sm:$0xff] %v21878_v12  ;;  %v21886_v56 = vld [vmem:[#allocation2 + $0x3c8] sm:$0xff]  ;;  %27076 = vst [vmem:[#allocation161_spill] sm:$0xff] %v21890_v20  ;;  %v21898_v63 = vld [vmem:[#allocation2 + $0x3f0] sm:$0xff] }
 0x6db   :  { %15214 = vmatmul.mubr.msk.f32.gmra.mrb[18].mxu1 %vm90_vm1, %v21738_v23  ;;  %27075 = vst [vmem:[#allocation160_spill] sm:$0xff] %v21886_v56  ;;  %v21894_v26 = vld [vmem:[#allocation2 + $0x3e8] sm:$0xff]  ;;  %27078 = vst [vmem:[#allocation163_spill] sm:$0xff] %v21898_v63 }
 0x6dc   :  { %15216 = vmatprep.mubr.msk.f32.mxu1 %vm90_vm1, %v21742_v10  ;;  %27077 = vst [vmem:[#allocation162_spill] sm:$0xff] %v21894_v26  ;;  %v21902_v11 = vld [vmem:[#allocation2 + $0x408] sm:$0xff] }
 0x6dd   :  { %27079 = vst [vmem:[#allocation164_spill] sm:$0xff] %v21902_v11 }
 0x6df   :  { %15217 = vmatmul.mubr.msk.f32.gmra.mrb[20].mxu1 %vm90_vm1, %v21746_v6 }
 0x6e0   :  { %15219 = vmatprep.mubr.msk.f32.mxu1 %vm90_vm1, %v21750_v36 }
 0x6e3   :  { %15220 = vmatmul.mubr.msk.f32.gmra.mrb[22].mxu1 %vm90_vm1, %v21754_v16 }
 0x6e4   :  { %15222 = vmatprep.mubr.msk.f32.mxu1 %vm90_vm1, %v21758_v4 }
 0x6e7   :  { %15223 = vmatmul.mubr.msk.f32.gmra.mrb[24].mxu1 %vm90_vm1, %v21762_v18 }
 0x6e8   :  { %15225 = vmatprep.mubr.msk.f32.mxu1 %vm90_vm1, %v21766_v38 }
 0x6eb   :  { %15226 = vmatmul.mubr.msk.f32.gmra.mrb[26].mxu1 %vm90_vm1, %v21770_v31 }
 0x6ec   :  { %15228 = vmatprep.mubr.msk.f32.mxu1 %vm90_vm1, %v21774_v30 }
 0x6ef   :  { %15229 = vmatmul.mubr.msk.f32.gmra.mrb[28].mxu1 %vm90_vm1, %v21778_v32 }
 0x6f0   :  { %15231 = vmatprep.mubr.msk.f32.mxu1 %vm90_vm1, %v21782_v47 }
 0x6f3   :  { %15232 = vmatmul.mubr.msk.f32.gmra.mrb[30].mxu1 %vm90_vm1, %v21788_v25 }
 0x6f4   :  { %15234 = vmatprep.mubr.msk.f32.mxu1 %vm90_vm1, %v21786_v5 }
 0x6f7   :  { %15235 = vmatmul.mubr.msk.f32.gmra.mrb[32].mxu1 %vm90_vm1, %v21794_v57 }
 0x6f8   :  { %15237 = vmatprep.mubr.msk.f32.mxu1 %vm90_vm1, %v21798_v17 }
 0x6fb   :  { %15238 = vmatmul.mubr.msk.f32.gmra.mrb[34].mxu1 %vm90_vm1, %v21802_v2 }
 0x6fc   :  { %15240 = vmatprep.mubr.msk.f32.mxu1 %vm90_vm1, %v21806_v43 }
 0x6ff   :  { %15241 = vmatmul.mubr.msk.f32.gmra.mrb[36].mxu1 %vm90_vm1, %v21810_v40 }
 0x700   :  { %15243 = vmatprep.mubr.msk.f32.mxu1 %vm90_vm1, %v21814_v27 }
 0x703   :  { %15244 = vmatmul.mubr.msk.f32.gmra.mrb[38].mxu1 %vm90_vm1, %v21818_v19 }
 0x704   :  { %15246 = vmatprep.mubr.msk.f32.mxu1 %vm90_vm1, %v21822_v7 }
 0x707   :  { %15247 = vmatmul.mubr.msk.f32.gmra.mrb[40].mxu1 %vm90_vm1, %v21826_v8 }
 0x708   :  { %15249 = vmatprep.mubr.msk.f32.mxu1 %vm90_vm1, %v21830_v0 }
 0x70b   :  { %15250 = vmatmul.mubr.msk.f32.gmra.mrb[42].mxu1 %vm90_vm1, %v21834_v62 }
 0x70c   :  { %15252 = vmatprep.mubr.msk.f32.mxu1 %vm90_vm1, %v21838_v49 }
 0x70f   :  { %15253 = vmatmul.mubr.msk.f32.gmra.mrb[44].mxu1 %vm90_vm1, %v21842_v37 }
 0x710   :  { %15255 = vmatprep.mubr.msk.f32.mxu1 %vm90_vm1, %v21846_v46 }
 0x713   :  { %15256 = vmatmul.mubr.msk.f32.gmra.mrb[46].mxu1 %vm90_vm1, %v21850_v21 }
 0x714   :  { %15258 = vmatprep.mubr.msk.f32.mxu1 %vm90_vm1, %v21854_v54 }
 0x717   :  { %15259 = vmatmul.mubr.msk.f32.gmra.mrb[48].mxu1 %vm90_vm1, %v21858_v55 }
 0x718   :  { %15261 = vmatprep.mubr.msk.f32.mxu1 %vm90_vm1, %v21862_v14 }
 0x71b   :  { %15262 = vmatmul.mubr.msk.f32.gmra.mrb[50].mxu1 %vm90_vm1, %v21866_v48 }
 0x71c   :  { %15264 = vmatprep.mubr.msk.f32.mxu1 %vm90_vm1, %v21870_v58  ;;  %v21920_v58 = vld [vmem:[#allocation2 + $0x430] sm:$0xff] }
 0x71f   :  { %15265 = vmatmul.mubr.msk.f32.gmra.mrb[52].mxu1 %vm90_vm1, %v21874_v51  ;;  %v21913_v51 = vld [vmem:[#allocation2 + $0x428] sm:$0xff] }
 0x720   :  { %15267 = vmatprep.mubr.msk.f32.mxu1 %vm90_vm1, %v21878_v12  ;;  %v21908_v12 = vld [vmem:[#allocation2 + $0x10] sm:$0xff]  ;;  %27081 = vst [vmem:[#allocation166_spill] sm:$0xff] %v21913_v51 }
 0x723   :  { %15268 = vmatmul.mubr.msk.f32.gmra.mrb[54].mxu1 %vm90_vm1, %v21882_v29 }
 0x724   :  { %15270 = vmatprep.mubr.msk.f32.mxu1 %vm90_vm1, %v21886_v56  ;;  %v21906_v56 = vld [vmem:[#allocation2 + $0x410] sm:$0xff] }
 0x725   :  { %27080 = vst [vmem:[#allocation165_spill] sm:$0xff] %v21906_v56 }
 0x727   :  { %15271 = vmatmul.mubr.msk.f32.gmra.mrb[56].mxu1 %vm90_vm1, %v21890_v20  ;;  %v17155_v20 = vld [vmem:[#allocation2 + $0x8] sm:$0xff] }
 0x728   :  { %15273 = vmatprep.mubr.msk.f32.mxu1 %vm90_vm1, %v21894_v26  ;;  %v7540_v29 = vrot.slane %v17155_v20, 1  ;;  %v6322_v20 = vrot.slane %v21607_v61, 7 }
 0x72b   :  { %15274 = vmatmul.mubr.msk.f32.gmra.mrb[58].mxu1 %vm90_vm1, %v21898_v63  ;;  %v6069_v63 = vld [vmem:[#allocation2 + $0x20] sm:$0xff] }
 0x72c   :  { %15276 = vmatprep.mubr.msk.f32.mxu1 %vm90_vm1, %v21902_v11  ;;  %v27082_v11 = vrot.slane %v27066_v24, 7  ;;  %v6321_v26 = vrot.slane %v6069_v63, 7  ;;  %v6324_v24 = vrot.slane %v21609_v35, 7 }
 0x72e   :  { %v6318_v53 = vsel %vm551_vm2, %v6316_v13, %v27082_v11  ;;  %v21935_v11 = vld [vmem:[%s25850_s4 + $0xc] sm:$0xf]  ;;  %v21940_v63 = vsel %vm551_vm2, %v6321_v26, %v6322_v20 }
 0x72f   :  { %15277 = vmatmul.mubr.msk.f32.gmra.mrb[60].mxu1 %vm90_vm1, %v21906_v56  ;;  %v27083_v56 = vrot.slane %v21908_v12, 1  ;;  %27084 = vst [vmem:[#allocation167_spill] sm:$0xff] %v21935_v11  ;;  %27085 = vst [vmem:[#allocation168_spill] sm:$0xff] %v21940_v63 }
 0x730   :  { %15279 = vmatprep.mubr.msk.f32.mxu1 %vm90_vm1, %v21913_v51  ;;  %v6073_v51 = vld [vmem:[#allocation2 + $0x40] sm:$0xff] }
 0x731   :  { %v21928_v48 = vsel %vm1777_vm3, %v7540_v29, %v27083_v56  ;;  %v6326_v13 = vrot.slane %v6073_v51, 7  ;;  %v6327_v29 = vrot.slane %v21631_v39, 7  ;;  %v6077_v56 = vld [vmem:[#allocation2 + $0x60] sm:$0xff] }
 0x732   :  { %v6331_v26 = vrot.slane %v6077_v56, 7  ;;  %v6337_v56 = vrot.slane %v21694_v45, 7 }
 0x733   :  { %15280 = vmatmul.mubr.msk.f32.gmra.mrb[62].mxu1 %vm90_vm1, %v21920_v58  ;;  %v21956_v51 = vsel %vm551_vm2, %v6326_v13, %v6327_v29 }
 0x734   :  { %15284 = vmatprep.mubr.msk.f32.mxu1 %vm90_vm1, %v6318_v53  ;;  %v21950_v53 = vsel %vm551_vm2, %v6322_v20, %v6324_v24  ;;  %27087 = vst [vmem:[#allocation170_spill] sm:$0xff] %v21956_v51  ;;  %v6334_v20 = vrot.slane %v21690_v3, 7 }
 0x735   :  { %27086 = vst [vmem:[#allocation169_spill] sm:$0xff] %v21950_v53 }
 0x737   :  { %15285 = vmatmul.mubr.msk.f32.vlgmr.msra.gmra.mrb[0].mxu1 %vm90_vm1, %v21688_v59  ;;  %v6329_v59 = vrot.slane %v21659_v34, 7 }
 0x738   :  { %15381 = vmatpush3.msk.msra.mxu1 %vm840_vm0, %v21563_v52  ;;  %15287 = vmatprep.mubr.msk.f32.mxu1 %vm90_vm1, %v21940_v63  ;;  %v6332_v52 = vrot.slane %v21671_v44, 7  ;;  %v6081_v63 = vld [vmem:[#allocation2 + $0x80] sm:$0xff] }
 0x739   :  { %15478 = vmatprep.subr.msk.mxu1 %vm840_vm0, %v21935_v11  ;;  %v21962_v11 = vsel %vm551_vm2, %v6327_v29, %v6329_v59  ;;  %v6336_v13 = vrot.slane %v6081_v63, 7  ;;  %v6339_v29 = vrot.slane %v21698_v42, 7  ;;  %v6342_v63 = vrot.slane %v21702_v50, 7 }
 0x73a   :  { %27088 = vst [vmem:[#allocation171_spill] sm:$0xff] %v21962_v11  ;;  %v21968_v24 = vsel %vm551_vm2, %v6331_v26, %v6332_v52 }
 0x73b   :  { %15288 = vmatmul.mubr.msk.f32.gmra.mrb[2].mxu1 %vm90_vm1, %v21950_v53  ;;  %27089 = vst [vmem:[#allocation172_spill] sm:$0xff] %v21968_v24  ;;  %v6085_v53 = vld [vmem:[#allocation2 + $0xa0] sm:$0xff]  ;;  %v21980_v59 = vsel %vm551_vm2, %v6336_v13, %v6337_v56 }
 0x73c   :  { %15290 = vmatprep.mubr.msk.f32.mxu1 %vm90_vm1, %v21956_v51  ;;  %v21974_v51 = vsel %vm551_vm2, %v6332_v52, %v6334_v20  ;;  %27091 = vst [vmem:[#allocation174_spill] sm:$0xff] %v21980_v59  ;;  %v6341_v26 = vrot.slane %v6085_v53, 7  ;;  %v6344_v52 = vrot.slane %v21706_v41, 7  ;;  %v6347_v53 = vrot.slane %v21710_v9, 7 }
 0x73d   :  { %27090 = vst [vmem:[#allocation173_spill] sm:$0xff] %v21974_v51 }
 0x73e   :  { %v21992_v20 = vsel %vm551_vm2, %v6341_v26, %v6342_v63 }
 0x73f   :  { %15291 = vmatmul.mubr.msk.f32.gmra.mrb[4].mxu1 %vm90_vm1, %v21962_v11  ;;  %v6089_v11 = vld [vmem:[#allocation2 + $0xc0] sm:$0xff]  ;;  %27093 = vst [vmem:[#allocation176_spill] sm:$0xff] %v21992_v20 }
 0x740   :  { %15293 = vmatprep.mubr.msk.f32.mxu1 %vm90_vm1, %v21968_v24  ;;  %v21986_v24 = vsel %vm551_vm2, %v6337_v56, %v6339_v29  ;;  %v6346_v13 = vrot.slane %v6089_v11, 7  ;;  %v6349_v56 = vrot.slane %v21714_v28, 7  ;;  %v6352_v11 = vrot.slane %v21718_v22, 7 }
 0x741   :  { %27092 = vst [vmem:[#allocation175_spill] sm:$0xff] %v21986_v24 }
 0x742   :  { %v22004_v29 = vsel %vm551_vm2, %v6346_v13, %v6347_v53 }
 0x743   :  { %15294 = vmatmul.mubr.msk.f32.gmra.mrb[6].mxu1 %vm90_vm1, %v21974_v51  ;;  %v6093_v51 = vld [vmem:[#allocation2 + $0xe0] sm:$0xff]  ;;  %27095 = vst [vmem:[#allocation178_spill] sm:$0xff] %v22004_v29 }
 0x744   :  { %15296 = vmatprep.mubr.msk.f32.mxu1 %vm90_vm1, %v21980_v59  ;;  %v21998_v59 = vsel %vm551_vm2, %v6342_v63, %v6344_v52  ;;  %v6351_v26 = vrot.slane %v6093_v51, 7  ;;  %v6354_v63 = vrot.slane %v21722_v1, 7  ;;  %v6357_v51 = vrot.slane %v21726_v33, 7 }
 0x745   :  { %27094 = vst [vmem:[#allocation177_spill] sm:$0xff] %v21998_v59 }
 0x746   :  { %v22016_v52 = vsel %vm551_vm2, %v6351_v26, %v6352_v11 }
 0x747   :  { %15297 = vmatmul.mubr.msk.f32.gmra.mrb[8].mxu1 %vm90_vm1, %v21986_v24  ;;  %v6097_v24 = vld [vmem:[#allocation2 + $0x100] sm:$0xff]  ;;  %27097 = vst [vmem:[#allocation180_spill] sm:$0xff] %v22016_v52 }
 0x748   :  { %15299 = vmatprep.mubr.msk.f32.mxu1 %vm90_vm1, %v21992_v20  ;;  %v22010_v20 = vsel %vm551_vm2, %v6347_v53, %v6349_v56  ;;  %v6356_v13 = vrot.slane %v6097_v24, 7  ;;  %v6359_v53 = vrot.slane %v21730_v15, 7  ;;  %v6362_v24 = vrot.slane %v21734_v60, 7 }
 0x749   :  { %27096 = vst [vmem:[#allocation179_spill] sm:$0xff] %v22010_v20 }
 0x74a   :  { %v22028_v56 = vsel %vm551_vm2, %v6356_v13, %v6357_v51 }
 0x74b   :  { %15300 = vmatmul.mubr.msk.f32.gmra.mrb[10].mxu1 %vm90_vm1, %v21998_v59  ;;  %v6101_v59 = vld [vmem:[#allocation2 + $0x120] sm:$0xff]  ;;  %27099 = vst [vmem:[#allocation182_spill] sm:$0xff] %v22028_v56 }
 0x74c   :  { %15302 = vmatprep.mubr.msk.f32.mxu1 %vm90_vm1, %v22004_v29  ;;  %v22022_v29 = vsel %vm551_vm2, %v6352_v11, %v6354_v63  ;;  %v6361_v26 = vrot.slane %v6101_v59, 7  ;;  %v6364_v11 = vrot.slane %v21738_v23, 7  ;;  %v6367_v59 = vrot.slane %v21742_v10, 7 }
 0x74d   :  { %27098 = vst [vmem:[#allocation181_spill] sm:$0xff] %v22022_v29 }
 0x74e   :  { %v22040_v63 = vsel %vm551_vm2, %v6361_v26, %v6362_v24 }
 0x74f   :  { %15303 = vmatmul.mubr.msk.f32.gmra.mrb[12].mxu1 %vm90_vm1, %v22010_v20  ;;  %v6105_v20 = vld [vmem:[#allocation2 + $0x140] sm:$0xff]  ;;  %27101 = vst [vmem:[#allocation184_spill] sm:$0xff] %v22040_v63 }
 0x750   :  { %15305 = vmatprep.mubr.msk.f32.mxu1 %vm90_vm1, %v22016_v52  ;;  %v22034_v52 = vsel %vm551_vm2, %v6357_v51, %v6359_v53  ;;  %v6366_v13 = vrot.slane %v6105_v20, 7  ;;  %v6369_v51 = vrot.slane %v21746_v6, 7  ;;  %v6372_v20 = vrot.slane %v21750_v36, 7 }
 0x751   :  { %27100 = vst [vmem:[#allocation183_spill] sm:$0xff] %v22034_v52 }
 0x752   :  { %v22052_v53 = vsel %vm551_vm2, %v6366_v13, %v6367_v59 }
 0x753   :  { %15306 = vmatmul.mubr.msk.f32.gmra.mrb[14].mxu1 %vm90_vm1, %v22022_v29  ;;  %v6109_v29 = vld [vmem:[#allocation2 + $0x160] sm:$0xff]  ;;  %27103 = vst [vmem:[#allocation186_spill] sm:$0xff] %v22052_v53 }
 0x754   :  { %15308 = vmatprep.mubr.msk.f32.mxu1 %vm90_vm1, %v22028_v56  ;;  %v22046_v56 = vsel %vm551_vm2, %v6362_v24, %v6364_v11  ;;  %v6371_v26 = vrot.slane %v6109_v29, 7  ;;  %v6374_v24 = vrot.slane %v21754_v16, 7  ;;  %v6377_v29 = vrot.slane %v21758_v4, 7 }
 0x755   :  { %27102 = vst [vmem:[#allocation185_spill] sm:$0xff] %v22046_v56 }
 0x756   :  { %v22064_v11 = vsel %vm551_vm2, %v6371_v26, %v6372_v20 }
 0x757   :  { %15309 = vmatmul.mubr.msk.f32.gmra.mrb[16].mxu1 %vm90_vm1, %v22034_v52  ;;  %v6113_v52 = vld [vmem:[#allocation2 + $0x180] sm:$0xff]  ;;  %27105 = vst [vmem:[#allocation188_spill] sm:$0xff] %v22064_v11 }
 0x758   :  { %15311 = vmatprep.mubr.msk.f32.mxu1 %vm90_vm1, %v22040_v63  ;;  %v22058_v63 = vsel %vm551_vm2, %v6367_v59, %v6369_v51  ;;  %v6376_v13 = vrot.slane %v6113_v52, 7  ;;  %v6379_v59 = vrot.slane %v21762_v18, 7  ;;  %v6382_v52 = vrot.slane %v21766_v38, 7 }
 0x759   :  { %27104 = vst [vmem:[#allocation187_spill] sm:$0xff] %v22058_v63 }
 0x75a   :  { %v22076_v51 = vsel %vm551_vm2, %v6376_v13, %v6377_v29 }
 0x75b   :  { %15312 = vmatmul.mubr.msk.f32.gmra.mrb[18].mxu1 %vm90_vm1, %v22046_v56  ;;  %v6117_v56 = vld [vmem:[#allocation2 + $0x1a0] sm:$0xff]  ;;  %27107 = vst [vmem:[#allocation190_spill] sm:$0xff] %v22076_v51 }
 0x75c   :  { %15314 = vmatprep.mubr.msk.f32.mxu1 %vm90_vm1, %v22052_v53  ;;  %v22070_v53 = vsel %vm551_vm2, %v6372_v20, %v6374_v24  ;;  %v6381_v26 = vrot.slane %v6117_v56, 7  ;;  %v6384_v20 = vrot.slane %v21770_v31, 7  ;;  %v6387_v56 = vrot.slane %v21774_v30, 7 }
 0x75d   :  { %27106 = vst [vmem:[#allocation189_spill] sm:$0xff] %v22070_v53 }
 0x75e   :  { %v22088_v24 = vsel %vm551_vm2, %v6381_v26, %v6382_v52 }
 0x75f   :  { %15315 = vmatmul.mubr.msk.f32.gmra.mrb[20].mxu1 %vm90_vm1, %v22058_v63  ;;  %v6121_v63 = vld [vmem:[#allocation2 + $0x1c0] sm:$0xff]  ;;  %27109 = vst [vmem:[#allocation192_spill] sm:$0xff] %v22088_v24 }
 0x760   :  { %15317 = vmatprep.mubr.msk.f32.mxu1 %vm90_vm1, %v22064_v11  ;;  %v22082_v11 = vsel %vm551_vm2, %v6377_v29, %v6379_v59  ;;  %v6386_v13 = vrot.slane %v6121_v63, 7  ;;  %v6389_v29 = vrot.slane %v21778_v32, 7  ;;  %v6137_v59 = vld [vmem:[#allocation2 + $0x240] sm:$0xff]  ;;  %v6392_v63 = vrot.slane %v21782_v47, 7 }
 0x761   :  { %27108 = vst [vmem:[#allocation191_spill] sm:$0xff] %v22082_v11  ;;  %v6396_v30 = vrot.slane %v6137_v59, 7 }
 0x763   :  { %15318 = vmatmul.mubr.msk.f32.gmra.mrb[22].mxu1 %vm90_vm1, %v22070_v53  ;;  %v6125_v53 = vld [vmem:[#allocation2 + $0x1e0] sm:$0xff] }
 0x764   :  { %15320 = vmatprep.mubr.msk.f32.mxu1 %vm90_vm1, %v22076_v51  ;;  %v22094_v51 = vsel %vm551_vm2, %v6382_v52, %v6384_v20  ;;  %v6391_v26 = vrot.slane %v6125_v53, 7  ;;  %v22107_v52 = vsel %vm551_vm2, %v6387_v56, %v6389_v29  ;;  %v6394_v20 = vrot.slane %v21788_v25, 7 }
 0x765   :  { %27110 = vst [vmem:[#allocation193_spill] sm:$0xff] %v22094_v51  ;;  %27112 = vst [vmem:[#allocation195_spill] sm:$0xff] %v22107_v52  ;;  %v6399_v53 = vrot.slane %v21794_v57, 7  ;;  %v6404_v57 = vrot.slane %v21802_v2, 7 }
 0x766   :  { %v22120_v59 = vsel %vm551_vm2, %v6392_v63, %v6394_v20  ;;  %v6407_v20 = vrot.slane %v21806_v43, 7 }
 0x767   :  { %15321 = vmatmul.mubr.msk.f32.gmra.mrb[24].mxu1 %vm90_vm1, %v22082_v11  ;;  %v22100_v11 = vsel %vm551_vm2, %v6386_v13, %v6387_v56  ;;  %v22113_v13 = vsel %vm551_vm2, %v6391_v26, %v6392_v63  ;;  %27114 = vst [vmem:[#allocation134_spill] sm:$0xff] %v22120_v59  ;;  %v6402_v56 = vrot.slane %v21798_v17, 7 }
 0x768   :  { %15323 = vmatprep.mubr.msk.f32.mxu1 %vm90_vm1, %v22088_v24  ;;  %27111 = vst [vmem:[#allocation194_spill] sm:$0xff] %v22100_v11  ;;  %v6397_v24 = vrot.slane %v21786_v5, 7  ;;  %27113 = vst [vmem:[#allocation23_spill] sm:$0xff] %v22113_v13 }
 0x76a   :  { %v6400_v26 = vsel %vm551_vm2, %v6397_v24, %v6399_v53 }
 0x76b   :  { %15324 = vmatmul.mubr.msk.f32.gmra.mrb[26].mxu1 %vm90_vm1, %v22094_v51  ;;  %v6398_v51 = vsel %vm551_vm2, %v6396_v30, %v6397_v24 }
 0x76c   :  { %15326 = vmatprep.mubr.msk.f32.mxu1 %vm90_vm1, %v22100_v11  ;;  %v6141_v11 = vld [vmem:[#allocation2 + $0x260] sm:$0xff] }
 0x76d   :  { %v6401_v29 = vrot.slane %v6141_v11, 7  ;;  %v22136_v11 = vsel %vm551_vm2, %v6402_v56, %v6404_v57  ;;  %v6414_v57 = vrot.slane %v21818_v19, 7 }
 0x76e   :  { %27116 = vst [vmem:[#allocation64_spill] sm:$0xff] %v22136_v11 }
 0x76f   :  { %15327 = vmatmul.mubr.msk.f32.gmra.mrb[28].mxu1 %vm90_vm1, %v22107_v52  ;;  %v6145_v52 = vld [vmem:[#allocation2 + $0x280] sm:$0xff]  ;;  %v22130_v30 = vsel %vm551_vm2, %v6401_v29, %v6402_v56 }
 0x770   :  { %15329 = vmatprep.mubr.msk.f32.mxu1 %vm90_vm1, %v22113_v13  ;;  %27115 = vst [vmem:[#allocation137_spill] sm:$0xff] %v22130_v30  ;;  %v6406_v63 = vrot.slane %v6145_v52, 7  ;;  %v6412_v52 = vrot.slane %v21814_v27, 7  ;;  %v6153_v29 = vld [vmem:[#allocation2 + $0x2c0] sm:$0xff] }
 0x771   :  { %v6181_v13 = vld [vmem:[#allocation2 + $0x3a0] sm:$0xff] }
 0x772   :  { %v22142_v24 = vsel %vm551_vm2, %v6406_v63, %v6407_v20  ;;  %v6416_v63 = vrot.slane %v6153_v29, 7  ;;  %v6422_v29 = vrot.slane %v21830_v0, 7 }
 0x773   :  { %15330 = vmatmul.mubr.msk.f32.gmra.mrb[30].mxu1 %vm90_vm1, %v22120_v59  ;;  %v6149_v59 = vld [vmem:[#allocation2 + $0x2a0] sm:$0xff]  ;;  %27117 = vst [vmem:[#allocation65_spill] sm:$0xff] %v22142_v24 }
 0x774   :  { %15332 = vmatprep.mubr.msk.f32.mxu1 %vm90_vm1, %v6398_v51  ;;  %v6409_v51 = vrot.slane %v21810_v40, 7  ;;  %v6411_v53 = vrot.slane %v6149_v59, 7  ;;  %v6417_v59 = vrot.slane %v21822_v7, 7 }
 0x776   :  { %v22154_v56 = vsel %vm551_vm2, %v6411_v53, %v6412_v52 }
 0x777   :  { %15333 = vmatmul.mubr.msk.f32.gmra.mrb[32].mxu1 %vm90_vm1, %v6400_v26  ;;  %v22148_v26 = vsel %vm551_vm2, %v6407_v20, %v6409_v51  ;;  %27119 = vst [vmem:[#allocation67_spill] sm:$0xff] %v22154_v56  ;;  %v6419_v20 = vrot.slane %v21826_v8, 7  ;;  %v22166_v51 = vsel %vm551_vm2, %v6416_v63, %v6417_v59 }
 0x778   :  { %15335 = vmatprep.mubr.msk.f32.mxu1 %vm90_vm1, %v22130_v30  ;;  %27118 = vst [vmem:[#allocation66_spill] sm:$0xff] %v22148_v26  ;;  %27121 = vst [vmem:[#allocation69_spill] sm:$0xff] %v22166_v51  ;;  %v27133_v30 = vld [vmem:[#allocation156_spill] sm:$0xff] }
 0x77b   :  { %15336 = vmatmul.mubr.msk.f32.gmra.mrb[34].mxu1 %vm90_vm1, %v22136_v11  ;;  %v6157_v11 = vld [vmem:[#allocation2 + $0x2e0] sm:$0xff] }
 0x77c   :  { %15338 = vmatprep.mubr.msk.f32.mxu1 %vm90_vm1, %v22142_v24  ;;  %v22160_v24 = vsel %vm551_vm2, %v6412_v52, %v6414_v57  ;;  %v6421_v53 = vrot.slane %v6157_v11, 7  ;;  %v6424_v52 = vrot.slane %v21834_v62, 7  ;;  %v6427_v11 = vrot.slane %v21838_v49, 7 }
 0x77d   :  { %27120 = vst [vmem:[#allocation68_spill] sm:$0xff] %v22160_v24 }
 0x77e   :  { %v22178_v57 = vsel %vm551_vm2, %v6421_v53, %v6422_v29 }
 0x77f   :  { %15339 = vmatmul.mubr.msk.f32.gmra.mrb[36].mxu1 %vm90_vm1, %v22148_v26  ;;  %v6161_v26 = vld [vmem:[#allocation2 + $0x300] sm:$0xff]  ;;  %27123 = vst [vmem:[#allocation71_spill] sm:$0xff] %v22178_v57 }
 0x780   :  { %15341 = vmatprep.mubr.msk.f32.mxu1 %vm90_vm1, %v22154_v56  ;;  %v22172_v56 = vsel %vm551_vm2, %v6417_v59, %v6419_v20  ;;  %v6426_v63 = vrot.slane %v6161_v26, 7  ;;  %v6429_v59 = vrot.slane %v21842_v37, 7  ;;  %v6432_v26 = vrot.slane %v21846_v46, 7 }
 0x781   :  { %27122 = vst [vmem:[#allocation70_spill] sm:$0xff] %v22172_v56 }
 0x782   :  { %v22190_v20 = vsel %vm551_vm2, %v6426_v63, %v6427_v11 }
 0x783   :  { %15342 = vmatmul.mubr.msk.f32.gmra.mrb[38].mxu1 %vm90_vm1, %v22160_v24  ;;  %v6165_v24 = vld [vmem:[#allocation2 + $0x320] sm:$0xff]  ;;  %27125 = vst [vmem:[#allocation73_spill] sm:$0xff] %v22190_v20 }
 0x784   :  { %15344 = vmatprep.mubr.msk.f32.mxu1 %vm90_vm1, %v22166_v51  ;;  %v22184_v51 = vsel %vm551_vm2, %v6422_v29, %v6424_v52  ;;  %v6431_v53 = vrot.slane %v6165_v24, 7  ;;  %v6434_v29 = vrot.slane %v21850_v21, 7  ;;  %v6437_v24 = vrot.slane %v21854_v54, 7 }
 0x785   :  { %27124 = vst [vmem:[#allocation72_spill] sm:$0xff] %v22184_v51 }
 0x786   :  { %v22202_v52 = vsel %vm551_vm2, %v6431_v53, %v6432_v26 }
 0x787   :  { %15345 = vmatmul.mubr.msk.f32.gmra.mrb[40].mxu1 %vm90_vm1, %v22172_v56  ;;  %v6169_v56 = vld [vmem:[#allocation2 + $0x340] sm:$0xff]  ;;  %27127 = vst [vmem:[#allocation76_spill] sm:$0xff] %v22202_v52 }
 0x788   :  { %15347 = vmatprep.mubr.msk.f32.mxu1 %vm90_vm1, %v22178_v57  ;;  %v22196_v57 = vsel %vm551_vm2, %v6427_v11, %v6429_v59  ;;  %v6436_v63 = vrot.slane %v6169_v56, 7  ;;  %v6439_v11 = vrot.slane %v21858_v55, 7  ;;  %v6442_v56 = vrot.slane %v21862_v14, 7 }
 0x789   :  { %27126 = vst [vmem:[#allocation74_spill] sm:$0xff] %v22196_v57 }
 0x78a   :  { %v22214_v59 = vsel %vm551_vm2, %v6436_v63, %v6437_v24 }
 0x78b   :  { %15348 = vmatmul.mubr.msk.f32.gmra.mrb[42].mxu1 %vm90_vm1, %v22184_v51  ;;  %v6173_v51 = vld [vmem:[#allocation2 + $0x360] sm:$0xff]  ;;  %27129 = vst [vmem:[#allocation143_spill] sm:$0xff] %v22214_v59 }
 0x78c   :  { %15350 = vmatprep.mubr.msk.f32.mxu1 %vm90_vm1, %v22190_v20  ;;  %v22208_v20 = vsel %vm551_vm2, %v6432_v26, %v6434_v29  ;;  %v6441_v53 = vrot.slane %v6173_v51, 7  ;;  %v27131_v26 = vld [vmem:[#allocation155_spill] sm:$0xff]  ;;  %v6447_v51 = vrot.slane %v27133_v30, 7 }
 0x78d   :  { %27128 = vst [vmem:[#allocation140_spill] sm:$0xff] %v22208_v20  ;;  %v6444_v29 = vrot.slane %v27131_v26, 7  ;;  %v27137_v26 = vld [vmem:[#allocation158_spill] sm:$0xff]  ;;  %v6185_v30 = vld [vmem:[#allocation2 + $0x3c0] sm:$0xff] }
 0x78f   :  { %15351 = vmatmul.mubr.msk.f32.gmra.mrb[44].mxu1 %vm90_vm1, %v22196_v57  ;;  %v6177_v57 = vld [vmem:[#allocation2 + $0x380] sm:$0xff] }
 0x790   :  { %15353 = vmatprep.mubr.msk.f32.mxu1 %vm90_vm1, %v22202_v52  ;;  %v22220_v52 = vsel %vm551_vm2, %v6437_v24, %v6439_v11  ;;  %v6446_v63 = vrot.slane %v6177_v57, 7  ;;  %v27135_v24 = vld [vmem:[#allocation157_spill] sm:$0xff]  ;;  %v6452_v57 = vrot.slane %v27137_v26, 7  ;;  %v6189_v26 = vld [vmem:[#allocation2 + $0x3e0] sm:$0xff] }
 0x791   :  { %27130 = vst [vmem:[#allocation144_spill] sm:$0xff] %v22220_v52  ;;  %v6449_v11 = vrot.slane %v27135_v24, 7  ;;  %v27141_v24 = vld [vmem:[#allocation160_spill] sm:$0xff] }
 0x793   :  { %15354 = vmatmul.mubr.msk.f32.gmra.mrb[46].mxu1 %vm90_vm1, %v22208_v20  ;;  %v22226_v20 = vsel %vm551_vm2, %v6441_v53, %v6442_v56  ;;  %v6451_v53 = vrot.slane %v6181_v13, 7  ;;  %v6457_v13 = vrot.slane %v27141_v24, 7  ;;  %v6193_v24 = vld [vmem:[#allocation2 + $0x400] sm:$0xff] }
 0x794   :  { %15356 = vmatprep.mubr.msk.f32.mxu1 %vm90_vm1, %v22214_v59  ;;  %27132 = vst [vmem:[#allocation145_spill] sm:$0xff] %v22226_v20  ;;  %v22232_v59 = vsel %vm551_vm2, %v6442_v56, %v6444_v29  ;;  %v27139_v56 = vld [vmem:[#allocation159_spill] sm:$0xff] }
 0x795   :  { %27134 = vst [vmem:[#allocation146_spill] sm:$0xff] %v22232_v59  ;;  %v6454_v29 = vrot.slane %v27139_v56, 7  ;;  %v27145_v56 = vld [vmem:[#allocation162_spill] sm:$0xff] }
 0x797   :  { %15357 = vmatmul.mubr.msk.f32.gmra.mrb[48].mxu1 %vm90_vm1, %v22220_v52  ;;  %v22238_v52 = vsel %vm551_vm2, %v6446_v63, %v6447_v51  ;;  %v6456_v63 = vrot.slane %v6185_v30, 7  ;;  %v6462_v30 = vrot.slane %v27145_v56, 7  ;;  %v6197_v56 = vld [vmem:[#allocation2 + $0x420] sm:$0xff] }
 0x798   :  { %15359 = vmatprep.mubr.msk.f32.mxu1 %vm90_vm1, %v22226_v20  ;;  %27136 = vst [vmem:[#allocation147_spill] sm:$0xff] %v22238_v52  ;;  %v22244_v20 = vsel %vm551_vm2, %v6447_v51, %v6449_v11  ;;  %v27143_v51 = vld [vmem:[#allocation161_spill] sm:$0xff] }
 0x799   :  { %27138 = vst [vmem:[#allocation138_spill] sm:$0xff] %v22244_v20  ;;  %v6459_v11 = vrot.slane %v27143_v51, 7  ;;  %v27149_v51 = vld [vmem:[#allocation164_spill] sm:$0xff] }
 0x79b   :  { %15360 = vmatmul.mubr.msk.f32.gmra.mrb[50].mxu1 %vm90_vm1, %v22232_v59  ;;  %v22250_v59 = vsel %vm551_vm2, %v6451_v53, %v6452_v57  ;;  %v6461_v53 = vrot.slane %v6189_v26, 7  ;;  %v6467_v26 = vrot.slane %v27149_v51, 7  ;;  %v6068_v51 = vld [vmem:[#allocation2 + $0x18] sm:$0xff] }
 0x79c   :  { %15362 = vmatprep.mubr.msk.f32.mxu1 %vm90_vm1, %v22238_v52  ;;  %27140 = vst [vmem:[#allocation139_spill] sm:$0xff] %v22250_v59  ;;  %v22256_v52 = vsel %vm551_vm2, %v6452_v57, %v6454_v29  ;;  %v27147_v57 = vld [vmem:[#allocation163_spill] sm:$0xff] }
 0x79d   :  { %27142 = vst [vmem:[#allocation82_spill] sm:$0xff] %v22256_v52  ;;  %v6464_v29 = vrot.slane %v27147_v57, 7  ;;  %v27152_v57 = vld [vmem:[#allocation166_spill] sm:$0xff] }
 0x79f   :  { %15363 = vmatmul.mubr.msk.f32.gmra.mrb[52].mxu1 %vm90_vm1, %v22244_v20  ;;  %v22262_v20 = vsel %vm551_vm2, %v6456_v63, %v6457_v13  ;;  %v6466_v63 = vrot.slane %v6193_v24, 7  ;;  %v6472_v24 = vrot.slane %v27152_v57, 7 }
 0x7a0   :  { %15365 = vmatprep.mubr.msk.f32.mxu1 %vm90_vm1, %v22250_v59  ;;  %27144 = vst [vmem:[#allocation84_spill] sm:$0xff] %v22262_v20  ;;  %v22268_v59 = vsel %vm551_vm2, %v6457_v13, %v6459_v11  ;;  %v27150_v13 = vld [vmem:[#allocation165_spill] sm:$0xff] }
 0x7a1   :  { %27146 = vst [vmem:[#allocation83_spill] sm:$0xff] %v22268_v59  ;;  %v6469_v11 = vrot.slane %v27150_v13, 7 }
 0x7a3   :  { %15366 = vmatmul.mubr.msk.f32.gmra.mrb[54].mxu1 %vm90_vm1, %v22256_v52  ;;  %v22274_v52 = vsel %vm551_vm2, %v6461_v53, %v6462_v30  ;;  %v6471_v53 = vrot.slane %v6197_v56, 7  ;;  %v7543_v56 = vrot.slane %v6068_v51, 1  ;;  %v22317_v51 = vld [vmem:[%s25850_s4 + $0x10] sm:$0xf] }
 0x7a4   :  { %15368 = vmatprep.mubr.msk.f32.mxu1 %vm90_vm1, %v22262_v20  ;;  %27148 = vst [vmem:[#allocation86_spill] sm:$0xff] %v22274_v52  ;;  %v22280_v20 = vsel %vm551_vm2, %v6462_v30, %v6464_v29  ;;  %v6474_v30 = vrot.slane %v21920_v58, 7 }
 0x7a5   :  { %v22298_v29 = vsel %vm551_vm2, %v6471_v53, %v6472_v24  ;;  %v27156_v53 = vrot.slane %v21908_v12, 1 }
 0x7a6   :  { %27154 = vst [vmem:[#allocation87_spill] sm:$0xff] %v22298_v29 }
 0x7a7   :  { %15369 = vmatmul.mubr.msk.f32.gmra.mrb[56].mxu1 %vm90_vm1, %v22268_v59  ;;  %v22286_v59 = vsel %vm551_vm2, %v6466_v63, %v6467_v26  ;;  %v22303_v63 = vsel %vm551_vm2, %v6472_v24, %v6474_v30  ;;  %v7551_v24 = vrot.slane %v21659_v34, 1  ;;  %v27157_v30 = vld [vmem:[#allocation167_spill] sm:$0xff]  ;;  %v7555_v34 = vrot.slane %v21671_v44, 1 }
 0x7a8   :  { %15371 = vmatprep.mubr.msk.f32.mxu1 %vm90_vm1, %v22274_v52  ;;  %27151 = vst [vmem:[#allocation85_spill] sm:$0xff] %v22286_v59  ;;  %v22292_v52 = vsel %vm551_vm2, %v6467_v26, %v6469_v11  ;;  %27155 = vst [vmem:[#allocation90_spill] sm:$0xff] %v22303_v63  ;;  %v7546_v26 = vrot.slane %v21609_v35, 1  ;;  %v6072_v11 = vld [vmem:[#allocation2 + $0x38] sm:$0xff]  ;;  %v7550_v35 = vrot.slane %v21631_v39, 1  ;;  %v7561_v44 = vrot.slane %v21698_v42, 1 }
 0x7a9   :  { %27153 = vst [vmem:[#allocation88_spill] sm:$0xff] %v22292_v52 }
 0x7aa   :  { %v22337_v39 = vsel %vm1777_vm3, %v7550_v35, %v7551_v24  ;;  %v6084_v35 = vld [vmem:[#allocation2 + $0x98] sm:$0xff] }
 0x7ab   :  { %15372 = vmatmul.mubr.msk.f32.gmra.mrb[58].mxu1 %vm90_vm1, %v22280_v20 }
 0x7ac   :  { %15374 = vmatprep.mubr.msk.f32.mxu1 %vm90_vm1, %v22286_v59  ;;  %v7545_v59 = vrot.slane %v21607_v61, 1 }
 0x7ae   :  { %v22321_v61 = vsel %vm1777_vm3, %v7545_v59, %v7546_v26  ;;  %v7556_v59 = vrot.slane %v21690_v3, 1 }
 0x7af   :  { %15375 = vmatmul.mubr.msk.f32.gmra.mrb[60].mxu1 %vm90_vm1, %v22292_v52  ;;  %v7544_v52 = vsel %vm1777_vm3, %v27156_v53, %v7543_v56  ;;  %v6080_v56 = vld [vmem:[#allocation2 + $0x78] sm:$0xff]  ;;  %v7560_v53 = vrot.slane %v21694_v45, 1  ;;  %v7566_v45 = vrot.slane %v21706_v41, 1 }
 0x7b0   :  { %15377 = vmatprep.mubr.msk.f32.mxu1 %vm90_vm1, %v22298_v29  ;;  %v7548_v29 = vrot.slane %v6072_v11, 1 }
 0x7b2   :  { %v22332_v12 = vsel %vm1777_vm3, %v7546_v26, %v7548_v29  ;;  %v7558_v29 = vrot.slane %v6080_v56, 1  ;;  %v22349_v26 = vsel %vm1777_vm3, %v7555_v34, %v7556_v59  ;;  %v7570_v56 = vrot.slane %v21710_v9, 1 }
 0x7b3   :  { %15378 = vmatmul.mubr.msk.f32.gmra.mrb[62].mxu1 %vm90_vm1, %v22303_v63  ;;  %v7576_v9 = vrot.slane %v21722_v1, 1 }
 0x7b4   :  { %15382 = vmatprep.mubr.msk.f32.mxu1 %vm90_vm1, %v21928_v48  ;;  %v6076_v48 = vld [vmem:[#allocation2 + $0x58] sm:$0xff]  ;;  %v22356_v3 = vsel %vm1777_vm3, %v7556_v59, %v7558_v29 }
 0x7b5   :  { %v6092_v29 = vld [vmem:[#allocation2 + $0xd8] sm:$0xff] }
 0x7b7   :  { %15383 = vmatmul.mubr.msk.f32.vlgmr.msra.gmra.mrb[0].mxu1 %vm90_vm1, %v7544_v52  ;;  %v7553_v52 = vrot.slane %v6076_v48, 1  ;;  %v22361_v48 = vsel %vm1777_vm3, %v7560_v53, %v7561_v44  ;;  %v7573_v53 = vrot.slane %v6092_v29, 1  ;;  %v7585_v29 = vrot.slane %v21734_v60, 1 }
 0x7b8   :  { %15479 = vmatpush3.msk.msra.mxu1 %vm840_vm0, %v27157_v30  ;;  %15385 = vmatprep.mubr.msk.f32.mxu1 %vm90_vm1, %v22321_v61  ;;  %v7565_v30 = vrot.slane %v21702_v50, 1  ;;  %v7571_v50 = vrot.slane %v21714_v28, 1  ;;  %v7591_v60 = vrot.slane %v21746_v6, 1 }
 0x7b9   :  { %15576 = vmatprep.subr.msk.mxu1 %vm840_vm0, %v22317_v51  ;;  %v22344_v11 = vsel %vm1777_vm3, %v7551_v24, %v7553_v52  ;;  %v7563_v24 = vrot.slane %v6084_v35, 1  ;;  %v6088_v52 = vld [vmem:[#allocation2 + $0xb8] sm:$0xff]  ;;  %v7575_v35 = vrot.slane %v21718_v22, 1  ;;  %v7581_v22 = vrot.slane %v21730_v15, 1 }
 0x7ba   :  { %v7568_v34 = vrot.slane %v6088_v52, 1  ;;  %v22373_v59 = vsel %vm1777_vm3, %v7565_v30, %v7566_v45  ;;  %v22392_v28 = vsel %vm1777_vm3, %v7571_v50, %v7573_v53  ;;  %v7580_v52 = vrot.slane %v21726_v33, 1  ;;  %v6104_v53 = vld [vmem:[#allocation2 + $0x138] sm:$0xff] }
 0x7bb   :  { %15386 = vmatmul.mubr.msk.f32.gmra.mrb[2].mxu1 %vm90_vm1, %v22332_v12  ;;  %v22368_v42 = vsel %vm1777_vm3, %v7561_v44, %v7563_v24  ;;  %v22385_v44 = vsel %vm1777_vm3, %v7570_v56, %v7571_v50  ;;  %v6096_v24 = vld [vmem:[#allocation2 + $0xf8] sm:$0xff]  ;;  %v7586_v33 = vrot.slane %v21738_v23, 1 }
 0x7bc   :  { %15388 = vmatprep.mubr.msk.f32.mxu1 %vm90_vm1, %v22337_v39  ;;  %v22380_v41 = vsel %vm1777_vm3, %v7566_v45, %v7568_v34  ;;  %v7578_v30 = vrot.slane %v6096_v24, 1  ;;  %v22397_v45 = vsel %vm1777_vm3, %v7575_v35, %v7576_v9  ;;  %v6100_v34 = vld [vmem:[#allocation2 + $0x118] sm:$0xff]  ;;  %v22409_v50 = vsel %vm1777_vm3, %v7580_v52, %v7581_v22 }
 0x7bd   :  { %v7583_v56 = vrot.slane %v6100_v34, 1  ;;  %v7588_v35 = vrot.slane %v6104_v53, 1  ;;  %v7590_v24 = vrot.slane %v21742_v10, 1  ;;  %v7595_v34 = vrot.slane %v21750_v36, 1 }
 0x7be   :  { %v22404_v1 = vsel %vm1777_vm3, %v7576_v9, %v7578_v30  ;;  %v22421_v9 = vsel %vm1777_vm3, %v7585_v29, %v7586_v33  ;;  %v6108_v30 = vld [vmem:[#allocation2 + $0x158] sm:$0xff]  ;;  %v7596_v10 = vrot.slane %v21754_v16, 1  ;;  %v7600_v53 = vrot.slane %v21758_v4, 1 }
 0x7bf   :  { %15389 = vmatmul.mubr.msk.f32.gmra.mrb[4].mxu1 %vm90_vm1, %v22344_v11  ;;  %v22416_v15 = vsel %vm1777_vm3, %v7581_v22, %v7583_v56  ;;  %v22428_v23 = vsel %vm1777_vm3, %v7586_v33, %v7588_v35  ;;  %v7593_v52 = vrot.slane %v6108_v30, 1  ;;  %v22433_v22 = vsel %vm1777_vm3, %v7590_v24, %v7591_v60  ;;  %v6112_v56 = vld [vmem:[#allocation2 + $0x178] sm:$0xff] }
 0x7c0   :  { %15391 = vmatprep.mubr.msk.f32.mxu1 %vm90_vm1, %v22349_v26  ;;  %v7598_v29 = vrot.slane %v6112_v56, 1  ;;  %v22445_v33 = vsel %vm1777_vm3, %v7595_v34, %v7596_v10  ;;  %v7601_v36 = vrot.slane %v21762_v18, 1  ;;  %v6116_v35 = vld [vmem:[#allocation2 + $0x198] sm:$0xff]  ;;  %v7605_v30 = vrot.slane %v21766_v38, 1  ;;  %v27160_v56 = vld [vmem:[#allocation153_spill] sm:$0xff] }
 0x7c1   :  { %v22440_v6 = vsel %vm1777_vm3, %v7591_v60, %v7593_v52  ;;  %v7603_v24 = vrot.slane %v6116_v35, 1  ;;  %v7606_v4 = vrot.slane %v21770_v31, 1  ;;  %v6120_v52 = vld [vmem:[#allocation2 + $0x1b8] sm:$0xff]  ;;  %v7611_v38 = vrot.slane %v21778_v32, 1 }
 0x7c2   :  { %v22452_v16 = vsel %vm1777_vm3, %v7596_v10, %v7598_v29  ;;  %v22457_v60 = vsel %vm1777_vm3, %v7600_v53, %v7601_v36  ;;  %v7608_v34 = vrot.slane %v6120_v52, 1  ;;  %v7610_v29 = vrot.slane %v27160_v56, 1  ;;  %v6124_v53 = vld [vmem:[#allocation2 + $0x1d8] sm:$0xff] }
 0x7c3   :  { %15392 = vmatmul.mubr.msk.f32.gmra.mrb[6].mxu1 %vm90_vm1, %v22356_v3  ;;  %27158 = vst [vmem:[#allocation89_spill] sm:$0xff] %v22457_v60  ;;  %v22464_v18 = vsel %vm1777_vm3, %v7601_v36, %v7603_v24  ;;  %v22469_v10 = vsel %vm1777_vm3, %v7605_v30, %v7606_v4  ;;  %v7613_v36 = vrot.slane %v6124_v53, 1  ;;  %v7615_v24 = vrot.slane %v21782_v47, 1  ;;  %v6128_v52 = vld [vmem:[#allocation2 + $0x1f8] sm:$0xff] }
 0x7c4   :  { %15394 = vmatprep.mubr.msk.f32.mxu1 %vm90_vm1, %v22361_v48  ;;  %27159 = vst [vmem:[#allocation92_spill] sm:$0xff] %v22464_v18  ;;  %v22476_v31 = vsel %vm1777_vm3, %v7606_v4, %v7608_v34  ;;  %v22481_v35 = vsel %vm1777_vm3, %v7610_v29, %v7611_v38  ;;  %v7616_v30 = vrot.slane %v21788_v25, 1  ;;  %v7620_v32 = vrot.slane %v21786_v5, 1  ;;  %v27162_v56 = vld [vmem:[#allocation154_spill] sm:$0xff] }
 0x7c5   :  { %27161 = vst [vmem:[#allocation91_spill] sm:$0xff] %v22476_v31  ;;  %v7621_v4 = vrot.slane %v27162_v56, 1  ;;  %v6140_v34 = vld [vmem:[#allocation2 + $0x258] sm:$0xff]  ;;  %v22490_v53 = vsel %vm1777_vm3, %v7611_v38, %v7613_v36  ;;  %v7625_v56 = vrot.slane %v21798_v17, 1  ;;  %v7626_v38 = vrot.slane %v21802_v2, 1 }
 0x7c6   :  { %27163 = vst [vmem:[#allocation94_spill] sm:$0xff] %v22490_v53  ;;  %v22495_v47 = vsel %vm1777_vm3, %v7615_v24, %v7616_v30  ;;  %v7623_v25 = vrot.slane %v6140_v34, 1  ;;  %v6144_v36 = vld [vmem:[#allocation2 + $0x278] sm:$0xff]  ;;  %v7631_v17 = vrot.slane %v21810_v40, 1 }
 0x7c7   :  { %15395 = vmatmul.mubr.msk.f32.gmra.mrb[8].mxu1 %vm90_vm1, %v22368_v42  ;;  %v7622_v29 = vsel %vm1777_vm3, %v7620_v32, %v7621_v4  ;;  %v22511_v32 = vsel %vm1777_vm3, %v7625_v56, %v7626_v38 }
 0x7c8   :  { %15397 = vmatprep.mubr.msk.f32.mxu1 %vm90_vm1, %v22373_v59  ;;  %v7624_v24 = vsel %vm1777_vm3, %v7621_v4, %v7623_v25  ;;  %v7635_v25 = vrot.slane %v21814_v27, 1  ;;  %v7641_v27 = vrot.slane %v21826_v8, 1 }
 0x7cb   :  { %15398 = vmatmul.mubr.msk.f32.gmra.mrb[10].mxu1 %vm90_vm1, %v22380_v41 }
 0x7cc   :  { %15400 = vmatprep.mubr.msk.f32.mxu1 %vm90_vm1, %v22385_v44 }
 0x7cf   :  { %15401 = vmatmul.mubr.msk.f32.gmra.mrb[12].mxu1 %vm90_vm1, %v22392_v28 }
 0x7d0   :  { %15403 = vmatprep.mubr.msk.f32.mxu1 %vm90_vm1, %v22397_v45 }
 0x7d3   :  { %15404 = vmatmul.mubr.msk.f32.gmra.mrb[14].mxu1 %vm90_vm1, %v22404_v1 }
 0x7d4   :  { %15406 = vmatprep.mubr.msk.f32.mxu1 %vm90_vm1, %v22409_v50 }
 0x7d7   :  { %15407 = vmatmul.mubr.msk.f32.gmra.mrb[16].mxu1 %vm90_vm1, %v22416_v15 }
 0x7d8   :  { %15409 = vmatprep.mubr.msk.f32.mxu1 %vm90_vm1, %v22421_v9 }
 0x7db   :  { %15410 = vmatmul.mubr.msk.f32.gmra.mrb[18].mxu1 %vm90_vm1, %v22428_v23 }
 0x7dc   :  { %15412 = vmatprep.mubr.msk.f32.mxu1 %vm90_vm1, %v22433_v22 }
 0x7df   :  { %15413 = vmatmul.mubr.msk.f32.gmra.mrb[20].mxu1 %vm90_vm1, %v22440_v6 }
 0x7e0   :  { %15415 = vmatprep.mubr.msk.f32.mxu1 %vm90_vm1, %v22445_v33 }
 0x7e3   :  { %15416 = vmatmul.mubr.msk.f32.gmra.mrb[22].mxu1 %vm90_vm1, %v22452_v16 }
 0x7e4   :  { %15418 = vmatprep.mubr.msk.f32.mxu1 %vm90_vm1, %v22457_v60 }
 0x7e7   :  { %15419 = vmatmul.mubr.msk.f32.gmra.mrb[24].mxu1 %vm90_vm1, %v22464_v18 }
 0x7e8   :  { %15421 = vmatprep.mubr.msk.f32.mxu1 %vm90_vm1, %v22469_v10 }
 0x7eb   :  { %15422 = vmatmul.mubr.msk.f32.gmra.mrb[26].mxu1 %vm90_vm1, %v22476_v31  ;;  %v7618_v31 = vrot.slane %v6128_v52, 1  ;;  %v7628_v52 = vrot.slane %v6144_v36, 1  ;;  %v7640_v36 = vrot.slane %v21822_v7, 1  ;;  %v7646_v7 = vrot.slane %v21834_v62, 1 }
 0x7ec   :  { %15424 = vmatprep.mubr.msk.f32.mxu1 %vm90_vm1, %v22481_v35 }
 0x7ed   :  { %v22501_v5 = vsel %vm1777_vm3, %v7616_v30, %v7618_v31  ;;  %v7630_v31 = vrot.slane %v21806_v43, 1  ;;  %v6148_v30 = vld [vmem:[#allocation2 + $0x298] sm:$0xff]  ;;  %v22518_v2 = vsel %vm1777_vm3, %v7626_v38, %v7628_v52  ;;  %v7636_v43 = vrot.slane %v21818_v19, 1 }
 0x7ee   :  { %v7633_v34 = vrot.slane %v6148_v30, 1  ;;  %v6160_v30 = vld [vmem:[#allocation2 + $0x2f8] sm:$0xff] }
 0x7ef   :  { %15425 = vmatmul.mubr.msk.f32.gmra.mrb[28].mxu1 %vm90_vm1, %v22490_v53  ;;  %v22523_v4 = vsel %vm1777_vm3, %v7630_v31, %v7631_v17  ;;  %v22535_v38 = vsel %vm1777_vm3, %v7635_v25, %v7636_v43  ;;  %v22547_v31 = vsel %vm1777_vm3, %v7640_v36, %v7641_v27 }
 0x7f0   :  { %15427 = vmatprep.mubr.msk.f32.mxu1 %vm90_vm1, %v22495_v47  ;;  %v22530_v40 = vsel %vm1777_vm3, %v7631_v17, %v7633_v34  ;;  %v7645_v17 = vrot.slane %v21830_v0, 1  ;;  %v7648_v34 = vrot.slane %v6160_v30, 1  ;;  %v7651_v0 = vrot.slane %v21842_v37, 1  ;;  %v6172_v30 = vld [vmem:[#allocation2 + $0x358] sm:$0xff] }
 0x7f2   :  { %v22559_v25 = vsel %vm1777_vm3, %v7645_v17, %v7646_v7  ;;  %v22566_v62 = vsel %vm1777_vm3, %v7646_v7, %v7648_v34  ;;  %v7660_v7 = vrot.slane %v21854_v54, 1  ;;  %v7663_v34 = vrot.slane %v6172_v30, 1  ;;  %v6180_v30 = vld [vmem:[#allocation2 + $0x398] sm:$0xff] }
 0x7f3   :  { %15428 = vmatmul.mubr.msk.f32.gmra.mrb[30].mxu1 %vm90_vm1, %v22501_v5 }
 0x7f4   :  { %15430 = vmatprep.mubr.msk.f32.mxu1 %vm90_vm1, %v7622_v29  ;;  %v6152_v29 = vld [vmem:[#allocation2 + $0x2b8] sm:$0xff] }
 0x7f5   :  { %v7638_v56 = vrot.slane %v6152_v29, 1  ;;  %v6164_v29 = vld [vmem:[#allocation2 + $0x318] sm:$0xff] }
 0x7f7   :  { %15431 = vmatmul.mubr.msk.f32.gmra.mrb[32].mxu1 %vm90_vm1, %v7624_v24  ;;  %v6156_v24 = vld [vmem:[#allocation2 + $0x2d8] sm:$0xff]  ;;  %v22542_v19 = vsel %vm1777_vm3, %v7636_v43, %v7638_v56  ;;  %v7650_v43 = vrot.slane %v21838_v49, 1  ;;  %v7653_v56 = vrot.slane %v6164_v29, 1  ;;  %v7656_v49 = vrot.slane %v21850_v21, 1  ;;  %v27166_v29 = vld [vmem:[#allocation155_spill] sm:$0xff] }
 0x7f8   :  { %15433 = vmatprep.mubr.msk.f32.mxu1 %vm90_vm1, %v22511_v32  ;;  %v7643_v52 = vrot.slane %v6156_v24, 1  ;;  %v6168_v24 = vld [vmem:[#allocation2 + $0x338] sm:$0xff]  ;;  %v7666_v54 = vrot.slane %v27166_v29, 1 }
 0x7f9   :  { %v22571_v36 = vsel %vm1777_vm3, %v7650_v43, %v7651_v0  ;;  %v22578_v37 = vsel %vm1777_vm3, %v7651_v0, %v7653_v56  ;;  %v7665_v0 = vrot.slane %v21862_v14, 1  ;;  %v6176_v56 = vld [vmem:[#allocation2 + $0x378] sm:$0xff] }
 0x7fa   :  { %v22554_v8 = vsel %vm1777_vm3, %v7641_v27, %v7643_v52  ;;  %v7655_v27 = vrot.slane %v21846_v46, 1  ;;  %v7658_v52 = vrot.slane %v6168_v24, 1  ;;  %v7661_v46 = vrot.slane %v21858_v55, 1  ;;  %v27169_v24 = vld [vmem:[#allocation156_spill] sm:$0xff] }
 0x7fb   :  { %15434 = vmatmul.mubr.msk.f32.gmra.mrb[34].mxu1 %vm90_vm1, %v22518_v2 }
 0x7fc   :  { %15436 = vmatprep.mubr.msk.f32.mxu1 %vm90_vm1, %v22523_v4  ;;  %v22583_v17 = vsel %vm1777_vm3, %v7655_v27, %v7656_v49  ;;  %v22590_v21 = vsel %vm1777_vm3, %v7656_v49, %v7658_v52  ;;  %v22595_v43 = vsel %vm1777_vm3, %v7660_v7, %v7661_v46  ;;  %v22602_v55 = vsel %vm1777_vm3, %v7661_v46, %v7663_v34  ;;  %v27170_v7 = vld [vmem:[#allocation157_spill] sm:$0xff] }
 0x7fd   :  { %27164 = vst [vmem:[#allocation93_spill] sm:$0xff] %v22590_v21  ;;  %27165 = vst [vmem:[#allocation96_spill] sm:$0xff] %v22595_v43  ;;  %v7668_v27 = vrot.slane %v6176_v56, 1  ;;  %v22607_v49 = vsel %vm1777_vm3, %v7665_v0, %v7666_v54  ;;  %v7670_v52 = vrot.slane %v27169_v24, 1  ;;  %v7671_v14 = vrot.slane %v27170_v7, 1  ;;  %v27173_v0 = vld [vmem:[#allocation158_spill] sm:$0xff] }
 0x7fe   :  { %27167 = vst [vmem:[#allocation95_spill] sm:$0xff] %v22602_v55  ;;  %27168 = vst [vmem:[#allocation118_spill] sm:$0xff] %v22607_v49  ;;  %v7673_v46 = vrot.slane %v6180_v30, 1  ;;  %v7675_v56 = vrot.slane %v27173_v0, 1 }
 0x7ff   :  { %15437 = vmatmul.mubr.msk.f32.gmra.mrb[36].mxu1 %vm90_vm1, %v22530_v40  ;;  %v22614_v29 = vsel %vm1777_vm3, %v7666_v54, %v7668_v27  ;;  %v22619_v34 = vsel %vm1777_vm3, %v7670_v52, %v7671_v14  ;;  %v27177_v52 = vld [vmem:[#allocation160_spill] sm:$0xff] }
 0x800   :  { %15439 = vmatprep.mubr.msk.f32.mxu1 %vm90_vm1, %v22535_v38  ;;  %27171 = vst [vmem:[#allocation119_spill] sm:$0xff] %v22614_v29  ;;  %27172 = vst [vmem:[#allocation97_spill] sm:$0xff] %v22619_v34  ;;  %v22626_v7 = vsel %vm1777_vm3, %v7671_v14, %v7673_v46  ;;  %v7680_v30 = vrot.slane %v27177_v52, 1  ;;  %v27181_v46 = vld [vmem:[#allocation162_spill] sm:$0xff] }
 0x801   :  { %27175 = vst [vmem:[#allocation98_spill] sm:$0xff] %v22626_v7 }
 0x803   :  { %15440 = vmatmul.mubr.msk.f32.gmra.mrb[38].mxu1 %vm90_vm1, %v22542_v19 }
 0x804   :  { %15442 = vmatprep.mubr.msk.f32.mxu1 %vm90_vm1, %v22547_v31 }
 0x807   :  { %15443 = vmatmul.mubr.msk.f32.gmra.mrb[40].mxu1 %vm90_vm1, %v22554_v8 }
 0x808   :  { %15445 = vmatprep.mubr.msk.f32.mxu1 %vm90_vm1, %v22559_v25 }
 0x80b   :  { %15446 = vmatmul.mubr.msk.f32.gmra.mrb[42].mxu1 %vm90_vm1, %v22566_v62 }
 0x80c   :  { %15448 = vmatprep.mubr.msk.f32.mxu1 %vm90_vm1, %v22571_v36 }
 0x80f   :  { %15449 = vmatmul.mubr.msk.f32.gmra.mrb[44].mxu1 %vm90_vm1, %v22578_v37 }
 0x810   :  { %15451 = vmatprep.mubr.msk.f32.mxu1 %vm90_vm1, %v22583_v17 }
 0x813   :  { %15452 = vmatmul.mubr.msk.f32.gmra.mrb[46].mxu1 %vm90_vm1, %v22590_v21 }
 0x814   :  { %15454 = vmatprep.mubr.msk.f32.mxu1 %vm90_vm1, %v22595_v43  ;;  %v6184_v43 = vld [vmem:[#allocation2 + $0x3b8] sm:$0xff] }
 0x815   :  { %v7678_v54 = vrot.slane %v6184_v43, 1 }
 0x817   :  { %15455 = vmatmul.mubr.msk.f32.gmra.mrb[48].mxu1 %vm90_vm1, %v22602_v55  ;;  %v27174_v55 = vld [vmem:[#allocation159_spill] sm:$0xff] }
 0x818   :  { %15457 = vmatprep.mubr.msk.f32.mxu1 %vm90_vm1, %v22607_v49  ;;  %v7676_v24 = vrot.slane %v27174_v55, 1  ;;  %v6188_v49 = vld [vmem:[#allocation2 + $0x3d8] sm:$0xff] }
 0x819   :  { %v7683_v14 = vrot.slane %v6188_v49, 1 }
 0x81a   :  { %v22631_v27 = vsel %vm1777_vm3, %v7675_v56, %v7676_v24  ;;  %v22638_v55 = vsel %vm1777_vm3, %v7676_v24, %v7678_v54  ;;  %v7685_v56 = vrot.slane %v27181_v46, 1  ;;  %v27185_v54 = vld [vmem:[#allocation164_spill] sm:$0xff]  ;;  %v7691_v46 = vrot.slane %v27150_v13, 1 }
 0x81b   :  { %15458 = vmatmul.mubr.msk.f32.gmra.mrb[50].mxu1 %vm90_vm1, %v22614_v29  ;;  %27176 = vst [vmem:[#allocation99_spill] sm:$0xff] %v22631_v27  ;;  %v27178_v29 = vld [vmem:[#allocation161_spill] sm:$0xff]  ;;  %27179 = vst [vmem:[#allocation100_spill] sm:$0xff] %v22638_v55 }
 0x81c   :  { %15460 = vmatprep.mubr.msk.f32.mxu1 %vm90_vm1, %v22619_v34  ;;  %v7681_v0 = vrot.slane %v27178_v29, 1  ;;  %v6192_v34 = vld [vmem:[#allocation2 + $0x3f8] sm:$0xff] }
 0x81d   :  { %v7688_v24 = vrot.slane %v6192_v34, 1 }
 0x81e   :  { %v22643_v43 = vsel %vm1777_vm3, %v7680_v30, %v7681_v0  ;;  %v22650_v29 = vsel %vm1777_vm3, %v7681_v0, %v7683_v14  ;;  %v7690_v30 = vrot.slane %v27185_v54, 1  ;;  %v7695_v14 = vrot.slane %v27152_v57, 1  ;;  %v6200_v54 = vld [vmem:[#allocation2 + $0x438] sm:$0xff] }
 0x81f   :  { %15461 = vmatmul.mubr.msk.f32.gmra.mrb[52].mxu1 %vm90_vm1, %v22626_v7  ;;  %27180 = vst [vmem:[#allocation101_spill] sm:$0xff] %v22643_v43  ;;  %v27182_v7 = vld [vmem:[#allocation163_spill] sm:$0xff]  ;;  %27183 = vst [vmem:[#allocation102_spill] sm:$0xff] %v22650_v29 }
 0x820   :  { %15463 = vmatprep.mubr.msk.f32.mxu1 %vm90_vm1, %v22631_v27  ;;  %v7686_v52 = vrot.slane %v27182_v7, 1  ;;  %v22667_v34 = vsel %vm1777_vm3, %v7690_v30, %v7691_v46  ;;  %v27192_v30 = vld [vmem:[#allocation169_spill] sm:$0xff] }
 0x821   :  { %27187 = vst [vmem:[#allocation105_spill] sm:$0xff] %v22667_v34 }
 0x822   :  { %v22655_v49 = vsel %vm1777_vm3, %v7685_v56, %v7686_v52  ;;  %v22662_v7 = vsel %vm1777_vm3, %v7686_v52, %v7688_v24  ;;  %v7696_v56 = vrot.slane %v21920_v58, 1  ;;  %v7698_v52 = vrot.slane %v6200_v54, 1  ;;  %v27191_v58 = vld [vmem:[#allocation168_spill] sm:$0xff]  ;;  %v22693_v24 = vld [vmem:[%s25850_s4 + $0x14] sm:$0xf]  ;;  %v27197_v54 = vld [vmem:[#allocation174_spill] sm:$0xff] }
 0x823   :  { %15464 = vmatmul.mubr.msk.f32.gmra.mrb[54].mxu1 %vm90_vm1, %v22638_v55  ;;  %27184 = vst [vmem:[#allocation103_spill] sm:$0xff] %v22655_v49  ;;  %v6196_v55 = vld [vmem:[#allocation2 + $0x418] sm:$0xff]  ;;  %27186 = vst [vmem:[#allocation104_spill] sm:$0xff] %v22662_v7 }
 0x824   :  { %15466 = vmatprep.mubr.msk.f32.mxu1 %vm90_vm1, %v22643_v43  ;;  %v7693_v0 = vrot.slane %v6196_v55, 1  ;;  %v22679_v55 = vsel %vm1777_vm3, %v7695_v14, %v7696_v56  ;;  %v22684_v57 = vsel %vm1777_vm3, %v7696_v56, %v7698_v52  ;;  %v27195_v14 = vld [vmem:[#allocation172_spill] sm:$0xff]  ;;  %v27196_v56 = vld [vmem:[#allocation173_spill] sm:$0xff]  ;;  %v27198_v52 = vld [vmem:[#allocation175_spill] sm:$0xff] }
 0x825   :  { %27189 = vst [vmem:[#allocation107_spill] sm:$0xff] %v22679_v55  ;;  %27190 = vst [vmem:[#allocation108_spill] sm:$0xff] %v22684_v57 }
 0x826   :  { %v22674_v13 = vsel %vm1777_vm3, %v7691_v46, %v7693_v0  ;;  %v27193_v46 = vld [vmem:[#allocation170_spill] sm:$0xff]  ;;  %v27194_v0 = vld [vmem:[#allocation171_spill] sm:$0xff] }
 0x827   :  { %15467 = vmatmul.mubr.msk.f32.gmra.mrb[56].mxu1 %vm90_vm1, %v22650_v29  ;;  %27188 = vst [vmem:[#allocation106_spill] sm:$0xff] %v22674_v13 }
 0x828   :  { %15469 = vmatprep.mubr.msk.f32.mxu1 %vm90_vm1, %v22655_v49 }
 0x82b   :  { %15470 = vmatmul.mubr.msk.f32.gmra.mrb[58].mxu1 %vm90_vm1, %v22662_v7 }
 0x82c   :  { %15472 = vmatprep.mubr.msk.f32.mxu1 %vm90_vm1, %v22667_v34 }
 0x82f   :  { %15473 = vmatmul.mubr.msk.f32.gmra.mrb[60].mxu1 %vm90_vm1, %v22674_v13 }
 0x830   :  { %15475 = vmatprep.mubr.msk.f32.mxu1 %vm90_vm1, %v22679_v55  ;;  %v27225_v55 = vld [vmem:[#allocation65_spill] sm:$0xff] }
 0x833   :  { %15476 = vmatmul.mubr.msk.f32.gmra.mrb[62].mxu1 %vm90_vm1, %v22684_v57  ;;  %v22756_v57 = vld [vmem:[#allocation2 + $0x210] sm:$0xff] }
 0x834   :  { %15480 = vmatprep.mubr.msk.f32.mxu1 %vm90_vm1, %v27191_v58  ;;  %v27200_v58 = vld [vmem:[#allocation177_spill] sm:$0xff] }
 0x837   :  { %15481 = vmatmul.mubr.msk.f32.vlgmr.msra.gmra.mrb[0].mxu1 %vm90_vm1, %v27192_v30  ;;  %v27201_v30 = vld [vmem:[#allocation178_spill] sm:$0xff] }
 0x838   :  { %15577 = vmatpush3.msk.msra.mxu1 %vm840_vm0, %v22317_v51  ;;  %15483 = vmatprep.mubr.msk.f32.mxu1 %vm90_vm1, %v27193_v46  ;;  %v27199_v51 = vld [vmem:[#allocation176_spill] sm:$0xff]  ;;  %v27218_v46 = vld [vmem:[#allocation195_spill] sm:$0xff] }
 0x839   :  { %15674 = vmatprep.subr.msk.mxu1 %vm840_vm0, %v22693_v24 }
 0x83b   :  { %15484 = vmatmul.mubr.msk.f32.gmra.mrb[2].mxu1 %vm90_vm1, %v27194_v0  ;;  %v27202_v0 = vld [vmem:[#allocation179_spill] sm:$0xff] }
 0x83c   :  { %15486 = vmatprep.mubr.msk.f32.mxu1 %vm90_vm1, %v27195_v14  ;;  %v27203_v14 = vld [vmem:[#allocation180_spill] sm:$0xff] }
 0x83f   :  { %15487 = vmatmul.mubr.msk.f32.gmra.mrb[4].mxu1 %vm90_vm1, %v27196_v56  ;;  %v27204_v56 = vld [vmem:[#allocation181_spill] sm:$0xff] }
 0x840   :  { %15489 = vmatprep.mubr.msk.f32.mxu1 %vm90_vm1, %v27197_v54  ;;  %v27205_v54 = vld [vmem:[#allocation182_spill] sm:$0xff] }
 0x843   :  { %15490 = vmatmul.mubr.msk.f32.gmra.mrb[6].mxu1 %vm90_vm1, %v27198_v52  ;;  %v27206_v52 = vld [vmem:[#allocation183_spill] sm:$0xff] }
 0x844   :  { %15492 = vmatprep.mubr.msk.f32.mxu1 %vm90_vm1, %v27199_v51  ;;  %v27207_v51 = vld [vmem:[#allocation184_spill] sm:$0xff] }
 0x847   :  { %15493 = vmatmul.mubr.msk.f32.gmra.mrb[8].mxu1 %vm90_vm1, %v27200_v58  ;;  %v27208_v58 = vld [vmem:[#allocation185_spill] sm:$0xff] }
 0x848   :  { %15495 = vmatprep.mubr.msk.f32.mxu1 %vm90_vm1, %v27201_v30  ;;  %v27209_v30 = vld [vmem:[#allocation186_spill] sm:$0xff] }
 0x84b   :  { %15496 = vmatmul.mubr.msk.f32.gmra.mrb[10].mxu1 %vm90_vm1, %v27202_v0  ;;  %v27210_v0 = vld [vmem:[#allocation187_spill] sm:$0xff] }
 0x84c   :  { %15498 = vmatprep.mubr.msk.f32.mxu1 %vm90_vm1, %v27203_v14  ;;  %v27211_v14 = vld [vmem:[#allocation188_spill] sm:$0xff] }
 0x84f   :  { %15499 = vmatmul.mubr.msk.f32.gmra.mrb[12].mxu1 %vm90_vm1, %v27204_v56  ;;  %v27212_v56 = vld [vmem:[#allocation189_spill] sm:$0xff] }
 0x850   :  { %15501 = vmatprep.mubr.msk.f32.mxu1 %vm90_vm1, %v27205_v54  ;;  %v27213_v54 = vld [vmem:[#allocation190_spill] sm:$0xff] }
 0x853   :  { %15502 = vmatmul.mubr.msk.f32.gmra.mrb[14].mxu1 %vm90_vm1, %v27206_v52  ;;  %v27214_v52 = vld [vmem:[#allocation191_spill] sm:$0xff] }
 0x854   :  { %15504 = vmatprep.mubr.msk.f32.mxu1 %vm90_vm1, %v27207_v51  ;;  %v27215_v51 = vld [vmem:[#allocation192_spill] sm:$0xff] }
 0x857   :  { %15505 = vmatmul.mubr.msk.f32.gmra.mrb[16].mxu1 %vm90_vm1, %v27208_v58  ;;  %v27216_v58 = vld [vmem:[#allocation193_spill] sm:$0xff] }
 0x858   :  { %15507 = vmatprep.mubr.msk.f32.mxu1 %vm90_vm1, %v27209_v30  ;;  %v27217_v30 = vld [vmem:[#allocation194_spill] sm:$0xff] }
 0x85b   :  { %15508 = vmatmul.mubr.msk.f32.gmra.mrb[18].mxu1 %vm90_vm1, %v27210_v0  ;;  %v6129_v0 = vld [vmem:[#allocation2 + $0x200] sm:$0xff] }
 0x85c   :  { %15510 = vmatprep.mubr.msk.f32.mxu1 %vm90_vm1, %v27211_v14  ;;  %v22751_v14 = vld [vmem:[#allocation2 + $0x208] sm:$0xff] }
 0x85f   :  { %15511 = vmatmul.mubr.msk.f32.gmra.mrb[20].mxu1 %vm90_vm1, %v27212_v56  ;;  %v8286_v56 = vrot.slane %v6129_v0, 7 }
 0x860   :  { %15513 = vmatprep.mubr.msk.f32.mxu1 %vm90_vm1, %v27213_v54  ;;  %v8287_v54 = vrot.slane %v22751_v14, 7 }
 0x863   :  { %15514 = vmatmul.mubr.msk.f32.gmra.mrb[22].mxu1 %vm90_vm1, %v27214_v52  ;;  %v27219_v52 = vld [vmem:[#allocation23_spill] sm:$0xff] }
 0x864   :  { %15516 = vmatprep.mubr.msk.f32.mxu1 %vm90_vm1, %v27215_v51  ;;  %v8289_v51 = vrot.slane %v22756_v57, 7 }
 0x866   :  { %v22769_v0 = vsel %vm551_vm2, %v8287_v54, %v8289_v51  ;;  %v27229_v51 = vld [vmem:[#allocation69_spill] sm:$0xff] }
 0x867   :  { %15517 = vmatmul.mubr.msk.f32.gmra.mrb[24].mxu1 %vm90_vm1, %v27216_v58  ;;  %v27220_v58 = vld [vmem:[#allocation134_spill] sm:$0xff]  ;;  %27222 = vst [vmem:[#allocation80_spill] sm:$0xff] %v22769_v0 }
 0x868   :  { %15519 = vmatprep.mubr.msk.f32.mxu1 %vm90_vm1, %v27217_v30  ;;  %v22764_v30 = vsel %vm551_vm2, %v8286_v56, %v8287_v54  ;;  %v27226_v56 = vld [vmem:[#allocation66_spill] sm:$0xff]  ;;  %v27228_v54 = vld [vmem:[#allocation68_spill] sm:$0xff] }
 0x869   :  { %27221 = vst [vmem:[#allocation109_spill] sm:$0xff] %v22764_v30 }
 0x86b   :  { %15520 = vmatmul.mubr.msk.f32.gmra.mrb[26].mxu1 %vm90_vm1, %v27218_v46  ;;  %v27223_v46 = vld [vmem:[#allocation137_spill] sm:$0xff] }
 0x86c   :  { %15522 = vmatprep.mubr.msk.f32.mxu1 %vm90_vm1, %v27219_v52  ;;  %v27224_v52 = vld [vmem:[#allocation64_spill] sm:$0xff] }
 0x86f   :  { %15523 = vmatmul.mubr.msk.f32.gmra.mrb[28].mxu1 %vm90_vm1, %v27220_v58  ;;  %v27227_v58 = vld [vmem:[#allocation67_spill] sm:$0xff] }
 0x870   :  { %15525 = vmatprep.mubr.msk.f32.mxu1 %vm90_vm1, %v22764_v30  ;;  %v22832_v30 = vld [vmem:[#allocation2 + $0x450] sm:$0xff] }
 0x873   :  { %15526 = vmatmul.mubr.msk.f32.gmra.mrb[30].mxu1 %vm90_vm1, %v22769_v0  ;;  %v27230_v0 = vld [vmem:[#allocation70_spill] sm:$0xff] }
 0x874   :  { %15528 = vmatprep.mubr.msk.f32.mxu1 %vm90_vm1, %v27223_v46  ;;  %v27231_v46 = vld [vmem:[#allocation71_spill] sm:$0xff] }
 0x877   :  { %15529 = vmatmul.mubr.msk.f32.gmra.mrb[32].mxu1 %vm90_vm1, %v27224_v52  ;;  %v27232_v52 = vld [vmem:[#allocation72_spill] sm:$0xff] }
 0x878   :  { %15531 = vmatprep.mubr.msk.f32.mxu1 %vm90_vm1, %v27225_v55  ;;  %v27233_v55 = vld [vmem:[#allocation73_spill] sm:$0xff] }
 0x87b   :  { %15532 = vmatmul.mubr.msk.f32.gmra.mrb[34].mxu1 %vm90_vm1, %v27226_v56  ;;  %v27234_v56 = vld [vmem:[#allocation74_spill] sm:$0xff] }
 0x87c   :  { %15534 = vmatprep.mubr.msk.f32.mxu1 %vm90_vm1, %v27227_v58  ;;  %v27235_v58 = vld [vmem:[#allocation76_spill] sm:$0xff] }
 0x87f   :  { %15535 = vmatmul.mubr.msk.f32.gmra.mrb[36].mxu1 %vm90_vm1, %v27228_v54  ;;  %v27236_v54 = vld [vmem:[#allocation140_spill] sm:$0xff] }
 0x880   :  { %15537 = vmatprep.mubr.msk.f32.mxu1 %vm90_vm1, %v27229_v51  ;;  %v27237_v51 = vld [vmem:[#allocation143_spill] sm:$0xff] }
 0x883   :  { %15538 = vmatmul.mubr.msk.f32.gmra.mrb[38].mxu1 %vm90_vm1, %v27230_v0  ;;  %v27238_v0 = vld [vmem:[#allocation144_spill] sm:$0xff] }
 0x884   :  { %15540 = vmatprep.mubr.msk.f32.mxu1 %vm90_vm1, %v27231_v46  ;;  %v27239_v46 = vld [vmem:[#allocation145_spill] sm:$0xff] }
 0x887   :  { %15541 = vmatmul.mubr.msk.f32.gmra.mrb[40].mxu1 %vm90_vm1, %v27232_v52  ;;  %v27240_v52 = vld [vmem:[#allocation146_spill] sm:$0xff] }
 0x888   :  { %15543 = vmatprep.mubr.msk.f32.mxu1 %vm90_vm1, %v27233_v55  ;;  %v27241_v55 = vld [vmem:[#allocation147_spill] sm:$0xff] }
 0x88b   :  { %15544 = vmatmul.mubr.msk.f32.gmra.mrb[42].mxu1 %vm90_vm1, %v27234_v56  ;;  %v27242_v56 = vld [vmem:[#allocation138_spill] sm:$0xff] }
 0x88c   :  { %15546 = vmatprep.mubr.msk.f32.mxu1 %vm90_vm1, %v27235_v58  ;;  %v27243_v58 = vld [vmem:[#allocation139_spill] sm:$0xff] }
 0x88f   :  { %15547 = vmatmul.mubr.msk.f32.gmra.mrb[44].mxu1 %vm90_vm1, %v27236_v54  ;;  %v27244_v54 = vld [vmem:[#allocation82_spill] sm:$0xff] }
 0x890   :  { %15549 = vmatprep.mubr.msk.f32.mxu1 %vm90_vm1, %v27237_v51  ;;  %v27245_v51 = vld [vmem:[#allocation84_spill] sm:$0xff] }
 0x893   :  { %15550 = vmatmul.mubr.msk.f32.gmra.mrb[46].mxu1 %vm90_vm1, %v27238_v0  ;;  %v27246_v0 = vld [vmem:[#allocation83_spill] sm:$0xff] }
 0x894   :  { %15552 = vmatprep.mubr.msk.f32.mxu1 %vm90_vm1, %v27239_v46  ;;  %v27247_v46 = vld [vmem:[#allocation86_spill] sm:$0xff] }
 0x897   :  { %15553 = vmatmul.mubr.msk.f32.gmra.mrb[48].mxu1 %vm90_vm1, %v27240_v52  ;;  %v27249_v52 = vld [vmem:[#allocation88_spill] sm:$0xff] }
 0x898   :  { %15555 = vmatprep.mubr.msk.f32.mxu1 %vm90_vm1, %v27241_v55  ;;  %v27248_v55 = vld [vmem:[#allocation85_spill] sm:$0xff] }
 0x89b   :  { %15556 = vmatmul.mubr.msk.f32.gmra.mrb[50].mxu1 %vm90_vm1, %v27242_v56  ;;  %v6201_v56 = vld [vmem:[#allocation2 + $0x440] sm:$0xff] }
 0x89c   :  { %15558 = vmatprep.mubr.msk.f32.mxu1 %vm90_vm1, %v27243_v58  ;;  %v22827_v58 = vld [vmem:[#allocation2 + $0x448] sm:$0xff] }
 0x89f   :  { %15559 = vmatmul.mubr.msk.f32.gmra.mrb[52].mxu1 %vm90_vm1, %v27244_v54  ;;  %v8291_v54 = vrot.slane %v6201_v56, 7 }
 0x8a0   :  { %15561 = vmatprep.mubr.msk.f32.mxu1 %vm90_vm1, %v27245_v51  ;;  %v8292_v51 = vrot.slane %v22827_v58, 7 }
 0x8a3   :  { %15562 = vmatmul.mubr.msk.f32.gmra.mrb[54].mxu1 %vm90_vm1, %v27246_v0  ;;  %v27250_v0 = vld [vmem:[#allocation87_spill] sm:$0xff] }
 0x8a4   :  { %15564 = vmatprep.mubr.msk.f32.mxu1 %vm90_vm1, %v27247_v46  ;;  %v8294_v46 = vrot.slane %v22832_v30, 7 }
 0x8a6   :  { %v22845_v56 = vsel %vm551_vm2, %v8292_v51, %v8294_v46  ;;  %v22868_v46 = vld [vmem:[#allocation2 + $0x68] sm:$0xff] }
 0x8a7   :  { %15565 = vmatmul.mubr.msk.f32.gmra.mrb[56].mxu1 %vm90_vm1, %v22280_v20  ;;  %27253 = vst [vmem:[#allocation113_spill] sm:$0xff] %v22868_v46 }
 0x8a8   :  { %15567 = vmatprep.mubr.msk.f32.mxu1 %vm90_vm1, %v27248_v55  ;;  %v22840_v55 = vsel %vm551_vm2, %v8291_v54, %v8292_v51  ;;  %v22858_v54 = vld [vmem:[#allocation2 + $0x48] sm:$0xff]  ;;  %v22864_v51 = vld [vmem:[#allocation2 + $0x50] sm:$0xff] }
 0x8a9   :  { %27251 = vst [vmem:[#allocation81_spill] sm:$0xff] %v22858_v54  ;;  %27252 = vst [vmem:[#allocation112_spill] sm:$0xff] %v22864_v51 }
 0x8ab   :  { %15568 = vmatmul.mubr.msk.f32.gmra.mrb[58].mxu1 %vm90_vm1, %v27249_v52  ;;  %v17157_v52 = vld [vmem:[#allocation2 + $0x28] sm:$0xff] }
 0x8ac   :  { %15570 = vmatprep.mubr.msk.f32.mxu1 %vm90_vm1, %v27250_v0  ;;  %v22853_v0 = vld [vmem:[%s25850_s4 + $0x18] sm:$0xf] }
 0x8af   :  { %15571 = vmatmul.mubr.msk.f32.gmra.mrb[60].mxu1 %vm90_vm1, %v22303_v63  ;;  %v17158_v63 = vld [vmem:[#allocation2 + $0x30] sm:$0xff] }
 0x8b0   :  { %15573 = vmatprep.mubr.msk.f32.mxu1 %vm90_vm1, %v22840_v55 }
 0x8b3   :  { %15574 = vmatmul.mubr.msk.f32.gmra.mrb[62].mxu1 %vm90_vm1, %v22845_v56 }
 0x8b4   :  { %15578 = vmatprep.mubr.msk.f32.mxu1 %vm90_vm1, %v17157_v52  ;;  %v22880_v52 = vld [vmem:[#allocation2 + $0x90] sm:$0xff] }
 0x8b5   :  { %27256 = vst [vmem:[#allocation116_spill] sm:$0xff] %v22880_v52 }
 0x8b7   :  { %15579 = vmatmul.mubr.msk.f32.vlgmr.msra.gmra.mrb[0].mxu1 %vm90_vm1, %v17158_v63  ;;  %v22872_v63 = vld [vmem:[#allocation2 + $0x70] sm:$0xff] }
 0x8b8   :  { %15675 = vmatpush3.msk.msra.mxu1 %vm840_vm0, %v22693_v24  ;;  %15581 = vmatprep.mubr.msk.f32.mxu1 %vm90_vm1, %v22858_v54  ;;  %27254 = vst [vmem:[#allocation114_spill] sm:$0xff] %v22872_v63  ;;  %v22876_v24 = vld [vmem:[#allocation2 + $0x88] sm:$0xff]  ;;  %v22990_v54 = vld [vmem:[#allocation2 + $0x2b0] sm:$0xff] }
 0x8b9   :  { %15772 = vmatprep.subr.msk.mxu1 %vm840_vm0, %v22853_v0  ;;  %27255 = vst [vmem:[#allocation115_spill] sm:$0xff] %v22876_v24  ;;  %27281 = vst [vmem:[#allocation121_spill] sm:$0xff] %v22990_v54 }
 0x8bb   :  { %15582 = vmatmul.mubr.msk.f32.gmra.mrb[2].mxu1 %vm90_vm1, %v22864_v51  ;;  %v22884_v51 = vld [vmem:[#allocation2 + $0xa8] sm:$0xff] }
 0x8bc   :  { %15584 = vmatprep.mubr.msk.f32.mxu1 %vm90_vm1, %v22868_v46  ;;  %27257 = vst [vmem:[#allocation117_spill] sm:$0xff] %v22884_v51  ;;  %v22888_v46 = vld [vmem:[#allocation2 + $0xb0] sm:$0xff] }
 0x8bd   :  { %27258 = vst [vmem:[#allocation123_spill] sm:$0xff] %v22888_v46 }
 0x8bf   :  { %15585 = vmatmul.mubr.msk.f32.gmra.mrb[4].mxu1 %vm90_vm1, %v22872_v63  ;;  %v22892_v63 = vld [vmem:[#allocation2 + $0xc8] sm:$0xff] }
 0x8c0   :  { %15587 = vmatprep.mubr.msk.f32.mxu1 %vm90_vm1, %v22876_v24  ;;  %27259 = vst [vmem:[#allocation124_spill] sm:$0xff] %v22892_v63  ;;  %v22896_v24 = vld [vmem:[#allocation2 + $0xd0] sm:$0xff] }
 0x8c1   :  { %27260 = vst [vmem:[#allocation125_spill] sm:$0xff] %v22896_v24 }
 0x8c3   :  { %15588 = vmatmul.mubr.msk.f32.gmra.mrb[6].mxu1 %vm90_vm1, %v22880_v52  ;;  %v22900_v52 = vld [vmem:[#allocation2 + $0xe8] sm:$0xff] }
 0x8c4   :  { %15590 = vmatprep.mubr.msk.f32.mxu1 %vm90_vm1, %v22884_v51  ;;  %27261 = vst [vmem:[#allocation126_spill] sm:$0xff] %v22900_v52  ;;  %v22904_v51 = vld [vmem:[#allocation2 + $0xf0] sm:$0xff] }
 0x8c5   :  { %27262 = vst [vmem:[#allocation127_spill] sm:$0xff] %v22904_v51 }
 0x8c7   :  { %15591 = vmatmul.mubr.msk.f32.gmra.mrb[8].mxu1 %vm90_vm1, %v22888_v46  ;;  %v22908_v46 = vld [vmem:[#allocation2 + $0x108] sm:$0xff] }
 0x8c8   :  { %15593 = vmatprep.mubr.msk.f32.mxu1 %vm90_vm1, %v22892_v63  ;;  %27263 = vst [vmem:[#allocation128_spill] sm:$0xff] %v22908_v46  ;;  %v22912_v63 = vld [vmem:[#allocation2 + $0x110] sm:$0xff] }
 0x8c9   :  { %27264 = vst [vmem:[#allocation122_spill] sm:$0xff] %v22912_v63 }
 0x8cb   :  { %15594 = vmatmul.mubr.msk.f32.gmra.mrb[10].mxu1 %vm90_vm1, %v22896_v24  ;;  %v22916_v24 = vld [vmem:[#allocation2 + $0x128] sm:$0xff] }
 0x8cc   :  { %15596 = vmatprep.mubr.msk.f32.mxu1 %vm90_vm1, %v22900_v52  ;;  %27265 = vst [vmem:[#allocation129_spill] sm:$0xff] %v22916_v24  ;;  %v22920_v52 = vld [vmem:[#allocation2 + $0x130] sm:$0xff] }
 0x8cd   :  { %27266 = vst [vmem:[#allocation130_spill] sm:$0xff] %v22920_v52 }
 0x8cf   :  { %15597 = vmatmul.mubr.msk.f32.gmra.mrb[12].mxu1 %vm90_vm1, %v22904_v51  ;;  %v22924_v51 = vld [vmem:[#allocation2 + $0x148] sm:$0xff] }
 0x8d0   :  { %15599 = vmatprep.mubr.msk.f32.mxu1 %vm90_vm1, %v22908_v46  ;;  %27267 = vst [vmem:[#allocation131_spill] sm:$0xff] %v22924_v51  ;;  %v22928_v46 = vld [vmem:[#allocation2 + $0x150] sm:$0xff] }
 0x8d1   :  { %27268 = vst [vmem:[#allocation132_spill] sm:$0xff] %v22928_v46 }
 0x8d3   :  { %15600 = vmatmul.mubr.msk.f32.gmra.mrb[14].mxu1 %vm90_vm1, %v22912_v63  ;;  %v22932_v63 = vld [vmem:[#allocation2 + $0x168] sm:$0xff] }
 0x8d4   :  { %15602 = vmatprep.mubr.msk.f32.mxu1 %vm90_vm1, %v22916_v24  ;;  %27269 = vst [vmem:[#allocation75_spill] sm:$0xff] %v22932_v63  ;;  %v22936_v24 = vld [vmem:[#allocation2 + $0x170] sm:$0xff] }
 0x8d5   :  { %27270 = vst [vmem:[#allocation133_spill] sm:$0xff] %v22936_v24 }
 0x8d7   :  { %15603 = vmatmul.mubr.msk.f32.gmra.mrb[16].mxu1 %vm90_vm1, %v22920_v52  ;;  %v22940_v52 = vld [vmem:[#allocation2 + $0x188] sm:$0xff] }
 0x8d8   :  { %15605 = vmatprep.mubr.msk.f32.mxu1 %vm90_vm1, %v22924_v51  ;;  %27271 = vst [vmem:[#allocation78_spill] sm:$0xff] %v22940_v52  ;;  %v22944_v51 = vld [vmem:[#allocation2 + $0x190] sm:$0xff] }
 0x8d9   :  { %27272 = vst [vmem:[#allocation79_spill] sm:$0xff] %v22944_v51 }
 0x8db   :  { %15606 = vmatmul.mubr.msk.f32.gmra.mrb[18].mxu1 %vm90_vm1, %v22928_v46  ;;  %v22948_v46 = vld [vmem:[#allocation2 + $0x1a8] sm:$0xff] }
 0x8dc   :  { %15608 = vmatprep.mubr.msk.f32.mxu1 %vm90_vm1, %v22932_v63  ;;  %27273 = vst [vmem:[#allocation110_spill] sm:$0xff] %v22948_v46  ;;  %v22952_v63 = vld [vmem:[#allocation2 + $0x1b0] sm:$0xff] }
 0x8dd   :  { %27274 = vst [vmem:[#allocation111_spill] sm:$0xff] %v22952_v63 }
 0x8df   :  { %15609 = vmatmul.mubr.msk.f32.gmra.mrb[20].mxu1 %vm90_vm1, %v22936_v24  ;;  %v22956_v24 = vld [vmem:[#allocation2 + $0x1c8] sm:$0xff] }
 0x8e0   :  { %15611 = vmatprep.mubr.msk.f32.mxu1 %vm90_vm1, %v22940_v52  ;;  %27275 = vst [vmem:[#allocation77_spill] sm:$0xff] %v22956_v24  ;;  %v22960_v52 = vld [vmem:[#allocation2 + $0x1d0] sm:$0xff] }
 0x8e1   :  { %27276 = vst [vmem:[#allocation148_spill] sm:$0xff] %v22960_v52 }
 0x8e3   :  { %15612 = vmatmul.mubr.msk.f32.gmra.mrb[22].mxu1 %vm90_vm1, %v22944_v51  ;;  %v22964_v51 = vld [vmem:[#allocation2 + $0x1e8] sm:$0xff] }
 0x8e4   :  { %15614 = vmatprep.mubr.msk.f32.mxu1 %vm90_vm1, %v22948_v46  ;;  %27277 = vst [vmem:[#allocation149_spill] sm:$0xff] %v22964_v51  ;;  %v22968_v46 = vld [vmem:[#allocation2 + $0x1f0] sm:$0xff] }
 0x8e5   :  { %27278 = vst [vmem:[#allocation150_spill] sm:$0xff] %v22968_v46 }
 0x8e7   :  { %15615 = vmatmul.mubr.msk.f32.gmra.mrb[24].mxu1 %vm90_vm1, %v22952_v63  ;;  %v22978_v63 = vld [vmem:[#allocation2 + $0x288] sm:$0xff] }
 0x8e8   :  { %15617 = vmatprep.mubr.msk.f32.mxu1 %vm90_vm1, %v22956_v24  ;;  %v17187_v24 = vld [vmem:[#allocation2 + $0x268] sm:$0xff] }
 0x8eb   :  { %15618 = vmatmul.mubr.msk.f32.gmra.mrb[26].mxu1 %vm90_vm1, %v22960_v52  ;;  %v17188_v52 = vld [vmem:[#allocation2 + $0x270] sm:$0xff] }
 0x8ec   :  { %15620 = vmatprep.mubr.msk.f32.mxu1 %vm90_vm1, %v22964_v51  ;;  %v22982_v51 = vld [vmem:[#allocation2 + $0x290] sm:$0xff] }
 0x8ed   :  { %27279 = vst [vmem:[#allocation151_spill] sm:$0xff] %v22982_v51 }
 0x8ef   :  { %15621 = vmatmul.mubr.msk.f32.gmra.mrb[28].mxu1 %vm90_vm1, %v22968_v46  ;;  %v22986_v46 = vld [vmem:[#allocation2 + $0x2a8] sm:$0xff] }
 0x8f0   :  { %15623 = vmatprep.mubr.msk.f32.mxu1 %vm90_vm1, %v22751_v14  ;;  %27280 = vst [vmem:[#allocation152_spill] sm:$0xff] %v22986_v46 }
 0x8f3   :  { %15624 = vmatmul.mubr.msk.f32.gmra.mrb[30].mxu1 %vm90_vm1, %v22756_v57 }
 0x8f4   :  { %15626 = vmatprep.mubr.msk.f32.mxu1 %vm90_vm1, %v17187_v24  ;;  %v22994_v24 = vld [vmem:[#allocation2 + $0x2c8] sm:$0xff] }
 0x8f5   :  { %27282 = vst [vmem:[#allocation120_spill] sm:$0xff] %v22994_v24 }
 0x8f7   :  { %15627 = vmatmul.mubr.msk.f32.gmra.mrb[32].mxu1 %vm90_vm1, %v17188_v52  ;;  %v22998_v52 = vld [vmem:[#allocation2 + $0x2d0] sm:$0xff] }
 0x8f8   :  { %15629 = vmatprep.mubr.msk.f32.mxu1 %vm90_vm1, %v22978_v63  ;;  %27283 = vst [vmem:[#allocation165_spill] sm:$0xff] %v22998_v52 }
 0x8fb   :  { %15630 = vmatmul.mubr.msk.f32.gmra.mrb[34].mxu1 %vm90_vm1, %v22982_v51  ;;  %v23002_v51 = vld [vmem:[#allocation2 + $0x2e8] sm:$0xff] }
 0x8fc   :  { %15632 = vmatprep.mubr.msk.f32.mxu1 %vm90_vm1, %v22986_v46  ;;  %27284 = vst [vmem:[#allocation166_spill] sm:$0xff] %v23002_v51  ;;  %v23006_v46 = vld [vmem:[#allocation2 + $0x2f0] sm:$0xff] }
 0x8fd   :  { %27285 = vst [vmem:[#allocation167_spill] sm:$0xff] %v23006_v46 }
 0x8ff   :  { %15633 = vmatmul.mubr.msk.f32.gmra.mrb[36].mxu1 %vm90_vm1, %v22990_v54  ;;  %v23010_v54 = vld [vmem:[#allocation2 + $0x308] sm:$0xff] }
 0x900   :  { %15635 = vmatprep.mubr.msk.f32.mxu1 %vm90_vm1, %v22994_v24  ;;  %27286 = vst [vmem:[#allocation153_spill] sm:$0xff] %v23010_v54  ;;  %v23014_v24 = vld [vmem:[#allocation2 + $0x310] sm:$0xff] }
 0x901   :  { %27287 = vst [vmem:[#allocation154_spill] sm:$0xff] %v23014_v24 }
 0x903   :  { %15636 = vmatmul.mubr.msk.f32.gmra.mrb[38].mxu1 %vm90_vm1, %v22998_v52  ;;  %v23018_v52 = vld [vmem:[#allocation2 + $0x328] sm:$0xff] }
 0x904   :  { %15638 = vmatprep.mubr.msk.f32.mxu1 %vm90_vm1, %v23002_v51  ;;  %27288 = vst [vmem:[#allocation155_spill] sm:$0xff] %v23018_v52  ;;  %v23022_v51 = vld [vmem:[#allocation2 + $0x330] sm:$0xff] }
 0x905   :  { %27289 = vst [vmem:[#allocation156_spill] sm:$0xff] %v23022_v51 }
 0x907   :  { %15639 = vmatmul.mubr.msk.f32.gmra.mrb[40].mxu1 %vm90_vm1, %v23006_v46  ;;  %v23026_v46 = vld [vmem:[#allocation2 + $0x348] sm:$0xff] }
 0x908   :  { %15641 = vmatprep.mubr.msk.f32.mxu1 %vm90_vm1, %v23010_v54  ;;  %27290 = vst [vmem:[#allocation157_spill] sm:$0xff] %v23026_v46  ;;  %v23030_v54 = vld [vmem:[#allocation2 + $0x350] sm:$0xff] }
 0x909   :  { %27291 = vst [vmem:[#allocation158_spill] sm:$0xff] %v23030_v54 }
 0x90b   :  { %15642 = vmatmul.mubr.msk.f32.gmra.mrb[42].mxu1 %vm90_vm1, %v23014_v24  ;;  %v23034_v24 = vld [vmem:[#allocation2 + $0x368] sm:$0xff] }
 0x90c   :  { %15644 = vmatprep.mubr.msk.f32.mxu1 %vm90_vm1, %v23018_v52  ;;  %27292 = vst [vmem:[#allocation159_spill] sm:$0xff] %v23034_v24  ;;  %v23038_v52 = vld [vmem:[#allocation2 + $0x370] sm:$0xff] }
 0x90d   :  { %27293 = vst [vmem:[#allocation160_spill] sm:$0xff] %v23038_v52 }
 0x90f   :  { %15645 = vmatmul.mubr.msk.f32.gmra.mrb[44].mxu1 %vm90_vm1, %v23022_v51  ;;  %v23042_v51 = vld [vmem:[#allocation2 + $0x388] sm:$0xff] }
 0x910   :  { %15647 = vmatprep.mubr.msk.f32.mxu1 %vm90_vm1, %v23026_v46  ;;  %27294 = vst [vmem:[#allocation161_spill] sm:$0xff] %v23042_v51  ;;  %v23046_v46 = vld [vmem:[#allocation2 + $0x390] sm:$0xff] }
 0x911   :  { %27295 = vst [vmem:[#allocation162_spill] sm:$0xff] %v23046_v46 }
 0x913   :  { %15648 = vmatmul.mubr.msk.f32.gmra.mrb[46].mxu1 %vm90_vm1, %v23030_v54  ;;  %v23050_v54 = vld [vmem:[#allocation2 + $0x3a8] sm:$0xff] }
 0x914   :  { %15650 = vmatprep.mubr.msk.f32.mxu1 %vm90_vm1, %v23034_v24  ;;  %27296 = vst [vmem:[#allocation163_spill] sm:$0xff] %v23050_v54  ;;  %v23054_v24 = vld [vmem:[#allocation2 + $0x3b0] sm:$0xff] }
 0x915   :  { %27297 = vst [vmem:[#allocation164_spill] sm:$0xff] %v23054_v24 }
 0x917   :  { %15651 = vmatmul.mubr.msk.f32.gmra.mrb[48].mxu1 %vm90_vm1, %v23038_v52  ;;  %v23058_v52 = vld [vmem:[#allocation2 + $0x3c8] sm:$0xff] }
 0x918   :  { %15653 = vmatprep.mubr.msk.f32.mxu1 %vm90_vm1, %v23042_v51  ;;  %27298 = vst [vmem:[#allocation168_spill] sm:$0xff] %v23058_v52  ;;  %v23062_v51 = vld [vmem:[#allocation2 + $0x3d0] sm:$0xff] }
 0x919   :  { %27299 = vst [vmem:[#allocation169_spill] sm:$0xff] %v23062_v51 }
 0x91b   :  { %15654 = vmatmul.mubr.msk.f32.gmra.mrb[50].mxu1 %vm90_vm1, %v23046_v46  ;;  %v23066_v46 = vld [vmem:[#allocation2 + $0x3e8] sm:$0xff] }
 0x91c   :  { %15656 = vmatprep.mubr.msk.f32.mxu1 %vm90_vm1, %v23050_v54  ;;  %27300 = vst [vmem:[#allocation137_spill] sm:$0xff] %v23066_v46  ;;  %v23070_v54 = vld [vmem:[#allocation2 + $0x3f0] sm:$0xff] }
 0x91f   :  { %15657 = vmatmul.mubr.msk.f32.gmra.mrb[52].mxu1 %vm90_vm1, %v23054_v24  ;;  %v23074_v24 = vld [vmem:[#allocation2 + $0x408] sm:$0xff] }
 0x920   :  { %15659 = vmatprep.mubr.msk.f32.mxu1 %vm90_vm1, %v23058_v52  ;;  %v23078_v52 = vld [vmem:[#allocation2 + $0x410] sm:$0xff] }
 0x921   :  { %27301 = vst [vmem:[#allocation64_spill] sm:$0xff] %v23078_v52 }
 0x923   :  { %15660 = vmatmul.mubr.msk.f32.gmra.mrb[54].mxu1 %vm90_vm1, %v23062_v51  ;;  %v23082_v51 = vld [vmem:[#allocation2 + $0x428] sm:$0xff] }
 0x924   :  { %15662 = vmatprep.mubr.msk.f32.mxu1 %vm90_vm1, %v23066_v46  ;;  %v23086_v46 = vld [vmem:[#allocation2 + $0x430] sm:$0xff] }
 0x927   :  { %15663 = vmatmul.mubr.msk.f32.gmra.mrb[56].mxu1 %vm90_vm1, %v23070_v54 }
 0x928   :  { %15665 = vmatprep.mubr.msk.f32.mxu1 %vm90_vm1, %v23074_v24 }
 0x92b   :  { %15666 = vmatmul.mubr.msk.f32.gmra.mrb[58].mxu1 %vm90_vm1, %v23078_v52  ;;  %v23099_v52 = vld [vmem:[%s25850_s4 + $0x1c] sm:$0xf] }
 0x92c   :  { %15668 = vmatprep.mubr.msk.f32.mxu1 %vm90_vm1, %v23082_v51 }
 0x92f   :  { %15669 = vmatmul.mubr.msk.f32.gmra.mrb[60].mxu1 %vm90_vm1, %v23086_v46 }
 0x930   :  { %15671 = vmatprep.mubr.msk.f32.mxu1 %vm90_vm1, %v22827_v58 }
 0x933   :  { %15672 = vmatmul.mubr.msk.f32.gmra.mrb[62].mxu1 %vm90_vm1, %v22832_v30 }
 0x934   :  { %15676 = vmatprep.mubr.msk.f32.mxu1 %vm90_vm1, %v22321_v61  ;;  %v27302_v61 = vld [vmem:[#allocation91_spill] sm:$0xff] }
 0x937   :  { %15677 = vmatmul.mubr.msk.f32.vlgmr.msra.gmra.mrb[0].mxu1 %vm90_vm1, %v22332_v12  ;;  %v9218_v12 = vrot.slane %v22751_v14, 1 }
 0x938   :  { %15773 = vmatpush3.msk.msra.mxu1 %vm840_vm0, %v22853_v0  ;;  %15679 = vmatprep.mubr.msk.f32.mxu1 %vm90_vm1, %v22337_v39  ;;  %v9219_v0 = vrot.slane %v22756_v57, 1 }
 0x939   :  { %15870 = vmatprep.subr.msk.mxu1 %vm840_vm0, %v23099_v52 }
 0x93b   :  { %15680 = vmatmul.mubr.msk.f32.gmra.mrb[2].mxu1 %vm90_vm1, %v22344_v11 }
 0x93c   :  { %15682 = vmatprep.mubr.msk.f32.mxu1 %vm90_vm1, %v22349_v26 }
 0x93f   :  { %15683 = vmatmul.mubr.msk.f32.gmra.mrb[4].mxu1 %vm90_vm1, %v22356_v3 }
 0x940   :  { %15685 = vmatprep.mubr.msk.f32.mxu1 %vm90_vm1, %v22361_v48 }
 0x943   :  { %15686 = vmatmul.mubr.msk.f32.gmra.mrb[6].mxu1 %vm90_vm1, %v22368_v42 }
 0x944   :  { %15688 = vmatprep.mubr.msk.f32.mxu1 %vm90_vm1, %v22373_v59 }
 0x947   :  { %15689 = vmatmul.mubr.msk.f32.gmra.mrb[8].mxu1 %vm90_vm1, %v22380_v41 }
 0x948   :  { %15691 = vmatprep.mubr.msk.f32.mxu1 %vm90_vm1, %v22385_v44 }
 0x94b   :  { %15692 = vmatmul.mubr.msk.f32.gmra.mrb[10].mxu1 %vm90_vm1, %v22392_v28 }
 0x94c   :  { %15694 = vmatprep.mubr.msk.f32.mxu1 %vm90_vm1, %v22397_v45 }
 0x94f   :  { %15695 = vmatmul.mubr.msk.f32.gmra.mrb[12].mxu1 %vm90_vm1, %v22404_v1 }
 0x950   :  { %15697 = vmatprep.mubr.msk.f32.mxu1 %vm90_vm1, %v22409_v50 }
 0x953   :  { %15698 = vmatmul.mubr.msk.f32.gmra.mrb[14].mxu1 %vm90_vm1, %v22416_v15 }
 0x954   :  { %15700 = vmatprep.mubr.msk.f32.mxu1 %vm90_vm1, %v22421_v9 }
 0x957   :  { %15701 = vmatmul.mubr.msk.f32.gmra.mrb[16].mxu1 %vm90_vm1, %v22428_v23 }
 0x958   :  { %15703 = vmatprep.mubr.msk.f32.mxu1 %vm90_vm1, %v22433_v22 }
 0x95b   :  { %15704 = vmatmul.mubr.msk.f32.gmra.mrb[18].mxu1 %vm90_vm1, %v22440_v6 }
 0x95c   :  { %15706 = vmatprep.mubr.msk.f32.mxu1 %vm90_vm1, %v22445_v33 }
 0x95f   :  { %15707 = vmatmul.mubr.msk.f32.gmra.mrb[20].mxu1 %vm90_vm1, %v22452_v16 }
 0x960   :  { %15709 = vmatprep.mubr.msk.f32.mxu1 %vm90_vm1, %v22457_v60  ;;  %v6132_v60 = vld [vmem:[#allocation2 + $0x218] sm:$0xff] }
 0x963   :  { %15710 = vmatmul.mubr.msk.f32.gmra.mrb[22].mxu1 %vm90_vm1, %v22464_v18  ;;  %v9221_v18 = vrot.slane %v6132_v60, 1  ;;  %v27303_v60 = vld [vmem:[#allocation96_spill] sm:$0xff] }
 0x964   :  { %15712 = vmatprep.mubr.msk.f32.mxu1 %vm90_vm1, %v22469_v10 }
 0x967   :  { %15713 = vmatmul.mubr.msk.f32.gmra.mrb[24].mxu1 %vm90_vm1, %v27302_v61  ;;  %v23166_v61 = vsel %vm1777_vm3, %v9218_v12, %v9219_v0  ;;  %v27307_v12 = vld [vmem:[#allocation97_spill] sm:$0xff] }
 0x968   :  { %15715 = vmatprep.mubr.msk.f32.mxu1 %vm90_vm1, %v22481_v35 }
 0x96b   :  { %15716 = vmatmul.mubr.msk.f32.gmra.mrb[26].mxu1 %vm90_vm1, %v22490_v53  ;;  %v23171_v53 = vsel %vm1777_vm3, %v9219_v0, %v9221_v18  ;;  %v27304_v18 = vld [vmem:[#allocation95_spill] sm:$0xff]  ;;  %v27308_v0 = vld [vmem:[#allocation98_spill] sm:$0xff] }
 0x96c   :  { %15718 = vmatprep.mubr.msk.f32.mxu1 %vm90_vm1, %v22495_v47 }
 0x96f   :  { %15719 = vmatmul.mubr.msk.f32.gmra.mrb[28].mxu1 %vm90_vm1, %v22501_v5 }
 0x970   :  { %15721 = vmatprep.mubr.msk.f32.mxu1 %vm90_vm1, %v23166_v61 }
 0x973   :  { %15722 = vmatmul.mubr.msk.f32.gmra.mrb[30].mxu1 %vm90_vm1, %v23171_v53 }
 0x974   :  { %15724 = vmatprep.mubr.msk.f32.mxu1 %vm90_vm1, %v22511_v32  ;;  %v27305_v32 = vld [vmem:[#allocation118_spill] sm:$0xff] }
 0x977   :  { %15725 = vmatmul.mubr.msk.f32.gmra.mrb[32].mxu1 %vm90_vm1, %v22518_v2  ;;  %v27306_v2 = vld [vmem:[#allocation119_spill] sm:$0xff] }
 0x978   :  { %15727 = vmatprep.mubr.msk.f32.mxu1 %vm90_vm1, %v22523_v4 }
 0x97b   :  { %15728 = vmatmul.mubr.msk.f32.gmra.mrb[34].mxu1 %vm90_vm1, %v22530_v40 }
 0x97c   :  { %15730 = vmatprep.mubr.msk.f32.mxu1 %vm90_vm1, %v22535_v38 }
 0x97f   :  { %15731 = vmatmul.mubr.msk.f32.gmra.mrb[36].mxu1 %vm90_vm1, %v22542_v19 }
 0x980   :  { %15733 = vmatprep.mubr.msk.f32.mxu1 %vm90_vm1, %v22547_v31 }
 0x983   :  { %15734 = vmatmul.mubr.msk.f32.gmra.mrb[38].mxu1 %vm90_vm1, %v22554_v8 }
 0x984   :  { %15736 = vmatprep.mubr.msk.f32.mxu1 %vm90_vm1, %v22559_v25 }
 0x987   :  { %15737 = vmatmul.mubr.msk.f32.gmra.mrb[40].mxu1 %vm90_vm1, %v22566_v62 }
 0x988   :  { %15739 = vmatprep.mubr.msk.f32.mxu1 %vm90_vm1, %v22571_v36 }
 0x98b   :  { %15740 = vmatmul.mubr.msk.f32.gmra.mrb[42].mxu1 %vm90_vm1, %v22578_v37 }
 0x98c   :  { %15742 = vmatprep.mubr.msk.f32.mxu1 %vm90_vm1, %v22583_v17 }
 0x98f   :  { %15743 = vmatmul.mubr.msk.f32.gmra.mrb[44].mxu1 %vm90_vm1, %v22590_v21  ;;  %v27309_v21 = vld [vmem:[#allocation100_spill] sm:$0xff] }
 0x990   :  { %15745 = vmatprep.mubr.msk.f32.mxu1 %vm90_vm1, %v27303_v60 }
 0x993   :  { %15746 = vmatmul.mubr.msk.f32.gmra.mrb[46].mxu1 %vm90_vm1, %v27304_v18 }
 0x994   :  { %15748 = vmatprep.mubr.msk.f32.mxu1 %vm90_vm1, %v27305_v32  ;;  %v27343_v32 = vld [vmem:[#allocation80_spill] sm:$0xff] }
 0x997   :  { %15749 = vmatmul.mubr.msk.f32.gmra.mrb[48].mxu1 %vm90_vm1, %v27306_v2 }
 0x998   :  { %15751 = vmatprep.mubr.msk.f32.mxu1 %vm90_vm1, %v27307_v12  ;;  %v27311_v12 = vld [vmem:[#allocation108_spill] sm:$0xff] }
 0x99b   :  { %15752 = vmatmul.mubr.msk.f32.gmra.mrb[50].mxu1 %vm90_vm1, %v27308_v0  ;;  %v27310_v0 = vld [vmem:[#allocation107_spill] sm:$0xff] }
 0x99c   :  { %15754 = vmatprep.mubr.msk.f32.mxu1 %vm90_vm1, %v22631_v27  ;;  %v9224_v27 = vrot.slane %v22832_v30, 1 }
 0x99f   :  { %15755 = vmatmul.mubr.msk.f32.gmra.mrb[52].mxu1 %vm90_vm1, %v27309_v21  ;;  %v9223_v21 = vrot.slane %v22827_v58, 1 }
 0x9a0   :  { %15757 = vmatprep.mubr.msk.f32.mxu1 %vm90_vm1, %v22643_v43  ;;  %v6204_v43 = vld [vmem:[#allocation2 + $0x458] sm:$0xff] }
 0x9a3   :  { %15758 = vmatmul.mubr.msk.f32.gmra.mrb[54].mxu1 %vm90_vm1, %v22650_v29  ;;  %v9226_v29 = vrot.slane %v6204_v43, 1  ;;  %v23252_v43 = vld [vmem:[%s25850_s4 + $0x20] sm:$0xf] }
 0x9a4   :  { %15760 = vmatprep.mubr.msk.f32.mxu1 %vm90_vm1, %v22655_v49  ;;  %v23313_v49 = vld [vmem:[#allocation2 + $0x230] sm:$0xff] }
 0x9a7   :  { %15761 = vmatmul.mubr.msk.f32.gmra.mrb[56].mxu1 %vm90_vm1, %v22662_v7  ;;  %v23238_v7 = vsel %vm1777_vm3, %v9223_v21, %v9224_v27  ;;  %v27316_v21 = vld [vmem:[#allocation172_spill] sm:$0xff] }
 0x9a8   :  { %15763 = vmatprep.mubr.msk.f32.mxu1 %vm90_vm1, %v22667_v34  ;;  %27312 = vst [vmem:[#allocation96_spill] sm:$0xff] %v23238_v7  ;;  %v27314_v34 = vld [vmem:[#allocation170_spill] sm:$0xff] }
 0x9ab   :  { %15764 = vmatmul.mubr.msk.f32.gmra.mrb[58].mxu1 %vm90_vm1, %v22674_v13  ;;  %v23243_v13 = vsel %vm1777_vm3, %v9224_v27, %v9226_v29  ;;  %v27317_v27 = vld [vmem:[#allocation173_spill] sm:$0xff]  ;;  %v27318_v29 = vld [vmem:[#allocation174_spill] sm:$0xff] }
 0x9ac   :  { %15766 = vmatprep.mubr.msk.f32.mxu1 %vm90_vm1, %v27310_v0  ;;  %27313 = vst [vmem:[#allocation95_spill] sm:$0xff] %v23243_v13  ;;  %v27339_v0 = vld [vmem:[#allocation195_spill] sm:$0xff] }
 0x9af   :  { %15767 = vmatmul.mubr.msk.f32.gmra.mrb[60].mxu1 %vm90_vm1, %v27311_v12  ;;  %v27315_v12 = vld [vmem:[#allocation171_spill] sm:$0xff] }
 0x9b0   :  { %15769 = vmatprep.mubr.msk.f32.mxu1 %vm90_vm1, %v23238_v7  ;;  %v27324_v7 = vld [vmem:[#allocation180_spill] sm:$0xff] }
 0x9b3   :  { %15770 = vmatmul.mubr.msk.f32.gmra.mrb[62].mxu1 %vm90_vm1, %v23243_v13  ;;  %v27320_v13 = vld [vmem:[#allocation176_spill] sm:$0xff] }
 0x9b4   :  { %15774 = vmatprep.mubr.msk.f32.mxu1 %vm90_vm1, %v27314_v34  ;;  %v27319_v34 = vld [vmem:[#allocation175_spill] sm:$0xff] }
 0x9b7   :  { %15775 = vmatmul.mubr.msk.f32.vlgmr.msra.gmra.mrb[0].mxu1 %vm90_vm1, %v27315_v12  ;;  %v27321_v12 = vld [vmem:[#allocation177_spill] sm:$0xff] }
 0x9b8   :  { %15871 = vmatpush3.msk.msra.mxu1 %vm840_vm0, %v23099_v52  ;;  %15777 = vmatprep.mubr.msk.f32.mxu1 %vm90_vm1, %v27316_v21  ;;  %v27322_v52 = vld [vmem:[#allocation178_spill] sm:$0xff]  ;;  %v27323_v21 = vld [vmem:[#allocation179_spill] sm:$0xff] }
 0x9b9   :  { %15968 = vmatprep.subr.msk.mxu1 %vm840_vm0, %v23252_v43 }
 0x9bb   :  { %15778 = vmatmul.mubr.msk.f32.gmra.mrb[2].mxu1 %vm90_vm1, %v27317_v27  ;;  %v27325_v27 = vld [vmem:[#allocation181_spill] sm:$0xff] }
 0x9bc   :  { %15780 = vmatprep.mubr.msk.f32.mxu1 %vm90_vm1, %v27318_v29  ;;  %v27326_v29 = vld [vmem:[#allocation182_spill] sm:$0xff] }
 0x9bf   :  { %15781 = vmatmul.mubr.msk.f32.gmra.mrb[4].mxu1 %vm90_vm1, %v27319_v34  ;;  %v27327_v34 = vld [vmem:[#allocation183_spill] sm:$0xff] }
 0x9c0   :  { %15783 = vmatprep.mubr.msk.f32.mxu1 %vm90_vm1, %v27320_v13  ;;  %v27328_v13 = vld [vmem:[#allocation184_spill] sm:$0xff] }
 0x9c3   :  { %15784 = vmatmul.mubr.msk.f32.gmra.mrb[6].mxu1 %vm90_vm1, %v27321_v12  ;;  %v27329_v12 = vld [vmem:[#allocation185_spill] sm:$0xff] }
 0x9c4   :  { %15786 = vmatprep.mubr.msk.f32.mxu1 %vm90_vm1, %v27322_v52  ;;  %v27330_v52 = vld [vmem:[#allocation186_spill] sm:$0xff] }
 0x9c7   :  { %15787 = vmatmul.mubr.msk.f32.gmra.mrb[8].mxu1 %vm90_vm1, %v27323_v21  ;;  %v27331_v21 = vld [vmem:[#allocation187_spill] sm:$0xff] }
 0x9c8   :  { %15789 = vmatprep.mubr.msk.f32.mxu1 %vm90_vm1, %v27324_v7  ;;  %v27332_v7 = vld [vmem:[#allocation188_spill] sm:$0xff] }
 0x9cb   :  { %15790 = vmatmul.mubr.msk.f32.gmra.mrb[10].mxu1 %vm90_vm1, %v27325_v27  ;;  %v27333_v27 = vld [vmem:[#allocation189_spill] sm:$0xff] }
 0x9cc   :  { %15792 = vmatprep.mubr.msk.f32.mxu1 %vm90_vm1, %v27326_v29  ;;  %v27334_v29 = vld [vmem:[#allocation190_spill] sm:$0xff] }
 0x9cf   :  { %15793 = vmatmul.mubr.msk.f32.gmra.mrb[12].mxu1 %vm90_vm1, %v27327_v34  ;;  %v27335_v34 = vld [vmem:[#allocation191_spill] sm:$0xff] }
 0x9d0   :  { %15795 = vmatprep.mubr.msk.f32.mxu1 %vm90_vm1, %v27328_v13  ;;  %v27336_v13 = vld [vmem:[#allocation192_spill] sm:$0xff] }
 0x9d3   :  { %15796 = vmatmul.mubr.msk.f32.gmra.mrb[14].mxu1 %vm90_vm1, %v27329_v12  ;;  %v27337_v12 = vld [vmem:[#allocation193_spill] sm:$0xff] }
 0x9d4   :  { %15798 = vmatprep.mubr.msk.f32.mxu1 %vm90_vm1, %v27330_v52  ;;  %v27338_v52 = vld [vmem:[#allocation194_spill] sm:$0xff] }
 0x9d7   :  { %15799 = vmatmul.mubr.msk.f32.gmra.mrb[16].mxu1 %vm90_vm1, %v27331_v21  ;;  %v6133_v21 = vld [vmem:[#allocation2 + $0x220] sm:$0xff] }
 0x9d8   :  { %15801 = vmatprep.mubr.msk.f32.mxu1 %vm90_vm1, %v27332_v7  ;;  %v23306_v7 = vld [vmem:[#allocation2 + $0x228] sm:$0xff] }
 0x9db   :  { %15802 = vmatmul.mubr.msk.f32.gmra.mrb[18].mxu1 %vm90_vm1, %v27333_v27  ;;  %v27340_v27 = vld [vmem:[#allocation23_spill] sm:$0xff] }
 0x9dc   :  { %15804 = vmatprep.mubr.msk.f32.mxu1 %vm90_vm1, %v27334_v29  ;;  %v9694_v29 = vrot.slane %v6133_v21, 7  ;;  %v27344_v21 = vld [vmem:[#allocation65_spill] sm:$0xff] }
 0x9df   :  { %15805 = vmatmul.mubr.msk.f32.gmra.mrb[20].mxu1 %vm90_vm1, %v27335_v34  ;;  %v9695_v34 = vrot.slane %v23306_v7, 7 }
 0x9e0   :  { %15807 = vmatprep.mubr.msk.f32.mxu1 %vm90_vm1, %v27336_v13  ;;  %v27341_v13 = vld [vmem:[#allocation134_spill] sm:$0xff] }
 0x9e1   :  { %v9696_v2 = vsel %vm551_vm2, %v9694_v29, %v9695_v34  ;;  %v27348_v29 = vld [vmem:[#allocation69_spill] sm:$0xff] }
 0x9e3   :  { %15808 = vmatmul.mubr.msk.f32.gmra.mrb[22].mxu1 %vm90_vm1, %v27337_v12  ;;  %v27342_v12 = vld [vmem:[#allocation109_spill] sm:$0xff] }
 0x9e4   :  { %15810 = vmatprep.mubr.msk.f32.mxu1 %vm90_vm1, %v27338_v52  ;;  %v9697_v52 = vrot.slane %v23313_v49, 7 }
 0x9e7   :  { %15811 = vmatmul.mubr.msk.f32.gmra.mrb[24].mxu1 %vm90_vm1, %v27339_v0  ;;  %v9698_v0 = vsel %vm551_vm2, %v9695_v34, %v9697_v52  ;;  %v27351_v34 = vld [vmem:[#allocation72_spill] sm:$0xff]  ;;  %v27352_v52 = vld [vmem:[#allocation73_spill] sm:$0xff] }
 0x9e8   :  { %15813 = vmatprep.mubr.msk.f32.mxu1 %vm90_vm1, %v27340_v27  ;;  %v27345_v27 = vld [vmem:[#allocation66_spill] sm:$0xff] }
 0x9eb   :  { %15814 = vmatmul.mubr.msk.f32.gmra.mrb[26].mxu1 %vm90_vm1, %v27341_v13  ;;  %v27346_v13 = vld [vmem:[#allocation67_spill] sm:$0xff] }
 0x9ec   :  { %15816 = vmatprep.mubr.msk.f32.mxu1 %vm90_vm1, %v27342_v12  ;;  %v27347_v12 = vld [vmem:[#allocation68_spill] sm:$0xff] }
 0x9ef   :  { %15817 = vmatmul.mubr.msk.f32.gmra.mrb[28].mxu1 %vm90_vm1, %v27343_v32  ;;  %v27349_v32 = vld [vmem:[#allocation70_spill] sm:$0xff] }
 0x9f0   :  { %15819 = vmatprep.mubr.msk.f32.mxu1 %vm90_vm1, %v9696_v2  ;;  %v27350_v2 = vld [vmem:[#allocation71_spill] sm:$0xff] }
 0x9f3   :  { %15820 = vmatmul.mubr.msk.f32.gmra.mrb[30].mxu1 %vm90_vm1, %v9698_v0  ;;  %v27353_v0 = vld [vmem:[#allocation74_spill] sm:$0xff] }
 0x9f4   :  { %15822 = vmatprep.mubr.msk.f32.mxu1 %vm90_vm1, %v27344_v21  ;;  %v27354_v21 = vld [vmem:[#allocation76_spill] sm:$0xff] }
 0x9f7   :  { %15823 = vmatmul.mubr.msk.f32.gmra.mrb[32].mxu1 %vm90_vm1, %v27345_v27  ;;  %v27355_v27 = vld [vmem:[#allocation140_spill] sm:$0xff] }
 0x9f8   :  { %15825 = vmatprep.mubr.msk.f32.mxu1 %vm90_vm1, %v27346_v13  ;;  %v27356_v13 = vld [vmem:[#allocation143_spill] sm:$0xff] }
 0x9fb   :  { %15826 = vmatmul.mubr.msk.f32.gmra.mrb[34].mxu1 %vm90_vm1, %v27347_v12  ;;  %v27357_v12 = vld [vmem:[#allocation144_spill] sm:$0xff] }
 0x9fc   :  { %15828 = vmatprep.mubr.msk.f32.mxu1 %vm90_vm1, %v27348_v29  ;;  %v27358_v29 = vld [vmem:[#allocation145_spill] sm:$0xff] }
 0x9ff   :  { %15829 = vmatmul.mubr.msk.f32.gmra.mrb[36].mxu1 %vm90_vm1, %v27349_v32  ;;  %v27359_v32 = vld [vmem:[#allocation146_spill] sm:$0xff] }
 0xa00   :  { %15831 = vmatprep.mubr.msk.f32.mxu1 %vm90_vm1, %v27350_v2  ;;  %v27360_v2 = vld [vmem:[#allocation147_spill] sm:$0xff] }
 0xa03   :  { %15832 = vmatmul.mubr.msk.f32.gmra.mrb[38].mxu1 %vm90_vm1, %v27351_v34  ;;  %v27361_v34 = vld [vmem:[#allocation138_spill] sm:$0xff] }
 0xa04   :  { %15834 = vmatprep.mubr.msk.f32.mxu1 %vm90_vm1, %v27352_v52  ;;  %v27362_v52 = vld [vmem:[#allocation139_spill] sm:$0xff] }
 0xa07   :  { %15835 = vmatmul.mubr.msk.f32.gmra.mrb[40].mxu1 %vm90_vm1, %v27353_v0  ;;  %v27363_v0 = vld [vmem:[#allocation82_spill] sm:$0xff] }
 0xa08   :  { %15837 = vmatprep.mubr.msk.f32.mxu1 %vm90_vm1, %v27354_v21  ;;  %v27364_v21 = vld [vmem:[#allocation84_spill] sm:$0xff] }
 0xa0b   :  { %15838 = vmatmul.mubr.msk.f32.gmra.mrb[42].mxu1 %vm90_vm1, %v27355_v27  ;;  %v27365_v27 = vld [vmem:[#allocation83_spill] sm:$0xff] }
 0xa0c   :  { %15840 = vmatprep.mubr.msk.f32.mxu1 %vm90_vm1, %v27356_v13  ;;  %v27366_v13 = vld [vmem:[#allocation86_spill] sm:$0xff] }
 0xa0f   :  { %15841 = vmatmul.mubr.msk.f32.gmra.mrb[44].mxu1 %vm90_vm1, %v27357_v12  ;;  %v27367_v12 = vld [vmem:[#allocation85_spill] sm:$0xff] }
 0xa10   :  { %15843 = vmatprep.mubr.msk.f32.mxu1 %vm90_vm1, %v27358_v29  ;;  %v6205_v29 = vld [vmem:[#allocation2 + $0x460] sm:$0xff] }
 0xa13   :  { %15844 = vmatmul.mubr.msk.f32.gmra.mrb[46].mxu1 %vm90_vm1, %v27359_v32  ;;  %v23376_v32 = vld [vmem:[#allocation2 + $0x468] sm:$0xff] }
 0xa14   :  { %15846 = vmatprep.mubr.msk.f32.mxu1 %vm90_vm1, %v27360_v2  ;;  %v27368_v2 = vld [vmem:[#allocation88_spill] sm:$0xff] }
 0xa17   :  { %15847 = vmatmul.mubr.msk.f32.gmra.mrb[48].mxu1 %vm90_vm1, %v27361_v34  ;;  %v27369_v34 = vld [vmem:[#allocation87_spill] sm:$0xff] }
 0xa18   :  { %15849 = vmatprep.mubr.msk.f32.mxu1 %vm90_vm1, %v27362_v52  ;;  %v9699_v52 = vrot.slane %v6205_v29, 7  ;;  %v27371_v29 = vld [vmem:[#allocation81_spill] sm:$0xff] }
 0xa1b   :  { %15850 = vmatmul.mubr.msk.f32.gmra.mrb[50].mxu1 %vm90_vm1, %v27363_v0  ;;  %v9700_v0 = vrot.slane %v23376_v32, 7 }
 0xa1c   :  { %15852 = vmatprep.mubr.msk.f32.mxu1 %vm90_vm1, %v27364_v21  ;;  %v23383_v21 = vld [vmem:[#allocation2 + $0x470] sm:$0xff] }
 0xa1f   :  { %15853 = vmatmul.mubr.msk.f32.gmra.mrb[52].mxu1 %vm90_vm1, %v27365_v27  ;;  %v27370_v27 = vld [vmem:[#allocation90_spill] sm:$0xff] }
 0xa20   :  { %15855 = vmatprep.mubr.msk.f32.mxu1 %vm90_vm1, %v27366_v13  ;;  %v9701_v13 = vsel %vm551_vm2, %v9699_v52, %v9700_v0  ;;  %v27376_v52 = vld [vmem:[#allocation116_spill] sm:$0xff] }
 0xa23   :  { %15856 = vmatmul.mubr.msk.f32.gmra.mrb[54].mxu1 %vm90_vm1, %v22280_v20  ;;  %v9702_v20 = vrot.slane %v23383_v21, 7 }
 0xa24   :  { %15858 = vmatprep.mubr.msk.f32.mxu1 %vm90_vm1, %v27367_v12 }
 0xa25   :  { %v9703_v12 = vsel %vm551_vm2, %v9700_v0, %v9702_v20  ;;  %v27377_v0 = vld [vmem:[#allocation117_spill] sm:$0xff]  ;;  %v27379_v20 = vld [vmem:[#allocation124_spill] sm:$0xff] }
 0xa27   :  { %15859 = vmatmul.mubr.msk.f32.gmra.mrb[56].mxu1 %vm90_vm1, %v27368_v2  ;;  %v27372_v2 = vld [vmem:[#allocation112_spill] sm:$0xff] }
 0xa28   :  { %15861 = vmatprep.mubr.msk.f32.mxu1 %vm90_vm1, %v27369_v34  ;;  %v27374_v34 = vld [vmem:[#allocation114_spill] sm:$0xff] }
 0xa2b   :  { %15862 = vmatmul.mubr.msk.f32.gmra.mrb[58].mxu1 %vm90_vm1, %v27370_v27  ;;  %v27378_v27 = vld [vmem:[#allocation123_spill] sm:$0xff] }
 0xa2c   :  { %15864 = vmatprep.mubr.msk.f32.mxu1 %vm90_vm1, %v22840_v55  ;;  %v27373_v55 = vld [vmem:[#allocation113_spill] sm:$0xff] }
 0xa2f   :  { %15865 = vmatmul.mubr.msk.f32.gmra.mrb[60].mxu1 %vm90_vm1, %v22845_v56  ;;  %v27375_v56 = vld [vmem:[#allocation115_spill] sm:$0xff] }
 0xa30   :  { %15867 = vmatprep.mubr.msk.f32.mxu1 %vm90_vm1, %v9701_v13  ;;  %v27381_v13 = vld [vmem:[#allocation126_spill] sm:$0xff] }
 0xa33   :  { %15868 = vmatmul.mubr.msk.f32.gmra.mrb[62].mxu1 %vm90_vm1, %v9703_v12  ;;  %v27382_v12 = vld [vmem:[#allocation127_spill] sm:$0xff] }
 0xa34   :  { %15872 = vmatprep.mubr.msk.f32.mxu1 %vm90_vm1, %v27371_v29  ;;  %v27383_v29 = vld [vmem:[#allocation128_spill] sm:$0xff] }
 0xa37   :  { %15873 = vmatmul.mubr.msk.f32.vlgmr.msra.gmra.mrb[0].mxu1 %vm90_vm1, %v27372_v2  ;;  %v27384_v2 = vld [vmem:[#allocation122_spill] sm:$0xff] }
 0xa38   :  { %15969 = vmatpush3.msk.msra.mxu1 %vm840_vm0, %v23252_v43  ;;  %15875 = vmatprep.mubr.msk.f32.mxu1 %vm90_vm1, %v27373_v55  ;;  %v27380_v43 = vld [vmem:[#allocation125_spill] sm:$0xff] }
 0xa39   :  { %v27385_v55 = vld [vmem:[#allocation129_spill] sm:$0xff] }
 0xa3b   :  { %15876 = vmatmul.mubr.msk.f32.gmra.mrb[2].mxu1 %vm90_vm1, %v27374_v34  ;;  %v27386_v34 = vld [vmem:[#allocation130_spill] sm:$0xff] }
 0xa3c   :  { %15878 = vmatprep.mubr.msk.f32.mxu1 %vm90_vm1, %v27375_v56  ;;  %v27387_v56 = vld [vmem:[#allocation131_spill] sm:$0xff] }
 0xa3f   :  { %15879 = vmatmul.mubr.msk.f32.gmra.mrb[4].mxu1 %vm90_vm1, %v27376_v52  ;;  %v27388_v52 = vld [vmem:[#allocation132_spill] sm:$0xff] }
 0xa40   :  { %15881 = vmatprep.mubr.msk.f32.mxu1 %vm90_vm1, %v27377_v0  ;;  %v27389_v0 = vld [vmem:[#allocation75_spill] sm:$0xff] }
 0xa43   :  { %15882 = vmatmul.mubr.msk.f32.gmra.mrb[6].mxu1 %vm90_vm1, %v27378_v27  ;;  %v27390_v27 = vld [vmem:[#allocation133_spill] sm:$0xff] }
 0xa44   :  { %15884 = vmatprep.mubr.msk.f32.mxu1 %vm90_vm1, %v27379_v20  ;;  %v27391_v20 = vld [vmem:[#allocation78_spill] sm:$0xff] }
 0xa47   :  { %15885 = vmatmul.mubr.msk.f32.gmra.mrb[8].mxu1 %vm90_vm1, %v27380_v43  ;;  %v27392_v43 = vld [vmem:[#allocation79_spill] sm:$0xff] }
 0xa48   :  { %15887 = vmatprep.mubr.msk.f32.mxu1 %vm90_vm1, %v27381_v13  ;;  %v27393_v13 = vld [vmem:[#allocation110_spill] sm:$0xff] }
 0xa4b   :  { %15888 = vmatmul.mubr.msk.f32.gmra.mrb[10].mxu1 %vm90_vm1, %v27382_v12  ;;  %v27394_v12 = vld [vmem:[#allocation111_spill] sm:$0xff] }
 0xa4c   :  { %15890 = vmatprep.mubr.msk.f32.mxu1 %vm90_vm1, %v27383_v29  ;;  %v27395_v29 = vld [vmem:[#allocation77_spill] sm:$0xff] }
 0xa4f   :  { %15891 = vmatmul.mubr.msk.f32.gmra.mrb[12].mxu1 %vm90_vm1, %v27384_v2  ;;  %v27396_v2 = vld [vmem:[#allocation148_spill] sm:$0xff] }
 0xa50   :  { %15893 = vmatprep.mubr.msk.f32.mxu1 %vm90_vm1, %v27385_v55  ;;  %v27397_v55 = vld [vmem:[#allocation149_spill] sm:$0xff] }
 0xa53   :  { %15894 = vmatmul.mubr.msk.f32.gmra.mrb[14].mxu1 %vm90_vm1, %v27386_v34  ;;  %v27398_v34 = vld [vmem:[#allocation150_spill] sm:$0xff] }
 0xa54   :  { %15896 = vmatprep.mubr.msk.f32.mxu1 %vm90_vm1, %v27387_v56  ;;  %v27399_v56 = vld [vmem:[#allocation151_spill] sm:$0xff] }
 0xa57   :  { %15897 = vmatmul.mubr.msk.f32.gmra.mrb[16].mxu1 %vm90_vm1, %v27388_v52  ;;  %v27400_v52 = vld [vmem:[#allocation152_spill] sm:$0xff] }
 0xa58   :  { %15899 = vmatprep.mubr.msk.f32.mxu1 %vm90_vm1, %v27389_v0  ;;  %v27401_v0 = vld [vmem:[#allocation121_spill] sm:$0xff] }
 0xa5b   :  { %15900 = vmatmul.mubr.msk.f32.gmra.mrb[18].mxu1 %vm90_vm1, %v27390_v27  ;;  %v27404_v27 = vld [vmem:[#allocation166_spill] sm:$0xff] }
 0xa5c   :  { %15902 = vmatprep.mubr.msk.f32.mxu1 %vm90_vm1, %v27391_v20  ;;  %v27405_v20 = vld [vmem:[#allocation167_spill] sm:$0xff] }
 0xa5f   :  { %15903 = vmatmul.mubr.msk.f32.gmra.mrb[20].mxu1 %vm90_vm1, %v27392_v43  ;;  %v27407_v43 = vld [vmem:[#allocation154_spill] sm:$0xff] }
 0xa60   :  { %15905 = vmatprep.mubr.msk.f32.mxu1 %vm90_vm1, %v27393_v13  ;;  %v27408_v13 = vld [vmem:[#allocation155_spill] sm:$0xff] }
 0xa63   :  { %15906 = vmatmul.mubr.msk.f32.gmra.mrb[22].mxu1 %vm90_vm1, %v27394_v12  ;;  %v27409_v12 = vld [vmem:[#allocation156_spill] sm:$0xff] }
 0xa64   :  { %15908 = vmatprep.mubr.msk.f32.mxu1 %vm90_vm1, %v27395_v29  ;;  %v27410_v29 = vld [vmem:[#allocation157_spill] sm:$0xff] }
 0xa67   :  { %15909 = vmatmul.mubr.msk.f32.gmra.mrb[24].mxu1 %vm90_vm1, %v27396_v2  ;;  %v27411_v2 = vld [vmem:[#allocation158_spill] sm:$0xff] }
 0xa68   :  { %15911 = vmatprep.mubr.msk.f32.mxu1 %vm90_vm1, %v27397_v55  ;;  %v27412_v55 = vld [vmem:[#allocation159_spill] sm:$0xff] }
 0xa6b   :  { %15912 = vmatmul.mubr.msk.f32.gmra.mrb[26].mxu1 %vm90_vm1, %v27398_v34  ;;  %v27413_v34 = vld [vmem:[#allocation160_spill] sm:$0xff] }
 0xa6c   :  { %15914 = vmatprep.mubr.msk.f32.mxu1 %vm90_vm1, %v22751_v14  ;;  %v27402_v14 = vld [vmem:[#allocation120_spill] sm:$0xff] }
 0xa6f   :  { %15915 = vmatmul.mubr.msk.f32.gmra.mrb[28].mxu1 %vm90_vm1, %v22756_v57  ;;  %v27403_v57 = vld [vmem:[#allocation165_spill] sm:$0xff] }
 0xa70   :  { %15917 = vmatprep.mubr.msk.f32.mxu1 %vm90_vm1, %v23306_v7 }
 0xa73   :  { %15918 = vmatmul.mubr.msk.f32.gmra.mrb[30].mxu1 %vm90_vm1, %v23313_v49 }
 0xa74   :  { %15920 = vmatprep.mubr.msk.f32.mxu1 %vm90_vm1, %v22978_v63  ;;  %v27406_v63 = vld [vmem:[#allocation153_spill] sm:$0xff] }
 0xa77   :  { %15921 = vmatmul.mubr.msk.f32.gmra.mrb[32].mxu1 %vm90_vm1, %v27399_v56  ;;  %v27414_v56 = vld [vmem:[#allocation161_spill] sm:$0xff] }
 0xa78   :  { %15923 = vmatprep.mubr.msk.f32.mxu1 %vm90_vm1, %v27400_v52  ;;  %v27415_v52 = vld [vmem:[#allocation162_spill] sm:$0xff] }
 0xa7b   :  { %15924 = vmatmul.mubr.msk.f32.gmra.mrb[34].mxu1 %vm90_vm1, %v27401_v0  ;;  %v27416_v0 = vld [vmem:[#allocation163_spill] sm:$0xff] }
 0xa7c   :  { %15926 = vmatprep.mubr.msk.f32.mxu1 %vm90_vm1, %v27402_v14  ;;  %v27417_v14 = vld [vmem:[#allocation164_spill] sm:$0xff] }
 0xa7f   :  { %15927 = vmatmul.mubr.msk.f32.gmra.mrb[36].mxu1 %vm90_vm1, %v27403_v57  ;;  %v27418_v57 = vld [vmem:[#allocation168_spill] sm:$0xff] }
 0xa80   :  { %15929 = vmatprep.mubr.msk.f32.mxu1 %vm90_vm1, %v27404_v27  ;;  %v27419_v27 = vld [vmem:[#allocation169_spill] sm:$0xff] }
 0xa83   :  { %15930 = vmatmul.mubr.msk.f32.gmra.mrb[38].mxu1 %vm90_vm1, %v27405_v20  ;;  %v27420_v20 = vld [vmem:[#allocation137_spill] sm:$0xff] }
 0xa84   :  { %15932 = vmatprep.mubr.msk.f32.mxu1 %vm90_vm1, %v27406_v63  ;;  %v27421_v63 = vld [vmem:[#allocation64_spill] sm:$0xff] }
 0xa87   :  { %15933 = vmatmul.mubr.msk.f32.gmra.mrb[40].mxu1 %vm90_vm1, %v27407_v43 }
 0xa88   :  { %15935 = vmatprep.mubr.msk.f32.mxu1 %vm90_vm1, %v27408_v13 }
 0xa8b   :  { %15936 = vmatmul.mubr.msk.f32.gmra.mrb[42].mxu1 %vm90_vm1, %v27409_v12 }
 0xa8c   :  { %15938 = vmatprep.mubr.msk.f32.mxu1 %vm90_vm1, %v27410_v29 }
 0xa8f   :  { %15939 = vmatmul.mubr.msk.f32.gmra.mrb[44].mxu1 %vm90_vm1, %v27411_v2 }
 0xa90   :  { %15941 = vmatprep.mubr.msk.f32.mxu1 %vm90_vm1, %v27412_v55 }
 0xa93   :  { %15942 = vmatmul.mubr.msk.f32.gmra.mrb[46].mxu1 %vm90_vm1, %v27413_v34 }
 0xa94   :  { %15944 = vmatprep.mubr.msk.f32.mxu1 %vm90_vm1, %v27414_v56 }
 0xa97   :  { %15945 = vmatmul.mubr.msk.f32.gmra.mrb[48].mxu1 %vm90_vm1, %v27415_v52 }
 0xa98   :  { %15947 = vmatprep.mubr.msk.f32.mxu1 %vm90_vm1, %v27416_v0 }
 0xa9b   :  { %15948 = vmatmul.mubr.msk.f32.gmra.mrb[50].mxu1 %vm90_vm1, %v27417_v14 }
 0xa9c   :  { %15950 = vmatprep.mubr.msk.f32.mxu1 %vm90_vm1, %v27418_v57 }
 0xa9f   :  { %15951 = vmatmul.mubr.msk.f32.gmra.mrb[52].mxu1 %vm90_vm1, %v27419_v27 }
 0xaa0   :  { %15953 = vmatprep.mubr.msk.f32.mxu1 %vm90_vm1, %v27420_v20 }
 0xaa3   :  { %15954 = vmatmul.mubr.msk.f32.gmra.mrb[54].mxu1 %vm90_vm1, %v23070_v54 }
 0xaa4   :  { %15956 = vmatprep.mubr.msk.f32.mxu1 %vm90_vm1, %v23074_v24 }
 0xaa7   :  { %15957 = vmatmul.mubr.msk.f32.gmra.mrb[56].mxu1 %vm90_vm1, %v27421_v63 }
 0xaa8   :  { %15959 = vmatprep.mubr.msk.f32.mxu1 %vm90_vm1, %v23082_v51 }
 0xaab   :  { %15960 = vmatmul.mubr.msk.f32.gmra.mrb[58].mxu1 %vm90_vm1, %v23086_v46 }
 0xaac   :  { %15962 = vmatprep.mubr.msk.f32.mxu1 %vm90_vm1, %v22827_v58 }
 0xaaf   :  { %15963 = vmatmul.mubr.msk.f32.gmra.mrb[60].mxu1 %vm90_vm1, %v22832_v30 }
 0xab0   :  { %15965 = vmatprep.mubr.msk.f32.mxu1 %vm90_vm1, %v23376_v32 }
 0xab3   :  { %15966 = vmatmul.mubr.msk.f32.gmra.mrb[62].mxu1 %vm90_vm1, %v23383_v21 }
 0xab4   :  { %15970 = vmatprep.mubr.msk.f32.mxu1 %vm90_vm1, %v22337_v39  ;;  %v27422_v39 = vld [vmem:[#allocation89_spill] sm:$0xff] }
 0xab7   :  { %15971 = vmatmul.mubr.msk.f32.vlgmr.msra.gmra.mrb[0].mxu1 %vm90_vm1, %v22344_v11  ;;  %v27423_v11 = vld [vmem:[#allocation92_spill] sm:$0xff] }
 0xab8   :  { %15973 = vmatprep.mubr.msk.f32.mxu1 %vm90_vm1, %v22349_v26  ;;  %v27424_v26 = vld [vmem:[#allocation91_spill] sm:$0xff] }
 0xabb   :  { %15974 = vmatmul.mubr.msk.f32.gmra.mrb[2].mxu1 %vm90_vm1, %v22356_v3  ;;  %v27425_v3 = vld [vmem:[#allocation94_spill] sm:$0xff] }
 0xabc   :  { %15976 = vmatprep.mubr.msk.f32.mxu1 %vm90_vm1, %v22361_v48  ;;  %v10626_v48 = vrot.slane %v23306_v7, 1 }
 0xabf   :  { %15977 = vmatmul.mubr.msk.f32.gmra.mrb[4].mxu1 %vm90_vm1, %v22368_v42  ;;  %v10627_v42 = vrot.slane %v23313_v49, 1 }
 0xac0   :  { %15979 = vmatprep.mubr.msk.f32.mxu1 %vm90_vm1, %v22373_v59  ;;  %v6136_v59 = vld [vmem:[#allocation2 + $0x238] sm:$0xff] }
 0xac3   :  { %15980 = vmatmul.mubr.msk.f32.gmra.mrb[6].mxu1 %vm90_vm1, %v22380_v41  ;;  %v10629_v41 = vrot.slane %v6136_v59, 1 }
 0xac4   :  { %15982 = vmatprep.mubr.msk.f32.mxu1 %vm90_vm1, %v22385_v44  ;;  %v10628_v44 = vsel %vm1777_vm3, %v10626_v48, %v10627_v42 }
 0xac7   :  { %15983 = vmatmul.mubr.msk.f32.gmra.mrb[8].mxu1 %vm90_vm1, %v22392_v28  ;;  %v10630_v28 = vsel %vm1777_vm3, %v10627_v42, %v10629_v41 }
 0xac8   :  { %15985 = vmatprep.mubr.msk.f32.mxu1 %vm90_vm1, %v22397_v45  ;;  %v27426_v45 = vld [vmem:[#allocation93_spill] sm:$0xff] }
 0xacb   :  { %15986 = vmatmul.mubr.msk.f32.gmra.mrb[10].mxu1 %vm90_vm1, %v22404_v1  ;;  %v27427_v1 = vld [vmem:[#allocation118_spill] sm:$0xff] }
 0xacc   :  { %15988 = vmatprep.mubr.msk.f32.mxu1 %vm90_vm1, %v22409_v50  ;;  %v27428_v50 = vld [vmem:[#allocation119_spill] sm:$0xff] }
 0xacf   :  { %15989 = vmatmul.mubr.msk.f32.gmra.mrb[12].mxu1 %vm90_vm1, %v22416_v15  ;;  %v27429_v15 = vld [vmem:[#allocation97_spill] sm:$0xff] }
 0xad0   :  { %15991 = vmatprep.mubr.msk.f32.mxu1 %vm90_vm1, %v22421_v9  ;;  %v27430_v9 = vld [vmem:[#allocation98_spill] sm:$0xff] }
 0xad3   :  { %15992 = vmatmul.mubr.msk.f32.gmra.mrb[14].mxu1 %vm90_vm1, %v22428_v23  ;;  %v27431_v23 = vld [vmem:[#allocation99_spill] sm:$0xff] }
 0xad4   :  { %15994 = vmatprep.mubr.msk.f32.mxu1 %vm90_vm1, %v22433_v22  ;;  %v27432_v22 = vld [vmem:[#allocation100_spill] sm:$0xff] }
 0xad7   :  { %15995 = vmatmul.mubr.msk.f32.gmra.mrb[16].mxu1 %vm90_vm1, %v22440_v6  ;;  %v27433_v6 = vld [vmem:[#allocation101_spill] sm:$0xff] }
 0xad8   :  { %15997 = vmatprep.mubr.msk.f32.mxu1 %vm90_vm1, %v22445_v33  ;;  %v27434_v33 = vld [vmem:[#allocation102_spill] sm:$0xff] }
 0xadb   :  { %15998 = vmatmul.mubr.msk.f32.gmra.mrb[18].mxu1 %vm90_vm1, %v22452_v16  ;;  %v27435_v16 = vld [vmem:[#allocation103_spill] sm:$0xff] }
 0xadc   :  { %16000 = vmatprep.mubr.msk.f32.mxu1 %vm90_vm1, %v27422_v39 }
 0xadf   :  { %16001 = vmatmul.mubr.msk.f32.gmra.mrb[20].mxu1 %vm90_vm1, %v27423_v11 }
 0xae0   :  { %16003 = vmatprep.mubr.msk.f32.mxu1 %vm90_vm1, %v22469_v10  ;;  %v27436_v10 = vld [vmem:[#allocation104_spill] sm:$0xff] }
 0xae3   :  { %16004 = vmatmul.mubr.msk.f32.gmra.mrb[22].mxu1 %vm90_vm1, %v27424_v26 }
 0xae4   :  { %16006 = vmatprep.mubr.msk.f32.mxu1 %vm90_vm1, %v22481_v35  ;;  %v27437_v35 = vld [vmem:[#allocation105_spill] sm:$0xff] }
 0xae7   :  { %16007 = vmatmul.mubr.msk.f32.gmra.mrb[24].mxu1 %vm90_vm1, %v27425_v3 }
 0xae8   :  { %16009 = vmatprep.mubr.msk.f32.mxu1 %vm90_vm1, %v22495_v47  ;;  %v27439_v47 = vld [vmem:[#allocation107_spill] sm:$0xff] }
 0xaeb   :  { %16010 = vmatmul.mubr.msk.f32.gmra.mrb[26].mxu1 %vm90_vm1, %v22501_v5  ;;  %v10631_v5 = vrot.slane %v23376_v32, 1 }
 0xaec   :  { %16012 = vmatprep.mubr.msk.f32.mxu1 %vm90_vm1, %v23166_v61 }
 0xaef   :  { %16013 = vmatmul.mubr.msk.f32.gmra.mrb[28].mxu1 %vm90_vm1, %v23171_v53  ;;  %v27438_v53 = vld [vmem:[#allocation106_spill] sm:$0xff] }
 0xaf0   :  { %16015 = vmatprep.mubr.msk.f32.mxu1 %vm90_vm1, %v10628_v44 }
 0xaf3   :  { %16016 = vmatmul.mubr.msk.f32.gmra.mrb[30].mxu1 %vm90_vm1, %v10630_v28 }
 0xaf4   :  { %16018 = vmatprep.mubr.msk.f32.mxu1 %vm90_vm1, %v22523_v4  ;;  %v10632_v4 = vrot.slane %v23383_v21, 1 }
 0xaf7   :  { %16019 = vmatmul.mubr.msk.f32.gmra.mrb[32].mxu1 %vm90_vm1, %v22530_v40  ;;  %v6208_v40 = vld [vmem:[#allocation2 + $0x478] sm:$0xff] }
 0xaf8   :  { %16021 = vmatprep.mubr.msk.f32.mxu1 %vm90_vm1, %v22535_v38  ;;  %v27440_v38 = vld [vmem:[#allocation108_spill] sm:$0xff] }
 0xafb   :  { %16022 = vmatmul.mubr.msk.f32.gmra.mrb[34].mxu1 %vm90_vm1, %v22542_v19  ;;  %v27441_v19 = vld [vmem:[#allocation96_spill] sm:$0xff] }
 0xafc   :  { %16024 = vmatprep.mubr.msk.f32.mxu1 %vm90_vm1, %v22547_v31  ;;  %v10634_v31 = vrot.slane %v6208_v40, 1 }
 0xaff   :  { %16025 = vmatmul.mubr.msk.f32.gmra.mrb[36].mxu1 %vm90_vm1, %v22554_v8  ;;  %v10633_v8 = vsel %vm1777_vm3, %v10631_v5, %v10632_v4 }
 0xb00   :  { %16027 = vmatprep.mubr.msk.f32.mxu1 %vm90_vm1, %v22559_v25  ;;  %v27442_v25 = vld [vmem:[#allocation95_spill] sm:$0xff] }
 0xb03   :  { %16028 = vmatmul.mubr.msk.f32.gmra.mrb[38].mxu1 %vm90_vm1, %v22566_v62  ;;  %v10635_v62 = vsel %vm1777_vm3, %v10632_v4, %v10634_v31 }
 0xb04   :  { %16030 = vmatprep.mubr.msk.f32.mxu1 %vm90_vm1, %v22571_v36 }
 0xb07   :  { %16031 = vmatmul.mubr.msk.f32.gmra.mrb[40].mxu1 %vm90_vm1, %v22578_v37 }
 0xb08   :  { %16033 = vmatprep.mubr.msk.f32.mxu1 %vm90_vm1, %v22583_v17 }
 0xb0b   :  { %16034 = vmatmul.mubr.msk.f32.gmra.mrb[42].mxu1 %vm90_vm1, %v27426_v45 }
 0xb0c   :  { %16036 = vmatprep.mubr.msk.f32.mxu1 %vm90_vm1, %v27303_v60 }
 0xb0f   :  { %16037 = vmatmul.mubr.msk.f32.gmra.mrb[44].mxu1 %vm90_vm1, %v27304_v18 }
 0xb10   :  { %16039 = vmatprep.mubr.msk.f32.mxu1 %vm90_vm1, %v27427_v1 }
 0xb13   :  { %16040 = vmatmul.mubr.msk.f32.gmra.mrb[46].mxu1 %vm90_vm1, %v27428_v50 }
 0xb14   :  { %16042 = vmatprep.mubr.msk.f32.mxu1 %vm90_vm1, %v27429_v15 }
 0xb17   :  { %16043 = vmatmul.mubr.msk.f32.gmra.mrb[48].mxu1 %vm90_vm1, %v27430_v9 }
 0xb18   :  { %16045 = vmatprep.mubr.msk.f32.mxu1 %vm90_vm1, %v27431_v23 }
 0xb1b   :  { %16046 = vmatmul.mubr.msk.f32.gmra.mrb[50].mxu1 %vm90_vm1, %v27432_v22 }
 0xb1c   :  { %16048 = vmatprep.mubr.msk.f32.mxu1 %vm90_vm1, %v27433_v6 }
 0xb1f   :  { %16049 = vmatmul.mubr.msk.f32.gmra.mrb[52].mxu1 %vm90_vm1, %v27434_v33 }
 0xb20   :  { %16051 = vmatprep.mubr.msk.f32.mxu1 %vm90_vm1, %v27435_v16 }
 0xb23   :  { %16052 = vmatmul.mubr.msk.f32.gmra.mrb[54].mxu1 %vm90_vm1, %v27436_v10 }
 0xb24   :  { %16054 = vmatprep.mubr.msk.f32.mxu1 %vm90_vm1, %v27437_v35 }
 0xb27   :  { %16055 = vmatmul.mubr.msk.f32.gmra.mrb[56].mxu1 %vm90_vm1, %v27438_v53 }
 0xb28   :  { %16057 = vmatprep.mubr.msk.f32.mxu1 %vm90_vm1, %v27439_v47 }
 0xb2b   :  { %16058 = vmatmul.mubr.msk.f32.gmra.mrb[58].mxu1 %vm90_vm1, %v27440_v38 }
 0xb2c   :  { %16060 = vmatprep.mubr.msk.f32.mxu1 %vm90_vm1, %v27441_v19 }
 0xb2f   :  { %16061 = vmatmul.mubr.msk.f32.gmra.mrb[60].mxu1 %vm90_vm1, %v27442_v25 }
 0xb30   :  { %16063 = vmatprep.mubr.msk.f32.mxu1 %vm90_vm1, %v10633_v8 }
 0xb33   :  { %16064 = vmatmul.mubr.msk.f32.gmra.mrb[62].mxu1 %vm90_vm1, %v10635_v62 }
 0xb8a   :  { %v23658_v36 = vpop.f32.mrb[0].mxu1 }
 0xb8b   :  { %v11097_v37 = vsel %vm90_vm1, %v23658_v36, 0.0  ;;  %v23662_v17 = vpop.f32.mrb[1].mxu1 }
 0xb8c   :  { %v11096_v49 = vsel %vm90_vm1, %v23662_v17, 0.0 }
 0xb8d   :  { %v11098_v58 = vadd.f32 %v11097_v37, %v11096_v49 }
 0xb8e   :  { %v23666_v30 = vpop.f32.mrb[2].mxu1 }
 0xb8f   :  { %v23668_v54 = vpop.f32.mrb[3].mxu1  ;;  %v11101_v24 = vsel %vm90_vm1, %v23666_v30, 0.0 }
 0xb90   :  { %v11099_v51 = vsel %vm90_vm1, %v23668_v54, 0.0 }
 0xb91   :  { %v11100_v46 = vadd.f32 %v11099_v51, %v11098_v58 }
 0xb92   :  { %v23674_v61 = vpop.f32.mrb[4].mxu1 }
 0xb93   :  { %v11102_v60 = vadd.f32 %v11101_v24, %v11100_v46  ;;  %v23676_v18 = vpop.f32.mrb[5].mxu1  ;;  %v11105_v21 = vsel %vm90_vm1, %v23674_v61, 0.0 }
 0xb94   :  { %v11103_v7 = vsel %vm90_vm1, %v23676_v18, 0.0 }
 0xb95   :  { %v11104_v32 = vadd.f32 %v11103_v7, %v11102_v60 }
 0xb96   :  { %v23682_v43 = vpop.f32.mrb[6].mxu1 }
 0xb97   :  { %v23684_v13 = vpop.f32.mrb[7].mxu1  ;;  %v11106_v12 = vadd.f32 %v11105_v21, %v11104_v32  ;;  %v11109_v55 = vsel %vm90_vm1, %v23682_v43, 0.0 }
 0xb98   :  { %v11107_v29 = vsel %vm90_vm1, %v23684_v13, 0.0 }
 0xb99   :  { %v11108_v2 = vadd.f32 %v11107_v29, %v11106_v12 }
 0xb9a   :  { %v23690_v34 = vpop.f32.mrb[8].mxu1 }
 0xb9b   :  { %v23692_v56 = vpop.f32.mrb[9].mxu1  ;;  %v11110_v52 = vadd.f32 %v11109_v55, %v11108_v2  ;;  %v11113_v57 = vsel %vm90_vm1, %v23690_v34, 0.0 }
 0xb9c   :  { %v11111_v0 = vsel %vm90_vm1, %v23692_v56, 0.0 }
 0xb9d   :  { %v11112_v14 = vadd.f32 %v11111_v0, %v11110_v52 }
 0xb9e   :  { %v23698_v27 = vpop.f32.mrb[10].mxu1 }
 0xb9f   :  { %v23700_v20 = vpop.f32.mrb[11].mxu1  ;;  %v11114_v63 = vadd.f32 %v11113_v57, %v11112_v14  ;;  %v11117_v26 = vsel %vm90_vm1, %v23698_v27, 0.0 }
 0xba0   :  { %v11115_v39 = vsel %vm90_vm1, %v23700_v20, 0.0 }
 0xba1   :  { %v11116_v11 = vadd.f32 %v11115_v39, %v11114_v63 }
 0xba2   :  { %v23706_v3 = vpop.f32.mrb[12].mxu1 }
 0xba3   :  { %v23708_v48 = vpop.f32.mrb[13].mxu1  ;;  %v11118_v42 = vadd.f32 %v11117_v26, %v11116_v11  ;;  %v11121_v44 = vsel %vm90_vm1, %v23706_v3, 0.0 }
 0xba4   :  { %v11119_v59 = vsel %vm90_vm1, %v23708_v48, 0.0 }
 0xba5   :  { %v11120_v41 = vadd.f32 %v11119_v59, %v11118_v42 }
 0xba6   :  { %v23714_v28 = vpop.f32.mrb[14].mxu1 }
 0xba7   :  { %v23716_v45 = vpop.f32.mrb[15].mxu1  ;;  %v11122_v1 = vadd.f32 %v11121_v44, %v11120_v41  ;;  %v11125_v9 = vsel %vm90_vm1, %v23714_v28, 0.0 }
 0xba8   :  { %v11123_v50 = vsel %vm90_vm1, %v23716_v45, 0.0 }
 0xba9   :  { %v11124_v15 = vadd.f32 %v11123_v50, %v11122_v1 }
 0xbaa   :  { %v23722_v23 = vpop.f32.mrb[16].mxu1 }
 0xbab   :  { %v23724_v22 = vpop.f32.mrb[17].mxu1  ;;  %v11126_v6 = vadd.f32 %v11125_v9, %v11124_v15  ;;  %v11129_v10 = vsel %vm90_vm1, %v23722_v23, 0.0 }
 0xbac   :  { %v11127_v33 = vsel %vm90_vm1, %v23724_v22, 0.0 }
 0xbad   :  { %v11128_v16 = vadd.f32 %v11127_v33, %v11126_v6 }
 0xbae   :  { %v23730_v35 = vpop.f32.mrb[18].mxu1 }
 0xbaf   :  { %v23732_v53 = vpop.f32.mrb[19].mxu1  ;;  %v11130_v47 = vadd.f32 %v11129_v10, %v11128_v16  ;;  %v11133_v40 = vsel %vm90_vm1, %v23730_v35, 0.0 }
 0xbb0   :  { %v11131_v5 = vsel %vm90_vm1, %v23732_v53, 0.0 }
 0xbb1   :  { %v11132_v4 = vadd.f32 %v11131_v5, %v11130_v47 }
 0xbb2   :  { %v23738_v38 = vpop.f32.mrb[20].mxu1 }
 0xbb3   :  { %v23740_v19 = vpop.f32.mrb[21].mxu1  ;;  %v11134_v31 = vadd.f32 %v11133_v40, %v11132_v4  ;;  %v11137_v62 = vsel %vm90_vm1, %v23738_v38, 0.0 }
 0xbb4   :  { %v11135_v8 = vsel %vm90_vm1, %v23740_v19, 0.0 }
 0xbb5   :  { %v11136_v25 = vadd.f32 %v11135_v8, %v11134_v31 }
 0xbb6   :  { %v23746_v37 = vpop.f32.mrb[22].mxu1 }
 0xbb7   :  { %v23748_v49 = vpop.f32.mrb[23].mxu1  ;;  %v11138_v58 = vadd.f32 %v11137_v62, %v11136_v25  ;;  %v11141_v24 = vsel %vm90_vm1, %v23746_v37, 0.0 }
 0xbb8   :  { %v11139_v51 = vsel %vm90_vm1, %v23748_v49, 0.0 }
 0xbb9   :  { %v11140_v46 = vadd.f32 %v11139_v51, %v11138_v58 }
 0xbba   :  { %v23754_v60 = vpop.f32.mrb[24].mxu1 }
 0xbbb   :  { %v23756_v7 = vpop.f32.mrb[25].mxu1  ;;  %v11142_v32 = vadd.f32 %v11141_v24, %v11140_v46  ;;  %v11145_v29 = vsel %vm90_vm1, %v23754_v60, 0.0 }
 0xbbc   :  { %v11143_v21 = vsel %vm90_vm1, %v23756_v7, 0.0 }
 0xbbd   :  { %v11144_v12 = vadd.f32 %v11143_v21, %v11142_v32 }
 0xbbe   :  { %v23762_v2 = vpop.f32.mrb[26].mxu1 }
 0xbbf   :  { %v23764_v55 = vpop.f32.mrb[27].mxu1  ;;  %v11146_v52 = vadd.f32 %v11145_v29, %v11144_v12  ;;  %v11149_v57 = vsel %vm90_vm1, %v23762_v2, 0.0 }
 0xbc0   :  { %v11147_v0 = vsel %vm90_vm1, %v23764_v55, 0.0 }
 0xbc1   :  { %v11148_v14 = vadd.f32 %v11147_v0, %v11146_v52 }
 0xbc2   :  { %v23770_v63 = vpop.f32.mrb[28].mxu1 }
 0xbc3   :  { %v23772_v39 = vpop.f32.mrb[29].mxu1  ;;  %v11150_v11 = vadd.f32 %v11149_v57, %v11148_v14  ;;  %v11153_v59 = vsel %vm90_vm1, %v23770_v63, 0.0 }
 0xbc4   :  { %v11151_v26 = vsel %vm90_vm1, %v23772_v39, 0.0 }
 0xbc5   :  { %v11152_v42 = vadd.f32 %v11151_v26, %v11150_v11 }
 0xbc6   :  { %v23778_v41 = vpop.f32.mrb[30].mxu1 }
 0xbc7   :  { %v23780_v44 = vpop.f32.mrb[31].mxu1  ;;  %v11154_v1 = vadd.f32 %v11153_v59, %v11152_v42  ;;  %v11157_v9 = vsel %vm90_vm1, %v23778_v41, 0.0 }
 0xbc8   :  { %v11155_v50 = vsel %vm90_vm1, %v23780_v44, 0.0 }
 0xbc9   :  { %v11156_v15 = vadd.f32 %v11155_v50, %v11154_v1 }
 0xbca   :  { %v23786_v6 = vpop.f32.mrb[32].mxu1 }
 0xbcb   :  { %v23788_v33 = vpop.f32.mrb[33].mxu1  ;;  %v11158_v16 = vadd.f32 %v11157_v9, %v11156_v15  ;;  %v11161_v5 = vsel %vm90_vm1, %v23786_v6, 0.0 }
 0xbcc   :  { %v11159_v10 = vsel %vm90_vm1, %v23788_v33, 0.0 }
 0xbcd   :  { %v11160_v47 = vadd.f32 %v11159_v10, %v11158_v16 }
 0xbce   :  { %v23794_v4 = vpop.f32.mrb[34].mxu1 }
 0xbcf   :  { %v23796_v40 = vpop.f32.mrb[35].mxu1  ;;  %v11162_v31 = vadd.f32 %v11161_v5, %v11160_v47  ;;  %v11165_v62 = vsel %vm90_vm1, %v23794_v4, 0.0 }
 0xbd0   :  { %v11163_v8 = vsel %vm90_vm1, %v23796_v40, 0.0 }
 0xbd1   :  { %v11164_v25 = vadd.f32 %v11163_v8, %v11162_v31 }
 0xbd2   :  { %v23802_v58 = vpop.f32.mrb[36].mxu1 }
 0xbd3   :  { %v23804_v51 = vpop.f32.mrb[37].mxu1  ;;  %v11166_v46 = vadd.f32 %v11165_v62, %v11164_v25  ;;  %v11169_v21 = vsel %vm90_vm1, %v23802_v58, 0.0 }
 0xbd4   :  { %v11167_v24 = vsel %vm90_vm1, %v23804_v51, 0.0 }
 0xbd5   :  { %v11168_v32 = vadd.f32 %v11167_v24, %v11166_v46 }
 0xbd6   :  { %v23810_v12 = vpop.f32.mrb[38].mxu1 }
 0xbd7   :  { %v23812_v29 = vpop.f32.mrb[39].mxu1  ;;  %v11170_v52 = vadd.f32 %v11169_v21, %v11168_v32  ;;  %v11173_v57 = vsel %vm90_vm1, %v23810_v12, 0.0 }
 0xbd8   :  { %v11171_v0 = vsel %vm90_vm1, %v23812_v29, 0.0 }
 0xbd9   :  { %v11172_v14 = vadd.f32 %v11171_v0, %v11170_v52 }
 0xbda   :  { %v23818_v11 = vpop.f32.mrb[40].mxu1 }
 0xbdb   :  { %v23820_v26 = vpop.f32.mrb[41].mxu1  ;;  %v11174_v42 = vadd.f32 %v11173_v57, %v11172_v14  ;;  %v11177_v50 = vsel %vm90_vm1, %v23818_v11, 0.0 }
 0xbdc   :  { %v11175_v59 = vsel %vm90_vm1, %v23820_v26, 0.0 }
 0xbdd   :  { %v11176_v1 = vadd.f32 %v11175_v59, %v11174_v42 }
 0xbde   :  { %v23826_v15 = vpop.f32.mrb[42].mxu1 }
 0xbdf   :  { %v23828_v9 = vpop.f32.mrb[43].mxu1  ;;  %v11178_v16 = vadd.f32 %v11177_v50, %v11176_v1  ;;  %v11181_v5 = vsel %vm90_vm1, %v23826_v15, 0.0 }
 0xbe0   :  { %v11179_v10 = vsel %vm90_vm1, %v23828_v9, 0.0 }
 0xbe1   :  { %v11180_v47 = vadd.f32 %v11179_v10, %v11178_v16 }
 0xbe2   :  { %v23834_v31 = vpop.f32.mrb[44].mxu1 }
 0xbe3   :  { %v23836_v8 = vpop.f32.mrb[45].mxu1  ;;  %v11182_v25 = vadd.f32 %v11181_v5, %v11180_v47  ;;  %v11185_v24 = vsel %vm90_vm1, %v23834_v31, 0.0 }
 0xbe4   :  { %v11183_v62 = vsel %vm90_vm1, %v23836_v8, 0.0 }
 0xbe5   :  { %v11184_v46 = vadd.f32 %v11183_v62, %v11182_v25 }
 0xbe6   :  { %v23842_v32 = vpop.f32.mrb[46].mxu1 }
 0xbe7   :  { %27443 = vst [vmem:[#allocation170_spill] sm:$0xff] %v23842_v32  ;;  %v23844_v21 = vpop.f32.mrb[47].mxu1  ;;  %v11186_v52 = vadd.f32 %v11185_v24, %v11184_v46  ;;  %v11189_v57 = vsel %vm90_vm1, %v23842_v32, 0.0 }
 0xbe8   :  { %v11187_v0 = vsel %vm90_vm1, %v23844_v21, 0.0 }
 0xbe9   :  { %v11188_v14 = vadd.f32 %v11187_v0, %v11186_v52 }
 0xbea   :  { %v23850_v42 = vpop.f32.mrb[48].mxu1 }
 0xbeb   :  { %27444 = vst [vmem:[#allocation171_spill] sm:$0xff] %v23850_v42  ;;  %v23852_v59 = vpop.f32.mrb[49].mxu1  ;;  %v11190_v1 = vadd.f32 %v11189_v57, %v11188_v14  ;;  %v11193_v10 = vsel %vm90_vm1, %v23850_v42, 0.0 }
 0xbec   :  { %27445 = vst [vmem:[#allocation172_spill] sm:$0xff] %v23852_v59  ;;  %v11191_v50 = vsel %vm90_vm1, %v23852_v59, 0.0 }
 0xbed   :  { %v11192_v16 = vadd.f32 %v11191_v50, %v11190_v1 }
 0xbee   :  { %v23858_v47 = vpop.f32.mrb[50].mxu1 }
 0xbef   :  { %27446 = vst [vmem:[#allocation173_spill] sm:$0xff] %v23858_v47  ;;  %v23860_v5 = vpop.f32.mrb[51].mxu1  ;;  %v11194_v25 = vadd.f32 %v11193_v10, %v11192_v16  ;;  %v11197_v24 = vsel %vm90_vm1, %v23858_v47, 0.0 }
 0xbf0   :  { %27447 = vst [vmem:[#allocation174_spill] sm:$0xff] %v23860_v5  ;;  %v11195_v62 = vsel %vm90_vm1, %v23860_v5, 0.0 }
 0xbf1   :  { %v11196_v46 = vadd.f32 %v11195_v62, %v11194_v25 }
 0xbf2   :  { %v23866_v52 = vpop.f32.mrb[52].mxu1 }
 0xbf3   :  { %27448 = vst [vmem:[#allocation175_spill] sm:$0xff] %v23866_v52  ;;  %v23868_v0 = vpop.f32.mrb[53].mxu1  ;;  %v11198_v14 = vadd.f32 %v11197_v24, %v11196_v46  ;;  %v11201_v50 = vsel %vm90_vm1, %v23866_v52, 0.0 }
 0xbf4   :  { %27449 = vst [vmem:[#allocation176_spill] sm:$0xff] %v23868_v0  ;;  %v11199_v57 = vsel %vm90_vm1, %v23868_v0, 0.0 }
 0xbf5   :  { %v11200_v1 = vadd.f32 %v11199_v57, %v11198_v14 }
 0xbf6   :  { %v23874_v16 = vpop.f32.mrb[54].mxu1 }
 0xbf7   :  { %27450 = vst [vmem:[#allocation177_spill] sm:$0xff] %v23874_v16  ;;  %v23876_v10 = vpop.f32.mrb[55].mxu1  ;;  %v11202_v25 = vadd.f32 %v11201_v50, %v11200_v1  ;;  %v11205_v5 = vsel %vm90_vm1, %v23874_v16, 0.0 }
 0xbf8   :  { %27451 = vst [vmem:[#allocation178_spill] sm:$0xff] %v23876_v10  ;;  %v11203_v62 = vsel %vm90_vm1, %v23876_v10, 0.0 }
 0xbf9   :  { %v11204_v47 = vadd.f32 %v11203_v62, %v11202_v25 }
 0xbfa   :  { %v23882_v46 = vpop.f32.mrb[56].mxu1 }
 0xbfb   :  { %27452 = vst [vmem:[#allocation179_spill] sm:$0xff] %v23882_v46  ;;  %v23884_v24 = vpop.f32.mrb[57].mxu1  ;;  %v11206_v14 = vadd.f32 %v11205_v5, %v11204_v47  ;;  %v11209_v0 = vsel %vm90_vm1, %v23882_v46, 0.0 }
 0xbfc   :  { %27453 = vst [vmem:[#allocation180_spill] sm:$0xff] %v23884_v24  ;;  %v11207_v57 = vsel %vm90_vm1, %v23884_v24, 0.0 }
 0xbfd   :  { %v11208_v52 = vadd.f32 %v11207_v57, %v11206_v14 }
 0xbfe   :  { %v23890_v1 = vpop.f32.mrb[58].mxu1 }
 0xbff   :  { %27454 = vst [vmem:[#allocation181_spill] sm:$0xff] %v23890_v1  ;;  %v23892_v50 = vpop.f32.mrb[59].mxu1  ;;  %v11210_v25 = vadd.f32 %v11209_v0, %v11208_v52  ;;  %v11213_v10 = vsel %vm90_vm1, %v23890_v1, 0.0 }
 0xc00   :  { %27455 = vst [vmem:[#allocation182_spill] sm:$0xff] %v23892_v50  ;;  %v11211_v62 = vsel %vm90_vm1, %v23892_v50, 0.0 }
 0xc01   :  { %v11212_v16 = vadd.f32 %v11211_v62, %v11210_v25 }
 0xc02   :  { %v23898_v47 = vpop.f32.mrb[60].mxu1 }
 0xc03   :  { %27456 = vst [vmem:[#allocation183_spill] sm:$0xff] %v23898_v47  ;;  %v23900_v5 = vpop.f32.mrb[61].mxu1  ;;  %v11214_v14 = vadd.f32 %v11213_v10, %v11212_v16  ;;  %v11217_v24 = vsel %vm90_vm1, %v23898_v47, 0.0 }
 0xc04   :  { %27457 = vst [vmem:[#allocation184_spill] sm:$0xff] %v23900_v5  ;;  %v11215_v57 = vsel %vm90_vm1, %v23900_v5, 0.0 }
 0xc05   :  { %v11216_v46 = vadd.f32 %v11215_v57, %v11214_v14 }
 0xc06   :  { %v23906_v52 = vpop.f32.mrb[62].mxu1 }
 0xc07   :  { %v23908_v0 = vpop.f32.mrb[63].mxu1  ;;  %v11218_v25 = vadd.f32 %v11217_v24, %v11216_v46  ;;  %v11221_v50 = vsel %vm90_vm1, %v23906_v52, 0.0 }
 0xc08   :  { %v11219_v62 = vsel %vm90_vm1, %v23908_v0, 0.0 }
 0xc09   :  { %v11220_v1 = vadd.f32 %v11219_v62, %v11218_v25  ;;  %v27468_v25 = vld [vmem:[#allocation174_spill] sm:$0xff]  ;;  %v27470_v62 = vld [vmem:[#allocation173_spill] sm:$0xff] }
 0xc0b   :  { %v11222_v16 = vadd.f32 %v11221_v50, %v11220_v1  ;;  %v27464_v50 = vld [vmem:[#allocation172_spill] sm:$0xff] }
 0xc0d   :  { %v11223_v10 = vrot.slane %v11222_v16, 4 }
 0xc0f   :  { %v11224_v42 = vadd.f32 %v11223_v10, %v11222_v16  ;;  %v27472_v16 = vld [vmem:[#allocation176_spill] sm:$0xff] }
 0xc11   :  { %v11225_v5 = vrot.slane %v11224_v42, 2 }
 0xc13   :  { %v11226_v14 = vadd.f32 %v11225_v5, %v11224_v42  ;;  %v27466_v5 = vld [vmem:[#allocation171_spill] sm:$0xff] }
 0xc15   :  { %v11227_v57 = vrot.slane %v11226_v14, 1 }
 0xc17   :  { %v11228_v59 = vadd.f32 %v11227_v57, %v11226_v14  ;;  %v27474_v14 = vld [vmem:[#allocation175_spill] sm:$0xff] }
 0xc19   :  { %v23914_v47 = vmul.f32 0.001953125, %v11228_v59  ;;  %v27462_v59 = vld [vmem:[#allocation170_spill] sm:$0xff] }
 0xc1b   :  { %v23918_v32 = vsub.f32 %v23662_v17, %v23914_v47  ;;  %v23922_v46 = vsub.f32 %v23658_v36, %v23914_v47  ;;  %v23926_v24 = vsub.f32 %v23668_v54, %v23914_v47  ;;  %v23930_v1 = vsub.f32 %v23666_v30, %v23914_v47 }
 0xc1c   :  { %v23934_v42 = vsub.f32 %v23676_v18, %v23914_v47  ;;  %v23938_v17 = vsub.f32 %v23674_v61, %v23914_v47  ;;  %v23942_v36 = vsub.f32 %v23684_v13, %v23914_v47  ;;  %v23946_v54 = vsub.f32 %v23682_v43, %v23914_v47 }
 0xc1d   :  { %27458 = vst [vmem:[#allocation185_spill] sm:$0xff] %v23918_v32  ;;  %27459 = vst [vmem:[#allocation186_spill] sm:$0xff] %v23922_v46  ;;  %v23950_v30 = vsub.f32 %v23692_v56, %v23914_v47  ;;  %v23954_v18 = vsub.f32 %v23690_v34, %v23914_v47  ;;  %v23958_v61 = vsub.f32 %v23700_v20, %v23914_v47 }
 0xc1e   :  { %27460 = vst [vmem:[#allocation187_spill] sm:$0xff] %v23926_v24  ;;  %27461 = vst [vmem:[#allocation188_spill] sm:$0xff] %v23930_v1  ;;  %v23962_v13 = vsub.f32 %v23698_v27, %v23914_v47  ;;  %v23966_v43 = vsub.f32 %v23708_v48, %v23914_v47  ;;  %v23970_v56 = vsub.f32 %v23706_v3, %v23914_v47 }
 0xc1f   :  { %v23974_v34 = vsub.f32 %v23716_v45, %v23914_v47  ;;  %v23978_v20 = vsub.f32 %v23714_v28, %v23914_v47  ;;  %v23982_v27 = vsub.f32 %v23724_v22, %v23914_v47  ;;  %v23986_v48 = vsub.f32 %v23722_v23, %v23914_v47 }
 0xc20   :  { %v23990_v3 = vsub.f32 %v23732_v53, %v23914_v47  ;;  %v23994_v45 = vsub.f32 %v23730_v35, %v23914_v47  ;;  %v23998_v28 = vsub.f32 %v23740_v19, %v23914_v47  ;;  %v24002_v22 = vsub.f32 %v23738_v38, %v23914_v47 }
 0xc21   :  { %v24006_v23 = vsub.f32 %v23748_v49, %v23914_v47  ;;  %v24010_v53 = vsub.f32 %v23746_v37, %v23914_v47  ;;  %v24014_v35 = vsub.f32 %v23756_v7, %v23914_v47  ;;  %v24018_v19 = vsub.f32 %v23754_v60, %v23914_v47 }
 0xc22   :  { %v24022_v38 = vsub.f32 %v23764_v55, %v23914_v47  ;;  %v24026_v49 = vsub.f32 %v23762_v2, %v23914_v47  ;;  %v24030_v37 = vsub.f32 %v23772_v39, %v23914_v47  ;;  %v24034_v7 = vsub.f32 %v23770_v63, %v23914_v47 }
 0xc23   :  { %v24038_v60 = vsub.f32 %v23780_v44, %v23914_v47  ;;  %v24042_v55 = vsub.f32 %v23778_v41, %v23914_v47  ;;  %v24046_v2 = vsub.f32 %v23788_v33, %v23914_v47  ;;  %v24050_v39 = vsub.f32 %v23786_v6, %v23914_v47 }
 0xc24   :  { %v24054_v63 = vsub.f32 %v23796_v40, %v23914_v47  ;;  %v24058_v44 = vsub.f32 %v23794_v4, %v23914_v47  ;;  %v24062_v41 = vsub.f32 %v23804_v51, %v23914_v47  ;;  %v24066_v33 = vsub.f32 %v23802_v58, %v23914_v47 }
 0xc25   :  { %v24070_v6 = vsub.f32 %v23812_v29, %v23914_v47  ;;  %v24074_v40 = vsub.f32 %v23810_v12, %v23914_v47  ;;  %v24078_v4 = vsub.f32 %v23820_v26, %v23914_v47  ;;  %v24082_v51 = vsub.f32 %v23818_v11, %v23914_v47 }
 0xc26   :  { %v24086_v58 = vsub.f32 %v23828_v9, %v23914_v47  ;;  %v24090_v29 = vsub.f32 %v23826_v15, %v23914_v47  ;;  %v24094_v12 = vsub.f32 %v23836_v8, %v23914_v47  ;;  %v24098_v26 = vsub.f32 %v23834_v31, %v23914_v47 }
 0xc27   :  { %v24102_v11 = vsub.f32 %v23844_v21, %v23914_v47  ;;  %v24106_v9 = vsub.f32 %v27462_v59, %v23914_v47  ;;  %v24110_v15 = vsub.f32 %v27464_v50, %v23914_v47  ;;  %v24114_v8 = vsub.f32 %v27466_v5, %v23914_v47  ;;  %v27476_v59 = vld [vmem:[#allocation178_spill] sm:$0xff]  ;;  %v27478_v5 = vld [vmem:[#allocation177_spill] sm:$0xff] }
 0xc28   :  { %v24118_v31 = vsub.f32 %v27468_v25, %v23914_v47  ;;  %v24122_v21 = vsub.f32 %v27470_v62, %v23914_v47  ;;  %v24126_v10 = vsub.f32 %v27472_v16, %v23914_v47  ;;  %v24130_v57 = vsub.f32 %v27474_v14, %v23914_v47 }
 0xc29   :  { %27463 = vst [vmem:[#allocation189_spill] sm:$0xff] %v24106_v9  ;;  %27465 = vst [vmem:[#allocation190_spill] sm:$0xff] %v24110_v15  ;;  %v24134_v50 = vsub.f32 %v27476_v59, %v23914_v47  ;;  %v24138_v25 = vsub.f32 %v27478_v5, %v23914_v47 }
 0xc2a   :  { %27467 = vst [vmem:[#allocation191_spill] sm:$0xff] %v24114_v8  ;;  %27469 = vst [vmem:[#allocation192_spill] sm:$0xff] %v24118_v31  ;;  %v27480_v31 = vld [vmem:[#allocation180_spill] sm:$0xff] }
 0xc2b   :  { %27471 = vst [vmem:[#allocation193_spill] sm:$0xff] %v24122_v21  ;;  %27473 = vst [vmem:[#allocation194_spill] sm:$0xff] %v24126_v10  ;;  %v24142_v62 = vsub.f32 %v27480_v31, %v23914_v47  ;;  %v27482_v21 = vld [vmem:[#allocation179_spill] sm:$0xff]  ;;  %v27484_v10 = vld [vmem:[#allocation182_spill] sm:$0xff] }
 0xc2c   :  { %27475 = vst [vmem:[#allocation195_spill] sm:$0xff] %v24130_v57  ;;  %27477 = vst [vmem:[#allocation23_spill] sm:$0xff] %v24134_v50  ;;  %v24146_v16 = vsub.f32 %v27482_v21, %v23914_v47  ;;  %v24150_v14 = vsub.f32 %v27484_v10, %v23914_v47  ;;  %v27486_v57 = vld [vmem:[#allocation181_spill] sm:$0xff]  ;;  %v27488_v50 = vld [vmem:[#allocation184_spill] sm:$0xff]  ;;  %v24166_v21 = vsub.f32 %v23908_v0, %v23914_v47 }
 0xc2d   :  { %27479 = vst [vmem:[#allocation134_spill] sm:$0xff] %v24138_v25  ;;  %27481 = vst [vmem:[#allocation109_spill] sm:$0xff] %v24142_v62  ;;  %v24154_v59 = vsub.f32 %v27486_v57, %v23914_v47  ;;  %v24158_v5 = vsub.f32 %v27488_v50, %v23914_v47  ;;  %v27490_v25 = vld [vmem:[#allocation183_spill] sm:$0xff]  ;;  %v24170_v10 = vsub.f32 %v23906_v52, %v23914_v47 }
 0xc2e   :  { %27483 = vst [vmem:[#allocation80_spill] sm:$0xff] %v24146_v16  ;;  %27485 = vst [vmem:[#allocation65_spill] sm:$0xff] %v24150_v14  ;;  %v24162_v31 = vsub.f32 %v27490_v25, %v23914_v47  ;;  %v11294_v57 = vmul.f32 %v23918_v32, %v23918_v32  ;;  %v11296_v50 = vmul.f32 %v23926_v24, %v23926_v24 }
 0xc2f   :  { %27487 = vst [vmem:[#allocation66_spill] sm:$0xff] %v24154_v59  ;;  %27489 = vst [vmem:[#allocation67_spill] sm:$0xff] %v24158_v5  ;;  %v11295_v59 = vmul.f32 %v23922_v46, %v23922_v46  ;;  %v11297_v25 = vmul.f32 %v23930_v1, %v23930_v1  ;;  %v11298_v47 = vmul.f32 %v23934_v42, %v23934_v42 }
 0xc30   :  { %27491 = vst [vmem:[#allocation68_spill] sm:$0xff] %v24162_v31  ;;  %27492 = vst [vmem:[#allocation69_spill] sm:$0xff] %v24166_v21  ;;  %v11358_v31 = vsel %vm90_vm1, %v11294_v57, 0.0  ;;  %v11361_v52 = vsel %vm90_vm1, %v11296_v50, 0.0  ;;  %v11299_v46 = vmul.f32 %v23938_v17, %v23938_v17  ;;  %v11300_v1 = vmul.f32 %v23942_v36, %v23942_v36 }
 0xc31   :  { %27493 = vst [vmem:[#allocation70_spill] sm:$0xff] %v24170_v10  ;;  %v11359_v0 = vsel %vm90_vm1, %v11295_v59, 0.0  ;;  %v11363_v10 = vsel %vm90_vm1, %v11297_v25, 0.0  ;;  %v11365_v57 = vsel %vm90_vm1, %v11298_v47, 0.0  ;;  %v11301_v59 = vmul.f32 %v23946_v54, %v23946_v54 }
 0xc32   :  { %v11360_v21 = vadd.f32 %v11359_v0, %v11358_v31  ;;  %v11367_v31 = vsel %vm90_vm1, %v11299_v46, 0.0  ;;  %v11369_v50 = vsel %vm90_vm1, %v11300_v1, 0.0  ;;  %v11305_v46 = vmul.f32 %v23962_v13, %v23962_v13 }
 0xc33   :  { %v11306_v1 = vmul.f32 %v23966_v43, %v23966_v43 }
 0xc34   :  { %v11362_v32 = vadd.f32 %v11361_v52, %v11360_v21  ;;  %v11302_v21 = vmul.f32 %v23950_v30, %v23950_v30 }
 0xc36   :  { %v11364_v24 = vadd.f32 %v11363_v10, %v11362_v32  ;;  %v11303_v32 = vmul.f32 %v23954_v18, %v23954_v18  ;;  %v11371_v10 = vsel %vm90_vm1, %v11301_v59, 0.0  ;;  %v11373_v47 = vsel %vm90_vm1, %v11302_v21, 0.0 }
 0xc37   :  { %v11307_v59 = vmul.f32 %v23970_v56, %v23970_v56  ;;  %v11308_v21 = vmul.f32 %v23974_v34, %v23974_v34 }
 0xc38   :  { %v11366_v5 = vadd.f32 %v11365_v57, %v11364_v24  ;;  %v11304_v24 = vmul.f32 %v23958_v61, %v23958_v61 }
 0xc3a   :  { %v11368_v0 = vadd.f32 %v11367_v31, %v11366_v5  ;;  %v11375_v5 = vsel %vm90_vm1, %v11303_v32, 0.0  ;;  %v11309_v32 = vmul.f32 %v23978_v20, %v23978_v20 }
 0xc3c   :  { %v11370_v52 = vadd.f32 %v11369_v50, %v11368_v0  ;;  %v11377_v0 = vsel %vm90_vm1, %v11304_v24, 0.0  ;;  %v11310_v24 = vmul.f32 %v23982_v27, %v23982_v27 }
 0xc3e   :  { %v11372_v25 = vadd.f32 %v11371_v10, %v11370_v52  ;;  %v11379_v52 = vsel %vm90_vm1, %v11305_v46, 0.0  ;;  %v11311_v46 = vmul.f32 %v23986_v48, %v23986_v48 }
 0xc40   :  { %v11374_v57 = vadd.f32 %v11373_v47, %v11372_v25  ;;  %v11381_v25 = vsel %vm90_vm1, %v11306_v1, 0.0  ;;  %v11312_v1 = vmul.f32 %v23990_v3, %v23990_v3 }
 0xc42   :  { %v11376_v31 = vadd.f32 %v11375_v5, %v11374_v57  ;;  %v11383_v57 = vsel %vm90_vm1, %v11307_v59, 0.0  ;;  %v11313_v59 = vmul.f32 %v23994_v45, %v23994_v45 }
 0xc44   :  { %v11378_v50 = vadd.f32 %v11377_v0, %v11376_v31  ;;  %v11385_v31 = vsel %vm90_vm1, %v11308_v21, 0.0  ;;  %v11314_v21 = vmul.f32 %v23998_v28, %v23998_v28 }
 0xc46   :  { %v11380_v10 = vadd.f32 %v11379_v52, %v11378_v50  ;;  %v11387_v50 = vsel %vm90_vm1, %v11309_v32, 0.0  ;;  %v11315_v32 = vmul.f32 %v24002_v22, %v24002_v22 }
 0xc48   :  { %v11382_v47 = vadd.f32 %v11381_v25, %v11380_v10  ;;  %v11389_v10 = vsel %vm90_vm1, %v11310_v24, 0.0  ;;  %v11316_v24 = vmul.f32 %v24006_v23, %v24006_v23 }
 0xc4a   :  { %v11384_v5 = vadd.f32 %v11383_v57, %v11382_v47  ;;  %v11391_v47 = vsel %vm90_vm1, %v11311_v46, 0.0  ;;  %v11317_v46 = vmul.f32 %v24010_v53, %v24010_v53 }
 0xc4c   :  { %v11386_v0 = vadd.f32 %v11385_v31, %v11384_v5  ;;  %v11393_v5 = vsel %vm90_vm1, %v11312_v1, 0.0  ;;  %v11318_v1 = vmul.f32 %v24014_v35, %v24014_v35 }
 0xc4e   :  { %v11388_v52 = vadd.f32 %v11387_v50, %v11386_v0  ;;  %v11395_v0 = vsel %vm90_vm1, %v11313_v59, 0.0  ;;  %v11319_v59 = vmul.f32 %v24018_v19, %v24018_v19 }
 0xc50   :  { %v11390_v25 = vadd.f32 %v11389_v10, %v11388_v52  ;;  %v11397_v52 = vsel %vm90_vm1, %v11314_v21, 0.0  ;;  %v11320_v21 = vmul.f32 %v24022_v38, %v24022_v38 }
 0xc52   :  { %v11392_v57 = vadd.f32 %v11391_v47, %v11390_v25  ;;  %v11399_v25 = vsel %vm90_vm1, %v11315_v32, 0.0  ;;  %v11321_v32 = vmul.f32 %v24026_v49, %v24026_v49 }
 0xc54   :  { %v11394_v31 = vadd.f32 %v11393_v5, %v11392_v57  ;;  %v11401_v57 = vsel %vm90_vm1, %v11316_v24, 0.0  ;;  %v11322_v24 = vmul.f32 %v24030_v37, %v24030_v37 }
 0xc56   :  { %v11396_v50 = vadd.f32 %v11395_v0, %v11394_v31  ;;  %v11403_v31 = vsel %vm90_vm1, %v11317_v46, 0.0  ;;  %v11323_v46 = vmul.f32 %v24034_v7, %v24034_v7 }
 0xc58   :  { %v11398_v10 = vadd.f32 %v11397_v52, %v11396_v50  ;;  %v11405_v50 = vsel %vm90_vm1, %v11318_v1, 0.0  ;;  %v11324_v1 = vmul.f32 %v24038_v60, %v24038_v60 }
 0xc5a   :  { %v11400_v47 = vadd.f32 %v11399_v25, %v11398_v10  ;;  %v11407_v10 = vsel %vm90_vm1, %v11319_v59, 0.0  ;;  %v11325_v59 = vmul.f32 %v24042_v55, %v24042_v55 }
 0xc5c   :  { %v11402_v5 = vadd.f32 %v11401_v57, %v11400_v47  ;;  %v11409_v47 = vsel %vm90_vm1, %v11320_v21, 0.0  ;;  %v11326_v21 = vmul.f32 %v24046_v2, %v24046_v2 }
 0xc5e   :  { %v11404_v0 = vadd.f32 %v11403_v31, %v11402_v5  ;;  %v11411_v5 = vsel %vm90_vm1, %v11321_v32, 0.0  ;;  %v11327_v32 = vmul.f32 %v24050_v39, %v24050_v39 }
 0xc60   :  { %v11406_v52 = vadd.f32 %v11405_v50, %v11404_v0  ;;  %v11413_v0 = vsel %vm90_vm1, %v11322_v24, 0.0  ;;  %v11328_v24 = vmul.f32 %v24054_v63, %v24054_v63 }
 0xc62   :  { %v11408_v25 = vadd.f32 %v11407_v10, %v11406_v52  ;;  %v11415_v52 = vsel %vm90_vm1, %v11323_v46, 0.0  ;;  %v11329_v46 = vmul.f32 %v24058_v44, %v24058_v44 }
 0xc64   :  { %v11410_v57 = vadd.f32 %v11409_v47, %v11408_v25  ;;  %v11417_v25 = vsel %vm90_vm1, %v11324_v1, 0.0  ;;  %v11330_v1 = vmul.f32 %v24062_v41, %v24062_v41 }
 0xc66   :  { %v11412_v31 = vadd.f32 %v11411_v5, %v11410_v57  ;;  %v11419_v57 = vsel %vm90_vm1, %v11325_v59, 0.0  ;;  %v11331_v59 = vmul.f32 %v24066_v33, %v24066_v33 }
 0xc68   :  { %v11414_v50 = vadd.f32 %v11413_v0, %v11412_v31  ;;  %v11421_v31 = vsel %vm90_vm1, %v11326_v21, 0.0  ;;  %v11332_v21 = vmul.f32 %v24070_v6, %v24070_v6 }
 0xc6a   :  { %v11416_v10 = vadd.f32 %v11415_v52, %v11414_v50  ;;  %v11423_v50 = vsel %vm90_vm1, %v11327_v32, 0.0  ;;  %v11333_v32 = vmul.f32 %v24074_v40, %v24074_v40 }
 0xc6c   :  { %v11418_v47 = vadd.f32 %v11417_v25, %v11416_v10  ;;  %v11425_v10 = vsel %vm90_vm1, %v11328_v24, 0.0  ;;  %v11334_v24 = vmul.f32 %v24078_v4, %v24078_v4 }
 0xc6e   :  { %v11420_v5 = vadd.f32 %v11419_v57, %v11418_v47  ;;  %v11427_v47 = vsel %vm90_vm1, %v11329_v46, 0.0  ;;  %v11335_v46 = vmul.f32 %v24082_v51, %v24082_v51 }
 0xc70   :  { %v11422_v0 = vadd.f32 %v11421_v31, %v11420_v5  ;;  %v11429_v5 = vsel %vm90_vm1, %v11330_v1, 0.0  ;;  %v11336_v1 = vmul.f32 %v24086_v58, %v24086_v58 }
 0xc72   :  { %v11424_v52 = vadd.f32 %v11423_v50, %v11422_v0  ;;  %v11431_v0 = vsel %vm90_vm1, %v11331_v59, 0.0  ;;  %v11337_v59 = vmul.f32 %v24090_v29, %v24090_v29 }
 0xc74   :  { %v11426_v25 = vadd.f32 %v11425_v10, %v11424_v52  ;;  %v11433_v52 = vsel %vm90_vm1, %v11332_v21, 0.0  ;;  %v11338_v21 = vmul.f32 %v24094_v12, %v24094_v12 }
 0xc76   :  { %v11428_v57 = vadd.f32 %v11427_v47, %v11426_v25  ;;  %v11435_v25 = vsel %vm90_vm1, %v11333_v32, 0.0  ;;  %v11339_v32 = vmul.f32 %v24098_v26, %v24098_v26 }
 0xc78   :  { %v11430_v31 = vadd.f32 %v11429_v5, %v11428_v57  ;;  %v11437_v57 = vsel %vm90_vm1, %v11334_v24, 0.0  ;;  %v11340_v24 = vmul.f32 %v24102_v11, %v24102_v11 }
 0xc7a   :  { %v11432_v50 = vadd.f32 %v11431_v0, %v11430_v31  ;;  %v11439_v31 = vsel %vm90_vm1, %v11335_v46, 0.0  ;;  %v11341_v46 = vmul.f32 %v24106_v9, %v24106_v9 }
 0xc7c   :  { %v11434_v10 = vadd.f32 %v11433_v52, %v11432_v50  ;;  %v11441_v50 = vsel %vm90_vm1, %v11336_v1, 0.0  ;;  %v11342_v1 = vmul.f32 %v24110_v15, %v24110_v15 }
 0xc7e   :  { %v11436_v47 = vadd.f32 %v11435_v25, %v11434_v10  ;;  %v11443_v10 = vsel %vm90_vm1, %v11337_v59, 0.0  ;;  %v11343_v59 = vmul.f32 %v24114_v8, %v24114_v8 }
 0xc80   :  { %v11438_v5 = vadd.f32 %v11437_v57, %v11436_v47  ;;  %v11445_v47 = vsel %vm90_vm1, %v11338_v21, 0.0  ;;  %v27494_v21 = vld [vmem:[#allocation192_spill] sm:$0xff] }
 0xc82   :  { %v11440_v0 = vadd.f32 %v11439_v31, %v11438_v5  ;;  %v11447_v5 = vsel %vm90_vm1, %v11339_v32, 0.0  ;;  %v27495_v32 = vld [vmem:[#allocation193_spill] sm:$0xff] }
 0xc84   :  { %v11442_v52 = vadd.f32 %v11441_v50, %v11440_v0  ;;  %v11449_v0 = vsel %vm90_vm1, %v11340_v24, 0.0  ;;  %v27496_v24 = vld [vmem:[#allocation194_spill] sm:$0xff] }
 0xc86   :  { %v11444_v25 = vadd.f32 %v11443_v10, %v11442_v52  ;;  %v11451_v52 = vsel %vm90_vm1, %v11341_v46, 0.0  ;;  %v27497_v46 = vld [vmem:[#allocation195_spill] sm:$0xff] }
 0xc88   :  { %v11446_v57 = vadd.f32 %v11445_v47, %v11444_v25  ;;  %v11344_v25 = vmul.f32 %v27494_v21, %v27494_v21  ;;  %v11453_v47 = vsel %vm90_vm1, %v11342_v1, 0.0  ;;  %v27498_v1 = vld [vmem:[#allocation23_spill] sm:$0xff] }
 0xc8a   :  { %v11448_v31 = vadd.f32 %v11447_v5, %v11446_v57  ;;  %v11345_v57 = vmul.f32 %v27495_v32, %v27495_v32  ;;  %v11455_v5 = vsel %vm90_vm1, %v11343_v59, 0.0  ;;  %v27499_v59 = vld [vmem:[#allocation134_spill] sm:$0xff] }
 0xc8c   :  { %v11450_v50 = vadd.f32 %v11449_v0, %v11448_v31  ;;  %v11346_v31 = vmul.f32 %v27496_v24, %v27496_v24  ;;  %v11457_v0 = vsel %vm90_vm1, %v11344_v25, 0.0 }
 0xc8e   :  { %v11452_v10 = vadd.f32 %v11451_v52, %v11450_v50  ;;  %v11347_v50 = vmul.f32 %v27497_v46, %v27497_v46  ;;  %v11459_v52 = vsel %vm90_vm1, %v11345_v57, 0.0 }
 0xc90   :  { %v11454_v9 = vadd.f32 %v11453_v47, %v11452_v10  ;;  %v11348_v10 = vmul.f32 %v27498_v1, %v27498_v1  ;;  %v11461_v47 = vsel %vm90_vm1, %v11346_v31, 0.0 }
 0xc92   :  { %v11456_v15 = vadd.f32 %v11455_v5, %v11454_v9  ;;  %v11349_v9 = vmul.f32 %v27499_v59, %v27499_v59  ;;  %v11463_v5 = vsel %vm90_vm1, %v11347_v50, 0.0  ;;  %v11465_v25 = vsel %vm90_vm1, %v11348_v10, 0.0  ;;  %v27500_v50 = vld [vmem:[#allocation66_spill] sm:$0xff]  ;;  %v27501_v10 = vld [vmem:[#allocation67_spill] sm:$0xff] }
 0xc94   :  { %v11458_v8 = vadd.f32 %v11457_v0, %v11456_v15  ;;  %v11350_v15 = vmul.f32 %v24142_v62, %v24142_v62  ;;  %v11467_v57 = vsel %vm90_vm1, %v11349_v9, 0.0  ;;  %v27502_v9 = vld [vmem:[#allocation68_spill] sm:$0xff] }
 0xc96   :  { %v11460_v21 = vadd.f32 %v11459_v52, %v11458_v8  ;;  %v11351_v8 = vmul.f32 %v24146_v16, %v24146_v16  ;;  %v11469_v31 = vsel %vm90_vm1, %v11350_v15, 0.0  ;;  %v27503_v15 = vld [vmem:[#allocation69_spill] sm:$0xff] }
 0xc98   :  { %v11462_v32 = vadd.f32 %v11461_v47, %v11460_v21  ;;  %v11352_v21 = vmul.f32 %v24150_v14, %v24150_v14 }
 0xc9a   :  { %v11464_v24 = vadd.f32 %v11463_v5, %v11462_v32  ;;  %v11353_v32 = vmul.f32 %v27500_v50, %v27500_v50  ;;  %v11471_v5 = vsel %vm90_vm1, %v11351_v8, 0.0  ;;  %v27504_v8 = vld [vmem:[#allocation70_spill] sm:$0xff] }
 0xc9c   :  { %v11466_v0 = vadd.f32 %v11465_v25, %v11464_v24  ;;  %v11354_v24 = vmul.f32 %v27501_v10, %v27501_v10  ;;  %v11473_v25 = vsel %vm90_vm1, %v11352_v21, 0.0 }
 0xc9e   :  { %v11468_v52 = vadd.f32 %v11467_v57, %v11466_v0  ;;  %v11355_v0 = vmul.f32 %v27502_v9, %v27502_v9  ;;  %v11475_v57 = vsel %vm90_vm1, %v11353_v32, 0.0 }
 0xca0   :  { %v11470_v47 = vadd.f32 %v11469_v31, %v11468_v52  ;;  %v11356_v52 = vmul.f32 %v27503_v15, %v27503_v15  ;;  %v11477_v31 = vsel %vm90_vm1, %v11354_v24, 0.0 }
 0xca2   :  { %v11472_v62 = vadd.f32 %v11471_v5, %v11470_v47  ;;  %v11357_v47 = vmul.f32 %v27504_v8, %v27504_v8  ;;  %v11479_v5 = vsel %vm90_vm1, %v11355_v0, 0.0  ;;  %v27505_v8 = vld [vmem:[#allocation185_spill] sm:$0xff]  ;;  %v27506_v0 = vld [vmem:[#allocation186_spill] sm:$0xff] }
 0xca4   :  { %v11474_v16 = vadd.f32 %v11473_v25, %v11472_v62  ;;  %v11481_v62 = vsel %vm90_vm1, %v11356_v52, 0.0  ;;  %v11483_v25 = vsel %vm90_vm1, %v11357_v47, 0.0  ;;  %v27507_v52 = vld [vmem:[#allocation187_spill] sm:$0xff]  ;;  %v27508_v47 = vld [vmem:[#allocation188_spill] sm:$0xff] }
 0xca6   :  { %v11476_v14 = vadd.f32 %v11475_v57, %v11474_v16 }
 0xca8   :  { %v11478_v50 = vadd.f32 %v11477_v31, %v11476_v14 }
 0xcaa   :  { %v11480_v10 = vadd.f32 %v11479_v5, %v11478_v50 }
 0xcac   :  { %v11482_v21 = vadd.f32 %v11481_v62, %v11480_v10 }
 0xcae   :  { %v11484_v9 = vadd.f32 %v11483_v25, %v11482_v21  ;;  %v27509_v21 = vld [vmem:[#allocation189_spill] sm:$0xff]  ;;  %v27510_v25 = vld [vmem:[#allocation190_spill] sm:$0xff] }
 0xcb0   :  { %v11485_v32 = vrot.slane %v11484_v9, 4 }
 0xcb2   :  { %v11486_v16 = vadd.f32 %v11485_v32, %v11484_v9  ;;  %v27511_v32 = vld [vmem:[#allocation191_spill] sm:$0xff] }
 0xcb4   :  { %v11487_v57 = vrot.slane %v11486_v16, 2 }
 0xcb6   :  { %v11488_v59 = vadd.f32 %v11487_v57, %v11486_v16  ;;  %v27512_v16 = vld [vmem:[#allocation192_spill] sm:$0xff]  ;;  %v27513_v57 = vld [vmem:[#allocation193_spill] sm:$0xff] }
 0xcb8   :  { %v11489_v15 = vrot.slane %v11488_v59, 1 }
 0xcba   :  { %v11490_v1 = vadd.f32 %v11489_v15, %v11488_v59 }
 0xcbc   :  { %v11491_v24 = vmul.f32 0.001953125, %v11490_v1 }
 0xcbe   :  { %v11492_v14 = vadd.f32 1e-05, %v11491_v24  ;;  %v24577_v24 = vld [vmem:[%s25853_s5] ss:$0 sm:$0xff] }
 0xcc0   :  { %17093 = vrsqrt.f32 %v11492_v14  ;;  %v27515_v14 = vld [vmem:[#allocation194_spill] sm:$0xff] }
 0xcca   :  { %v24364_v31 = vpop.eup %17093 }
 0xccb   :  { %v24368_v50 = vmul.f32 %v24364_v31, %v27505_v8  ;;  %v24372_v10 = vmul.f32 %v24364_v31, %v27506_v0  ;;  %v24376_v9 = vmul.f32 %v24364_v31, %v27507_v52  ;;  %v24380_v59 = vmul.f32 %v24364_v31, %v27508_v47  ;;  %v27518_v47 = vld [vmem:[#allocation23_spill] sm:$0xff] }
 0xccc   :  { %v24384_v1 = vmul.f32 %v24364_v31, %v23934_v42  ;;  %v24388_v15 = vmul.f32 %v24364_v31, %v23938_v17  ;;  %v24392_v8 = vmul.f32 %v24364_v31, %v23942_v36  ;;  %v24396_v5 = vmul.f32 %v24364_v31, %v23946_v54 }
 0xccd   :  { %v24400_v62 = vmul.f32 %v24364_v31, %v23950_v30  ;;  %v24404_v42 = vmul.f32 %v24364_v31, %v23954_v18  ;;  %v24408_v17 = vmul.f32 %v24364_v31, %v23958_v61  ;;  %v24412_v36 = vmul.f32 %v24364_v31, %v23962_v13 }
 0xcce   :  { %v24416_v54 = vmul.f32 %v24364_v31, %v23966_v43  ;;  %v24420_v30 = vmul.f32 %v24364_v31, %v23970_v56  ;;  %v24424_v18 = vmul.f32 %v24364_v31, %v23974_v34  ;;  %v24428_v61 = vmul.f32 %v24364_v31, %v23978_v20 }
 0xccf   :  { %v24432_v13 = vmul.f32 %v24364_v31, %v23982_v27  ;;  %v24436_v43 = vmul.f32 %v24364_v31, %v23986_v48  ;;  %v24440_v56 = vmul.f32 %v24364_v31, %v23990_v3  ;;  %v24444_v34 = vmul.f32 %v24364_v31, %v23994_v45 }
 0xcd0   :  { %v24448_v20 = vmul.f32 %v24364_v31, %v23998_v28  ;;  %v24452_v27 = vmul.f32 %v24364_v31, %v24002_v22  ;;  %v24456_v48 = vmul.f32 %v24364_v31, %v24006_v23  ;;  %v24460_v3 = vmul.f32 %v24364_v31, %v24010_v53 }
 0xcd1   :  { %v24464_v45 = vmul.f32 %v24364_v31, %v24014_v35  ;;  %v24468_v28 = vmul.f32 %v24364_v31, %v24018_v19  ;;  %v24472_v22 = vmul.f32 %v24364_v31, %v24022_v38  ;;  %v24476_v23 = vmul.f32 %v24364_v31, %v24026_v49 }
 0xcd2   :  { %v24480_v53 = vmul.f32 %v24364_v31, %v24030_v37  ;;  %v24484_v35 = vmul.f32 %v24364_v31, %v24034_v7  ;;  %v24488_v19 = vmul.f32 %v24364_v31, %v24038_v60  ;;  %v24492_v38 = vmul.f32 %v24364_v31, %v24042_v55 }
 0xcd3   :  { %v24496_v49 = vmul.f32 %v24364_v31, %v24046_v2  ;;  %v24500_v37 = vmul.f32 %v24364_v31, %v24050_v39  ;;  %v24504_v7 = vmul.f32 %v24364_v31, %v24054_v63  ;;  %v24508_v60 = vmul.f32 %v24364_v31, %v24058_v44 }
 0xcd4   :  { %v24512_v55 = vmul.f32 %v24364_v31, %v24062_v41  ;;  %v24516_v2 = vmul.f32 %v24364_v31, %v24066_v33  ;;  %v24520_v39 = vmul.f32 %v24364_v31, %v24070_v6  ;;  %v24524_v63 = vmul.f32 %v24364_v31, %v24074_v40 }
 0xcd5   :  { %v24528_v44 = vmul.f32 %v24364_v31, %v24078_v4  ;;  %v24532_v41 = vmul.f32 %v24364_v31, %v24082_v51  ;;  %v24536_v33 = vmul.f32 %v24364_v31, %v24086_v58  ;;  %v24540_v6 = vmul.f32 %v24364_v31, %v24090_v29 }
 0xcd6   :  { %v24544_v40 = vmul.f32 %v24364_v31, %v24094_v12  ;;  %v24548_v4 = vmul.f32 %v24364_v31, %v24098_v26  ;;  %v24552_v51 = vmul.f32 %v24364_v31, %v24102_v11  ;;  %v24556_v58 = vmul.f32 %v24364_v31, %v27509_v21 }
 0xcd7   :  { %v24560_v29 = vmul.f32 %v24364_v31, %v27510_v25  ;;  %v24564_v12 = vmul.f32 %v24364_v31, %v27511_v32  ;;  %v24568_v26 = vmul.f32 %v24364_v31, %v27512_v16  ;;  %v24572_v11 = vmul.f32 %v24364_v31, %v27513_v57  ;;  %v27520_v25 = vld [vmem:[#allocation134_spill] sm:$0xff]  ;;  %v27522_v16 = vld [vmem:[#allocation109_spill] sm:$0xff] }
 0xcd8   :  { %v24581_v0 = vmul.f32 %v24364_v31, %v27515_v14  ;;  %v24585_v52 = vmul.f32 %v24364_v31, %v27497_v46  ;;  %v24589_v21 = vmul.f32 %v24364_v31, %v27518_v47  ;;  %v24593_v32 = vmul.f32 %v24364_v31, %v27520_v25 }
 0xcd9   :  { %27514 = vst [vmem:[#allocation71_spill] sm:$0xff] %v24572_v11  ;;  %v24597_v57 = vmul.f32 %v24364_v31, %v27522_v16  ;;  %v27524_v11 = vld [vmem:[#allocation80_spill] sm:$0xff] }
 0xcda   :  { %27516 = vst [vmem:[#allocation72_spill] sm:$0xff] %v24581_v0  ;;  %27517 = vst [vmem:[#allocation73_spill] sm:$0xff] %v24585_v52  ;;  %v24601_v14 = vmul.f32 %v24364_v31, %v27524_v11  ;;  %v27526_v0 = vld [vmem:[#allocation65_spill] sm:$0xff]  ;;  %v27527_v52 = vld [vmem:[#allocation66_spill] sm:$0xff] }
 0xcdb   :  { %27519 = vst [vmem:[#allocation74_spill] sm:$0xff] %v24589_v21  ;;  %27521 = vst [vmem:[#allocation76_spill] sm:$0xff] %v24593_v32  ;;  %v24605_v46 = vmul.f32 %v24364_v31, %v27526_v0  ;;  %v24609_v47 = vmul.f32 %v24364_v31, %v27527_v52  ;;  %v27528_v21 = vld [vmem:[#allocation67_spill] sm:$0xff]  ;;  %v27529_v32 = vld [vmem:[#allocation68_spill] sm:$0xff]  ;;  %v24629_v52 = vmul.f32 %v24577_v24, %v24368_v50 }
 0xcdc   :  { %27523 = vst [vmem:[#allocation140_spill] sm:$0xff] %v24597_v57  ;;  %27525 = vst [vmem:[#allocation143_spill] sm:$0xff] %v24601_v14  ;;  %v24613_v25 = vmul.f32 %v24364_v31, %v27528_v21  ;;  %v24617_v16 = vmul.f32 %v24364_v31, %v27529_v32  ;;  %v27530_v57 = vld [vmem:[#allocation69_spill] sm:$0xff]  ;;  %v27531_v14 = vld [vmem:[#allocation70_spill] sm:$0xff]  ;;  %v24633_v21 = vmul.f32 %v24577_v24, %v24372_v10 }
 0xcdd   :  { %v24621_v11 = vmul.f32 %v24364_v31, %v27530_v57  ;;  %v24625_v0 = vmul.f32 %v24364_v31, %v27531_v14  ;;  %v24637_v32 = vmul.f32 %v24577_v24, %v24376_v9  ;;  %v24641_v57 = vmul.f32 %v24577_v24, %v24380_v59 }
 0xcde   :  { %v24645_v31 = vmul.f32 %v24577_v24, %v24384_v1  ;;  %v24649_v50 = vmul.f32 %v24577_v24, %v24388_v15  ;;  %v24653_v10 = vmul.f32 %v24577_v24, %v24392_v8  ;;  %v24657_v9 = vmul.f32 %v24577_v24, %v24396_v5 }
 0xcdf   :  { %v24661_v59 = vmul.f32 %v24577_v24, %v24400_v62  ;;  %v24665_v1 = vmul.f32 %v24577_v24, %v24404_v42  ;;  %v24669_v15 = vmul.f32 %v24577_v24, %v24408_v17  ;;  %v24673_v8 = vmul.f32 %v24577_v24, %v24412_v36 }
 0xce0   :  { %v24677_v5 = vmul.f32 %v24577_v24, %v24416_v54  ;;  %v24681_v62 = vmul.f32 %v24577_v24, %v24420_v30  ;;  %v24685_v42 = vmul.f32 %v24577_v24, %v24424_v18  ;;  %v24689_v17 = vmul.f32 %v24577_v24, %v24428_v61  ;;  %v27538_v14 = vld [vmem:[#allocation71_spill] sm:$0xff] }
 0xce1   :  { %v24693_v36 = vmul.f32 %v24577_v24, %v24432_v13  ;;  %v24697_v54 = vmul.f32 %v24577_v24, %v24436_v43  ;;  %v24701_v30 = vmul.f32 %v24577_v24, %v24440_v56  ;;  %v24705_v18 = vmul.f32 %v24577_v24, %v24444_v34 }
 0xce2   :  { %v24709_v61 = vmul.f32 %v24577_v24, %v24448_v20  ;;  %v24713_v13 = vmul.f32 %v24577_v24, %v24452_v27  ;;  %v24717_v43 = vmul.f32 %v24577_v24, %v24456_v48  ;;  %v24721_v56 = vmul.f32 %v24577_v24, %v24460_v3 }
 0xce3   :  { %v24725_v34 = vmul.f32 %v24577_v24, %v24464_v45  ;;  %v24729_v20 = vmul.f32 %v24577_v24, %v24468_v28  ;;  %v24733_v27 = vmul.f32 %v24577_v24, %v24472_v22  ;;  %v24737_v48 = vmul.f32 %v24577_v24, %v24476_v23 }
 0xce4   :  { %v24741_v3 = vmul.f32 %v24577_v24, %v24480_v53  ;;  %v24745_v45 = vmul.f32 %v24577_v24, %v24484_v35  ;;  %v24749_v28 = vmul.f32 %v24577_v24, %v24488_v19  ;;  %v24753_v22 = vmul.f32 %v24577_v24, %v24492_v38 }
 0xce5   :  { %v24757_v23 = vmul.f32 %v24577_v24, %v24496_v49  ;;  %v24761_v53 = vmul.f32 %v24577_v24, %v24500_v37  ;;  %v24765_v35 = vmul.f32 %v24577_v24, %v24504_v7  ;;  %v24769_v19 = vmul.f32 %v24577_v24, %v24508_v60 }
 0xce6   :  { %v24773_v38 = vmul.f32 %v24577_v24, %v24512_v55  ;;  %v24777_v49 = vmul.f32 %v24577_v24, %v24516_v2  ;;  %v24781_v37 = vmul.f32 %v24577_v24, %v24520_v39  ;;  %v24785_v7 = vmul.f32 %v24577_v24, %v24524_v63 }
 0xce7   :  { %v24789_v60 = vmul.f32 %v24577_v24, %v24528_v44  ;;  %v24793_v55 = vmul.f32 %v24577_v24, %v24532_v41  ;;  %v24797_v2 = vmul.f32 %v24577_v24, %v24536_v33  ;;  %v24801_v39 = vmul.f32 %v24577_v24, %v24540_v6 }
 0xce8   :  { %v24805_v63 = vmul.f32 %v24577_v24, %v24544_v40  ;;  %v24809_v44 = vmul.f32 %v24577_v24, %v24548_v4  ;;  %v24813_v41 = vmul.f32 %v24577_v24, %v24552_v51  ;;  %v24817_v33 = vmul.f32 %v24577_v24, %v24556_v58  ;;  %v24838_v58 = vld [vmem:[%s25854_s6] ss:$0 sm:$0xff] }
 0xce9   :  { %v24821_v6 = vmul.f32 %v24577_v24, %v24560_v29  ;;  %v24825_v40 = vmul.f32 %v24577_v24, %v24564_v12  ;;  %v24829_v4 = vmul.f32 %v24577_v24, %v24568_v26  ;;  %v24833_v51 = vmul.f32 %v24577_v24, %v27538_v14 }
 0xcea   :  { %27532 = vst [vmem:[#allocation144_spill] sm:$0xff] %v24809_v44  ;;  %27533 = vst [vmem:[#allocation145_spill] sm:$0xff] %v24813_v41  ;;  %v27545_v44 = vld [vmem:[#allocation143_spill] sm:$0xff] }
 0xceb   :  { %27534 = vst [vmem:[#allocation146_spill] sm:$0xff] %v24817_v33  ;;  %27535 = vst [vmem:[#allocation147_spill] sm:$0xff] %v24821_v6  ;;  %v27540_v33 = vld [vmem:[#allocation72_spill] sm:$0xff]  ;;  %v27541_v6 = vld [vmem:[#allocation73_spill] sm:$0xff] }
 0xcec   :  { %27536 = vst [vmem:[#allocation138_spill] sm:$0xff] %v24825_v40  ;;  %27537 = vst [vmem:[#allocation139_spill] sm:$0xff] %v24829_v4  ;;  %v24842_v29 = vmul.f32 %v24577_v24, %v27540_v33  ;;  %v24846_v12 = vmul.f32 %v24577_v24, %v27541_v6  ;;  %v27542_v40 = vld [vmem:[#allocation74_spill] sm:$0xff]  ;;  %v27543_v4 = vld [vmem:[#allocation76_spill] sm:$0xff]  ;;  %v24862_v33 = vmul.f32 %v24577_v24, %v27545_v44 }
 0xced   :  { %27539 = vst [vmem:[#allocation82_spill] sm:$0xff] %v24833_v51  ;;  %v24850_v26 = vmul.f32 %v24577_v24, %v27542_v40  ;;  %v24854_v14 = vmul.f32 %v24577_v24, %v27543_v4  ;;  %v27544_v51 = vld [vmem:[#allocation140_spill] sm:$0xff]  ;;  %v24866_v6 = vmul.f32 %v24577_v24, %v24605_v46  ;;  %v24870_v40 = vmul.f32 %v24577_v24, %v24609_v47 }
 0xcee   :  { %v24858_v41 = vmul.f32 %v24577_v24, %v27544_v51  ;;  %v24874_v4 = vmul.f32 %v24577_v24, %v24613_v25  ;;  %v24878_v51 = vmul.f32 %v24577_v24, %v24617_v16  ;;  %v24882_v44 = vmul.f32 %v24577_v24, %v24621_v11 }
 0xcef   :  { %v24886_v46 = vmul.f32 %v24577_v24, %v24625_v0  ;;  %v24890_v47 = vadd.f32 %v24838_v58, %v24629_v52  ;;  %v24894_v25 = vadd.f32 %v24838_v58, %v24633_v21  ;;  %v24898_v16 = vadd.f32 %v24838_v58, %v24637_v32 }
 0xcf0   :  { %v24902_v11 = vadd.f32 %v24838_v58, %v24641_v57  ;;  %v24906_v24 = vadd.f32 %v24838_v58, %v24645_v31  ;;  %v24910_v0 = vadd.f32 %v24838_v58, %v24649_v50  ;;  %v24914_v52 = vadd.f32 %v24838_v58, %v24653_v10 }
 0xcf1   :  { %v24918_v21 = vadd.f32 %v24838_v58, %v24657_v9  ;;  %v24922_v32 = vadd.f32 %v24838_v58, %v24661_v59  ;;  %v24926_v57 = vadd.f32 %v24838_v58, %v24665_v1  ;;  %v24930_v31 = vadd.f32 %v24838_v58, %v24669_v15 }
 0xcf2   :  { %v24934_v50 = vadd.f32 %v24838_v58, %v24673_v8  ;;  %v24938_v10 = vadd.f32 %v24838_v58, %v24677_v5  ;;  %v24942_v9 = vadd.f32 %v24838_v58, %v24681_v62  ;;  %v24946_v59 = vadd.f32 %v24838_v58, %v24685_v42 }
 0xcf3   :  { %v24950_v1 = vadd.f32 %v24838_v58, %v24689_v17  ;;  %v24954_v15 = vadd.f32 %v24838_v58, %v24693_v36  ;;  %v24958_v8 = vadd.f32 %v24838_v58, %v24697_v54  ;;  %v24962_v5 = vadd.f32 %v24838_v58, %v24701_v30 }
 0xcf4   :  { %v24966_v62 = vadd.f32 %v24838_v58, %v24705_v18  ;;  %v24970_v42 = vadd.f32 %v24838_v58, %v24709_v61  ;;  %v24974_v17 = vadd.f32 %v24838_v58, %v24713_v13  ;;  %v24978_v36 = vadd.f32 %v24838_v58, %v24717_v43 }
 0xcf5   :  { %v24982_v54 = vadd.f32 %v24838_v58, %v24721_v56  ;;  %v24986_v30 = vadd.f32 %v24838_v58, %v24725_v34  ;;  %v24990_v18 = vadd.f32 %v24838_v58, %v24729_v20  ;;  %v24994_v61 = vadd.f32 %v24838_v58, %v24733_v27 }
 0xcf6   :  { %v24998_v13 = vadd.f32 %v24838_v58, %v24737_v48  ;;  %v25002_v43 = vadd.f32 %v24838_v58, %v24741_v3  ;;  %v25006_v56 = vadd.f32 %v24838_v58, %v24745_v45  ;;  %v25010_v34 = vadd.f32 %v24838_v58, %v24749_v28 }
 0xcf7   :  { %v25014_v20 = vadd.f32 %v24838_v58, %v24753_v22  ;;  %v25018_v27 = vadd.f32 %v24838_v58, %v24757_v23  ;;  %v25022_v48 = vadd.f32 %v24838_v58, %v24761_v53  ;;  %v25026_v3 = vadd.f32 %v24838_v58, %v24765_v35 }
 0xcf8   :  { %27546 = vst [vmem:[#allocation84_spill] sm:$0xff] %v25010_v34  ;;  %v25030_v45 = vadd.f32 %v24838_v58, %v24769_v19  ;;  %v25034_v28 = vadd.f32 %v24838_v58, %v24773_v38  ;;  %v25038_v22 = vadd.f32 %v24838_v58, %v24777_v49  ;;  %v25042_v23 = vadd.f32 %v24838_v58, %v24781_v37 }
 0xcf9   :  { %27547 = vst [vmem:[#allocation83_spill] sm:$0xff] %v25014_v20  ;;  %27548 = vst [vmem:[#allocation86_spill] sm:$0xff] %v25018_v27  ;;  %v25046_v53 = vadd.f32 %v24838_v58, %v24785_v7  ;;  %v25050_v35 = vadd.f32 %v24838_v58, %v24789_v60  ;;  %v25054_v19 = vadd.f32 %v24838_v58, %v24793_v55  ;;  %v27556_v7 = vld [vmem:[#allocation144_spill] sm:$0xff] }
 0xcfa   :  { %27549 = vst [vmem:[#allocation85_spill] sm:$0xff] %v25022_v48  ;;  %27550 = vst [vmem:[#allocation88_spill] sm:$0xff] %v25026_v3  ;;  %v25058_v38 = vadd.f32 %v24838_v58, %v24797_v2  ;;  %v25062_v49 = vadd.f32 %v24838_v58, %v24801_v39  ;;  %v25066_v37 = vadd.f32 %v24838_v58, %v24805_v63 }
 0xcfb   :  { %27551 = vst [vmem:[#allocation87_spill] sm:$0xff] %v25050_v35  ;;  %27552 = vst [vmem:[#allocation90_spill] sm:$0xff] %v25054_v19  ;;  %v25070_v60 = vadd.f32 %v24838_v58, %v27556_v7  ;;  %v27558_v35 = vld [vmem:[#allocation145_spill] sm:$0xff]  ;;  %v27559_v19 = vld [vmem:[#allocation146_spill] sm:$0xff] }
 0xcfc   :  { %27553 = vst [vmem:[#allocation81_spill] sm:$0xff] %v25058_v38  ;;  %27554 = vst [vmem:[#allocation112_spill] sm:$0xff] %v25062_v49  ;;  %v25074_v55 = vadd.f32 %v24838_v58, %v27558_v35  ;;  %v25078_v2 = vadd.f32 %v24838_v58, %v27559_v19  ;;  %v27561_v38 = vld [vmem:[#allocation147_spill] sm:$0xff]  ;;  %v27563_v49 = vld [vmem:[#allocation138_spill] sm:$0xff]  ;;  %v25098_v19 = vadd.f32 %v24838_v58, %v24842_v29 }
 0xcfd   :  { %27555 = vst [vmem:[#allocation113_spill] sm:$0xff] %v25066_v37  ;;  %27557 = vst [vmem:[#allocation114_spill] sm:$0xff] %v25070_v60  ;;  %v25082_v39 = vadd.f32 %v24838_v58, %v27561_v38  ;;  %v25086_v63 = vadd.f32 %v24838_v58, %v27563_v49  ;;  %v27565_v37 = vld [vmem:[#allocation139_spill] sm:$0xff]  ;;  %v27567_v60 = vld [vmem:[#allocation82_spill] sm:$0xff]  ;;  %v25102_v38 = vadd.f32 %v24838_v58, %v24846_v12 }
 0xcfe   :  { %27560 = vst [vmem:[#allocation115_spill] sm:$0xff] %v25078_v2  ;;  %v25090_v7 = vadd.f32 %v24838_v58, %v27565_v37  ;;  %v25094_v35 = vadd.f32 %v24838_v58, %v27567_v60  ;;  %v25106_v49 = vadd.f32 %v24838_v58, %v24850_v26  ;;  %v25110_v37 = vadd.f32 %v24838_v58, %v24854_v14 }
 0xcff   :  { %27562 = vst [vmem:[#allocation116_spill] sm:$0xff] %v25082_v39  ;;  %27564 = vst [vmem:[#allocation117_spill] sm:$0xff] %v25086_v63  ;;  %v25114_v60 = vadd.f32 %v24838_v58, %v24858_v41  ;;  %v25118_v29 = vadd.f32 %v24838_v58, %v24862_v33  ;;  %v25122_v12 = vadd.f32 %v24838_v58, %v24866_v6 }
 0xd00   :  { %27566 = vst [vmem:[#allocation123_spill] sm:$0xff] %v25090_v7  ;;  %27568 = vst [vmem:[#allocation124_spill] sm:$0xff] %v25094_v35  ;;  %v25126_v26 = vadd.f32 %v24838_v58, %v24870_v40  ;;  %v25130_v14 = vadd.f32 %v24838_v58, %v24874_v4  ;;  %v25134_v41 = vadd.f32 %v24838_v58, %v24878_v51  ;;  %v27593_v40 = vld [vmem:[#allocation6_spill] sm:$0xff]  ;;  %v27595_v4 = vld [vmem:[#allocation7_spill] sm:$0xff] }
 0xd01   :  { %27569 = vst [vmem:[#allocation125_spill] sm:$0xff] %v25102_v38  ;;  %27570 = vst [vmem:[#allocation126_spill] sm:$0xff] %v25118_v29  ;;  %v25138_v33 = vadd.f32 %v24838_v58, %v24882_v44  ;;  %v25142_v6 = vadd.f32 %v24838_v58, %v24886_v46  ;;  %v27587_v38 = vld [vmem:[#allocation3_spill] sm:$0xff]  ;;  %v27590_v44 = vmax.f32 %v24894_v25, 0.0  ;;  %v27592_v58 = vmax.f32 %v24898_v16, 0.0 }
 0xd02   :  { %27571 = vst [vmem:[#allocation127_spill] sm:$0xff] %v25122_v12  ;;  %27572 = vst [vmem:[#allocation128_spill] sm:$0xff] %v25126_v26  ;;  %v27576_v12 = vld [vmem:[#allocation87_spill] sm:$0xff]  ;;  %v27577_v34 = vld [vmem:[#allocation90_spill] sm:$0xff]  ;;  %v27583_v39 = vmov %v25126_v26  ;;  %v27584_v63 = vmov %v25130_v14  ;;  %v27585_v7 = vmov %v25134_v41  ;;  %v27594_v26 = vmax.f32 %v24902_v11, 0.0 }
 0xd03   :  { %27573 = vst [vmem:[#allocation122_spill] sm:$0xff] %v25130_v14  ;;  %27574 = vst [vmem:[#allocation129_spill] sm:$0xff] %v25134_v41  ;;  %v27578_v20 = vld [vmem:[#allocation81_spill] sm:$0xff]  ;;  %v27579_v27 = vld [vmem:[#allocation112_spill] sm:$0xff]  ;;  %v27588_v14 = vmax.f32 %v24890_v47, 0.0  ;;  %v27596_v47 = vmax.f32 %v24906_v24, 0.0 }
 0xd04   :  { %27575 = vst [vmem:[#allocation130_spill] sm:$0xff] %v25138_v33  ;;  %v27580_v48 = vld [vmem:[#allocation113_spill] sm:$0xff]  ;;  %v27581_v3 = vld [vmem:[#allocation114_spill] sm:$0xff]  ;;  %v27589_v41 = vld [vmem:[#allocation4_spill] sm:$0xff]  ;;  %v25226_v35 = vadd.f32 %v27594_v26, %v27593_v40  ;;  %v27598_v25 = vmax.f32 %v24910_v0, 0.0  ;;  %v27600_v16 = vmax.f32 %v24914_v52, 0.0 }
 0xd05   :  { %v25211_v51 = vadd.f32 %v27588_v14, %v27587_v38  ;;  %v25216_v29 = vadd.f32 %v27590_v44, %v27589_v41  ;;  %v27591_v33 = vld [vmem:[#allocation5_spill] sm:$0xff]  ;;  %v25231_v38 = vadd.f32 %v27596_v47, %v27595_v4  ;;  %v27597_v14 = vld [vmem:[#allocation8_spill] sm:$0xff]  ;;  %v27602_v11 = vmax.f32 %v24918_v21, 0.0  ;;  %v27603_v40 = vld [vmem:[#allocation11_spill] sm:$0xff] }
 0xd06   :  { %v25221_v46 = vadd.f32 %v27592_v58, %v27591_v33  ;;  %v25236_v41 = vadd.f32 %v27598_v25, %v27597_v14  ;;  %v27599_v44 = vld [vmem:[#allocation9_spill] sm:$0xff]  ;;  %v27601_v58 = vld [vmem:[#allocation10_spill] sm:$0xff]  ;;  %v27604_v24 = vmax.f32 %v24922_v32, 0.0  ;;  %v27605_v47 = vld [vmem:[#allocation12_spill] sm:$0xff]  ;;  %v27606_v0 = vmax.f32 %v24926_v57, 0.0 }
 0xd07   :  { %v25241_v33 = vadd.f32 %v27600_v16, %v27599_v44  ;;  %v25246_v26 = vadd.f32 %v27602_v11, %v27601_v58  ;;  %v27607_v25 = vld [vmem:[#allocation13_spill] sm:$0xff]  ;;  %v27608_v52 = vmax.f32 %v24930_v31, 0.0  ;;  %v27609_v16 = vld [vmem:[#allocation14_spill] sm:$0xff]  ;;  %v27610_v21 = vmax.f32 %v24934_v50, 0.0  ;;  %v27611_v11 = vld [vmem:[#allocation15_spill] sm:$0xff] }
 0xd08   :  { %v25251_v4 = vadd.f32 %v27604_v24, %v27603_v40  ;;  %v25256_v14 = vadd.f32 %v27606_v0, %v27605_v47  ;;  %v27612_v32 = vmax.f32 %v24938_v10, 0.0  ;;  %v27613_v24 = vld [vmem:[#allocation16_spill] sm:$0xff]  ;;  %v27614_v57 = vmax.f32 %v24942_v9, 0.0  ;;  %v27615_v0 = vld [vmem:[#allocation17_spill] sm:$0xff] }
 0xd09   :  { %v27582_v2 = vld [vmem:[#allocation127_spill] sm:$0xff]  ;;  %v25261_v44 = vadd.f32 %v27608_v52, %v27607_v25  ;;  %v25266_v58 = vadd.f32 %v27610_v21, %v27609_v16  ;;  %v27616_v31 = vmax.f32 %v24946_v59, 0.0  ;;  %v27617_v52 = vld [vmem:[#allocation18_spill] sm:$0xff]  ;;  %v27618_v50 = vmax.f32 %v24950_v1, 0.0 }
 0xd0a   :  { %v25271_v40 = vadd.f32 %v27612_v32, %v27611_v11  ;;  %v25276_v47 = vadd.f32 %v27614_v57, %v27613_v24  ;;  %v27619_v21 = vld [vmem:[#allocation19_spill] sm:$0xff]  ;;  %v27620_v10 = vmax.f32 %v24954_v15, 0.0  ;;  %v27621_v32 = vld [vmem:[#allocation20_spill] sm:$0xff]  ;;  %v27622_v9 = vmax.f32 %v24958_v8, 0.0  ;;  %v27623_v57 = vld [vmem:[#allocation21_spill] sm:$0xff] }
 0xd0b   :  { %v25281_v25 = vadd.f32 %v27616_v31, %v27615_v0  ;;  %v25286_v16 = vadd.f32 %v27618_v50, %v27617_v52  ;;  %v27624_v59 = vmax.f32 %v24962_v5, 0.0  ;;  %v27625_v31 = vld [vmem:[#allocation22_spill] sm:$0xff]  ;;  %v27626_v1 = vmax.f32 %v24966_v62, 0.0  ;;  %v27627_v50 = vld [vmem:[#allocation24_spill] sm:$0xff] }
 0xd0c   :  { %v25291_v11 = vadd.f32 %v27620_v10, %v27619_v21  ;;  %v25296_v24 = vadd.f32 %v27622_v9, %v27621_v32  ;;  %v27628_v15 = vmax.f32 %v24970_v42, 0.0  ;;  %v27629_v10 = vld [vmem:[#allocation25_spill] sm:$0xff]  ;;  %v27630_v8 = vmax.f32 %v24974_v17, 0.0  ;;  %v27631_v9 = vld [vmem:[#allocation26_spill] sm:$0xff] }
 0xd0d   :  { %v25301_v0 = vadd.f32 %v27624_v59, %v27623_v57  ;;  %v25306_v52 = vadd.f32 %v27626_v1, %v27625_v31  ;;  %v27632_v5 = vmax.f32 %v24978_v36, 0.0  ;;  %v27633_v59 = vld [vmem:[#allocation27_spill] sm:$0xff]  ;;  %v27634_v62 = vmax.f32 %v24982_v54, 0.0  ;;  %v27635_v1 = vld [vmem:[#allocation28_spill] sm:$0xff] }
 0xd0e   :  { %v25311_v21 = vadd.f32 %v27628_v15, %v27627_v50  ;;  %v25316_v32 = vadd.f32 %v27630_v8, %v27629_v10  ;;  %v27636_v42 = vmax.f32 %v24986_v30, 0.0  ;;  %v27637_v15 = vld [vmem:[#allocation29_spill] sm:$0xff]  ;;  %v27638_v17 = vmax.f32 %v24990_v18, 0.0  ;;  %v27640_v8 = vld [vmem:[#allocation30_spill] sm:$0xff] }
 0xd0f   :  { %v25321_v57 = vadd.f32 %v27632_v5, %v27631_v9  ;;  %v25326_v31 = vadd.f32 %v27634_v62, %v27633_v59  ;;  %v27641_v36 = vmax.f32 %v24994_v61, 0.0  ;;  %v27643_v5 = vld [vmem:[#allocation31_spill] sm:$0xff]  ;;  %v27644_v54 = vmax.f32 %v24998_v13, 0.0  ;;  %v27646_v62 = vld [vmem:[#allocation32_spill] sm:$0xff] }
 0xd10   :  { %v25331_v50 = vadd.f32 %v27636_v42, %v27635_v1  ;;  %v25336_v10 = vadd.f32 %v27638_v17, %v27637_v15  ;;  %v27647_v30 = vmax.f32 %v25002_v43, 0.0  ;;  %v27649_v42 = vld [vmem:[#allocation33_spill] sm:$0xff]  ;;  %v27650_v18 = vmax.f32 %v25006_v56, 0.0  ;;  %v27652_v17 = vld [vmem:[#allocation135_spill] sm:$0xff] }
 0xd11   :  { %v25341_v9 = vadd.f32 %v27641_v36, %v27640_v8  ;;  %v25346_v59 = vadd.f32 %v27644_v54, %v27643_v5  ;;  %v27655_v36 = vld [vmem:[#allocation136_spill] sm:$0xff]  ;;  %v27658_v54 = vld [vmem:[#allocation34_spill] sm:$0xff] }
 0xd12   :  { %27639 = vst [vmem:[#allocation131_spill] sm:$0xff] %v25336_v10  ;;  %v25351_v1 = vadd.f32 %v27647_v30, %v27646_v62  ;;  %v25356_v15 = vadd.f32 %v27650_v18, %v27649_v42  ;;  %v27653_v10 = vld [vmem:[#allocation84_spill] sm:$0xff]  ;;  %v27661_v30 = vld [vmem:[#allocation35_spill] sm:$0xff] }
 0xd13   :  { %27642 = vst [vmem:[#allocation132_spill] sm:$0xff] %v25341_v9  ;;  %27645 = vst [vmem:[#allocation75_spill] sm:$0xff] %v25346_v59  ;;  %v27654_v61 = vmax.f32 %v27653_v10, 0.0  ;;  %v27656_v9 = vld [vmem:[#allocation83_spill] sm:$0xff]  ;;  %v27659_v59 = vld [vmem:[#allocation86_spill] sm:$0xff] }
 0xd14   :  { %27648 = vst [vmem:[#allocation133_spill] sm:$0xff] %v25351_v1  ;;  %27651 = vst [vmem:[#allocation78_spill] sm:$0xff] %v25356_v15  ;;  %v27657_v13 = vmax.f32 %v27656_v9, 0.0  ;;  %v27660_v43 = vmax.f32 %v27659_v59, 0.0  ;;  %v27662_v1 = vld [vmem:[#allocation85_spill] sm:$0xff]  ;;  %v27664_v18 = vld [vmem:[#allocation36_spill] sm:$0xff] }
 0xd15   :  { %v25361_v8 = vadd.f32 %v27654_v61, %v27652_v17  ;;  %v27663_v56 = vmax.f32 %v27662_v1, 0.0  ;;  %v27665_v15 = vld [vmem:[#allocation88_spill] sm:$0xff]  ;;  %v27667_v61 = vld [vmem:[#allocation37_spill] sm:$0xff]  ;;  %v27668_v9 = vmax.f32 %v25030_v45, 0.0  ;;  %v27670_v59 = vmax.f32 %v25034_v28, 0.0 }
 0xd16   :  { %v25366_v5 = vadd.f32 %v27657_v13, %v27655_v36  ;;  %v25371_v62 = vadd.f32 %v27660_v43, %v27658_v54  ;;  %v27666_v10 = vmax.f32 %v27665_v15, 0.0  ;;  %v27669_v13 = vld [vmem:[#allocation38_spill] sm:$0xff]  ;;  %v27671_v43 = vld [vmem:[#allocation39_spill] sm:$0xff]  ;;  %v27672_v1 = vmax.f32 %v25038_v22, 0.0 }
 0xd17   :  { %v25376_v42 = vadd.f32 %v27663_v56, %v27661_v30  ;;  %v25386_v36 = vadd.f32 %v27668_v9, %v27667_v61  ;;  %v25391_v54 = vadd.f32 %v27670_v59, %v27669_v13  ;;  %v27673_v56 = vld [vmem:[#allocation40_spill] sm:$0xff]  ;;  %v27674_v15 = vmax.f32 %v25042_v23, 0.0  ;;  %v27677_v9 = vld [vmem:[#allocation42_spill] sm:$0xff]  ;;  %v27679_v59 = vld [vmem:[#allocation43_spill] sm:$0xff] }
 0xd18   :  { %v25381_v17 = vadd.f32 %v27666_v10, %v27664_v18  ;;  %v25396_v30 = vadd.f32 %v27672_v1, %v27671_v43  ;;  %v27675_v10 = vld [vmem:[#allocation41_spill] sm:$0xff]  ;;  %v27676_v45 = vmax.f32 %v25046_v53, 0.0  ;;  %v27678_v28 = vmax.f32 %v27576_v12, 0.0  ;;  %v27681_v1 = vld [vmem:[#allocation44_spill] sm:$0xff] }
 0xd19   :  { %v25401_v18 = vadd.f32 %v27674_v15, %v27673_v56  ;;  %v27680_v22 = vmax.f32 %v27577_v34, 0.0  ;;  %v27682_v23 = vmax.f32 %v27578_v20, 0.0  ;;  %v27684_v15 = vld [vmem:[#allocation45_spill] sm:$0xff]  ;;  %v27685_v53 = vmax.f32 %v27579_v27, 0.0 }
 0xd1a   :  { %v25406_v61 = vadd.f32 %v27676_v45, %v27675_v10  ;;  %v25411_v13 = vadd.f32 %v27678_v28, %v27677_v9  ;;  %v27687_v45 = vld [vmem:[#allocation46_spill] sm:$0xff]  ;;  %v27688_v12 = vmax.f32 %v27580_v48, 0.0  ;;  %v27690_v28 = vld [vmem:[#allocation47_spill] sm:$0xff]  ;;  %v27691_v34 = vmax.f32 %v27581_v3, 0.0 }
 0xd1b   :  { %v25416_v43 = vadd.f32 %v27680_v22, %v27679_v59  ;;  %v25421_v56 = vadd.f32 %v27682_v23, %v27681_v1  ;;  %v25426_v10 = vadd.f32 %v27685_v53, %v27684_v15  ;;  %v27693_v22 = vld [vmem:[#allocation48_spill] sm:$0xff]  ;;  %v27694_v20 = vmax.f32 %v25074_v55, 0.0  ;;  %v27696_v23 = vld [vmem:[#allocation49_spill] sm:$0xff]  ;;  %v27699_v53 = vld [vmem:[#allocation50_spill] sm:$0xff] }
 0xd1c   :  { %v25431_v9 = vadd.f32 %v27688_v12, %v27687_v45  ;;  %v25436_v59 = vadd.f32 %v27691_v34, %v27690_v28  ;;  %v27703_v12 = vld [vmem:[#allocation51_spill] sm:$0xff]  ;;  %v27706_v34 = vld [vmem:[#allocation52_spill] sm:$0xff] }
 0xd1d   :  { %27683 = vst [vmem:[#allocation79_spill] sm:$0xff] %v25421_v56  ;;  %27686 = vst [vmem:[#allocation110_spill] sm:$0xff] %v25426_v10  ;;  %v25441_v1 = vadd.f32 %v27694_v20, %v27693_v22  ;;  %v27697_v56 = vld [vmem:[#allocation115_spill] sm:$0xff]  ;;  %v27700_v10 = vld [vmem:[#allocation116_spill] sm:$0xff] }
 0xd1e   :  { %27689 = vst [vmem:[#allocation111_spill] sm:$0xff] %v25431_v9  ;;  %27692 = vst [vmem:[#allocation77_spill] sm:$0xff] %v25436_v59  ;;  %v27698_v27 = vmax.f32 %v27697_v56, 0.0  ;;  %v27701_v48 = vmax.f32 %v27700_v10, 0.0  ;;  %v27704_v9 = vld [vmem:[#allocation117_spill] sm:$0xff]  ;;  %v27707_v59 = vld [vmem:[#allocation123_spill] sm:$0xff] }
 0xd1f   :  { %27695 = vst [vmem:[#allocation148_spill] sm:$0xff] %v25441_v1  ;;  %v27705_v3 = vmax.f32 %v27704_v9, 0.0  ;;  %v27708_v55 = vmax.f32 %v27707_v59, 0.0  ;;  %v27709_v20 = vld [vmem:[#allocation53_spill] sm:$0xff]  ;;  %v27710_v1 = vld [vmem:[#allocation124_spill] sm:$0xff]  ;;  %v27713_v10 = vmax.f32 %v25098_v19, 0.0 }
 0xd20   :  { %v25446_v15 = vadd.f32 %v27698_v27, %v27696_v23  ;;  %v25451_v45 = vadd.f32 %v27701_v48, %v27699_v53  ;;  %v27711_v56 = vmax.f32 %v27710_v1, 0.0  ;;  %v27712_v27 = vld [vmem:[#allocation54_spill] sm:$0xff]  ;;  %v27715_v48 = vld [vmem:[#allocation55_spill] sm:$0xff]  ;;  %v27719_v59 = vmax.f32 %v25106_v49, 0.0 }
 0xd21   :  { %v25456_v28 = vadd.f32 %v27705_v3, %v27703_v12  ;;  %v25461_v22 = vadd.f32 %v27708_v55, %v27706_v34  ;;  %v25471_v53 = vadd.f32 %v27713_v10, %v27712_v27  ;;  %v27718_v3 = vld [vmem:[#allocation56_spill] sm:$0xff]  ;;  %v27720_v55 = vld [vmem:[#allocation57_spill] sm:$0xff]  ;;  %v27721_v1 = vmax.f32 %v25110_v37, 0.0  ;;  %v27724_v10 = vld [vmem:[#allocation59_spill] sm:$0xff] }
 0xd22   :  { %27702 = vst [vmem:[#allocation149_spill] sm:$0xff] %v25451_v45  ;;  %v25466_v23 = vadd.f32 %v27711_v56, %v27709_v20  ;;  %v27716_v45 = vld [vmem:[#allocation125_spill] sm:$0xff]  ;;  %v25481_v34 = vadd.f32 %v27719_v59, %v27718_v3  ;;  %v27722_v56 = vld [vmem:[#allocation58_spill] sm:$0xff]  ;;  %v27723_v19 = vmax.f32 %v25114_v60, 0.0  ;;  %v27729_v49 = vmax.f32 %v27582_v2, 0.0 }
 0xd23   :  { %27714 = vst [vmem:[#allocation150_spill] sm:$0xff] %v25471_v53  ;;  %v27717_v9 = vmax.f32 %v27716_v45, 0.0  ;;  %v25486_v20 = vadd.f32 %v27721_v1, %v27720_v55  ;;  %v27725_v53 = vld [vmem:[#allocation126_spill] sm:$0xff]  ;;  %v27730_v59 = vld [vmem:[#allocation61_spill] sm:$0xff]  ;;  %v27731_v37 = vmax.f32 %v27583_v39, 0.0  ;;  %v27733_v60 = vmax.f32 %v27584_v63, 0.0 }
 0xd24   :  { %v25491_v27 = vadd.f32 %v27723_v19, %v27722_v56  ;;  %v27726_v45 = vmax.f32 %v27725_v53, 0.0  ;;  %v27732_v1 = vld [vmem:[#allocation62_spill] sm:$0xff]  ;;  %v27734_v19 = vld [vmem:[#allocation63_spill] sm:$0xff]  ;;  %v27735_v53 = vmax.f32 %v27585_v7, 0.0  ;;  %v27740_v39 = vmax.f32 %v25142_v6, 0.0 }
 0xd25   :  { %v25476_v12 = vadd.f32 %v27717_v9, %v27715_v48  ;;  %v27728_v9 = vld [vmem:[#allocation60_spill] sm:$0xff]  ;;  %v25506_v55 = vadd.f32 %v27731_v37, %v27730_v59  ;;  %v25511_v56 = vadd.f32 %v27733_v60, %v27732_v1  ;;  %v11826_v37 = vmax.f32 %v25211_v51, 0.0 }
 0xd26   :  { %v25496_v48 = vadd.f32 %v27726_v45, %v27724_v10  ;;  %v25501_v3 = vadd.f32 %v27729_v49, %v27728_v9  ;;  %v25516_v10 = vadd.f32 %v27735_v53, %v27734_v19  ;;  %v27736_v45 = vld [vmem:[#allocation141_spill] sm:$0xff]  ;;  %v27739_v49 = vld [vmem:[#allocation142_spill] sm:$0xff]  ;;  %v11827_v63 = vmax.f32 %v25216_v29, 0.0 }
 0xd27   :  { %v25526_v59 = vadd.f32 %v27740_v39, %v27739_v49  ;;  %v11828_v1 = vmax.f32 %v25221_v46, 0.0  ;;  %v11829_v7 = vmax.f32 %v25226_v35, 0.0  ;;  %v11830_v60 = vmax.f32 %v25231_v38, 0.0  ;;  %11890 = vst.msk [vmem:[%s25855_s7] sm:$0xff] %vm90_vm1, %v11826_v37 }
 0xd28   :  { %27727 = vst [vmem:[#allocation151_spill] sm:$0xff] %v25496_v48  ;;  %v27737_v48 = vld [vmem:[#allocation130_spill] sm:$0xff]  ;;  %v11831_v19 = vmax.f32 %v25236_v41, 0.0  ;;  %v11833_v53 = vmax.f32 %v25246_v26, 0.0  ;;  %v11834_v6 = vmax.f32 %v25251_v4, 0.0  ;;  %v11836_v51 = vmax.f32 %v25261_v44, 0.0 }
 0xd29   :  { %v27738_v2 = vmax.f32 %v27737_v48, 0.0  ;;  %v11832_v48 = vmax.f32 %v25241_v33, 0.0  ;;  %v11837_v29 = vmax.f32 %v25266_v58, 0.0  ;;  %11891 = vst.msk [vmem:[%s25855_s7 + $0x8] sm:$0xff] %vm90_vm1, %v11827_v63  ;;  %11892 = vst.msk [vmem:[%s25855_s7 + $0x10] sm:$0xff] %vm90_vm1, %v11828_v1  ;;  %v11838_v35 = vmax.f32 %v25271_v40, 0.0 }
 0xd2a   :  { %11893 = vst.msk [vmem:[%s25855_s7 + $0x18] sm:$0xff] %vm90_vm1, %v11829_v7  ;;  %v11839_v46 = vmax.f32 %v25276_v47, 0.0  ;;  %v11840_v38 = vmax.f32 %v25281_v25, 0.0  ;;  %v11841_v41 = vmax.f32 %v25286_v16, 0.0  ;;  %11894 = vst.msk [vmem:[%s25855_s7 + $0x20] sm:$0xff] %vm90_vm1, %v11830_v60  ;;  %v11842_v33 = vmax.f32 %v25291_v11, 0.0 }
 0xd2b   :  { %v25521_v9 = vadd.f32 %v27738_v2, %v27736_v45  ;;  %v11835_v45 = vmax.f32 %v25256_v14, 0.0  ;;  %11895 = vst.msk [vmem:[%s25855_s7 + $0x28] sm:$0xff] %vm90_vm1, %v11831_v19  ;;  %11896 = vst.msk [vmem:[%s25855_s7 + $0x30] sm:$0xff] %vm90_vm1, %v11832_v48  ;;  %v11843_v26 = vmax.f32 %v25296_v24, 0.0  ;;  %v11844_v4 = vmax.f32 %v25301_v0, 0.0  ;;  %v27741_v16 = vld [vmem:[#allocation131_spill] sm:$0xff] }
 0xd2c   :  { %11897 = vst.msk [vmem:[%s25855_s7 + $0x38] sm:$0xff] %vm90_vm1, %v11833_v53  ;;  %v11845_v14 = vmax.f32 %v25306_v52, 0.0  ;;  %11898 = vst.msk [vmem:[%s25855_s7 + $0x40] sm:$0xff] %vm90_vm1, %v11834_v6  ;;  %v11846_v44 = vmax.f32 %v25311_v21, 0.0  ;;  %v11847_v58 = vmax.f32 %v25316_v32, 0.0  ;;  %v11848_v40 = vmax.f32 %v25321_v57, 0.0 }
 0xd2d   :  { %11899 = vst.msk [vmem:[%s25855_s7 + $0x48] sm:$0xff] %vm90_vm1, %v11835_v45  ;;  %11900 = vst.msk [vmem:[%s25855_s7 + $0x50] sm:$0xff] %vm90_vm1, %v11836_v51  ;;  %v11849_v47 = vmax.f32 %v25326_v31, 0.0  ;;  %v11850_v25 = vmax.f32 %v25331_v50, 0.0  ;;  %v11851_v11 = vmax.f32 %v27741_v16, 0.0  ;;  %v27742_v24 = vld [vmem:[#allocation132_spill] sm:$0xff] }
 0xd2e   :  { %11901 = vst.msk [vmem:[%s25855_s7 + $0x58] sm:$0xff] %vm90_vm1, %v11837_v29  ;;  %11902 = vst.msk [vmem:[%s25855_s7 + $0x60] sm:$0xff] %vm90_vm1, %v11838_v35  ;;  %v11852_v0 = vmax.f32 %v27742_v24, 0.0  ;;  %v27743_v52 = vld [vmem:[#allocation75_spill] sm:$0xff]  ;;  %v27744_v32 = vld [vmem:[#allocation133_spill] sm:$0xff]  ;;  %v11856_v2 = vmax.f32 %v25361_v8, 0.0 }
 0xd2f   :  { %11903 = vst.msk [vmem:[%s25855_s7 + $0x68] sm:$0xff] %vm90_vm1, %v11839_v46  ;;  %11904 = vst.msk [vmem:[%s25855_s7 + $0x70] sm:$0xff] %vm90_vm1, %v11840_v38  ;;  %v11853_v21 = vmax.f32 %v27743_v52, 0.0  ;;  %v11854_v57 = vmax.f32 %v27744_v32, 0.0  ;;  %v27745_v31 = vld [vmem:[#allocation78_spill] sm:$0xff]  ;;  %v11857_v49 = vmax.f32 %v25366_v5, 0.0 }
 0xd30   :  { %11905 = vst.msk [vmem:[%s25855_s7 + $0x78] sm:$0xff] %vm90_vm1, %v11841_v41  ;;  %11906 = vst.msk [vmem:[%s25855_s7 + $0x80] sm:$0xff] %vm90_vm1, %v11842_v33  ;;  %v11855_v50 = vmax.f32 %v27745_v31, 0.0  ;;  %v11858_v8 = vmax.f32 %v25371_v62, 0.0  ;;  %v11859_v5 = vmax.f32 %v25376_v42, 0.0  ;;  %v11860_v39 = vmax.f32 %v25381_v17, 0.0 }
 0xd31   :  { %11907 = vst.msk [vmem:[%s25855_s7 + $0x88] sm:$0xff] %vm90_vm1, %v11843_v26  ;;  %11908 = vst.msk [vmem:[%s25855_s7 + $0x90] sm:$0xff] %vm90_vm1, %v11844_v4  ;;  %v11861_v37 = vmax.f32 %v25386_v36, 0.0  ;;  %v11862_v62 = vmax.f32 %v25391_v54, 0.0  ;;  %v11863_v42 = vmax.f32 %v25396_v30, 0.0  ;;  %v11864_v17 = vmax.f32 %v25401_v18, 0.0 }
 0xd32   :  { %11909 = vst.msk [vmem:[%s25855_s7 + $0x98] sm:$0xff] %vm90_vm1, %v11845_v14  ;;  %11910 = vst.msk [vmem:[%s25855_s7 + $0xa0] sm:$0xff] %vm90_vm1, %v11846_v44  ;;  %v11865_v36 = vmax.f32 %v25406_v61, 0.0  ;;  %v11866_v54 = vmax.f32 %v25411_v13, 0.0  ;;  %v11867_v30 = vmax.f32 %v25416_v43, 0.0  ;;  %v27746_v18 = vld [vmem:[#allocation79_spill] sm:$0xff] }
 0xd33   :  { %11911 = vst.msk [vmem:[%s25855_s7 + $0xa8] sm:$0xff] %vm90_vm1, %v11847_v58  ;;  %11912 = vst.msk [vmem:[%s25855_s7 + $0xb0] sm:$0xff] %vm90_vm1, %v11848_v40  ;;  %v11868_v61 = vmax.f32 %v27746_v18, 0.0  ;;  %v27747_v63 = vld [vmem:[#allocation110_spill] sm:$0xff]  ;;  %v27748_v13 = vld [vmem:[#allocation111_spill] sm:$0xff]  ;;  %v11873_v53 = vmax.f32 %v25446_v15, 0.0 }
 0xd34   :  { %11913 = vst.msk [vmem:[%s25855_s7 + $0xb8] sm:$0xff] %vm90_vm1, %v11849_v47  ;;  %11914 = vst.msk [vmem:[%s25855_s7 + $0xc0] sm:$0xff] %vm90_vm1, %v11850_v25  ;;  %v11869_v1 = vmax.f32 %v27747_v63, 0.0  ;;  %v11870_v43 = vmax.f32 %v27748_v13, 0.0  ;;  %v27749_v7 = vld [vmem:[#allocation77_spill] sm:$0xff]  ;;  %v27750_v19 = vld [vmem:[#allocation148_spill] sm:$0xff] }
 0xd35   :  { %11915 = vst.msk [vmem:[%s25855_s7 + $0xc8] sm:$0xff] %vm90_vm1, %v11851_v11  ;;  %11916 = vst.msk [vmem:[%s25855_s7 + $0xd0] sm:$0xff] %vm90_vm1, %v11852_v0  ;;  %v11871_v60 = vmax.f32 %v27749_v7, 0.0  ;;  %v11872_v48 = vmax.f32 %v27750_v19, 0.0  ;;  %v27751_v15 = vld [vmem:[#allocation149_spill] sm:$0xff]  ;;  %v11875_v45 = vmax.f32 %v25456_v28, 0.0 }
 0xd36   :  { %11917 = vst.msk [vmem:[%s25855_s7 + $0xd8] sm:$0xff] %vm90_vm1, %v11853_v21  ;;  %11918 = vst.msk [vmem:[%s25855_s7 + $0xe0] sm:$0xff] %vm90_vm1, %v11854_v57  ;;  %v11874_v6 = vmax.f32 %v27751_v15, 0.0  ;;  %v11876_v51 = vmax.f32 %v25461_v22, 0.0  ;;  %v11877_v29 = vmax.f32 %v25466_v23, 0.0  ;;  %v27752_v28 = vld [vmem:[#allocation150_spill] sm:$0xff] }
 0xd37   :  { %11919 = vst.msk [vmem:[%s25855_s7 + $0xe8] sm:$0xff] %vm90_vm1, %v11855_v50  ;;  %11920 = vst.msk [vmem:[%s25855_s7 + $0xf0] sm:$0xff] %vm90_vm1, %v11856_v2  ;;  %v11878_v22 = vmax.f32 %v27752_v28, 0.0  ;;  %v11879_v23 = vmax.f32 %v25476_v12, 0.0  ;;  %v11880_v35 = vmax.f32 %v25481_v34, 0.0  ;;  %v11881_v46 = vmax.f32 %v25486_v20, 0.0 }
 0xd38   :  { %11921 = vst.msk [vmem:[%s25855_s7 + $0xf8] sm:$0xff] %vm90_vm1, %v11857_v49  ;;  %11922 = vst.msk [vmem:[%s25855_s7 + $0x100] sm:$0xff] %vm90_vm1, %v11858_v8  ;;  %v11882_v12 = vmax.f32 %v25491_v27, 0.0  ;;  %v27753_v34 = vld [vmem:[#allocation151_spill] sm:$0xff]  ;;  %v11884_v38 = vmax.f32 %v25501_v3, 0.0  ;;  %v11885_v41 = vmax.f32 %v25506_v55, 0.0 }
 0xd39   :  { %11923 = vst.msk [vmem:[%s25855_s7 + $0x108] sm:$0xff] %vm90_vm1, %v11859_v5  ;;  %11924 = vst.msk [vmem:[%s25855_s7 + $0x110] sm:$0xff] %vm90_vm1, %v11860_v39  ;;  %v11883_v20 = vmax.f32 %v27753_v34, 0.0  ;;  %v11886_v27 = vmax.f32 %v25511_v56, 0.0  ;;  %v11887_v3 = vmax.f32 %v25516_v10, 0.0  ;;  %v11888_v55 = vmax.f32 %v25521_v9, 0.0 }
 0xd3a   :  { %11925 = vst.msk [vmem:[%s25855_s7 + $0x118] sm:$0xff] %vm90_vm1, %v11861_v37  ;;  %11926 = vst.msk [vmem:[%s25855_s7 + $0x120] sm:$0xff] %vm90_vm1, %v11862_v62  ;;  %v11889_v33 = vmax.f32 %v25526_v59, 0.0 }
 0xd3b   :  { %11927 = vst.msk [vmem:[%s25855_s7 + $0x128] sm:$0xff] %vm90_vm1, %v11863_v42  ;;  %11928 = vst.msk [vmem:[%s25855_s7 + $0x130] sm:$0xff] %vm90_vm1, %v11864_v17 }
 0xd3c   :  { %11929 = vst.msk [vmem:[%s25855_s7 + $0x138] sm:$0xff] %vm90_vm1, %v11865_v36  ;;  %11930 = vst.msk [vmem:[%s25855_s7 + $0x140] sm:$0xff] %vm90_vm1, %v11866_v54 }
 0xd3d   :  { %11931 = vst.msk [vmem:[%s25855_s7 + $0x148] sm:$0xff] %vm90_vm1, %v11867_v30  ;;  %11932 = vst.msk [vmem:[%s25855_s7 + $0x150] sm:$0xff] %vm90_vm1, %v11868_v61 }
 0xd3e   :  { %11933 = vst.msk [vmem:[%s25855_s7 + $0x158] sm:$0xff] %vm90_vm1, %v11869_v1  ;;  %11934 = vst.msk [vmem:[%s25855_s7 + $0x160] sm:$0xff] %vm90_vm1, %v11870_v43 }
 0xd3f   :  { %11935 = vst.msk [vmem:[%s25855_s7 + $0x168] sm:$0xff] %vm90_vm1, %v11871_v60  ;;  %11936 = vst.msk [vmem:[%s25855_s7 + $0x170] sm:$0xff] %vm90_vm1, %v11872_v48 }
 0xd40   :  { %11937 = vst.msk [vmem:[%s25855_s7 + $0x178] sm:$0xff] %vm90_vm1, %v11873_v53  ;;  %11938 = vst.msk [vmem:[%s25855_s7 + $0x180] sm:$0xff] %vm90_vm1, %v11874_v6 }
 0xd41   :  { %11939 = vst.msk [vmem:[%s25855_s7 + $0x188] sm:$0xff] %vm90_vm1, %v11875_v45  ;;  %11940 = vst.msk [vmem:[%s25855_s7 + $0x190] sm:$0xff] %vm90_vm1, %v11876_v51 }
 0xd42   :  { %11941 = vst.msk [vmem:[%s25855_s7 + $0x198] sm:$0xff] %vm90_vm1, %v11877_v29  ;;  %11942 = vst.msk [vmem:[%s25855_s7 + $0x1a0] sm:$0xff] %vm90_vm1, %v11878_v22 }
 0xd43   :  { %11943 = vst.msk [vmem:[%s25855_s7 + $0x1a8] sm:$0xff] %vm90_vm1, %v11879_v23  ;;  %11944 = vst.msk [vmem:[%s25855_s7 + $0x1b0] sm:$0xff] %vm90_vm1, %v11880_v35 }
 0xd44   :  { %11945 = vst.msk [vmem:[%s25855_s7 + $0x1b8] sm:$0xff] %vm90_vm1, %v11881_v46  ;;  %11946 = vst.msk [vmem:[%s25855_s7 + $0x1c0] sm:$0xff] %vm90_vm1, %v11882_v12 }
 0xd45   :  { %11947 = vst.msk [vmem:[%s25855_s7 + $0x1c8] sm:$0xff] %vm90_vm1, %v11883_v20  ;;  %11948 = vst.msk [vmem:[%s25855_s7 + $0x1d0] sm:$0xff] %vm90_vm1, %v11884_v38 }
 0xd46   :  { %11949 = vst.msk [vmem:[%s25855_s7 + $0x1d8] sm:$0xff] %vm90_vm1, %v11885_v41  ;;  %11950 = vst.msk [vmem:[%s25855_s7 + $0x1e0] sm:$0xff] %vm90_vm1, %v11886_v27 }
 0xd47   :  { %11951 = vst.msk [vmem:[%s25855_s7 + $0x1e8] sm:$0xff] %vm90_vm1, %v11887_v3  ;;  %11952 = vst.msk [vmem:[%s25855_s7 + $0x1f0] sm:$0xff] %vm90_vm1, %v11888_v55 }
 0xd48   :  { %11953 = vst.msk [vmem:[%s25855_s7 + $0x1f8] sm:$0xff] %vm90_vm1, %v11889_v33 }

</bundles_post_ra>
